<compile_context>
chip_gen: v6e
topology: v6e:2x2x1
jax: 0.10.0
libtpu: 0.0.40
codegen_flags: <defaults>
</compile_context>

<pallas_src>
import functools

import jax
import jax.numpy as jnp
from jax.experimental import pallas as pl
from jax.experimental.pallas import tpu as pltpu


HIDDEN = 32       # channels of the ResNet-style backbone
N_CLASSES = 2     # resizeFC(): fc replaced by Linear(numFeat, 2)


def _round_up(v, m):
    return ((v + m - 1) // m) * m


# ------------------------------ fused kernel -------------------------------

def _fused_forward_kernel(h_img, w_img, wp, lead, seg, b_tile, guard,
                          x_ref, w1_ref, b1_ref, wa_ref, ba_ref, wb_ref, bb_ref,
                          wfc_ref, bfc_ref,
                          o_ref, h_scr, r_scr):
    """Whole forward pass for one block of `b_tile` images.

    Flattened layout per image: `lead` zero rows, then H*Wp rows (row-major y*Wp+x,
    Wp = W+1 with a zero padding column at x == W), then `tail` zero rows; images are
    stacked into one (b_tile*seg, C) region surrounded by `guard` zero rows.  With
    this layout every 3x3 tap of every valid output row reads either real data or a
    zero pad row/column, so the conv is exactly 9 shifted slices -> one big-K dot.
    """
    r_out = b_tile * seg
    hw = h_img * w_img
    ch = wa_ref.shape[-1]
    rows_buf = h_scr.shape[0]

    # Keep the never-written guard rows of the activation scratches zero.  These are a
    # few sub-vreg stores per step, done every step so the kernel stays correct when
    # the batch grid axis is sharded across TensorCores (scratch is per-core).
    zt = jnp.zeros((guard, ch), jnp.bfloat16)
    zb = jnp.zeros((rows_buf - guard - r_out, ch), jnp.bfloat16)
    h_scr[0:guard, :] = zt
    h_scr[guard + r_out:rows_buf, :] = zb
    r_scr[0:guard, :] = zt
    r_scr[guard + r_out:rows_buf, :] = zb

    # Valid-row mask, generated on-chip (no HBM mask input): a row is a real image
    # pixel iff it lies inside the H*Wp interior of its segment and its column < W.
    t = jax.lax.broadcasted_iota(jnp.int32, (r_out, 1), 0) % seg
    col = (t - lead) % wp
    valid = (t >= lead) & (t < lead + h_img * wp) & (col < w_img)

    taps = [(dy - 1) * wp + (dx - 1) for dy in range(3) for dx in range(3)]

    def conv3x3(read, w_ref, b_ref):
        # One MXU dot per conv: concat 9 shifted bf16 slices along lanes (K = 9*cin).
        cat = jnp.concatenate([read(guard + off) for off in taps], axis=-1)
        acc = jnp.dot(cat, w_ref[...], preferred_element_type=jnp.float32)
        return acc + b_ref[...]                                    # (r_out, ch) f32

    read_x = lambda s: x_ref[s:s + r_out, :]
    read_h = lambda s: h_scr[s:s + r_out, :]
    read_r = lambda s: r_scr[s:s + r_out, :]

    # --- stem conv (Cin -> 32) + ReLU --------------------------------------
    h1 = jnp.where(valid, jnp.maximum(conv3x3(read_x, w1_ref, b1_ref), 0.0), 0.0)
    h_scr[guard:guard + r_out, :] = h1.astype(jnp.bfloat16)

    # --- residual block: conv a (32 -> 32) + ReLU ---------------------------
    r1 = jnp.where(valid, jnp.maximum(conv3x3(read_h, wa_ref, ba_ref), 0.0), 0.0)
    r_scr[guard:guard + r_out, :] = r1.astype(jnp.bfloat16)

    # --- residual block: conv b (32 -> 32) + skip (f32) + ReLU --------------
    out = jnp.where(valid,
                    jnp.maximum(conv3x3(read_r, wb_ref, bb_ref) + h1, 0.0), 0.0)

    # --- fused per-image global-average-pool + fc(32 -> 2) epilogue ---------
    pooled = jnp.concatenate(
        [jnp.sum(out[b * seg:(b + 1) * seg, :], axis=0, keepdims=True)
         for b in range(b_tile)], axis=0) * (1.0 / hw)             # (b_tile, 32) f32
    logits = jnp.dot(pooled.astype(jnp.bfloat16), wfc_ref[...],
                     preferred_element_type=jnp.float32) + bfc_ref[...]
    o_ref[...] = logits


def _forward_pallas(xbuf, w1, b1, wa, ba, wb, bb, wfc, bfc, *,
                    h_img, w_img, wp, lead, seg, b_tile, guard):
    g, rows_buf, cin = xbuf.shape
    ch = wa.shape[-1]
    ncls = wfc.shape[-1]
    r_out = b_tile * seg

    kernel = functools.partial(_fused_forward_kernel, h_img, w_img, wp, lead, seg,
                               b_tile, guard)

    flops = g * (2 * r_out * (w1.shape[0] * ch + 2 * wa.shape[0] * ch)
                 + 2 * b_tile * ch * ncls)
    bytes_accessed = (xbuf.size * xbuf.dtype.itemsize
                      + (w1.size + wa.size + wb.size + wfc.size) * 2
                      + (b1.size + ba.size + bb.size + bfc.size) * 4
                      + g * b_tile * ncls * 4)

    # VMEM working set: double-buffered bf16 input block, two bf16 activation
    # scratches, resident weights, plus the bf16 im2col temporaries / f32 conv
    # outputs the compiler materializes.  Leave ~4x headroom, clamp to a safe range
    # (well under v7x's 64 MiB physical VMEM).
    work = (2 * rows_buf * cin * 2 + 2 * rows_buf * ch * 2
            + 4 * (w1.size + wa.size + wb.size + wfc.size)
            + r_out * 9 * ch * 2 * 2 + r_out * ch * 4 * 6)
    vmem_limit = int(min(48 * 2**20, max(16 * 2**20, 4 * work)))

    grid_spec = pltpu.PrefetchScalarGridSpec(
        num_scalar_prefetch=0,
        grid=(g,),
        in_specs=[
            pl.BlockSpec((None, rows_buf, cin), lambda i: (i, 0, 0)),  # padded acts
            pl.BlockSpec(w1.shape, lambda i: (0, 0)),                  # (9*cin, ch) bf16
            pl.BlockSpec(b1.shape, lambda i: (0, 0)),
            pl.BlockSpec(wa.shape, lambda i: (0, 0)),                  # (9*ch, ch) bf16
            pl.BlockSpec(ba.shape, lambda i: (0, 0)),
            pl.BlockSpec(wb.shape, lambda i: (0, 0)),                  # (9*ch, ch) bf16
            pl.BlockSpec(bb.shape, lambda i: (0, 0)),
            pl.BlockSpec(wfc.shape, lambda i: (0, 0)),                 # (ch, ncls) bf16
            pl.BlockSpec(bfc.shape, lambda i: (0, 0)),
        ],
        out_specs=pl.BlockSpec((None, b_tile, ncls), lambda i: (i, 0, 0)),
        scratch_shapes=[
            pltpu.VMEM((rows_buf, ch), jnp.bfloat16),   # stem output (padded layout)
            pltpu.VMEM((rows_buf, ch), jnp.bfloat16),   # conv-a output (padded layout)
        ],
    )

    out = pl.pallas_call(
        kernel,
        out_shape=jax.ShapeDtypeStruct((g, b_tile, ncls), jnp.float32),
        grid_spec=grid_spec,
        compiler_params=pltpu.CompilerParams(
            dimension_semantics=("parallel",),
            vmem_limit_bytes=vmem_limit,
        ),
        cost_estimate=pl.CostEstimate(
            flops=flops, transcendentals=0, bytes_accessed=bytes_accessed),
    )(xbuf, w1, b1, wa, ba, wb, bb, wfc, bfc)
    return out.reshape(g * b_tile, ncls)


# ------------------------------- JAX wrapper --------------------------------

@jax.jit
def generic_model_forward(params, x_nchw):
    """Equivalent of GenericModel.forward(x): run the wrapped ResNet-style model."""
    x = jnp.transpose(x_nchw, (0, 2, 3, 1)).astype(jnp.bfloat16)    # NCHW -> NHWC bf16
    n, h_img, w_img, cin = x.shape
    ch = params["w1"].shape[3]
    ncls = params["w_fc"].shape[1]

    wp = w_img + 1                                   # one zero column per image row
    lead = _round_up(wp + 1, 8)                      # per-image top zero rows
    seg = _round_up(lead + h_img * wp + wp + 1, 8)   # uniform per-image segment rows
    guard = _round_up(wp + 1, 8)                     # buffer guard rows (top & bottom)

    # Batch tiling: amortize per-grid-step overhead, but keep >=2 grid steps when
    # n >= 2 so both v7x TensorCores get work under dimension_semantics=("parallel",).
    g_target = 1 if n <= 1 else max(2, -(-n // 8))
    b_tile = max(1, -(-n // g_target))
    g = -(-n // b_tile)
    n_pad = g * b_tile
    r_out = b_tile * seg
    rows_buf = guard + r_out + guard

    # Build the zero-padded flattened layout in HBM (tiny at these shapes).
    # TODO(synk): for large images do this scatter inside the kernel + row-tiling.
    xw = jnp.pad(x, ((0, n_pad - n), (0, 0), (0, 1), (0, 0)))        # (n_pad,H,Wp,C)
    xs = jnp.pad(xw.reshape(n_pad, h_img * wp, cin),
                 ((0, 0), (lead, seg - lead - h_img * wp), (0, 0)))  # (n_pad,seg,C)
    xbuf = jnp.pad(xs.reshape(g, r_out, cin),
                   ((0, 0), (guard, guard), (0, 0)))                 # (g,rows_buf,C)

    cin_w = params["w1"].shape[2]
    w1 = params["w1"].reshape(9 * cin_w, ch).astype(jnp.bfloat16)
    wa = params["wa"].reshape(9 * ch, ch).astype(jnp.bfloat16)
    wb = params["wb"].reshape(9 * ch, ch).astype(jnp.bfloat16)
    b1 = params["b1"].reshape(1, ch).astype(jnp.float32)
    ba = params["ba"].reshape(1, ch).astype(jnp.float32)
    bb = params["bb"].reshape(1, ch).astype(jnp.float32)
    wfc = params["w_fc"].astype(jnp.bfloat16)
    bfc = params["b_fc"].reshape(1, ncls).astype(jnp.float32)

    out = _forward_pallas(xbuf, w1, b1, wa, ba, wb, bb, wfc, bfc,
                          h_img=h_img, w_img=w_img, wp=wp, lead=lead, seg=seg,
                          b_tile=b_tile, guard=guard)
    return out[:n]


def init_params(key, cin=3, hidden=HIDDEN, n_classes=N_CLASSES):
    ks = jax.random.split(key, 8)

    def conv_w(k, ci, co):
        return jax.random.normal(k, (3, 3, ci, co), jnp.float32) / jnp.sqrt(9.0 * ci)

    return {
        "w1": conv_w(ks[0], cin, hidden),
        "b1": 0.1 * jax.random.normal(ks[1], (hidden,), jnp.float32),
        "wa": conv_w(ks[2], hidden, hidden),
        "ba": 0.1 * jax.random.normal(ks[3], (hidden,), jnp.float32),
        "wb": conv_w(ks[4], hidden, hidden),
        "bb": 0.1 * jax.random.normal(ks[5], (hidden,), jnp.float32),
        # resizeFC(): fc replaced with Linear(numFeat=hidden, 2)
        "w_fc": jax.random.normal(ks[6], (hidden, n_classes), jnp.float32)
        / jnp.sqrt(1.0 * hidden),
        "b_fc": 0.1 * jax.random.normal(ks[7], (n_classes,), jnp.float32),
    }


def reference_forward(params, x_nchw):
    """Pure-JAX f32 reference for correctness checking."""
    x = jnp.transpose(x_nchw, (0, 2, 3, 1))
    dn = ("NHWC", "HWIO", "NHWC")

    def conv(v, wt):
        return jax.lax.conv_general_dilated(v, wt, (1, 1), "SAME",
                                            dimension_numbers=dn)

    h = jnp.maximum(conv(x, params["w1"]) + params["b1"], 0.0)
    r = jnp.maximum(conv(h, params["wa"]) + params["ba"], 0.0)
    out = jnp.maximum(conv(r, params["wb"]) + params["bb"] + h, 0.0)
    pooled = out.mean(axis=(1, 2))
    return pooled @ params["w_fc"] + params["b_fc"]


# TODO(synk): getClassifications / pUpdate are training-loop helpers (softmax metric
# slicing, loss.backward, optimizer.step) and are not part of forward(); not translated.


if __name__ == "__main__":
    key = jax.random.PRNGKey(0)
    pkey, xkey = jax.random.split(key)
    params = init_params(pkey)
    # PyTorch-convention NCHW input, 3 channels (ResNet-style backbone).
    x = jax.random.normal(xkey, (2, 3, 16, 16), jnp.float32)

    out = generic_model_forward(params, x)
    jax.block_until_ready(out)
    assert out.shape == (2, 2), out.shape

    ref = reference_forward(params, x)
    tol = 5e-2 * (1.0 + float(jnp.max(jnp.abs(ref))))
    err = float(jnp.max(jnp.abs(out - ref)))
    assert err < tol, f"max abs error vs reference = {err}"

    print("KERNEL_OK")
</pallas_src>

<mosaic_0001>
module attributes {stable_mosaic.version = 11 : i64} {
  func.func @_fused_forward_kernel(%arg0: i32, %arg1: memref<1x368x3xbf16, #tpu.memory_space<vmem>>, %arg2: memref<27x32xbf16, #tpu.memory_space<vmem>>, %arg3: memref<1x32xf32, #tpu.memory_space<vmem>>, %arg4: memref<288x32xbf16, #tpu.memory_space<vmem>>, %arg5: memref<1x32xf32, #tpu.memory_space<vmem>>, %arg6: memref<288x32xbf16, #tpu.memory_space<vmem>>, %arg7: memref<1x32xf32, #tpu.memory_space<vmem>>, %arg8: memref<32x2xbf16, #tpu.memory_space<vmem>>, %arg9: memref<1x2xf32, #tpu.memory_space<vmem>>, %arg10: memref<1x1x2xf32, #tpu.memory_space<vmem>>, %arg11: memref<368x32xbf16, #tpu.memory_space<vmem>>, %arg12: memref<368x32xbf16, #tpu.memory_space<vmem>>) attributes {dimension_semantics = [#tpu.dimension_semantics<parallel>], iteration_bounds = array<i64: 2>, scalar_prefetch = 0 : i64, scratch_operands = 2 : i64, tpu.core_type = #tpu.core_type<tc>, window_params = [{transform_indices = @transform_0, window_bounds = array<i64: 1, 368, 3>}, {pipeline_mode = #tpu.pipeline_mode<synchronous>, transform_indices = @transform_1, window_bounds = array<i64: 27, 32>}, {pipeline_mode = #tpu.pipeline_mode<synchronous>, transform_indices = @transform_2, window_bounds = array<i64: 1, 32>}, {pipeline_mode = #tpu.pipeline_mode<synchronous>, transform_indices = @transform_3, window_bounds = array<i64: 288, 32>}, {pipeline_mode = #tpu.pipeline_mode<synchronous>, transform_indices = @transform_4, window_bounds = array<i64: 1, 32>}, {pipeline_mode = #tpu.pipeline_mode<synchronous>, transform_indices = @transform_5, window_bounds = array<i64: 288, 32>}, {pipeline_mode = #tpu.pipeline_mode<synchronous>, transform_indices = @transform_6, window_bounds = array<i64: 1, 32>}, {pipeline_mode = #tpu.pipeline_mode<synchronous>, transform_indices = @transform_7, window_bounds = array<i64: 32, 2>}, {pipeline_mode = #tpu.pipeline_mode<synchronous>, transform_indices = @transform_8, window_bounds = array<i64: 1, 2>}, {transform_indices = @transform_9, window_bounds = array<i64: 1, 1, 2>}]} {
    %cst = arith.constant 0.000000e+00 : bf16
    %0 = vector.broadcast %cst : bf16 to vector<24x32xbf16>
    %cst_0 = arith.constant 0.000000e+00 : bf16
    %1 = vector.broadcast %cst_0 : bf16 to vector<24x32xbf16>
    %c0 = arith.constant 0 : index
    %c0_1 = arith.constant 0 : index
    %2 = vector.load %arg11[%c0, %c0_1] : memref<368x32xbf16, #tpu.memory_space<vmem>>, vector<24x32xbf16>
    tpu.vector_store %arg11[%c0, %c0_1], %0 {strides = array<i32>} : memref<368x32xbf16, #tpu.memory_space<vmem>>, vector<24x32xbf16>,
    %c344 = arith.constant 344 : index
    %c0_2 = arith.constant 0 : index
    %3 = vector.load %arg11[%c344, %c0_2] : memref<368x32xbf16, #tpu.memory_space<vmem>>, vector<24x32xbf16>
    tpu.vector_store %arg11[%c344, %c0_2], %1 {strides = array<i32>} : memref<368x32xbf16, #tpu.memory_space<vmem>>, vector<24x32xbf16>,
    %c0_3 = arith.constant 0 : index
    %c0_4 = arith.constant 0 : index
    %4 = vector.load %arg12[%c0_3, %c0_4] : memref<368x32xbf16, #tpu.memory_space<vmem>>, vector<24x32xbf16>
    tpu.vector_store %arg12[%c0_3, %c0_4], %0 {strides = array<i32>} : memref<368x32xbf16, #tpu.memory_space<vmem>>, vector<24x32xbf16>,
    %c344_5 = arith.constant 344 : index
    %c0_6 = arith.constant 0 : index
    %5 = vector.load %arg12[%c344_5, %c0_6] : memref<368x32xbf16, #tpu.memory_space<vmem>>, vector<24x32xbf16>
    tpu.vector_store %arg12[%c344_5, %c0_6], %1 {strides = array<i32>} : memref<368x32xbf16, #tpu.memory_space<vmem>>, vector<24x32xbf16>,
    %6 = tpu.iota {dimensions = array<i32: 0>} : vector<320x1xi32>
    %c320_i32 = arith.constant 320 : i32
    %c0_i32 = arith.constant 0 : i32
    %7 = arith.cmpi eq, %c320_i32, %c0_i32 : i32
    %c1_i32 = arith.constant 1 : i32
    %8 = arith.select %7, %c1_i32, %c320_i32 : i32
    %9 = vector.broadcast %8 : i32 to vector<320x1xi32>
    %10 = arith.remsi %6, %9 : vector<320x1xi32>
    %c0_i32_7 = arith.constant 0 : i32
    %11 = vector.broadcast %c0_i32_7 : i32 to vector<320x1xi32>
    %12 = arith.cmpi ne, %10, %11 : vector<320x1xi32>
    %c0_i32_8 = arith.constant 0 : i32
    %13 = vector.broadcast %c0_i32_8 : i32 to vector<320x1xi32>
    %14 = arith.cmpi slt, %10, %13 : vector<320x1xi32>
    %c0_i32_9 = arith.constant 0 : i32
    %15 = arith.cmpi slt, %8, %c0_i32_9 : i32
    %16 = vector.broadcast %15 : i1 to vector<320x1xi1>
    %17 = vector.broadcast %16 : vector<320x1xi1> to vector<320x1xi1>
    %18 = arith.xori %14, %17 : vector<320x1xi1>
    %19 = arith.andi %18, %12 : vector<320x1xi1>
    %20 = vector.broadcast %8 : i32 to vector<320x1xi32>
    %21 = arith.addi %10, %20 : vector<320x1xi32>
    %22 = arith.select %19, %21, %10 : vector<320x1xi1>, vector<320x1xi32>
    %c24_i32 = arith.constant 24 : i32
    %23 = vector.broadcast %c24_i32 : i32 to vector<320x1xi32>
    %24 = arith.subi %22, %23 : vector<320x1xi32>
    %c17_i32 = arith.constant 17 : i32
    %c0_i32_10 = arith.constant 0 : i32
    %25 = arith.cmpi eq, %c17_i32, %c0_i32_10 : i32
    %c1_i32_11 = arith.constant 1 : i32
    %26 = arith.select %25, %c1_i32_11, %c17_i32 : i32
    %27 = vector.broadcast %26 : i32 to vector<320x1xi32>
    %28 = arith.remsi %24, %27 : vector<320x1xi32>
    %c0_i32_12 = arith.constant 0 : i32
    %29 = vector.broadcast %c0_i32_12 : i32 to vector<320x1xi32>
    %30 = arith.cmpi ne, %28, %29 : vector<320x1xi32>
    %c0_i32_13 = arith.constant 0 : i32
    %31 = vector.broadcast %c0_i32_13 : i32 to vector<320x1xi32>
    %32 = arith.cmpi slt, %28, %31 : vector<320x1xi32>
    %c0_i32_14 = arith.constant 0 : i32
    %33 = arith.cmpi slt, %26, %c0_i32_14 : i32
    %34 = vector.broadcast %33 : i1 to vector<320x1xi1>
    %35 = vector.broadcast %34 : vector<320x1xi1> to vector<320x1xi1>
    %36 = arith.xori %32, %35 : vector<320x1xi1>
    %37 = arith.andi %36, %30 : vector<320x1xi1>
    %38 = vector.broadcast %26 : i32 to vector<320x1xi32>
    %39 = arith.addi %28, %38 : vector<320x1xi32>
    %40 = arith.select %37, %39, %28 : vector<320x1xi1>, vector<320x1xi32>
    %c24_i32_15 = arith.constant 24 : i32
    %41 = vector.broadcast %c24_i32_15 : i32 to vector<320x1xi32>
    %42 = arith.cmpi sge, %22, %41 : vector<320x1xi32>
    %c296_i32 = arith.constant 296 : i32
    %43 = vector.broadcast %c296_i32 : i32 to vector<320x1xi32>
    %44 = arith.cmpi slt, %22, %43 : vector<320x1xi32>
    %45 = arith.andi %42, %44 : vector<320x1xi1>
    %c16_i32 = arith.constant 16 : i32
    %46 = vector.broadcast %c16_i32 : i32 to vector<320x1xi32>
    %47 = arith.cmpi slt, %40, %46 : vector<320x1xi32>
    %48 = arith.andi %45, %47 : vector<320x1xi1>
    %c0_16 = arith.constant 0 : index
    %c6 = arith.constant 6 : index
    %c0_17 = arith.constant 0 : index
    %49 = vector.load %arg1[%c0_16, %c6, %c0_17] : memref<1x368x3xbf16, #tpu.memory_space<vmem>>, vector<1x320x3xbf16>
    %50 = vector.shape_cast %49 : vector<1x320x3xbf16> to vector<320x3xbf16>
    %c0_18 = arith.constant 0 : index
    %c7 = arith.constant 7 : index
    %c0_19 = arith.constant 0 : index
    %51 = vector.load %arg1[%c0_18, %c7, %c0_19] : memref<1x368x3xbf16, #tpu.memory_space<vmem>>, vector<1x320x3xbf16>
    %52 = vector.shape_cast %51 : vector<1x320x3xbf16> to vector<320x3xbf16>
    %c0_20 = arith.constant 0 : index
    %c8 = arith.constant 8 : index
    %c0_21 = arith.constant 0 : index
    %53 = vector.load %arg1[%c0_20, %c8, %c0_21] : memref<1x368x3xbf16, #tpu.memory_space<vmem>>, vector<1x320x3xbf16>
    %54 = vector.shape_cast %53 : vector<1x320x3xbf16> to vector<320x3xbf16>
    %c0_22 = arith.constant 0 : index
    %c23 = arith.constant 23 : index
    %c0_23 = arith.constant 0 : index
    %55 = vector.load %arg1[%c0_22, %c23, %c0_23] : memref<1x368x3xbf16, #tpu.memory_space<vmem>>, vector<1x320x3xbf16>
    %56 = vector.shape_cast %55 : vector<1x320x3xbf16> to vector<320x3xbf16>
    %c0_24 = arith.constant 0 : index
    %c24 = arith.constant 24 : index
    %c0_25 = arith.constant 0 : index
    %57 = vector.load %arg1[%c0_24, %c24, %c0_25] : memref<1x368x3xbf16, #tpu.memory_space<vmem>>, vector<1x320x3xbf16>
    %58 = vector.shape_cast %57 : vector<1x320x3xbf16> to vector<320x3xbf16>
    %c0_26 = arith.constant 0 : index
    %c25 = arith.constant 25 : index
    %c0_27 = arith.constant 0 : index
    %59 = vector.load %arg1[%c0_26, %c25, %c0_27] : memref<1x368x3xbf16, #tpu.memory_space<vmem>>, vector<1x320x3xbf16>
    %60 = vector.shape_cast %59 : vector<1x320x3xbf16> to vector<320x3xbf16>
    %c0_28 = arith.constant 0 : index
    %c40 = arith.constant 40 : index
    %c0_29 = arith.constant 0 : index
    %61 = vector.load %arg1[%c0_28, %c40, %c0_29] : memref<1x368x3xbf16, #tpu.memory_space<vmem>>, vector<1x320x3xbf16>
    %62 = vector.shape_cast %61 : vector<1x320x3xbf16> to vector<320x3xbf16>
    %c0_30 = arith.constant 0 : index
    %c41 = arith.constant 41 : index
    %c0_31 = arith.constant 0 : index
    %63 = vector.load %arg1[%c0_30, %c41, %c0_31] : memref<1x368x3xbf16, #tpu.memory_space<vmem>>, vector<1x320x3xbf16>
    %64 = vector.shape_cast %63 : vector<1x320x3xbf16> to vector<320x3xbf16>
    %c0_32 = arith.constant 0 : index
    %c42 = arith.constant 42 : index
    %c0_33 = arith.constant 0 : index
    %65 = vector.load %arg1[%c0_32, %c42, %c0_33] : memref<1x368x3xbf16, #tpu.memory_space<vmem>>, vector<1x320x3xbf16>
    %66 = vector.shape_cast %65 : vector<1x320x3xbf16> to vector<320x3xbf16>
    %67 = tpu.concatenate %50, %52, %54, %56, %58, %60, %62, %64, %66 in 1 : vector<320x3xbf16>, vector<320x3xbf16>, vector<320x3xbf16>, vector<320x3xbf16>, vector<320x3xbf16>, vector<320x3xbf16>, vector<320x3xbf16>, vector<320x3xbf16>, vector<320x3xbf16> -> vector<320x27xbf16>
    %c0_34 = arith.constant 0 : index
    %c0_35 = arith.constant 0 : index
    %68 = vector.load %arg2[%c0_34, %c0_35] : memref<27x32xbf16, #tpu.memory_space<vmem>>, vector<27x32xbf16>
    %cst_36 = arith.constant dense<0.000000e+00> : vector<320x32xf32>
    %69 = tpu.matmul %67, %68, %cst_36 {dimension_numbers = #tpu.dot_dimension_numbers<[1], [0], [0], [1], [0, 0, 1, 1], [], []>} : vector<320x27xbf16>, vector<27x32xbf16>, vector<320x32xf32> -> vector<320x32xf32>
    %c0_37 = arith.constant 0 : index
    %c0_38 = arith.constant 0 : index
    %70 = vector.load %arg3[%c0_37, %c0_38] : memref<1x32xf32, #tpu.memory_space<vmem>>, vector<1x32xf32>
    %71 = vector.broadcast %70 : vector<1x32xf32> to vector<320x32xf32>
    %72 = arith.addf %69, %71 : vector<320x32xf32>
    %cst_39 = arith.constant 0.000000e+00 : f32
    %73 = vector.broadcast %cst_39 : f32 to vector<320x32xf32>
    %74 = arith.maximumf %72, %73 : vector<320x32xf32>
    %cst_40 = arith.constant 0.000000e+00 : f32
    %75 = vector.shape_cast %48 : vector<320x1xi1> to vector<320x1xi1>
    %76 = vector.broadcast %75 : vector<320x1xi1> to vector<320x32xi1>
    %77 = vector.broadcast %cst_40 : f32 to vector<320x32xf32>
    %78 = arith.select %76, %74, %77 : vector<320x32xi1>, vector<320x32xf32>
    %79 = arith.truncf %78 : vector<320x32xf32> to vector<320x32xbf16>
    %c24_41 = arith.constant 24 : index
    %c0_42 = arith.constant 0 : index
    %80 = vector.load %arg11[%c24_41, %c0_42] : memref<368x32xbf16, #tpu.memory_space<vmem>>, vector<320x32xbf16>
    tpu.vector_store %arg11[%c24_41, %c0_42], %79 {strides = array<i32>} : memref<368x32xbf16, #tpu.memory_space<vmem>>, vector<320x32xbf16>,
    %c6_43 = arith.constant 6 : index
    %c0_44 = arith.constant 0 : index
    %81 = vector.load %arg11[%c6_43, %c0_44] : memref<368x32xbf16, #tpu.memory_space<vmem>>, vector<320x32xbf16>
    %c7_45 = arith.constant 7 : index
    %c0_46 = arith.constant 0 : index
    %82 = vector.load %arg11[%c7_45, %c0_46] : memref<368x32xbf16, #tpu.memory_space<vmem>>, vector<320x32xbf16>
    %c8_47 = arith.constant 8 : index
    %c0_48 = arith.constant 0 : index
    %83 = vector.load %arg11[%c8_47, %c0_48] : memref<368x32xbf16, #tpu.memory_space<vmem>>, vector<320x32xbf16>
    %c23_49 = arith.constant 23 : index
    %c0_50 = arith.constant 0 : index
    %84 = vector.load %arg11[%c23_49, %c0_50] : memref<368x32xbf16, #tpu.memory_space<vmem>>, vector<320x32xbf16>
    %c24_51 = arith.constant 24 : index
    %c0_52 = arith.constant 0 : index
    %85 = vector.load %arg11[%c24_51, %c0_52] : memref<368x32xbf16, #tpu.memory_space<vmem>>, vector<320x32xbf16>
    %c25_53 = arith.constant 25 : index
    %c0_54 = arith.constant 0 : index
    %86 = vector.load %arg11[%c25_53, %c0_54] : memref<368x32xbf16, #tpu.memory_space<vmem>>, vector<320x32xbf16>
    %c40_55 = arith.constant 40 : index
    %c0_56 = arith.constant 0 : index
    %87 = vector.load %arg11[%c40_55, %c0_56] : memref<368x32xbf16, #tpu.memory_space<vmem>>, vector<320x32xbf16>
    %c41_57 = arith.constant 41 : index
    %c0_58 = arith.constant 0 : index
    %88 = vector.load %arg11[%c41_57, %c0_58] : memref<368x32xbf16, #tpu.memory_space<vmem>>, vector<320x32xbf16>
    %c42_59 = arith.constant 42 : index
    %c0_60 = arith.constant 0 : index
    %89 = vector.load %arg11[%c42_59, %c0_60] : memref<368x32xbf16, #tpu.memory_space<vmem>>, vector<320x32xbf16>
    %90 = tpu.concatenate %81, %82, %83, %84, %85, %86, %87, %88, %89 in 1 : vector<320x32xbf16>, vector<320x32xbf16>, vector<320x32xbf16>, vector<320x32xbf16>, vector<320x32xbf16>, vector<320x32xbf16>, vector<320x32xbf16>, vector<320x32xbf16>, vector<320x32xbf16> -> vector<320x288xbf16>
    %c0_61 = arith.constant 0 : index
    %c0_62 = arith.constant 0 : index
    %91 = vector.load %arg4[%c0_61, %c0_62] : memref<288x32xbf16, #tpu.memory_space<vmem>>, vector<288x32xbf16>
    %cst_63 = arith.constant dense<0.000000e+00> : vector<320x32xf32>
    %92 = tpu.matmul %90, %91, %cst_63 {dimension_numbers = #tpu.dot_dimension_numbers<[1], [0], [0], [1], [0, 0, 1, 1], [], []>} : vector<320x288xbf16>, vector<288x32xbf16>, vector<320x32xf32> -> vector<320x32xf32>
    %c0_64 = arith.constant 0 : index
    %c0_65 = arith.constant 0 : index
    %93 = vector.load %arg5[%c0_64, %c0_65] : memref<1x32xf32, #tpu.memory_space<vmem>>, vector<1x32xf32>
    %94 = vector.broadcast %93 : vector<1x32xf32> to vector<320x32xf32>
    %95 = arith.addf %92, %94 : vector<320x32xf32>
    %cst_66 = arith.constant 0.000000e+00 : f32
    %96 = vector.broadcast %cst_66 : f32 to vector<320x32xf32>
    %97 = arith.maximumf %95, %96 : vector<320x32xf32>
    %cst_67 = arith.constant 0.000000e+00 : f32
    %98 = vector.shape_cast %48 : vector<320x1xi1> to vector<320x1xi1>
    %99 = vector.broadcast %98 : vector<320x1xi1> to vector<320x32xi1>
    %100 = vector.broadcast %cst_67 : f32 to vector<320x32xf32>
    %101 = arith.select %99, %97, %100 : vector<320x32xi1>, vector<320x32xf32>
    %102 = arith.truncf %101 : vector<320x32xf32> to vector<320x32xbf16>
    %c24_68 = arith.constant 24 : index
    %c0_69 = arith.constant 0 : index
    %103 = vector.load %arg12[%c24_68, %c0_69] : memref<368x32xbf16, #tpu.memory_space<vmem>>, vector<320x32xbf16>
    tpu.vector_store %arg12[%c24_68, %c0_69], %102 {strides = array<i32>} : memref<368x32xbf16, #tpu.memory_space<vmem>>, vector<320x32xbf16>,
    %c6_70 = arith.constant 6 : index
    %c0_71 = arith.constant 0 : index
    %104 = vector.load %arg12[%c6_70, %c0_71] : memref<368x32xbf16, #tpu.memory_space<vmem>>, vector<320x32xbf16>
    %c7_72 = arith.constant 7 : index
    %c0_73 = arith.constant 0 : index
    %105 = vector.load %arg12[%c7_72, %c0_73] : memref<368x32xbf16, #tpu.memory_space<vmem>>, vector<320x32xbf16>
    %c8_74 = arith.constant 8 : index
    %c0_75 = arith.constant 0 : index
    %106 = vector.load %arg12[%c8_74, %c0_75] : memref<368x32xbf16, #tpu.memory_space<vmem>>, vector<320x32xbf16>
    %c23_76 = arith.constant 23 : index
    %c0_77 = arith.constant 0 : index
    %107 = vector.load %arg12[%c23_76, %c0_77] : memref<368x32xbf16, #tpu.memory_space<vmem>>, vector<320x32xbf16>
    %c24_78 = arith.constant 24 : index
    %c0_79 = arith.constant 0 : index
    %108 = vector.load %arg12[%c24_78, %c0_79] : memref<368x32xbf16, #tpu.memory_space<vmem>>, vector<320x32xbf16>
    %c25_80 = arith.constant 25 : index
    %c0_81 = arith.constant 0 : index
    %109 = vector.load %arg12[%c25_80, %c0_81] : memref<368x32xbf16, #tpu.memory_space<vmem>>, vector<320x32xbf16>
    %c40_82 = arith.constant 40 : index
    %c0_83 = arith.constant 0 : index
    %110 = vector.load %arg12[%c40_82, %c0_83] : memref<368x32xbf16, #tpu.memory_space<vmem>>, vector<320x32xbf16>
    %c41_84 = arith.constant 41 : index
    %c0_85 = arith.constant 0 : index
    %111 = vector.load %arg12[%c41_84, %c0_85] : memref<368x32xbf16, #tpu.memory_space<vmem>>, vector<320x32xbf16>
    %c42_86 = arith.constant 42 : index
    %c0_87 = arith.constant 0 : index
    %112 = vector.load %arg12[%c42_86, %c0_87] : memref<368x32xbf16, #tpu.memory_space<vmem>>, vector<320x32xbf16>
    %113 = tpu.concatenate %104, %105, %106, %107, %108, %109, %110, %111, %112 in 1 : vector<320x32xbf16>, vector<320x32xbf16>, vector<320x32xbf16>, vector<320x32xbf16>, vector<320x32xbf16>, vector<320x32xbf16>, vector<320x32xbf16>, vector<320x32xbf16>, vector<320x32xbf16> -> vector<320x288xbf16>
    %c0_88 = arith.constant 0 : index
    %c0_89 = arith.constant 0 : index
    %114 = vector.load %arg6[%c0_88, %c0_89] : memref<288x32xbf16, #tpu.memory_space<vmem>>, vector<288x32xbf16>
    %cst_90 = arith.constant dense<0.000000e+00> : vector<320x32xf32>
    %115 = tpu.matmul %113, %114, %cst_90 {dimension_numbers = #tpu.dot_dimension_numbers<[1], [0], [0], [1], [0, 0, 1, 1], [], []>} : vector<320x288xbf16>, vector<288x32xbf16>, vector<320x32xf32> -> vector<320x32xf32>
    %c0_91 = arith.constant 0 : index
    %c0_92 = arith.constant 0 : index
    %116 = vector.load %arg7[%c0_91, %c0_92] : memref<1x32xf32, #tpu.memory_space<vmem>>, vector<1x32xf32>
    %117 = vector.broadcast %116 : vector<1x32xf32> to vector<320x32xf32>
    %118 = arith.addf %115, %117 : vector<320x32xf32>
    %119 = arith.addf %118, %78 : vector<320x32xf32>
    %cst_93 = arith.constant 0.000000e+00 : f32
    %120 = vector.broadcast %cst_93 : f32 to vector<320x32xf32>
    %121 = arith.maximumf %119, %120 : vector<320x32xf32>
    %cst_94 = arith.constant 0.000000e+00 : f32
    %122 = vector.shape_cast %48 : vector<320x1xi1> to vector<320x1xi1>
    %123 = vector.broadcast %122 : vector<320x1xi1> to vector<320x32xi1>
    %124 = vector.broadcast %cst_94 : f32 to vector<320x32xf32>
    %125 = arith.select %123, %121, %124 : vector<320x32xi1>, vector<320x32xf32>
    %cst_95 = arith.constant dense<0.000000e+00> : vector<32xf32>
    %126 = vector.multi_reduction <add>, %125, %cst_95 [0] : vector<320x32xf32> to vector<32xf32>
    %127 = vector.shape_cast %126 : vector<32xf32> to vector<1x32xf32>
    %cst_96 = arith.constant 3.906250e-03 : f32
    %128 = vector.broadcast %cst_96 : f32 to vector<1x32xf32>
    %129 = arith.mulf %127, %128 : vector<1x32xf32>
    %130 = arith.truncf %129 : vector<1x32xf32> to vector<1x32xbf16>
    %c0_97 = arith.constant 0 : index
    %c0_98 = arith.constant 0 : index
    %131 = vector.load %arg8[%c0_97, %c0_98] : memref<32x2xbf16, #tpu.memory_space<vmem>>, vector<32x2xbf16>
    %cst_99 = arith.constant dense<0.000000e+00> : vector<1x2xf32>
    %132 = tpu.matmul %130, %131, %cst_99 {dimension_numbers = #tpu.dot_dimension_numbers<[1], [0], [0], [1], [0, 0, 1, 1], [], []>} : vector<1x32xbf16>, vector<32x2xbf16>, vector<1x2xf32> -> vector<1x2xf32>
    %c0_100 = arith.constant 0 : index
    %c0_101 = arith.constant 0 : index
    %133 = vector.load %arg9[%c0_100, %c0_101] : memref<1x2xf32, #tpu.memory_space<vmem>>, vector<1x2xf32>
    %134 = arith.addf %132, %133 : vector<1x2xf32>
    %c0_102 = arith.constant 0 : index
    %c0_103 = arith.constant 0 : index
    %c0_104 = arith.constant 0 : index
    %135 = vector.load %arg10[%c0_102, %c0_103, %c0_104] : memref<1x1x2xf32, #tpu.memory_space<vmem>>, vector<1x1x2xf32>
    %136 = vector.shape_cast %135 : vector<1x1x2xf32> to vector<1x2xf32>
    %137 = vector.shape_cast %134 : vector<1x2xf32> to vector<1x1x2xf32>
    tpu.vector_store %arg10[%c0_102, %c0_103, %c0_104], %137 {strides = array<i32>} : memref<1x1x2xf32, #tpu.memory_space<vmem>>, vector<1x1x2xf32>,
    return
  }
  func.func @transform_0(%arg0: i32) -> (i32, i32, i32) {
    %c0_i32 = arith.constant 0 : i32
    %c0_i32_0 = arith.constant 0 : i32
    %c0_i32_1 = arith.constant 0 : i32
    return %arg0, %c0_i32, %c0_i32_0 : i32, i32, i32
  }
  func.func @transform_1(%arg0: i32) -> (i32, i32) {
    %c0_i32 = arith.constant 0 : i32
    %c0_i32_0 = arith.constant 0 : i32
    %c0_i32_1 = arith.constant 0 : i32
    return %c0_i32, %c0_i32_0 : i32, i32
  }
  func.func @transform_2(%arg0: i32) -> (i32, i32) {
    %c0_i32 = arith.constant 0 : i32
    %c0_i32_0 = arith.constant 0 : i32
    %c0_i32_1 = arith.constant 0 : i32
    return %c0_i32, %c0_i32_0 : i32, i32
  }
  func.func @transform_3(%arg0: i32) -> (i32, i32) {
    %c0_i32 = arith.constant 0 : i32
    %c0_i32_0 = arith.constant 0 : i32
    %c0_i32_1 = arith.constant 0 : i32
    return %c0_i32, %c0_i32_0 : i32, i32
  }
  func.func @transform_4(%arg0: i32) -> (i32, i32) {
    %c0_i32 = arith.constant 0 : i32
    %c0_i32_0 = arith.constant 0 : i32
    %c0_i32_1 = arith.constant 0 : i32
    return %c0_i32, %c0_i32_0 : i32, i32
  }
  func.func @transform_5(%arg0: i32) -> (i32, i32) {
    %c0_i32 = arith.constant 0 : i32
    %c0_i32_0 = arith.constant 0 : i32
    %c0_i32_1 = arith.constant 0 : i32
    return %c0_i32, %c0_i32_0 : i32, i32
  }
  func.func @transform_6(%arg0: i32) -> (i32, i32) {
    %c0_i32 = arith.constant 0 : i32
    %c0_i32_0 = arith.constant 0 : i32
    %c0_i32_1 = arith.constant 0 : i32
    return %c0_i32, %c0_i32_0 : i32, i32
  }
  func.func @transform_7(%arg0: i32) -> (i32, i32) {
    %c0_i32 = arith.constant 0 : i32
    %c0_i32_0 = arith.constant 0 : i32
    %c0_i32_1 = arith.constant 0 : i32
    return %c0_i32, %c0_i32_0 : i32, i32
  }
  func.func @transform_8(%arg0: i32) -> (i32, i32) {
    %c0_i32 = arith.constant 0 : i32
    %c0_i32_0 = arith.constant 0 : i32
    %c0_i32_1 = arith.constant 0 : i32
    return %c0_i32, %c0_i32_0 : i32, i32
  }
  func.func @transform_9(%arg0: i32) -> (i32, i32, i32) {
    %c0_i32 = arith.constant 0 : i32
    %c0_i32_0 = arith.constant 0 : i32
    %c0_i32_1 = arith.constant 0 : i32
    return %arg0, %c0_i32, %c0_i32_0 : i32, i32, i32
  }
}

</mosaic_0001>

<bundles_post_ra>
// kernel: generic_model_forward.1
= control target key start
LH: loop header
LB: loop body
LE: loop exit
PB: predicated region body
PF: predicated region fallthrough
CT: control target
= control target key end

     0   :  { %14 = vsyncpa [#allocation5], 0  ;;  %s17521_s0 = inlined_call_operand.vmem [shape: bf16[2,368,3], index: 0, kind: input, shape index: {}]   ;;  %s17522_s1 = inlined_call_operand.vmem [shape: bf16[27,32], index: 1, kind: input, shape index: {}]   ;;  %s17523_s2 = inlined_call_operand.vmem [shape: f32[1,32], index: 2, kind: input, shape index: {}]   ;;  %s17524_s3 = inlined_call_operand.vmem [shape: bf16[288,32], index: 3, kind: input, shape index: {}]   ;;  %s17525_s4 = inlined_call_operand.vmem [shape: f32[1,32], index: 4, kind: input, shape index: {}]   ;;  %s17526_s5 = inlined_call_operand.vmem [shape: bf16[288,32], index: 5, kind: input, shape index: {}]   ;;  %s17527_s6 = inlined_call_operand.vmem [shape: f32[1,32], index: 6, kind: input, shape index: {}]   ;;  %s17528_s7 = inlined_call_operand.vmem [shape: bf16[32,2], index: 7, kind: input, shape index: {}]   ;;  %s17529_s8 = inlined_call_operand.vmem [shape: f32[1,2], index: 8, kind: input, shape index: {}]   ;;  %s17530_s9 = inlined_call_operand.hbm [shape: f32[2,1,2], index: 9, kind: output, shape index: {}]  }
   0x1   :  { %16 = vsyncpa [#allocation5 + $0x1], 0  ;;  %s9706_s30 = smov 0   ;;  %s9708_s10 = smov 0  }
   0x2   :  { %s9710_s11 = smov 0   ;;  %s9712_s12 = smov 0  }
   0x3 LB: > { %s9727_s13 = sadd.s32 4294967295, %s9638_s12   ;;  %s8489_s14 = sadd.s32 4294967294, %s9638_s12   ;;  %s9638_s12 = sphi %s9712_s12, %s19504_s12   ;;  %s9634_s11 = sphi %s9710_s11, %s19503_s11   ;;  %s9630_s10 = sphi %s9708_s10, %s19502_s10   ;;  %s9626_s30 = sphi %s9706_s30, %s19501_s30  }
   0x4   : > { %s9731_s15 = sadd.s32 1, %s9638_s12   ;;  %s223_s16 = sadd.s32 1, %s9634_s11 }
   0x5   : > { %s220_s17 = ssub.s32 %s9638_s12, %s9731_s15  ;;  %p233_p0 = scmp.ne.s32.totalorder %s9634_s11, %s9630_s10 }
   0x6   : > { %p221_p1 = scmp.eq.s32.totalorder %s220_s17, 0  ;;  %p234_p2 = scmp.eq.s32.totalorder %s9727_s13, 1 }
   0x7   : > { %p239_p3 = scmp.ne.s32.totalorder %s9630_s10, %s9626_s30  ;;  %p240_p4 = scmp.eq.s32.totalorder %s8489_s14, 1 }
   0x8   : > { %s9742_s18 = scalar_select %p221_p1, %s9634_s11, %s223_s16  }
   0x9   : > { %p9744_p5 = por %p234_p2, %p233_p0  ;;  %p9748_p6 = por %p240_p4, %p239_p3 }
   0xa   : > { %p8492_p7 = scmp.ge.s32.totalorder %s9638_s12, 1  ;;  %p290_p8 = scmp.lt.s32.totalorder %s9638_s12, 3 }
   0xc   : > { %p291_p9 = pnand %p8492_p7, %p290_p8 }
   0xe   : > { %294 = sbr.rel (%p291_p9) target bundleno = 1833 (0x729), region = 56 }
  0x13   : > { %p325_p10 = scmp.lt.s32.totalorder %s9727_s13, 1  ;;  %vm17536_vm0 = vcmask 1042432   ;;  %s9640_s26 = smov 6   ;;  %vm17531_vm1 = vsmask.f32 7424  ;;  %vm17533_vm3 = vcmask 1041408  }
  0x14   : > { %s9641_s27 = smov 12   ;;  %s9642_s28 = smov 3   ;;  %vm17560_vm2 = vsmask.f32 2304  ;;  %vm17562_vm4 = vcmask 1044480   ;;  %vm3410_vm5 = vcmask 1045504  }
  0x15   : > { %s326_s21 = scalar_select %p325_p10, %s9727_s13, 1  ;;  %vm17599_vm6 = vcmask 23552   ;;  %vm17584_vm7 = vcmask 48128   ;;  %vm17583_vm8 = vcmask 72704   ;;  %vm17582_vm9 = vcmask 97280  }
  0x16   : > { %s9643_s29 = smov 9   ;;  %s9644_s14 = smov 15   ;;  %vm17581_vm10 = vcmask 121856   ;;  %vm17580_vm11 = vcmask 146432   ;;  %vm17579_vm12 = vcmask 171008   ;;  %vm17563_vm13 = vcmask 195584  }
  0x17   : > { %s9204_s22 = smul.u32 184, %s326_s21  ;;  %s9645_s16 = smov 18   ;;  %vm17561_vm14 = vcmask 220160   ;;  %vm17532_vm15 = vcmask 257024  }
  0x18   : > { %s9646_s17 = smov 21   ;;  %s9647_s21 = smov 24  }
  0x19   : > { %s9759_s25 = scalar_lea.vmem %s17521_s0, %s9204_s22  ;;  %s9651_s24 = smov 32  }
  0x1a   : > { %v1906_v0 = vld [vmem:[%s9759_s25 + $0x4] sm:$0xf]  ;;  %v1907_v1 = vld [vmem:[%s9759_s25 + $0x8] sm:$0xf]  ;;  %v1908_v2 = vld [vmem:[%s9759_s25 + $0xc] sm:$0xf] }
  0x1b   : > { %v1909_v3 = vld [vmem:[%s9759_s25 + $0x10] sm:$0xf]  ;;  %v1910_v4 = vld [vmem:[%s9759_s25 + $0x14] sm:$0xf]  ;;  %v1947_v5 = vld [vmem:[%s9759_s25 + $0x8] sm:$0x8]  ;;  %v9767_v6 = vcombine.low %v1907_v1, %v1908_v2  ;;  %v8596_v7 = vcombine.low %v1906_v0, %v1907_v1 }
  0x1c   : > { %v9769_v8 = vcombine.low %v1909_v3, %v1910_v4  ;;  %v8597_v9 = vcombine.low %v1908_v2, %v1909_v3  ;;  %v8616_v10 = vcombine.low %v1947_v5, %v1908_v2  ;;  %v1905_v11 = vld [vmem:[%s9759_s25] sm:$0x8]  ;;  %v9773_v12 = vld [vmem:[%s9759_s25 + $0x18] sm:$0xf]  ;;  %v1912_v13 = vld [vmem:[%s9759_s25 + $0x1c] sm:$0xf] }
  0x1d   : > { %v2292_v14 = vrot.slane %v8596_v7, 5  ;;  %v9776_v15 = vcombine.low %v1905_v11, %v1906_v0  ;;  %v2070_v16 = vshll.u32 %v9767_v6, 16  ;;  %v8598_v17 = vcombine.low %v1910_v4, %v9773_v12  ;;  %v1913_v26 = vld [vmem:[%s9759_s25 + $0x20] sm:$0xf]  ;;  %v1914_v31 = vld [vmem:[%s9759_s25 + $0x24] sm:$0xf] }
  0x1e   : > { %v2293_v18 = vrot.slane %v8597_v9, 5  ;;  %v2074_v19 = vshrl.u32 %v9767_v6, 16  ;;  %v2078_v20 = vshll.u32 %v9769_v8, 16  ;;  %v9783_v21 = vcombine.low %v9773_v12, %v1912_v13  ;;  %v1915_v0 = vld [vmem:[%s9759_s25 + $0x28] sm:$0xf]  ;;  %s323_s22 = sand.u32 1, %s9630_s10  }
  0x1f   : > { %2331 = vrot.lane.b32.xlu1 %v2292_v14, %s9640_s26  ;;  %v2065_v22 = vshll.u32 %v9776_v15, 16  ;;  %v2063_v23 = vshrl.u32 %v9776_v15, 16  ;;  %v2072_v24 = vrot.slane %v2070_v16, 1  ;;  %v9788_v25 = vrot.slane %v8598_v17, 5 }
  0x20   : > { %v2294_v27 = vsel %vm17536_vm0, %v2292_v14, %v2293_v18  ;;  %v2080_v28 = vrot.slane %v2078_v20, 1  ;;  %v2082_v29 = vshrl.u32 %v9769_v8, 16  ;;  %v2086_v30 = vshll.u32 %v9783_v21, 16 }
  0x21   : > { %2333 = vrot.lane.b32.xlu0 %v2294_v27, %s9640_s26  ;;  %v2067_v32 = vrot.slane %v2065_v22, 1  ;;  %v2076_v33 = vor.u32 %v2074_v19, %v2072_v24  ;;  %v2385_v34 = vshll.u32 %v8616_v10, 16  ;;  %v2383_v36 = vshrl.u32 %v8616_v10, 16  ;;  %v1916_v19 = vld [vmem:[%s9759_s25 + $0x2c] sm:$0xf] }
  0x22   : > { %v9797_v37 = vcombine.low %v1913_v26, %v1914_v31  ;;  %v2296_v38 = vsel %vm17536_vm0, %v2293_v18, %v9788_v25  ;;  %v2084_v39 = vor.u32 %v2082_v29, %v2080_v28  ;;  %v2088_v40 = vrot.slane %v2086_v30, 1  ;;  %v1917_v27 = vld [vmem:[%s9759_s25 + $0x30] sm:$0xf]  ;;  %v1918_v30 = vld [vmem:[%s9759_s25 + $0x34] sm:$0xf] }
  0x23   : > { %2451 = vrot.lane.b32.xlu1 %v2293_v18, %s9641_s27  ;;  %v2068_v35 = vor.u32 %v2067_v32, %v2063_v23  ;;  %v2387_v41 = vrot.slane %v2385_v34, 1  ;;  %v2081_v43 = vsel %vm17531_vm1, %v2076_v33, %v2080_v28  ;;  %v2090_v44 = vshrl.u32 %v9783_v21, 16  ;;  %v1954_v18 = vld [vmem:[%s9759_s25 + $0x14] sm:$0xe] }
  0x24   : > { %v9805_v45 = vcombine.low %v1912_v13, %v1913_v26  ;;  %v2094_v47 = vshll.u32 %v9797_v37, 16  ;;  %v2498_v48 = vshrl.u32 %v8597_v9, 16  ;;  %v2501_v49 = vshll.u32 %v8597_v9, 16 }
  0x25   : > { %v2073_v42 = vsel %vm17531_vm1, %v2068_v35, %v2072_v24  ;;  %v2388_v46 = vor.u32 %v2387_v41, %v2383_v36  ;;  %v2089_v50 = vsel %vm17531_vm1, %v2084_v39, %v2088_v40  ;;  %v2506_v51 = vshrl.u32 %v8598_v17, 16 }
  0x26   : > { %2229 = vrot.lane.b32.xlu0 %v2073_v42, %s9642_s28  ;;  %v2509_v52 = vshll.u32 %v8598_v17, 16  ;;  %v2092_v54 = vor.u32 %v2090_v44, %v2088_v40  ;;  %v2096_v55 = vrot.slane %v2094_v47, 1  ;;  %v2297_v56 = vrot.slane %v9805_v45, 5  ;;  %v9447_v42 = vld [vmem:[%s17522_s1 + $0x8] sm:$0x3f]  }
  0x27   : > { %2335 = vrot.lane.b32.xlu1 %v2296_v38, %s9640_s26  ;;  %v2389_v53 = vsel %vm17531_vm1, %v2388_v46, %v2080_v28  ;;  %v2500_v57 = vrot.slane %v2498_v48, 5  ;;  %v2503_v58 = vrot.slane %v2501_v49, 6  ;;  %v2508_v59 = vrot.slane %v2506_v51, 5 }
  0x28   : > { %v2511_v60 = vrot.slane %v2509_v52, 6  ;;  %v2097_v61 = vsel %vm17531_vm1, %v2092_v54, %v2096_v55  ;;  %v2515_v62 = vshrl.u32 %v9805_v45, 16  ;;  %v2518_v63 = vshll.u32 %v9805_v45, 16  ;;  %v9448_v52 = vld [vmem:[%s17522_s1] sm:$0xff]  }
  0x29   : > { %v9822_v1 = vsel %vm17536_vm0, %v9788_v25, %v2297_v56  ;;  %v2504_v2 = vor.u32 %v2503_v58, %v2500_v57  ;;  %v9825_v4 = vcombine.low %v1914_v31, %v1915_v0  ;;  %v8623_v20 = vcombine.low %v1954_v18, %v9773_v12  ;;  %v1922_v18 = vld [vmem:[%s9759_s25 + $0x44] sm:$0xf] }
  0x2a   : > { %2231 = vrot.lane.b32.xlu0 %v2081_v43, %s9642_s28  ;;  %v2512_v3 = vor.u32 %v2511_v60, %v2508_v59  ;;  %v2517_v5 = vrot.slane %v2515_v62, 5  ;;  %v2520_v7 = vrot.slane %v2518_v63, 6  ;;  %v9850_v24 = vcombine.low %v1915_v0, %v1916_v19 }
  0x2b   : > { %2233 = vrot.lane.b32.xlu1 %v2089_v50, %s9642_s28  ;;  %v2299_v11 = vrot.slane %v9825_v4, 5  ;;  %v2524_v14 = vshrl.u32 %v9825_v4, 16  ;;  %v2527_v16 = vshll.u32 %v9825_v4, 16  ;;  %v2098_v28 = vshrl.u32 %v9797_v37, 16 }
  0x2c   : > { %v2513_v9 = vsel %vm17560_vm2, %v2504_v2, %v2512_v3  ;;  %v2521_v10 = vor.u32 %v2520_v7, %v2517_v5  ;;  %v2102_v29 = vshll.u32 %v9850_v24, 16  ;;  %v2836_v31 = vrot.slane %v9805_v45, 6 }
  0x2d   : > { %v9842_v17 = vsel %vm17536_vm0, %v2297_v56, %v2299_v11  ;;  %v2526_v22 = vrot.slane %v2524_v14, 5  ;;  %v2529_v23 = vrot.slane %v2527_v16, 6  ;;  %v9863_v32 = vcombine.low %v1917_v27, %v1918_v30 }
  0x2e   : > { %2406 = vrot.lane.b32.xlu0 %v2389_v53, %s9643_s29  ;;  %v2522_v13 = vsel %vm17560_vm2, %v2512_v3, %v2521_v10  ;;  %v2100_v33 = vor.u32 %v2098_v28, %v2096_v55  ;;  %v2104_v34 = vrot.slane %v2102_v29, 1  ;;  %v2838_v35 = vrot.slane %v9825_v4, 6  ;;  %v1919_v53 = vld [vmem:[%s9759_s25 + $0x38] sm:$0xf] }
  0x2f   : > { %2408 = vrot.lane.b32.xlu1 %v2089_v50, %s9643_s29  ;;  %v2530_v26 = vor.u32 %v2529_v23, %v2526_v22  ;;  %v2110_v39 = vshll.u32 %v9863_v32, 16  ;;  %v9871_v40 = vcombine.low %v1916_v19, %v1917_v27  ;;  %v9648_v43 = vmov 65535  }
  0x30   : > { %v2105_v41 = vsel %vm17531_vm1, %v2100_v33, %v2104_v34  ;;  %v3411_v44 = vsel %vm17562_vm4, 4294967295, %v9648_v43  ;;  %v2839_v45 = vsel %vm17533_vm3, %v2836_v31, %v2838_v35  ;;  %v9894_v56 = vcombine.low %v1918_v30, %v1919_v53  ;;  %v1923_v30 = vld [vmem:[%s9759_s25 + $0x48] sm:$0xf] }
  0x31   : > { %v2531_v12 = vsel %vm17560_vm2, %v2521_v10, %v2530_v26  ;;  %v2112_v46 = vrot.slane %v2110_v39, 1  ;;  %v2533_v47 = vshrl.u32 %v9871_v40, 16  ;;  %v3412_v48 = vsel %vm3410_vm5, %v3411_v44, 0 }
  0x32   : > { %2410 = vrot.lane.b32.xlu0 %v2097_v61, %s9643_s29  ;;  %v2536_v50 = vshll.u32 %v9871_v40, 16  ;;  %v3414_v51 = vand.u32 %v9447_v42, %v3412_v48  ;;  %v2301_v54 = vrot.slane %v9871_v40, 5  ;;  %v2545_v62 = vshll.u32 %v9894_v56, 16  ;;  %v1924_v48 = vld [vmem:[%s9759_s25 + $0x4c] sm:$0xf] }
  0x33   : > { %2455 = vrot.lane.b32.xlu1 %v9822_v1, %s9641_s27  ;;  %v2535_v57 = vrot.slane %v2533_v47, 5  ;;  %v2303_v0 = vrot.slane %v9894_v56, 5  ;;  %v2114_v10 = vshrl.u32 %v9863_v32, 16  ;;  %v2842_v14 = vrot.slane %v9894_v56, 6 }
  0x34   : > { %9060 = vmatprep.subr.bf16.mxu0 %v3414_v51  ;;  %v2538_v58 = vrot.slane %v2536_v50, 6  ;;  %v2302_v59 = vsel %vm17536_vm0, %v2299_v11, %v2301_v54  ;;  %v9944_v4 = vcombine.low %v1922_v18, %v1923_v30 }
  0x35   : > { %9061 = vmatpush3.bf16.msra.mxu0 %v3414_v51  ;;  %v2304_v5 = vsel %vm17536_vm0, %v2301_v54, %v2303_v0  ;;  %v9960_v51 = vcombine.low %v1923_v30, %v1924_v48 }
  0x36   : > { %2453 = vrot.lane.b32.xlu0 %v2296_v38, %s9641_s27  ;;  %v2106_v38 = vshrl.u32 %v9850_v24, 16  ;;  %9062 = vmatprep.subr.bf16.mxu0 %v9448_v52  ;;  %v2539_v60 = vor.u32 %v2538_v58, %v2535_v57  ;;  %v2560_v42 = vshrl.u32 %v9944_v4, 16  ;;  %v2563_v43 = vshll.u32 %v9944_v4, 16  ;;  %v1925_v58 = vld [vmem:[%s9759_s25 + $0x50] sm:$0xf] }
  0x37   : > { %2683 = vrot.lane.b32.xlu1 %v2513_v9, %s9644_s14  ;;  %v2846_v54 = vrot.slane %v9944_v4, 6  ;;  %v2134_v57 = vshll.u32 %v9960_v51, 16 }
  0x38   : > { %v2108_v49 = vor.u32 %v2106_v38, %v2104_v34  ;;  %v2540_v63 = vsel %vm17560_vm2, %v2530_v26, %v2539_v60  ;;  %v2565_v47 = vrot.slane %v2563_v43, 6 }
  0x39   : > { %9063 = vmatpush3.bf16.msra.mxu0 %v9448_v52 }
  0x3a   : > { %2681 = vrot.lane.b32.xlu0 %v2504_v2, %s9644_s14  ;;  %v2113_v55 = vsel %vm17531_vm1, %v2108_v49, %v2112_v46  ;;  %v2547_v2 = vrot.slane %v2545_v62, 6  ;;  %v2136_v62 = vrot.slane %v2134_v57, 1 }
  0x3b   : > { %2730 = vrot.lane.b32.xlu1 %v9788_v25, %s9645_s16  ;;  %v2835_v25 = vrot.slane %v8623_v20, 6  ;;  %v2116_v20 = vor.u32 %v2114_v10, %v2112_v46  ;;  %v2562_v46 = vrot.slane %v2560_v42, 5 }
  0x3d   : > { %v2837_v36 = vsel %vm17533_vm3, %v2835_v25, %v2836_v31  ;;  %v2566_v50 = vor.u32 %v2565_v47, %v2562_v46 }
  0x3e   : > { %2685 = vrot.lane.b32.xlu0 %v2522_v13, %s9644_s14 }
  0x3f   : > { %2734 = vrot.lane.b32.xlu1 %v9842_v17, %s9645_s16 }
  0x42   : > { %2732 = vrot.lane.b32.xlu0 %v9822_v1, %s9645_s16 }
  0x43   : > { %2791 = vrot.lane.b32.xlu1 %v2522_v13, %s9646_s17  ;;  %v2840_v13 = vrot.slane %v9871_v40, 6 }
  0x45   : > { %v2843_v19 = vsel %vm17533_vm3, %v2840_v13, %v2842_v14 }
  0x46   : > { %2789 = vrot.lane.b32.xlu0 %v2512_v3, %s9646_s17  ;;  %v1920_v3 = vld [vmem:[%s9759_s25 + $0x3c] sm:$0xf] }
  0x47   : > { %2876 = vrot.lane.b32.xlu1 %v2835_v25, %s9647_s21  ;;  %v9913_v9 = vcombine.low %v1919_v53, %v1920_v3  ;;  %v2841_v25 = vsel %vm17533_vm3, %v2838_v35, %v2840_v13 }
  0x49   : > { %v2118_v16 = vshll.u32 %v9913_v9, 16  ;;  %v2122_v27 = vshrl.u32 %v9913_v9, 16 }
  0x4a   : > { %2793 = vrot.lane.b32.xlu0 %v2531_v12, %s9646_s17 }
  0x4b   : > { %2235 = vrot.lane.b32.xlu1 %v2097_v61, %s9642_s28  ;;  %v2542_v61 = vshrl.u32 %v9894_v56, 16  ;;  %v2120_v22 = vrot.slane %v2118_v16, 1 }
  0x4d   : > { %v2121_v26 = vsel %vm17531_vm1, %v2116_v20, %v2120_v22 }
  0x4e   : > { %2878 = vrot.lane.b32.xlu0 %v2837_v36, %s9647_s21 }
  0x4f   : > { %2237 = vrot.lane.b32.xlu1 %v2105_v41, %s9642_s28 }
  0x52   : > { %2880 = vrot.lane.b32.xlu0 %v2839_v45, %s9647_s21  ;;  %v2307_v45 = vrot.slane %v9944_v4, 5 }
  0x53   : > { %2339 = vrot.lane.b32.xlu1 %v9842_v17, %s9640_s26 }
  0x56   : > { %2337 = vrot.lane.b32.xlu0 %v9822_v1, %s9640_s26  ;;  %v2544_v1 = vrot.slane %v2542_v61, 5 }
  0x57   : > { %2414 = vrot.lane.b32.xlu1 %v2113_v55, %s9643_s29 }
  0x58   : > { %v2548_v7 = vor.u32 %v2547_v2, %v2544_v1  ;;  %v2138_v2 = vshrl.u32 %v9960_v51, 16 }
  0x5a   : > { %2412 = vrot.lane.b32.xlu0 %v2105_v41, %s9643_s29  ;;  %v2549_v11 = vsel %vm17560_vm2, %v2539_v60, %v2548_v7  ;;  %v2140_v10 = vor.u32 %v2138_v2, %v2136_v62 }
  0x5b   : > { %2459 = vrot.lane.b32.xlu1 %v2302_v59, %s9641_s27 }
  0x5e   : > { %2457 = vrot.lane.b32.xlu0 %v9842_v17, %s9641_s27  ;;  %v1921_v17 = vld [vmem:[%s9759_s25 + $0x40] sm:$0xf] }
  0x5f   : > { %2689 = vrot.lane.b32.xlu1 %v2540_v63, %s9644_s14  ;;  %v9929_v23 = vcombine.low %v1921_v17, %v1922_v18  ;;  %v8603_v29 = vcombine.low %v1920_v3, %v1921_v17 }
  0x61   : > { %v2126_v28 = vshll.u32 %v9929_v23, 16  ;;  %v2551_v33 = vshrl.u32 %v8603_v29, 16  ;;  %v2554_v34 = vshll.u32 %v8603_v29, 16  ;;  %v2305_v36 = vrot.slane %v8603_v29, 5 }
  0x62   : > { %2687 = vrot.lane.b32.xlu0 %v2531_v12, %s9644_s14  ;;  %v2124_v12 = vor.u32 %v2122_v27, %v2120_v22  ;;  %v2844_v52 = vrot.slane %v8603_v29, 6 }
  0x63   : > { %2738 = vrot.lane.b32.xlu1 %v2304_v5, %s9645_s16  ;;  %v2128_v31 = vrot.slane %v2126_v28, 1  ;;  %v2553_v38 = vrot.slane %v2551_v33, 5  ;;  %v2556_v39 = vrot.slane %v2554_v34, 6  ;;  %v2306_v40 = vsel %vm17536_vm0, %v2303_v0, %v2305_v36 }
  0x64   : > { %v2308_v49 = vsel %vm17536_vm0, %v2305_v36, %v2307_v45  ;;  %v2847_v60 = vsel %vm17533_vm3, %v2844_v52, %v2846_v54  ;;  %v2845_v0 = vsel %vm17533_vm3, %v2842_v14, %v2844_v52 }
  0x65   : > { %v2129_v35 = vsel %vm17531_vm1, %v2124_v12, %v2128_v31  ;;  %v2557_v41 = vor.u32 %v2556_v39, %v2553_v38  ;;  %v1928_v39 = vld [vmem:[%s9759_s25 + $0x5c] sm:$0xf] }
  0x66   : > { %2736 = vrot.lane.b32.xlu0 %v2302_v59, %s9645_s16 }
  0x67   : > { %2797 = vrot.lane.b32.xlu1 %v2549_v11, %s9646_s17  ;;  %v2558_v44 = vsel %vm17560_vm2, %v2548_v7, %v2557_v41  ;;  %v2567_v53 = vsel %vm17560_vm2, %v2557_v41, %v2566_v50  ;;  %v1927_v7 = vld [vmem:[%s9759_s25 + $0x58] sm:$0xf] }
  0x68   : > { %v10039_v43 = vcombine.low %v1927_v7, %v1928_v39 }
  0x6a   : > { %2795 = vrot.lane.b32.xlu0 %v2540_v63, %s9646_s17  ;;  %17870 = vst [vmem:[#allocation7_spill] sm:$0xff] %v10039_v43 }
  0x6b   : > { %2884 = vrot.lane.b32.xlu1 %v2843_v19, %s9647_s21 }
  0x6e   : > { %2882 = vrot.lane.b32.xlu0 %v2841_v25, %s9647_s21 }
  0x6f   : > { %2241 = vrot.lane.b32.xlu1 %v2121_v26, %s9642_s28 }
  0x72   : > { %2239 = vrot.lane.b32.xlu0 %v2113_v55, %s9642_s28  ;;  %v2130_v55 = vshrl.u32 %v9929_v23, 16 }
  0x73   : > { %2343 = vrot.lane.b32.xlu1 %v2304_v5, %s9640_s26 }
  0x74   : > { %v2132_v61 = vor.u32 %v2130_v55, %v2128_v31  ;;  %v1930_v55 = vld [vmem:[%s9759_s25 + $0x64] sm:$0xf] }
  0x76   : > { %2341 = vrot.lane.b32.xlu0 %v2302_v59, %s9640_s26  ;;  %v1926_v59 = vld [vmem:[%s9759_s25 + $0x54] sm:$0xf]  ;;  %v2137_v1 = vsel %vm17531_vm1, %v2132_v61, %v2136_v62 }
  0x77   : > { %2418 = vrot.lane.b32.xlu1 %v2129_v35, %s9643_s29  ;;  %v9975_v63 = vcombine.low %v1925_v58, %v1926_v59  ;;  %v9998_v17 = vcombine.low %v1926_v59, %v1927_v7 }
  0x79   : > { %v2142_v3 = vshll.u32 %v9975_v63, 16  ;;  %v2578_v29 = vshrl.u32 %v9998_v17, 16  ;;  %v2581_v30 = vshll.u32 %v9998_v17, 16  ;;  %v2311_v34 = vrot.slane %v9998_v17, 5 }
  0x7a   : > { %2416 = vrot.lane.b32.xlu0 %v2121_v26, %s9643_s29 }
  0x7b   : > { %2463 = vrot.lane.b32.xlu1 %v2306_v40, %s9641_s27  ;;  %v2583_v36 = vrot.slane %v2581_v30, 6 }
  0x7e   : > { %2461 = vrot.lane.b32.xlu0 %v2304_v5, %s9641_s27  ;;  %v9985_v5 = vcombine.low %v1924_v48, %v1925_v58  ;;  %v2850_v48 = vrot.slane %v9998_v17, 6 }
  0x7f   : > { %2693 = vrot.lane.b32.xlu1 %v2558_v44, %s9644_s14 }
  0x80   : > { %v2569_v13 = vshrl.u32 %v9985_v5, 16  ;;  %v2572_v56 = vshll.u32 %v9985_v5, 16  ;;  %v2309_v19 = vrot.slane %v9985_v5, 5 }
  0x82   : > { %2691 = vrot.lane.b32.xlu0 %v2549_v11, %s9644_s14  ;;  %v2144_v11 = vrot.slane %v2142_v3, 1  ;;  %v2571_v20 = vrot.slane %v2569_v13, 5  ;;  %v2574_v22 = vrot.slane %v2572_v56, 6  ;;  %v10012_v27 = vsel %vm17536_vm0, %v2307_v45, %v2309_v19 }
  0x83   : > { %2742 = vrot.lane.b32.xlu1 %v2308_v49, %s9645_s16  ;;  %v10035_v41 = vsel %vm17536_vm0, %v2309_v19, %v2311_v34  ;;  %v2848_v45 = vrot.slane %v9985_v5, 6  ;;  %v2154_v5 = vshrl.u32 %v10039_v43, 16 }
  0x84   : > { %v10001_v18 = vsel %vm17531_vm1, %v2140_v10, %v2144_v11  ;;  %v2575_v28 = vor.u32 %v2574_v22, %v2571_v20 }
  0x85   : > { %v2851_v58 = vsel %vm17533_vm3, %v2848_v45, %v2850_v48 }
  0x86   : > { %2740 = vrot.lane.b32.xlu0 %v2306_v40, %s9645_s16  ;;  %v2576_v33 = vsel %vm17560_vm2, %v2566_v50, %v2575_v28  ;;  %v2150_v50 = vshll.u32 %v10039_v43, 16 }
  0x87   : > { %2801 = vrot.lane.b32.xlu1 %v2567_v53, %s9646_s17 }
  0x8a   : > { %2799 = vrot.lane.b32.xlu0 %v2558_v44, %s9646_s17 }
  0x8b   : > { %2888 = vrot.lane.b32.xlu1 %v2847_v60, %s9647_s21  ;;  %v2152_v60 = vrot.slane %v2150_v50, 1 }
  0x8d   : > { %v2156_v56 = vor.u32 %v2154_v5, %v2152_v60 }
  0x8e   : > { %2886 = vrot.lane.b32.xlu0 %v2845_v0, %s9647_s21  ;;  %v2849_v0 = vsel %vm17533_vm3, %v2846_v54, %v2848_v45  ;;  %v1931_v54 = vld [vmem:[%s9759_s25 + $0x68] sm:$0xf] }
  0x8f   : > { %2245 = vrot.lane.b32.xlu1 %v2137_v1, %s9642_s28  ;;  %v10098_v22 = vcombine.low %v1930_v55, %v1931_v54 }
  0x91   : > { %v9992_v14 = vpop.permute.xlu1 %2331 }
  0x92   : > { %2243 = vrot.lane.b32.xlu0 %v2129_v35, %s9642_s28  ;;  %v2580_v35 = vrot.slane %v2578_v29, 5 }
  0x93   : > { %v9995_v16 = vpop.permute.xlu0 %2333  ;;  %2347 = vrot.lane.b32.xlu1 %v2308_v49, %s9640_s26 }
  0x94   : > { %v10037_v42 = vor.u32 %v2583_v36, %v2580_v35 }
  0x95   : > { %v10004_v25 = vpop.permute.xlu1 %2451 }
  0x96   : > { %2345 = vrot.lane.b32.xlu0 %v2306_v40, %s9640_s26  ;;  %v10051_v47 = vsel %vm17560_vm2, %v2575_v28, %v10037_v42 }
  0x97   : > { %2422 = vrot.lane.b32.xlu1 %v10001_v18, %s9643_s29 }
  0x98   : > { %v10009_v26 = vpop.permute.xlu0 %2229 }
  0x99   : > { %v10016_v12 = vpop.permute.xlu1 %2335  ;;  %v2920_v30 = vsel %vm17599_vm6, %v9776_v15, %v10009_v26  ;;  %v2596_v26 = vshrl.u32 %v10098_v22, 16 }
  0x9a   : > { %2420 = vrot.lane.b32.xlu0 %v2137_v1, %s9643_s29 }
  0x9b   : > { %2467 = vrot.lane.b32.xlu1 %v10012_v27, %s9641_s27 }
  0x9c   : > { %v10021_v31 = vpop.permute.xlu0 %2231 }
  0x9d   : > { %v10025_v38 = vpop.permute.xlu1 %2233  ;;  %v2922_v45 = vsel %vm17599_vm6, %v9767_v6, %v10021_v31  ;;  %v2315_v6 = vrot.slane %v10098_v22, 5 }
  0x9e   : > { %2465 = vrot.lane.b32.xlu0 %v2308_v49, %s9641_s27  ;;  %v2146_v49 = vshrl.u32 %v9975_v63, 16  ;;  %v2966_v31 = vsel %vm17584_vm7, %v2922_v45, %v9995_v16  ;;  %v1934_v45 = vld [vmem:[%s9759_s25 + $0x74] sm:$0xf] }
  0x9f   : > { %2697 = vrot.lane.b32.xlu1 %v2576_v33, %s9644_s14 }
  0xa0   : > { %v10030_v40 = vpop.permute.xlu0 %2406  ;;  %v2148_v59 = vor.u32 %v2146_v49, %v2144_v11 }
  0xa1   : > { %v10041_v44 = vpop.permute.xlu1 %2408 }
  0xa2   : > { %2695 = vrot.lane.b32.xlu0 %v2567_v53, %s9644_s14  ;;  %v1929_v53 = vld [vmem:[%s9759_s25 + $0x60] sm:$0xf]  ;;  %v2153_v3 = vsel %vm17531_vm1, %v2148_v59, %v2152_v60  ;;  %v3009_v59 = vsel %vm17583_vm8, %v2966_v31, %v10041_v44 }
  0xa3   : > { %2746 = vrot.lane.b32.xlu1 %v10035_v41, %s9645_s16  ;;  %v10069_v61 = vcombine.low %v1929_v53, %v1930_v55  ;;  %v10078_v1 = vcombine.low %v1928_v39, %v1929_v53  ;;  %v2964_v39 = vsel %vm17584_vm7, %v2920_v30, %v9992_v14  ;;  %v2599_v14 = vshll.u32 %v10098_v22, 16 }
  0xa4   : > { %v10047_v46 = vpop.permute.xlu0 %2410  ;;  %v3007_v49 = vsel %vm17583_vm8, %v2964_v39, %v10030_v40  ;;  %v2598_v55 = vrot.slane %v2596_v26, 5  ;;  %v1933_v26 = vld [vmem:[%s9759_s25 + $0x70] sm:$0xf] }
  0xa5   : > { %v10056_v52 = vpop.permute.xlu1 %2455  ;;  %17871 = vst [vmem:[#allocation8_spill] sm:$0xff] %v10069_v61  ;;  %v2158_v7 = vshll.u32 %v10069_v61, 16  ;;  %v2587_v11 = vshrl.u32 %v10078_v1, 16  ;;  %v2590_v4 = vshll.u32 %v10078_v1, 16  ;;  %v2313_v36 = vrot.slane %v10078_v1, 5 }
  0xa6   : > { %2744 = vrot.lane.b32.xlu0 %v10012_v27, %s9645_s16  ;;  %v3050_v40 = vsel %vm17582_vm9, %v3007_v49, %v10004_v25 }
  0xa7   : > { %2805 = vrot.lane.b32.xlu1 %v10051_v47, %s9646_s17  ;;  %v10090_v19 = vrot.slane %v2158_v7, 1  ;;  %v2589_v28 = vrot.slane %v2587_v11, 5  ;;  %v2592_v29 = vrot.slane %v2590_v4, 6 }
  0xa8   : > { %v10064_v57 = vpop.permute.xlu0 %2453 }
  0xa9   : > { %v10071_v62 = vpop.permute.xlu1 %2683  ;;  %v10105_v35 = vsel %vm17531_vm1, %v2156_v56, %v10090_v19  ;;  %v2593_v15 = vor.u32 %v2592_v29, %v2589_v28  ;;  %v3052_v25 = vsel %vm17582_vm9, %v3009_v59, %v10064_v57 }
  0xaa   : > { %2803 = vrot.lane.b32.xlu0 %v2576_v33, %s9646_s17  ;;  %v3095_v7 = vsel %vm17581_vm10, %v3052_v25, %v10071_v62 }
  0xab   : > { %2892 = vrot.lane.b32.xlu1 %v2851_v58, %s9647_s21  ;;  %v2924_v58 = vsel %vm17599_vm6, %v9769_v8, %v10025_v38 }
  0xac   : > { %v2682_v2 = vpop.permute.xlu0 %2681  ;;  %v2968_v38 = vsel %vm17584_vm7, %v2924_v58, %v10016_v12 }
  0xad   : > { %v2731_v10 = vpop.permute.xlu1 %2730  ;;  %v3093_v60 = vsel %vm17581_vm10, %v3050_v40, %v2682_v2  ;;  %v10161_v2 = vsel %vm17536_vm0, %v2313_v36, %v2315_v6  ;;  %v3011_v62 = vsel %vm17583_vm8, %v2968_v38, %v10047_v46 }
  0xae   : > { %2890 = vrot.lane.b32.xlu0 %v2849_v0, %s9647_s21  ;;  %v2601_v0 = vrot.slane %v2599_v14, 6  ;;  %v3054_v4 = vsel %vm17582_vm9, %v3011_v62, %v10056_v52  ;;  %v2852_v52 = vrot.slane %v10078_v1, 6 }
  0xaf   : > { %2249 = vrot.lane.b32.xlu1 %v2153_v3, %s9642_s28 }
  0xb0   : > { %v10087_v13 = vpop.permute.xlu0 %2685  ;;  %v10166_v11 = vor.u32 %v2601_v0, %v2598_v55  ;;  %v2853_v59 = vsel %vm17533_vm3, %v2850_v48, %v2852_v52 }
  0xb1   : > { %v10092_v20 = vpop.permute.xlu1 %2734  ;;  %v3097_v29 = vsel %vm17581_vm10, %v3054_v4, %v10087_v13 }
  0xb2   : > { %2247 = vrot.lane.b32.xlu0 %v10001_v18, %s9642_s28 }
  0xb3   : > { %2351 = vrot.lane.b32.xlu1 %v10035_v41, %s9640_s26 }
  0xb4   : > { %v2733_v33 = vpop.permute.xlu0 %2732 }
  0xb5   : > { %v2792_v18 = vpop.permute.xlu1 %2791  ;;  %v3138_v44 = vsel %vm17580_vm11, %v3095_v7, %v2733_v33  ;;  %v2854_v33 = vrot.slane %v10098_v22, 6  ;;  %v1935_v7 = vld [vmem:[%s9759_s25 + $0x78] sm:$0xf] }
  0xb6   : > { %2349 = vrot.lane.b32.xlu0 %v10012_v27, %s9640_s26  ;;  %v10123_v27 = vsel %vm17536_vm0, %v2311_v34, %v2313_v36  ;;  %v2594_v34 = vsel %vm17560_vm2, %v10037_v42, %v2593_v15  ;;  %v1932_v42 = vld [vmem:[%s9759_s25 + $0x6c] sm:$0xf]  ;;  %v2162_v36 = vshrl.u32 %v10069_v61, 16 }
  0xb7   : > { %2426 = vrot.lane.b32.xlu1 %v10105_v35, %s9643_s29  ;;  %v10168_v12 = vcombine.low %v1931_v54, %v1932_v42  ;;  %v3140_v54 = vsel %vm17580_vm11, %v3097_v29, %v10092_v20  ;;  %v2855_v31 = vsel %vm17533_vm3, %v2852_v52, %v2854_v33  ;;  %v10220_v25 = vcombine.low %v1932_v42, %v1933_v26 }
  0xb8   : > { %v2790_v50 = vpop.permute.xlu0 %2789  ;;  %v2164_v40 = vor.u32 %v2162_v36, %v10090_v19  ;;  %v10233_v42 = vcombine.low %v1934_v45, %v1935_v7 }
  0xb9   : > { %v2877_v53 = vpop.permute.xlu1 %2876  ;;  %17872 = vst [vmem:[#allocation9_spill] sm:$0xff] %v10168_v12  ;;  %v2166_v20 = vshll.u32 %v10168_v12, 16  ;;  %v2170_v0 = vshrl.u32 %v10168_v12, 16  ;;  %v2605_v48 = vshrl.u32 %v10220_v25, 16  ;;  %v2608_v38 = vshll.u32 %v10220_v25, 16 }
  0xba   : > { %2424 = vrot.lane.b32.xlu0 %v2153_v3, %s9643_s29  ;;  %v3136_v3 = vsel %vm17580_vm11, %v3093_v60, %v2731_v10  ;;  %v3181_v10 = vsel %vm17579_vm12, %v3138_v44, %v2792_v18 }
  0xbb   : > { %2471 = vrot.lane.b32.xlu1 %v10123_v27, %s9641_s27  ;;  %v3179_v8 = vsel %vm17579_vm12, %v3136_v3, %v2790_v50  ;;  %v2168_v55 = vrot.slane %v2166_v20, 1  ;;  %v2610_v4 = vrot.slane %v2608_v38, 6  ;;  %v2856_v38 = vrot.slane %v10220_v25, 6 }
  0xbc   : > { %v2794_v16 = vpop.permute.xlu0 %2793  ;;  %v3222_v57 = vsel %vm17563_vm13, %v3179_v8, %v2877_v53 }
  0xbd   : > { %v10145_v5 = vpop.permute.xlu1 %2235  ;;  %v3296_v30 = vrot.slane %v3222_v57, 3  ;;  %v3183_v13 = vsel %vm17579_vm12, %v3140_v54, %v2794_v16  ;;  %v2169_v16 = vsel %vm17531_vm1, %v2164_v40, %v2168_v55  ;;  %v2172_v8 = vor.u32 %v2170_v0, %v2168_v55  ;;  %v1936_v40 = vld [vmem:[%s9759_s25 + $0x7c] sm:$0xf] }
  0xbe   : > { %2469 = vrot.lane.b32.xlu0 %v10035_v41, %s9641_s27 }
  0xbf   : > { %2701 = vrot.lane.b32.xlu1 %v2594_v34, %s9644_s14 }
  0xc0   : > { %v2879_v41 = vpop.permute.xlu0 %2878 }
  0xc1   : > { %v3224_v56 = vsel %vm17563_vm13, %v3181_v10, %v2879_v41  ;;  %v2238_v28 = vpop.permute.xlu1 %2237  ;;  %v2317_v10 = vrot.slane %v10220_v25, 5  ;;  %v2607_v41 = vrot.slane %v2605_v48, 5  ;;  %v1938_v25 = vld [vmem:[%s9759_s25 + $0x84] sm:$0xf] }
  0xc2   : > { %v3297_v46 = vrot.slane %v3224_v56, 3  ;;  %2699 = vrot.lane.b32.xlu0 %v10051_v47, %s9644_s14  ;;  %v10188_v47 = vsel %vm17560_vm2, %v2593_v15, %v10166_v11  ;;  %v10202_v15 = vcombine.low %v1933_v26, %v1934_v45  ;;  %v2928_v56 = vsel %vm17599_vm6, %v9797_v37, %v2238_v28 }
  0xc3   : > { %2750 = vrot.lane.b32.xlu1 %v10161_v2, %s9645_s16  ;;  %v10252_v52 = vsel %vm17536_vm0, %v2315_v6, %v2317_v10  ;;  %v2611_v37 = vor.u32 %v2610_v4, %v2607_v41 }
  0xc4   : > { %v2881_v18 = vpop.permute.xlu0 %2880  ;;  %v3298_v39 = vsel %vm17562_vm4, %v3296_v30, %v3297_v46  ;;  %17873 = vst [vmem:[#allocation10_spill] sm:$0xff] %v10202_v15  ;;  %v2174_v19 = vshll.u32 %v10202_v15, 16  ;;  %v2617_v30 = vshll.u32 %v10233_v42, 16 }
  0xc5   : > { %v10194_v49 = vsel %vm17563_vm13, %v3183_v13, %v2881_v18  ;;  %9064 = vmatprep.mubr.msk.bf16.mxu0 %vm17561_vm14, %v3298_v39  ;;  %v2340_v1 = vpop.permute.xlu1 %2339 }
  0xc6   : > { %v3299_v50 = vrot.slane %v10194_v49, 3  ;;  %2748 = vrot.lane.b32.xlu0 %v10123_v27, %s9645_s16  ;;  %v10225_v17 = vrot.slane %v2174_v19, 1  ;;  %v2619_v20 = vrot.slane %v2617_v30, 6 }
  0xc7   : > { %2809 = vrot.lane.b32.xlu1 %v10188_v47, %s9646_s17 }
  0xc8   : > { %v2338_v14 = vpop.permute.xlu0 %2337  ;;  %v3300_v53 = vsel %vm17562_vm4, %v3297_v46, %v3299_v50  ;;  %v10237_v62 = vsel %vm17531_vm1, %v2172_v8, %v10225_v17  ;;  %v2972_v46 = vsel %vm17584_vm7, %v2928_v56, %v2340_v1  ;;  %v1937_v56 = vld [vmem:[%s9759_s25 + $0x80] sm:$0xf] }
  0xc9   : > { %9065 = vmatmul.mubr.msk.bf16.vlgmr.msra.gmra.mxu0 %vm17561_vm14, %v3300_v53  ;;  %v2415_v58 = vpop.permute.xlu1 %2414  ;;  %v10322_v30 = vcombine.low %v1937_v56, %v1938_v25 }
  0xca   : > { %2807 = vrot.lane.b32.xlu0 %v2594_v34, %s9646_s17  ;;  %v3015_v28 = vsel %vm17583_vm8, %v2972_v46, %v2415_v58 }
  0xcb   : > { %2896 = vrot.lane.b32.xlu1 %v2855_v31, %s9647_s21  ;;  %17875 = vst [vmem:[#allocation12_spill] sm:$0xff] %v10322_v30 }
  0xcc   : > { %v2413_v60 = vpop.permute.xlu0 %2412 }
  0xcd   : > { %v2460_v3 = vpop.permute.xlu1 %2459 }
  0xce   : > { %2894 = vrot.lane.b32.xlu0 %v2853_v59, %s9647_s21  ;;  %v3058_v13 = vsel %vm17582_vm9, %v3015_v28, %v2460_v3 }
  0xcf   : > { %2253 = vrot.lane.b32.xlu1 %v2169_v16, %s9642_s28 }
  0xd0   : > { %v2458_v34 = vpop.permute.xlu0 %2457 }
  0xd1   : > { %v2690_v44 = vpop.permute.xlu1 %2689 }
  0xd2   : > { %2251 = vrot.lane.b32.xlu0 %v10105_v35, %s9642_s28  ;;  %v2614_v35 = vshrl.u32 %v10233_v42, 16  ;;  %v3101_v39 = vsel %vm17581_vm10, %v3058_v13, %v2690_v44 }
  0xd3   : > { %2355 = vrot.lane.b32.xlu1 %v10161_v2, %s9640_s26 }
  0xd4   : > { %v2688_v57 = vpop.permute.xlu0 %2687  ;;  %v2616_v6 = vrot.slane %v2614_v35, 5 }
  0xd5   : > { %v2739_v29 = vpop.permute.xlu1 %2738 }
  0xd6   : > { %2353 = vrot.lane.b32.xlu0 %v10123_v27, %s9640_s26  ;;  %v2926_v27 = vsel %vm17599_vm6, %v9783_v21, %v10145_v5  ;;  %v3144_v45 = vsel %vm17580_vm11, %v3101_v39, %v2739_v29  ;;  %v2612_v21 = vsel %vm17560_vm2, %v10166_v11, %v2611_v37  ;;  %v2319_v5 = vrot.slane %v10233_v42, 5 }
  0xd7   : > { %2430 = vrot.lane.b32.xlu1 %v10237_v62, %s9643_s29  ;;  %v2970_v18 = vsel %vm17584_vm7, %v2926_v27, %v2338_v14  ;;  %v10280_v11 = vor.u32 %v2619_v20, %v2616_v6  ;;  %v2190_v27 = vshll.u32 %v10322_v30, 16 }
  0xd8   : > { %v2737_v54 = vpop.permute.xlu0 %2736  ;;  %v3013_v26 = vsel %vm17583_vm8, %v2970_v18, %v2413_v60  ;;  %v10287_v19 = vsel %vm17536_vm0, %v2317_v10, %v2319_v5  ;;  %v2178_v10 = vshrl.u32 %v10202_v15, 16  ;;  %v1939_v18 = vld [vmem:[%s9759_s25 + $0x88] sm:$0xf] }
  0xd9   : > { %v2798_v36 = vpop.permute.xlu1 %2797  ;;  %v3056_v53 = vsel %vm17582_vm9, %v3013_v26, %v2458_v34  ;;  %v10298_v48 = vsel %vm17560_vm2, %v2611_v37, %v10280_v11  ;;  %v10337_v22 = vrot.slane %v2190_v27, 1 }
  0xda   : > { %2428 = vrot.lane.b32.xlu0 %v2169_v16, %s9643_s29  ;;  %v3187_v14 = vsel %vm17579_vm12, %v3144_v45, %v2798_v36  ;;  %v3099_v55 = vsel %vm17581_vm10, %v3056_v53, %v2688_v57  ;;  %v2180_v29 = vor.u32 %v2178_v10, %v10225_v17  ;;  %v10332_v17 = vcombine.low %v1936_v40, %v1937_v56 }
  0xdb   : > { %2475 = vrot.lane.b32.xlu1 %v10252_v52, %s9641_s27  ;;  %v3142_v59 = vsel %vm17580_vm11, %v3099_v55, %v2737_v54  ;;  %v2857_v54 = vsel %vm17533_vm3, %v2854_v33, %v2856_v38  ;;  %v10341_v45 = vcombine.low %v1938_v25, %v1939_v18 }
  0xdc   : > { %v2796_v1 = vpop.permute.xlu0 %2795  ;;  %v2623_v33 = vshrl.u32 %v10332_v17, 16  ;;  %v2626_v20 = vshll.u32 %v10332_v17, 16 }
  0xdd   : > { %v2885_v31 = vpop.permute.xlu1 %2884  ;;  %v3185_v60 = vsel %vm17579_vm12, %v3142_v59, %v2796_v1  ;;  %v344_v1 = vlaneseq }
  0xde   : > { %2473 = vrot.lane.b32.xlu0 %v10161_v2, %s9641_s27  ;;  %v10276_v58 = vsel %vm17563_vm13, %v3187_v14, %v2885_v31  ;;  %v10289_v2 = vcombine.low %v1935_v7, %v1936_v40  ;;  %v2858_v7 = vrot.slane %v10233_v42, 6  ;;  %v2321_v14 = vrot.slane %v10332_v17, 5 }
  0xdf   : > { %2705 = vrot.lane.b32.xlu1 %v2612_v21, %s9644_s14  ;;  %v3303_v16 = vrot.slane %v10276_v58, 3  ;;  %v2625_v31 = vrot.slane %v2623_v33, 5  ;;  %v2628_v40 = vrot.slane %v2626_v20, 6 }
  0xe0   : > { %v2883_v0 = vpop.permute.xlu0 %2882  ;;  %17874 = vst [vmem:[#allocation11_spill] sm:$0xff] %v10289_v2  ;;  %v2182_v41 = vshll.u32 %v10289_v2, 16  ;;  %v2186_v36 = vshrl.u32 %v10289_v2, 16 }
  0xe1   : > { %v3228_v3 = vsel %vm17563_vm13, %v3185_v60, %v2883_v0  ;;  %v2242_v34 = vpop.permute.xlu1 %2241  ;;  %v2632_v60 = vshrl.u32 %v10341_v45, 16  ;;  %v10358_v0 = vshrl.u32 %v344_v1, 7 }
  0xe2   : > { %v3301_v8 = vrot.slane %v3228_v3, 3  ;;  %2703 = vrot.lane.b32.xlu0 %v10188_v47, %s9644_s14  ;;  %v2184_v35 = vrot.slane %v2182_v41, 1  ;;  %v2932_v55 = vsel %vm17599_vm6, %v9863_v32, %v2242_v34  ;;  %v10366_v32 = vsel %vm17536_vm0, %v2319_v5, %v2321_v14 }
  0xe3   : > { %2754 = vrot.lane.b32.xlu1 %v10287_v19, %s9645_s16  ;;  %v2629_v34 = vor.u32 %v2628_v40, %v2625_v31  ;;  %v1942_v31 = vld [vmem:[%s9759_s25 + $0x94] sm:$0xf] }
  0xe4   : > { %v2240_v44 = vpop.permute.xlu0 %2239  ;;  %v3302_v57 = vsel %vm17562_vm4, %v3299_v50, %v3301_v8  ;;  %v3304_v47 = vsel %vm17562_vm4, %v3301_v8, %v3303_v16  ;;  %v2859_v50 = vsel %vm17533_vm3, %v2856_v38, %v2858_v7  ;;  %v2185_v28 = vsel %vm17531_vm1, %v2180_v29, %v2184_v35 }
  0xe5   : > { %9068 = vmatprep.mubr.msk.bf16.mxu0 %vm17561_vm14, %v3302_v57  ;;  %v2344_v4 = vpop.permute.xlu1 %2343  ;;  %v2188_v6 = vor.u32 %v2186_v36, %v2184_v35  ;;  %v2930_v10 = vsel %vm17599_vm6, %v9850_v24, %v2240_v44  ;;  %v2630_v24 = vsel %vm17560_vm2, %v10280_v11, %v2629_v34  ;;  %v2323_v44 = vrot.slane %v10341_v45, 5  ;;  %v1940_v35 = vld [vmem:[%s9759_s25 + $0x8c] sm:$0xf] }
  0xe6   : > { %2752 = vrot.lane.b32.xlu0 %v10252_v52, %s9645_s16  ;;  %9069 = vmatmul.mubr.msk.bf16.gmra.mxu0 %vm17561_vm14, %v3304_v47  ;;  %v2976_v3 = vsel %vm17584_vm7, %v2932_v55, %v2344_v4  ;;  %v2634_v47 = vrot.slane %v2632_v60, 5  ;;  %v10374_v4 = vadd.s32 16, %v10358_v0  ;;  %v1943_v55 = vld [vmem:[%s9759_s25 + $0x98] sm:$0xf] }
  0xe7   : > { %2813 = vrot.lane.b32.xlu1 %v10298_v48, %s9646_s17  ;;  %v10349_v53 = vsel %vm17531_vm1, %v2188_v6, %v10337_v22  ;;  %v10405_v6 = vmul.u32.u64.low 3435973837, %v10358_v0  ;;  %v10406_v33 = vmul.u32.u64.high 3435973837, %v10358_v0, %v10405_v6  ;;  %v10413_v1 = vsel %vm17536_vm0, %v2321_v14, %v2323_v44 }
  0xe8   : > { %v2342_v49 = vpop.permute.xlu0 %2341  ;;  %v10397_v36 = vmul.u32.u64.low 3435973837, %v10374_v4  ;;  %v10398_v27 = vmul.u32.u64.high 3435973837, %v10374_v4, %v10397_v36  ;;  %v2194_v14 = vshrl.u32 %v10322_v30, 16  ;;  %v10479_v6 = vadd.s32 8, %v10358_v0 }
  0xe9   : > { %v2419_v46 = vpop.permute.xlu1 %2418  ;;  %v2974_v5 = vsel %vm17584_vm7, %v2930_v10, %v2342_v49  ;;  %v10448_v10 = vadd.s32 24, %v10358_v0 }
  0xea   : > { %2811 = vrot.lane.b32.xlu0 %v2612_v21, %s9646_s17  ;;  %v3019_v38 = vsel %vm17583_vm8, %v2976_v3, %v2419_v46  ;;  %v17538_v3 = vrot.slane %v10341_v45, 6 }
  0xeb   : > { %2900 = vrot.lane.b32.xlu1 %v2859_v50, %s9647_s21 }
  0xec   : > { %v2417_v37 = vpop.permute.xlu0 %2416 }
  0xed   : > { %v2464_v13 = vpop.permute.xlu1 %2463  ;;  %v3017_v25 = vsel %vm17583_vm8, %v2974_v5, %v2417_v37 }
  0xee   : > { %2898 = vrot.lane.b32.xlu0 %v2857_v54, %s9647_s21  ;;  %v3062_v41 = vsel %vm17582_vm9, %v3019_v38, %v2464_v13 }
  0xef   : > { %2257 = vrot.lane.b32.xlu1 %v2185_v28, %s9642_s28 }
  0xf0   : > { %v2462_v39 = vpop.permute.xlu0 %2461 }
  0xf1   : > { %v2694_v26 = vpop.permute.xlu1 %2693  ;;  %v3060_v46 = vsel %vm17582_vm9, %v3017_v25, %v2462_v39  ;;  %v10402_v39 = vcombine.low %v1939_v18, %v1940_v35 }
  0xf2   : > { %2255 = vrot.lane.b32.xlu0 %v10237_v62, %s9642_s28  ;;  %v2635_v62 = vshll.u32 %v10341_v45, 16  ;;  %v3105_v56 = vsel %vm17581_vm10, %v3062_v41, %v2694_v26 }
  0xf3   : > { %2359 = vrot.lane.b32.xlu1 %v10287_v19, %s9640_s26  ;;  %17876 = vst [vmem:[#allocation13_spill] sm:$0xff] %v10402_v39  ;;  %v2198_v38 = vshll.u32 %v10402_v39, 16 }
  0xf4   : > { %v2692_v21 = vpop.permute.xlu0 %2691 }
  0xf5   : > { %v2743_v59 = vpop.permute.xlu1 %2742  ;;  %v3103_v37 = vsel %vm17581_vm10, %v3060_v46, %v2692_v21  ;;  %v1941_v21 = vld [vmem:[%s9759_s25 + $0x90] sm:$0xf]  ;;  %v2200_v25 = vrot.slane %v2198_v38, 1 }
  0xf6   : > { %2357 = vrot.lane.b32.xlu0 %v10252_v52, %s9640_s26  ;;  %v2637_v52 = vrot.slane %v2635_v62, 6  ;;  %v3148_v50 = vsel %vm17580_vm11, %v3105_v56, %v2743_v59  ;;  %v10421_v59 = vcombine.low %v1940_v35, %v1941_v21  ;;  %v2860_v62 = vrot.slane %v10332_v17, 6 }
  0xf7   : > { %2434 = vrot.lane.b32.xlu1 %v10349_v53, %s9643_s29  ;;  %v413_v56 = vshrl.u32 %v10398_v27, 8  ;;  %v391_v35 = vshrl.u32 %v10406_v33, 8  ;;  %v1944_v33 = vld [vmem:[%s9759_s25 + $0x9c] sm:$0xf] }
  0xf8   : > { %v2741_v8 = vpop.permute.xlu0 %2740  ;;  %v2641_v41 = vshrl.u32 %v10421_v59, 16  ;;  %v2644_v5 = vshll.u32 %v10421_v59, 16  ;;  %v2863_v58 = vsel %vm17533_vm3, %v2860_v62, %v17538_v3 }
  0xf9   : > { %v2802_v57 = vpop.permute.xlu1 %2801  ;;  %v3146_v13 = vsel %vm17580_vm11, %v3103_v37, %v2741_v8 }
  0xfa   : > { %2432 = vrot.lane.b32.xlu0 %v2185_v28, %s9643_s29  ;;  %v3191_v49 = vsel %vm17579_vm12, %v3148_v50, %v2802_v57  ;;  %v10388_v28 = vor.u32 %v2637_v52, %v2634_v47  ;;  %v10435_v57 = vcombine.low %v1941_v21, %v1942_v31  ;;  %v10445_v52 = vcombine.low %v1942_v31, %v1943_v55 }
  0xfb   : > { %2479 = vrot.lane.b32.xlu1 %v10366_v32, %s9641_s27  ;;  %v2202_v50 = vshrl.u32 %v10402_v39, 16  ;;  %v2643_v27 = vrot.slane %v2641_v41, 5  ;;  %v2325_v31 = vrot.slane %v10421_v59, 5  ;;  %v10499_v41 = vld [vmem:[%s9759_s25 + $0xa4] sm:$0xf] }
  0xfc   : > { %v2800_v29 = vpop.permute.xlu0 %2799  ;;  %v10432_v8 = vsel %vm17560_vm2, %v2629_v34, %v10388_v28  ;;  %17877 = vst [vmem:[#allocation14_spill] sm:$0xff] %v10435_v57 }
  0xfd   : > { %v2889_v54 = vpop.permute.xlu1 %2888  ;;  %v3189_v20 = vsel %vm17579_vm12, %v3146_v13, %v2800_v29  ;;  %v2206_v29 = vshll.u32 %v10435_v57, 16  ;;  %v2646_v13 = vrot.slane %v2644_v5, 6  ;;  %v2204_v38 = vor.u32 %v2202_v50, %v2200_v25 }
  0xfe   : > { %2477 = vrot.lane.b32.xlu0 %v10287_v19, %s9641_s27  ;;  %v10394_v11 = vsel %vm17563_vm13, %v3191_v49, %v2889_v54  ;;  %v2650_v49 = vshrl.u32 %v10445_v52, 16  ;;  %v2653_v54 = vshll.u32 %v10445_v52, 16  ;;  %v17537_v50 = vrot.slane %v10445_v52, 5 }
  0xff   : > { %2709 = vrot.lane.b32.xlu1 %v2630_v24, %s9644_s14  ;;  %v17539_v19 = vrot.slane %v10394_v11, 3  ;;  %v10487_v21 = vrot.slane %v2206_v29, 1 }
 0x100   : > { %v2887_v26 = vpop.permute.xlu0 %2886 }
 0x101   : > { %v3232_v40 = vsel %vm17563_vm13, %v3189_v20, %v2887_v26  ;;  %v10418_v18 = vpop.permute.xlu1 %2245  ;;  %v414_v20 = vmul.u32 320, %v413_v56  ;;  %v2861_v26 = vsel %vm17533_vm3, %v2858_v7, %v2860_v62  ;;  %v2647_v7 = vor.u32 %v2646_v13, %v2643_v27 }
 0x102   : > { %v3305_v60 = vrot.slane %v3232_v40, 3  ;;  %2707 = vrot.lane.b32.xlu0 %v10298_v48, %s9644_s14  ;;  %v392_v40 = vmul.u32 320, %v391_v35  ;;  %v10503_v62 = vcombine.low %v1943_v55, %v1944_v33  ;;  %v17534_v13 = vmov 0  }
 0x103   : > { %2758 = vrot.lane.b32.xlu1 %v10413_v1, %s9645_s16  ;;  %332 = vst.msk [vmem:[#allocation2] sm:$0xf] %vm17532_vm15, %v17534_v13  ;;  %333 = vst.msk [vmem:[#allocation2 + $0x4] sm:$0xf] %vm17532_vm15, %v17534_v13  ;;  %5536 = vmatprep.subr.bf16.mxu1 %v17534_v13 }
 0x104   : > { %v10437_v47 = vpop.permute.xlu0 %2243  ;;  %v3306_v48 = vsel %vm17562_vm4, %v3303_v16, %v3305_v60  ;;  %v3308_v17 = vsel %vm17562_vm4, %v3305_v60, %v17539_v19  ;;  %v2196_v16 = vor.u32 %v2194_v14, %v10337_v22  ;;  %17878 = vst [vmem:[#allocation15_spill] sm:$0xff] %v10503_v62  ;;  %v10520_v55 = vsub.s32 %v10358_v0, %v392_v40 }
 0x105   : > { %9072 = vmatprep.mubr.msk.bf16.mxu0 %vm17561_vm14, %v3306_v48  ;;  %v10451_v34 = vpop.permute.xlu1 %2347  ;;  %v10473_v22 = vmul.u32.u64.low 3435973837, %v10448_v10  ;;  %v10474_v37 = vmul.u32.u64.high 3435973837, %v10448_v10, %v10473_v22  ;;  %v2655_v48 = vrot.slane %v2653_v54, 6  ;;  %v10537_v54 = vsel %vm17536_vm0, %v2323_v44, %v2325_v31  ;;  %334 = vst.msk [vmem:[#allocation2 + $0x8] sm:$0xf] %vm17532_vm15, %v17534_v13 }
 0x106   : > { %2756 = vrot.lane.b32.xlu0 %v10366_v32, %s9645_s16  ;;  %9073 = vmatmul.mubr.msk.bf16.gmra.mxu0 %vm17561_vm14, %v3308_v17  ;;  %v10493_v14 = vsel %vm17531_vm1, %v2196_v16, %v2200_v25  ;;  %v10496_v17 = vld [vmem:[%s9759_s25 + $0xa0] sm:$0xf]  ;;  %v10511_v16 = vsub.s32 %v10374_v4, %v414_v20  ;;  %v10541_v22 = vsel %vm17560_vm2, %v10388_v28, %v2647_v7  ;;  %v2214_v27 = vshll.u32 %v10503_v62, 16 }
 0x107   : > { %2817 = vrot.lane.b32.xlu1 %v10432_v8, %s9646_s17  ;;  %v10517_v56 = vcombine.low %v10496_v17, %v10499_v41  ;;  %v424_v35 = vshrl.u32 %v10474_v37, 8  ;;  %335 = vst.msk [vmem:[#allocation2 + $0xac] sm:$0xf] %vm17532_vm15, %v17534_v13  ;;  %336 = vst.msk [vmem:[#allocation2 + $0xb0] sm:$0xf] %vm17532_vm15, %v17534_v13  ;;  %v2210_v44 = vshrl.u32 %v10435_v57, 16  ;;  %v10578_v37 = vcombine.low %v1944_v33, %v10496_v17 }
 0x108   : > { %v10468_v46 = vpop.permute.xlu0 %2345  ;;  %337 = vst.msk [vmem:[#allocation2 + $0xb4] sm:$0xf] %vm17532_vm15, %v17534_v13  ;;  %338 = vst.msk [vmem:[#allocation3] sm:$0xf] %vm17532_vm15, %v17534_v13  ;;  %v2218_v28 = vshrl.u32 %v10503_v62, 16  ;;  %vm827_vm5 = vcmp.ne.s32.totalorder %v10511_v16, 0 }
 0x109   : > { %v10476_v36 = vpop.permute.xlu1 %2422  ;;  %339 = vst.msk [vmem:[#allocation3 + $0x4] sm:$0xf] %vm17532_vm15, %v17534_v13  ;;  %340 = vst.msk [vmem:[#allocation3 + $0x8] sm:$0xf] %vm17532_vm15, %v17534_v13  ;;  %v2391_v20 = vshll.u32 %v10517_v56, 16  ;;  %vm865_vm3 = vcmp.lt.s32.totalorder %v10520_v55, 0 }
 0x10a   : > { %2815 = vrot.lane.b32.xlu0 %v2630_v24, %s9646_s17  ;;  %v2652_v24 = vrot.slane %v2650_v49, 5  ;;  %v10532_v49 = vsel %vm17531_vm1, %v2204_v38, %v10487_v21  ;;  %341 = vst.msk [vmem:[#allocation3 + $0xac] sm:$0xf] %vm17532_vm15, %v17534_v13  ;;  %342 = vst.msk [vmem:[#allocation3 + $0xb0] sm:$0xf] %vm17532_vm15, %v17534_v13  ;;  %vm867_vm1 = vcmp.lt.s32.totalorder %v10511_v16, 0 }
 0x10b   : > { %2904 = vrot.lane.b32.xlu1 %v2863_v58, %s9647_s21  ;;  %v10506_v5 = vmul.u32.u64.low 3435973837, %v10479_v6  ;;  %v10507_v58 = vmul.u32.u64.high 3435973837, %v10479_v6, %v10506_v5  ;;  %343 = vst.msk [vmem:[#allocation3 + $0xb4] sm:$0xf] %vm17532_vm15, %v17534_v13  ;;  %vm825_vm15 = vcmp.ne.s32.totalorder %v10520_v55, 0  ;;  %v947_v33 = vadd.s32 320, %v10511_v16 }
 0x10c   : > { %v10490_v60 = vpop.permute.xlu0 %2420  ;;  %v10525_v29 = vor.u32 %v2655_v48, %v2652_v24  ;;  %v10593_v38 = vld [vmem:[%s9759_s25 + $0xa8] sm:$0xf]  ;;  %v425_v24 = vmul.u32 320, %v424_v35  ;;  %v2936_v48 = vsel %vm17599_vm6, %v9929_v23, %v10418_v18  ;;  %v10599_v13 = vrot.slane %v2214_v27, 1 }
 0x10d   : > { %v10501_v42 = vpop.permute.xlu1 %2467  ;;  %v10616_v35 = vor.u32 %v2210_v44, %v10487_v21  ;;  %v10623_v27 = vadd.s32 48, %v10358_v0  ;;  %v10634_v21 = vcombine.low %v10499_v41, %v10593_v38  ;;  %v2659_v44 = vshrl.u32 %v10578_v37, 16 }
 0x10e   : > { %2902 = vrot.lane.b32.xlu0 %v2861_v26, %s9647_s21  ;;  %v10586_v26 = vsel %vm17536_vm0, %v2325_v31, %v17537_v50  ;;  %v10590_v40 = vsel %vm17560_vm2, %v2647_v7, %v10525_v29  ;;  %vm10605_vm0 = vmand %vm867_vm1, %vm827_vm5  ;;  %v945_v7 = vadd.s32 320, %v10520_v55  ;;  %v402_v50 = vshrl.u32 %v10507_v58, 8 }
 0x10f   : > { %2261 = vrot.lane.b32.xlu1 %v10493_v14, %s9642_s28  ;;  %vm905_vm1 = vmand %vm865_vm3, %vm825_vm15  ;;  %v10630_v58 = vrot.slane %v2391_v20, 1  ;;  %v2980_v3 = vsel %vm17584_vm7, %v2936_v48, %v10451_v34  ;;  %v10640_v18 = vrot.slane %v10578_v37, 5  ;;  %v426_v20 = vsub.s32 %v10448_v10, %v425_v24 }
 0x110   : > { %v10522_v25 = vpop.permute.xlu0 %2465  ;;  %v3023_v41 = vsel %vm17583_vm8, %v2980_v3, %v10476_v36  ;;  %v2662_v62 = vshll.u32 %v10578_v37, 16  ;;  %v10652_v39 = vsel %vm905_vm1, %v945_v7, %v10520_v55  ;;  %v403_v34 = vmul.u32 320, %v402_v50 }
 0x111   : > { %v10528_v4 = vpop.permute.xlu1 %2697  ;;  %17881 = vst [vmem:[#allocation16_spill] sm:$0xff] %v10640_v18  ;;  %17883 = vst [vmem:[#allocation18_spill] sm:$0xff] %v10652_v39  ;;  %v2934_v48 = vsel %vm17599_vm6, %v9913_v9, %v10437_v47  ;;  %v10662_v10 = vmul.u32.u64.low 3435973837, %v10623_v27  ;;  %v10663_v3 = vmul.u32.u64.high 3435973837, %v10623_v27, %v10662_v10  ;;  %v10671_v9 = vrot.slane %v2659_v44, 5 }
 0x112   : > { %2259 = vrot.lane.b32.xlu0 %v10349_v53, %s9642_s28  ;;  %v2978_v36 = vsel %vm17584_vm7, %v2934_v48, %v10468_v46  ;;  %vm868_vm3 = vcmp.lt.s32.totalorder %v426_v20, 0  ;;  %v404_v31 = vsub.s32 %v10479_v6, %v403_v34  ;;  %v10693_v44 = vadd.s32 32, %v10358_v0 }
 0x113   : > { %2363 = vrot.lane.b32.xlu1 %v10413_v1, %s9640_s26  ;;  %v2671_v6 = vshll.u32 %v10634_v21, 16  ;;  %v17558_v2 = vrot.slane %v10634_v21, 6 }
 0x114   : > { %v2696_v53 = vpop.permute.xlu0 %2695  ;;  %vm826_vm5 = vcmp.ne.s32.totalorder %v404_v31, 0  ;;  %vm866_vm1 = vcmp.lt.s32.totalorder %v404_v31, 0 }
 0x115   : > { %v2747_v5 = vpop.permute.xlu1 %2746 }
 0x116   : > { %2361 = vrot.lane.b32.xlu0 %v10366_v32, %s9640_s26  ;;  %v10628_v32 = vor.u32 %v2218_v28, %v10599_v13  ;;  %v10645_v28 = vsel %vm10605_vm0, %v947_v33, %v10511_v16  ;;  %v3066_v16 = vsel %vm17582_vm9, %v3023_v41, %v10501_v42  ;;  %v10680_v33 = vadd.s32 4294967272, %v10652_v39 }
 0x117   : > { %2438 = vrot.lane.b32.xlu1 %v10532_v49, %s9643_s29  ;;  %17882 = vst [vmem:[#allocation17_spill] sm:$0xff] %v10645_v28  ;;  %v3109_v55 = vsel %vm17581_vm10, %v3066_v16, %v10528_v4  ;;  %v10674_v47 = vadd.s32 4294967272, %v10645_v28  ;;  %vm828_vm0 = vcmp.ne.s32.totalorder %v426_v20, 0  ;;  %v17901_v39 = vrot.slane %v10445_v52, 6 }
 0x118   : > { %v2745_v23 = vpop.permute.xlu0 %2744  ;;  %v3152_v42 = vsel %vm17580_vm11, %v3109_v55, %v2747_v5  ;;  %v2664_v5 = vrot.slane %v2662_v62, 6  ;;  %vm908_vm15 = vmand %vm868_vm3, %vm828_vm0  ;;  %v1066_v10 = vsub.s32 0, %v10680_v33  ;;  %v457_v55 = vshrl.u32 %v10663_v3, 8 }
 0x119   : > { %v2806_v19 = vpop.permute.xlu1 %2805  ;;  %v1088_v62 = vsub.s32 0, %v10674_v47  ;;  %v17885_v3 = vrot.slane %v10394_v11, 3  ;;  %vm10739_vm0 = vmand %vm866_vm1, %vm826_vm5  ;;  %v17888_v11 = vrot.slane %v10445_v52, 6  ;;  %vm17890_vm3 = vcmask 1041408  }
 0x11a   : > { %2436 = vrot.lane.b32.xlu0 %v10493_v14, %s9643_s29  ;;  %v3021_v14 = vsel %vm17583_vm8, %v2978_v36, %v10490_v60  ;;  %v3195_v4 = vsel %vm17579_vm12, %v3152_v42, %v2806_v19  ;;  %v2668_v19 = vshrl.u32 %v10634_v21, 16  ;;  %vm17894_vm5 = vsmask.f32 7424 }
 0x11b   : > { %2483 = vrot.lane.b32.xlu1 %v10537_v54, %s9641_s27  ;;  %v3064_v46 = vsel %vm17582_vm9, %v3021_v14, %v10522_v25  ;;  %v10716_v14 = vmul.u32.u64.low 3435973837, %v10693_v44  ;;  %v10717_v42 = vmul.u32.u64.high 3435973837, %v10693_v44, %v10716_v14  ;;  %vm17895_vm1 = vmmov %vm17894_vm5 }
 0x11c   : > { %v2804_v50 = vpop.permute.xlu0 %2803  ;;  %v3107_v7 = vsel %vm17581_vm10, %v3064_v46, %v2696_v53  ;;  %v948_v53 = vadd.s32 320, %v426_v20  ;;  %v10727_v46 = vcombine.low %v10593_v38, %v10593_v38 }
 0x11d   : > { %v2893_v24 = vpop.permute.xlu1 %2892  ;;  %v3150_v25 = vsel %vm17580_vm11, %v3107_v7, %v2745_v23  ;;  %v10706_v23 = vadd.s32 56, %v10358_v0  ;;  %v435_v57 = vshrl.u32 %v10717_v42, 8 }
 0x11e   : > { %2481 = vrot.lane.b32.xlu0 %v10413_v1, %s9641_s27  ;;  %v10690_v60 = vsel %vm17563_vm13, %v3195_v4, %v2893_v24  ;;  %v3193_v41 = vsel %vm17579_vm12, %v3150_v25, %v2804_v50  ;;  %v10723_v50 = vcombine.low %v10496_v17, %v10496_v17  ;;  %v10729_v4 = vsel %vm908_vm15, %v948_v53, %v426_v20  ;;  %vm17893_vm15 = vmmov %vm17890_vm3 }
 0x11f   : > { %2713 = vrot.lane.b32.xlu1 %v10541_v22, %s9644_s14  ;;  %v17542_v1 = vrot.slane %v10690_v60, 3  ;;  %17884 = vst [vmem:[#allocation19_spill] sm:$0xff] %v10729_v4  ;;  %v17889_v53 = vrot.slane %v10421_v59, 6  ;;  %v17896_v59 = vrot.slane %v10445_v52, 5 }
 0x120   : > { %v2891_v34 = vpop.permute.xlu0 %2890 }
 0x121   : > { %v3236_v48 = vsel %vm17563_vm13, %v3193_v41, %v2891_v34  ;;  %v10709_v16 = vpop.permute.xlu1 %2249  ;;  %v10744_v38 = vmul.u32.u64.low 3435973837, %v10706_v23  ;;  %v10745_v41 = vmul.u32.u64.high 3435973837, %v10706_v23, %v10744_v38  ;;  %v2867_v34 = vsel %vm17890_vm3, %v17889_v53, %v17888_v11 }
 0x122   : > { %v3309_v36 = vrot.slane %v3236_v48, 3  ;;  %2711 = vrot.lane.b32.xlu0 %v10432_v8, %s9644_s14  ;;  %v946_v8 = vadd.s32 320, %v404_v31  ;;  %v17891_v48 = vmov %v17889_v53  ;;  %v10764_v38 = vmin.u32 %v10680_v33, %v1066_v10 }
 0x123   : > { %2762 = vrot.lane.b32.xlu1 %v10586_v26, %s9645_s16  ;;  %vm17897_vm3 = vcmask 1042432   ;;  %v458_v10 = vmul.u32 320, %v457_v55  ;;  %v2673_v11 = vrot.slane %v2671_v6, 6  ;;  %v2399_v55 = vshll.u32 %v10727_v46, 16 }
 0x124   : > { %v10731_v24 = vpop.permute.xlu0 %2247  ;;  %v3310_v7 = vsel %vm17562_vm4, %v17885_v3, %v3309_v36  ;;  %v3312_v25 = vsel %vm17562_vm4, %v3309_v36, %v17542_v1  ;;  %v17892_v36 = vrot.slane %v10341_v45, 6  ;;  %v10761_v3 = vmin.u32 %v10674_v47, %v1088_v62 }
 0x125   : > { %9076 = vmatprep.mubr.msk.bf16.mxu0 %vm17561_vm14, %v3310_v7  ;;  %v10748_v20 = vpop.permute.xlu1 %2351  ;;  %v10772_v7 = vsel %vm17894_vm5, %v10616_v35, %v10599_v13  ;;  %v10777_v45 = vsel %vm17895_vm1, %v10628_v32, %v10630_v58  ;;  %v10783_v62 = vsel %vm17897_vm3, %v17896_v59, %v10640_v18  ;;  %v10788_v13 = vadd.s32 4294967272, %v10729_v4  ;;  %vm17899_vm5 = vmmov %vm17897_vm3 }
 0x126   : > { %v2865_v14 = vsel %vm17893_vm15, %v17892_v36, %v17891_v48  ;;  %2760 = vrot.lane.b32.xlu0 %v10537_v54, %s9645_s16  ;;  %9077 = vmatmul.mubr.msk.bf16.gmra.mxu0 %vm17561_vm14, %v3312_v25  ;;  %v2670_v25 = vrot.slane %v2668_v19, 5  ;;  %v10792_v35 = vsel %vm10739_vm0, %v946_v8, %v404_v31  ;;  %v2665_v48 = vor.u32 %v2664_v5, %v10671_v9 }
 0x127   : > { %2821 = vrot.lane.b32.xlu1 %v10590_v40, %s9646_s17  ;;  %17898 = vst [vmem:[#allocation20_spill] sm:$0xff] %v10792_v35  ;;  %v2222_v36 = vshll.u32 %v10723_v50, 16  ;;  %v10800_v59 = vadd.s32 40, %v10358_v0  ;;  %v10805_v6 = vmul.u32.u64.low 4042322161, %v10761_v3  ;;  %v10806_v1 = vmul.u32.u64.high 4042322161, %v10761_v3, %v10805_v6 }
 0x128   : > { %v10794_v53 = vpop.permute.xlu0 %2349  ;;  %v10809_v31 = vmul.u32.u64.low 4042322161, %v10764_v38  ;;  %v10810_v8 = vmul.u32.u64.high 4042322161, %v10764_v38, %v10809_v31  ;;  %v10815_v9 = vrot.slane %v10634_v21, 5  ;;  %v10818_v5 = vadd.s32 4294967272, %v10792_v35 }
 0x129   : > { %v10802_v19 = vpop.permute.xlu1 %2426  ;;  %v459_v17 = vsub.s32 %v10623_v27, %v458_v10  ;;  %v10823_v6 = vor.u32 %v2673_v11, %v2670_v25  ;;  %v2868_v31 = vrot.slane %v10578_v37, 6  ;;  %v2224_v4 = vrot.slane %v2222_v36, 1  ;;  %v9467_v36 = vld [vmem:[%s9759_s25 + $0xac] ss:$0 sps:$4 sm:$0x11]  }
 0x12a   : > { %2819 = vrot.lane.b32.xlu0 %v10541_v22, %s9646_s17  ;;  %v1099_v22 = vsub.s32 0, %v10788_v13  ;;  %v468_v35 = vshrl.u32 %v10745_v41, 8  ;;  %v10832_v27 = vmul.u32.u64.low 3435973837, %v10800_v59  ;;  %v10833_v10 = vmul.u32.u64.high 3435973837, %v10800_v59, %v10832_v27 }
 0x12b   : > { %2908 = vrot.lane.b32.xlu1 %v2867_v34, %s9647_s21  ;;  %v10839_v34 = vsel %vm17560_vm2, %v10525_v29, %v2665_v48  ;;  %v2226_v37 = vshrl.u32 %v10723_v50, 16  ;;  %v10842_v25 = vrot.slane %v2399_v55, 1  ;;  %v2403_v11 = vshrl.u32 %v10727_v46, 16 }
 0x12c   : > { %v10828_v30 = vpop.permute.xlu0 %2424  ;;  %v1077_v41 = vsub.s32 0, %v10818_v5  ;;  %vm831_vm0 = vcmp.ne.s32.totalorder %v459_v17, 0  ;;  %vm871_vm15 = vcmp.lt.s32.totalorder %v459_v17, 0  ;;  %v436_v27 = vmul.u32 320, %v435_v57 }
 0x12d   : > { %v10835_v42 = vpop.permute.xlu1 %2471  ;;  %v10853_v29 = vsel %vm17899_vm5, %v10640_v18, %v10815_v9  ;;  %v10857_v50 = vsel %vm17560_vm2, %v2665_v48, %v10823_v6  ;;  %vm17900_vm1 = vcmask 1041408   ;;  %v10868_v57 = vmin.u32 %v10788_v13, %v1099_v22  ;;  %vm911_vm5 = vmand %vm871_vm15, %vm831_vm0 }
 0x12e   : > { %2906 = vrot.lane.b32.xlu0 %v2865_v14, %s9647_s21  ;;  %v10862_v46 = vsel %vm17900_vm1, %v2868_v31, %v17558_v2  ;;  %v10865_v14 = vld [vmem:[%s9759_s25 + $0xac] sm:$0xff]   ;;  %vm17902_vm3 = vmmov %vm17900_vm1  ;;  %v2395_v48 = vshrl.u32 %v10517_v56, 16  ;;  %v951_v28 = vadd.s32 320, %v459_v17  ;;  %v469_v15 = vmul.u32 320, %v468_v35 }
 0x12f   : > { %2265 = vrot.lane.b32.xlu1 %v10772_v7, %s9642_s28  ;;  %v10875_v12 = vsel %vm17902_vm3, %v17901_v39, %v2868_v31  ;;  %v10878_v61 = vor.u32 %v2226_v37, %v2224_v4  ;;  %v2677_v2 = vshll.u32 %v9467_v36, 16  ;;  %v1093_v18 = vshrl.u32 %v10806_v1, 4 }
 0x130   : > { %v10870_v55 = vpop.permute.xlu0 %2469  ;;  %v1071_v22 = vshrl.u32 %v10810_v8, 4  ;;  %vm17903_vm1 = vsmask.f32 7424  ;;  %v10891_v52 = vor.u32 %v2403_v11, %v10842_v25  ;;  %v10894_v56 = vmin.u32 %v10818_v5, %v1077_v41 }
 0x131   : > { %v2702_v43 = vpop.permute.xlu1 %2701  ;;  %v10888_v39 = vsel %vm17903_vm1, %v10628_v32, %v2224_v4  ;;  %v437_v1 = vsub.s32 %v10693_v44, %v436_v27  ;;  %v2776_v35 = vshrl.u32 %v10865_v14, 16  ;;  %v10906_v31 = vor.u32 %v2395_v48, %v10630_v58 }
 0x132   : > { %2263 = vrot.lane.b32.xlu0 %v10532_v49, %s9642_s28  ;;  %17904 = vst [vmem:[#allocation21_spill] sm:$0xff] %v10888_v39  ;;  %17905 = vst [vmem:[#allocation22_spill] sm:$0xff] %v10891_v52  ;;  %v2779_v49 = vshll.u32 %v10865_v14, 16  ;;  %v10902_v8 = vmul.u32.u64.low 4042322161, %v10868_v57  ;;  %v10903_v32 = vmul.u32.u64.high 4042322161, %v10868_v57, %v10902_v8  ;;  %v10908_v37 = vsel %vm911_vm5, %v951_v28, %v459_v17 }
 0x133   : > { %2367 = vrot.lane.b32.xlu1 %v10586_v26, %s9640_s26  ;;  %17906 = vst [vmem:[#allocation23_spill] sm:$0xff] %v10908_v37  ;;  %v470_v11 = vsub.s32 %v10706_v23, %v469_v15  ;;  %v446_v44 = vshrl.u32 %v10833_v10, 8  ;;  %v2940_v36 = vsel %vm17599_vm6, %v9975_v63, %v10709_v16  ;;  %v10915_v27 = vrot.slane %v2677_v2, 6  ;;  %v10918_v52 = vld [vmem:[%s9759_s25 + $0xb4] ss:$0 sps:$4 sm:$0x11]  }
 0x134   : > { %v2700_v4 = vpop.permute.xlu0 %2699  ;;  %v1094_v8 = vmul.u32 17, %v1093_v18  ;;  %v1072_v39 = vmul.u32 17, %v1071_v22  ;;  %vm829_vm0 = vcmp.ne.s32.totalorder %v437_v1, 0  ;;  %vm869_vm15 = vcmp.lt.s32.totalorder %v437_v1, 0 }
 0x135   : > { %v2751_v41 = vpop.permute.xlu1 %2750  ;;  %v10923_v58 = vmul.u32.u64.low 4042322161, %v10894_v56  ;;  %v10924_v28 = vmul.u32.u64.high 4042322161, %v10894_v56, %v10923_v58  ;;  %v10928_v63 = vrot.slane %v2776_v35, 5  ;;  %v10930_v15 = vrot.slane %v2779_v49, 6  ;;  %vm10945_vm1 = vmand %vm869_vm15, %vm829_vm0 }
 0x136   : > { %2365 = vrot.lane.b32.xlu0 %v10537_v54, %s9640_s26  ;;  %v10933_v2 = vadd.s32 4294967272, %v10908_v37  ;;  %v949_v18 = vadd.s32 320, %v437_v1  ;;  %v2984_v54 = vsel %vm17584_vm7, %v2940_v36, %v10748_v20  ;;  %vm832_vm3 = vcmp.ne.s32.totalorder %v470_v11, 0 }
 0x137   : > { %2442 = vrot.lane.b32.xlu1 %v10777_v45, %s9643_s29  ;;  %vm872_vm5 = vcmp.lt.s32.totalorder %v470_v11, 0  ;;  %v447_v16 = vmul.u32 320, %v446_v44  ;;  %v3027_v17 = vsel %vm17583_vm8, %v2984_v54, %v10802_v19  ;;  %v2785_v45 = vshll.u32 %v10918_v52, 16 }
 0x138   : > { %v2749_v23 = vpop.permute.xlu0 %2748  ;;  %v10941_v48 = vsub.s32 %v10761_v3, %v1094_v8  ;;  %v10950_v20 = vadd.s32 80, %v10358_v0  ;;  %v2938_v35 = vsel %vm17599_vm6, %v9960_v51, %v10731_v24  ;;  %v3070_v19 = vsel %vm17582_vm9, %v3027_v17, %v10835_v42  ;;  %vm912_vm0 = vmand %vm872_vm5, %vm832_vm3 }
 0x139   : > { %v2810_v10 = vpop.permute.xlu1 %2809  ;;  %vm1087_vm2 = vcmp.lt.s32.totalorder %v10674_v47, 0  ;;  %v10961_v3 = vsub.s32 %v10764_v38, %v1072_v39  ;;  %v952_v49 = vadd.s32 320, %v470_v11  ;;  %v2982_v44 = vsel %vm17584_vm7, %v2938_v35, %v10794_v53 }
 0x13a   : > { %2440 = vrot.lane.b32.xlu0 %v10772_v7, %s9643_s29  ;;  %v3113_v36 = vsel %vm17581_vm10, %v3070_v19, %v2702_v43  ;;  %v1104_v51 = vshrl.u32 %v10903_v32, 4  ;;  %v1132_v24 = vsub.s32 0, %v10933_v2  ;;  %v3025_v38 = vsel %vm17583_vm8, %v2982_v44, %v10828_v30 }
 0x13b   : > { %2487 = vrot.lane.b32.xlu1 %v10783_v62, %s9641_s27  ;;  %v3156_v7 = vsel %vm17580_vm11, %v3113_v36, %v2751_v41  ;;  %v10977_v53 = vsel %vm10945_vm1, %v949_v18, %v437_v1  ;;  %v448_v43 = vsub.s32 %v10800_v59, %v447_v16  ;;  %v3068_v39 = vsel %vm17582_vm9, %v3025_v38, %v10870_v55 }
 0x13c   : > { %v2808_v42 = vpop.permute.xlu0 %2807  ;;  %17909 = vst [vmem:[#allocation24_spill] sm:$0xff] %v10977_v53  ;;  %v3199_v32 = vsel %vm17579_vm12, %v3156_v7, %v2810_v10  ;;  %v10984_v58 = vmul.u32.u64.low 3435973837, %v10950_v20  ;;  %v10985_v54 = vmul.u32.u64.high 3435973837, %v10950_v20, %v10984_v58  ;;  %v3111_v30 = vsel %vm17581_vm10, %v3068_v39, %v2700_v4 }
 0x13d   : > { %v2897_v8 = vpop.permute.xlu1 %2896  ;;  %v1082_v59 = vshrl.u32 %v10924_v28, 4  ;;  %v10994_v41 = vsel %vm912_vm0, %v952_v49, %v470_v11  ;;  %v3154_v55 = vsel %vm17580_vm11, %v3111_v30, %v2749_v23  ;;  %v11000_v18 = vmin.u32 %v10933_v2, %v1132_v24 }
 0x13e   : > { %2485 = vrot.lane.b32.xlu0 %v10586_v26, %s9641_s27  ;;  %v10991_v1 = vsel %vm17563_vm13, %v3199_v32, %v2897_v8  ;;  %17910 = vst [vmem:[#allocation25_spill] sm:$0xff] %v10994_v41  ;;  %v11003_v4 = vadd.s32 4294967272, %v10977_v53  ;;  %v11006_v26 = vadd.s32 64, %v10358_v0  ;;  %v3197_v16 = vsel %vm17579_vm12, %v3154_v55, %v2808_v42 }
 0x13f   : > { %2717 = vrot.lane.b32.xlu1 %v10839_v34, %s9644_s14  ;;  %v17564_v28 = vrot.slane %v10991_v1, 3  ;;  %vm830_vm15 = vcmp.ne.s32.totalorder %v448_v43, 0  ;;  %vm870_vm3 = vcmp.lt.s32.totalorder %v448_v43, 0  ;;  %v1096_v10 = vsub.s32 0, %v10941_v48 }
 0x140   : > { %v2895_v11 = vpop.permute.xlu0 %2894  ;;  %vm1065_vm5 = vcmp.lt.s32.totalorder %v10680_v33, 0  ;;  %v11016_v22 = vadd.s32 4294967272, %v10994_v41  ;;  %v1074_v19 = vsub.s32 0, %v10961_v3  ;;  %v1105_v49 = vmul.u32 17, %v1104_v51  ;;  %vm11030_vm1 = vmand %vm870_vm3, %vm830_vm15 }
 0x141   : > { %v3240_v23 = vsel %vm17563_vm13, %v3197_v16, %v2895_v11  ;;  %v11011_v17 = vpop.permute.xlu1 %2253  ;;  %v950_v44 = vadd.s32 320, %v448_v43  ;;  %v1083_v36 = vmul.u32 17, %v1082_v59  ;;  %v1110_v7 = vsub.s32 0, %v11003_v4 }
 0x142   : > { %v3313_v35 = vrot.slane %v3240_v23, 3  ;;  %2715 = vrot.lane.b32.xlu0 %v10590_v40, %s9644_s14  ;;  %v11024_v24 = vmul.u32.u64.low 4042322161, %v11000_v18  ;;  %v11025_v38 = vmul.u32.u64.high 4042322161, %v11000_v18, %v11024_v24  ;;  %v17913_v51 = vrot.slane %v10690_v60, 3 }
 0x143   : > { %2766 = vrot.lane.b32.xlu1 %v10853_v29, %s9645_s16  ;;  %v11043_v8 = vmul.u32.u64.low 3435973837, %v11006_v26  ;;  %v11044_v58 = vmul.u32.u64.high 3435973837, %v11006_v26, %v11043_v8  ;;  %v17565_v59 = vrot.slane %v10865_v14, 5  ;;  %v11053_v60 = vsel %vm1087_vm2, %v1096_v10, %v10941_v48 }
 0x144   : > { %v11034_v40 = vpop.permute.xlu0 %2251  ;;  %v3314_v39 = vsel %vm17562_vm4, %v17913_v51, %v3313_v35  ;;  %v3316_v32 = vsel %vm17562_vm4, %v3313_v35, %v17564_v28  ;;  %17914 = vst [vmem:[#allocation26_spill] sm:$0xff] %v11053_v60  ;;  %v1143_v55 = vsub.s32 0, %v11016_v22  ;;  %v501_v16 = vshrl.u32 %v10985_v54, 8 }
 0x145   : > { %9080 = vmatprep.mubr.msk.bf16.mxu0 %vm17561_vm14, %v3314_v39  ;;  %v11047_v30 = vpop.permute.xlu1 %2355  ;;  %v2782_v11 = vor.u32 %v10930_v15, %v10928_v63  ;;  %v2787_v23 = vrot.slane %v2785_v45, 6  ;;  %v2872_v35 = vrot.slane %v10865_v14, 6  ;;  %v11067_v47 = vsel %vm11030_vm1, %v950_v44, %v448_v43 }
 0x146   : > { %2764 = vrot.lane.b32.xlu0 %v10783_v62, %s9645_s16  ;;  %9081 = vmatmul.mubr.msk.bf16.gmra.mxu0 %vm17561_vm14, %v3316_v32  ;;  %17915 = vst [vmem:[#allocation27_spill] sm:$0xff] %v11067_v47  ;;  %v2874_v48 = vrot.slane %v10918_v52, 6  ;;  %v11075_v54 = vsel %vm1065_vm5, %v1074_v19, %v10961_v3  ;;  %v1106_v63 = vsub.s32 %v10868_v57, %v1105_v49  ;;  %vm1507_vm2 = vcmp.ne.s32.totalorder %v11053_v60, 0 }
 0x147   : > { %2825 = vrot.lane.b32.xlu1 %v10857_v50, %s9646_s17  ;;  %17916 = vst [vmem:[#allocation28_spill] sm:$0xff] %v11075_v54  ;;  %v1084_v15 = vsub.s32 %v10894_v56, %v1083_v36  ;;  %vm1547_vm0 = vcmp.lt.s32.totalorder %v11053_v60, 0  ;;  %v11084_v43 = vadd.s32 17, %v11053_v60  ;;  %v11087_v52 = vmin.u32 %v11003_v4, %v1110_v7 }
 0x148   : > { %v11079_v45 = vpop.permute.xlu0 %2353  ;;  %vm1098_vm15 = vcmp.lt.s32.totalorder %v10788_v13, 0  ;;  %v11093_v33 = vmin.u32 %v11016_v22, %v1143_v55  ;;  %v11096_v57 = vadd.s32 4294967272, %v11067_v47  ;;  %v502_v56 = vmul.u32 320, %v501_v16  ;;  %vm11136_vm14 = vmand %vm1547_vm0, %vm1507_vm2 }
 0x149   : > { %17917 = vst [vmem:[#allocation29_spill] sm:$0xff] %v11084_v43  ;;  %v11089_v10 = vpop.permute.xlu1 %2430  ;;  %vm1505_vm3 = vcmp.ne.s32.totalorder %v11075_v54, 0  ;;  %vm1545_vm5 = vcmp.lt.s32.totalorder %v11075_v54, 0  ;;  %v11103_v3 = vadd.s32 88, %v10358_v0  ;;  %v11106_v19 = vadd.s32 72, %v10358_v0 }
 0x14a   : > { %2823 = vrot.lane.b32.xlu0 %v10839_v34, %s9646_s17  ;;  %v11111_v49 = vadd.s32 17, %v11075_v54  ;;  %v1107_v44 = vsub.s32 0, %v1106_v63  ;;  %vm1076_vm1 = vcmp.lt.s32.totalorder %v10818_v5, 0  ;;  %v1085_v34 = vsub.s32 0, %v1084_v15  ;;  %v11205_v5 = vld [vmem:[#allocation2 + $0x8] sm:$0xf] }
 0x14b   : > { %2912 = vrot.lane.b32.xlu1 %v10862_v46, %s9647_s21  ;;  %v1137_v24 = vshrl.u32 %v11025_v38, 4  ;;  %v11118_v7 = vmul.u32.u64.low 4042322161, %v11087_v52  ;;  %v11119_v42 = vmul.u32.u64.high 4042322161, %v11087_v52, %v11118_v7  ;;  %v479_v51 = vshrl.u32 %v11044_v58, 8 }
 0x14c   : > { %17918 = vst [vmem:[#allocation30_spill] sm:$0xff] %v11111_v49  ;;  %v11114_v36 = vpop.permute.xlu0 %2428  ;;  %v11125_v46 = vmul.u32.u64.low 4042322161, %v11093_v33  ;;  %v11126_v32 = vmul.u32.u64.high 4042322161, %v11093_v33, %v11125_v46  ;;  %v1121_v8 = vsub.s32 0, %v11096_v57  ;;  %v503_v55 = vsub.s32 %v10950_v20, %v502_v56 }
 0x14d   : > { %v11122_v39 = vpop.permute.xlu1 %2475  ;;  %v11141_v58 = vmul.u32.u64.low 3435973837, %v11103_v3  ;;  %v11142_v16 = vmul.u32.u64.high 3435973837, %v11103_v3, %v11141_v58  ;;  %v11145_v7 = vmul.u32.u64.low 3435973837, %v11106_v19  ;;  %v11146_v46 = vmul.u32.u64.high 3435973837, %v11106_v19, %v11145_v7 }
 0x14e   : > { %2910 = vrot.lane.b32.xlu0 %v10875_v12, %s9647_s21  ;;  %vm17921_vm4 = vsmask.f32 7424  ;;  %vm17922_vm2 = vsmask.f32 2304  ;;  %vm17923_vm0 = vcmask 1042432   ;;  %v480_v28 = vmul.u32 320, %v479_v51 }
 0x14f   : > { %2269 = vrot.lane.b32.xlu1 %v10878_v61, %s9642_s28  ;;  %v11153_v12 = vsel %vm17921_vm4, %v10906_v31, %v10842_v25  ;;  %v11158_v20 = vsel %vm17922_vm2, %v10823_v6, %v10915_v27  ;;  %v11164_v56 = vsel %vm17923_vm0, %v10815_v9, %v17565_v59  ;;  %vm17924_vm13 = vmmov %vm17922_vm2  ;;  %v17925_v61 = vmov 0  ;;  %v3969_v7 = vld [vmem:[#allocation2] sm:$0x8] }
 0x150   : > { %v11167_v58 = vsel %vm17924_vm13, %v2782_v11, %v2787_v23  ;;  %vm11173_vm4 = vmand %vm1545_vm5, %vm1505_vm3  ;;  %v11177_v25 = vpop.permute.xlu0 %2473  ;;  %v11181_v31 = vsel %vm17922_vm2, %v10823_v6, %v2782_v11  ;;  %v11185_v27 = vsel %vm1098_vm15, %v1107_v44, %v1106_v63  ;;  %v11189_v23 = vsel %vm1076_vm1, %v1085_v34, %v1084_v15  ;;  %v11203_v6 = vld [vmem:[#allocation2 + $0x4] sm:$0xf] }
 0x151   : > { %v17926_v61 = vsel %vm11173_vm4, 4294967295, %v17925_v61  ;;  %v2706_v59 = vpop.permute.xlu1 %2705  ;;  %vm17928_vm13 = vcmask 1041408   ;;  %v17929_v41 = vrot.slane %v10634_v21, 6  ;;  %v1138_v11 = vmul.u32 17, %v1137_v24  ;;  %v17931_v63 = vld [vmem:[#allocation21_spill] sm:$0xff]  ;;  %v17934_v21 = vld [vmem:[#allocation8_spill] sm:$0xff] }
 0x152   : > { %17927 = vst [vmem:[#allocation31_spill] sm:$0xff] %v17926_v61  ;;  %v11192_v47 = vsel %vm17928_vm13, %v2872_v35, %v2874_v48  ;;  %vm17930_vm3 = vmmov %vm17928_vm13  ;;  %2267 = vrot.lane.b32.xlu0 %v17931_v63, %s9642_s28  ;;  %vm835_vm15 = vcmp.ne.s32.totalorder %v503_v55, 0  ;;  %vm875_vm5 = vcmp.lt.s32.totalorder %v503_v55, 0  ;;  %v11219_v48 = vadd.s32 17, %v11185_v27 }
 0x153   : > { %v11197_v53 = vsel %vm17930_vm3, %v17929_v41, %v2872_v35  ;;  %v11214_v41 = vmin.u32 %v11096_v57, %v1121_v8  ;;  %v17932_v35 = vld [vmem:[#allocation16_spill] sm:$0xff]  ;;  %v11222_v15 = vadd.s32 17, %v11189_v23  ;;  %v11225_v44 = vadd.s32 112, %v10358_v0  ;;  %vm915_vm1 = vmand %vm875_vm5, %vm835_vm15 }
 0x154   : > { %2371 = vrot.lane.b32.xlu1 %v17932_v35, %s9640_s26  ;;  %v11228_v34 = vadd.s32 96, %v10358_v0  ;;  %v2704_v24 = vpop.permute.xlu0 %2703  ;;  %v11231_v51 = vcombine.low %v3969_v7, %v11203_v6  ;;  %v955_v63 = vadd.s32 320, %v503_v55  ;;  %v481_v35 = vsub.s32 %v11006_v26, %v480_v28 }
 0x155   : > { %v2944_v13 = vsel %vm17599_vm6, %v17934_v21, %v11011_v17  ;;  %v2755_v37 = vpop.permute.xlu1 %2754  ;;  %v11240_v54 = vsub.s32 %v11000_v18, %v1138_v11  ;;  %v1115_v49 = vshrl.u32 %v11119_v42, 4  ;;  %v1148_v61 = vshrl.u32 %v11126_v32, 4  ;;  %v17935_v18 = vld [vmem:[#allocation22_spill] sm:$0xff] }
 0x156   : > { %17933 = vst [vmem:[#allocation21_spill] sm:$0xff] %v11231_v51  ;;  %2369 = vrot.lane.b32.xlu0 %v10783_v62, %s9640_s26  ;;  %v11249_v26 = vmul.u32.u64.low 4042322161, %v11214_v41  ;;  %v11250_v28 = vmul.u32.u64.high 4042322161, %v11214_v41, %v11249_v26  ;;  %v512_v17 = vshrl.u32 %v11142_v16, 8  ;;  %v490_v7 = vshrl.u32 %v11146_v46, 8  ;;  %v17937_v16 = vld [vmem:[#allocation7_spill] sm:$0xff] }
 0x157   : > { %v11257_v42 = vmul.u32.u64.low 3435973837, %v11225_v44  ;;  %v11258_v32 = vmul.u32.u64.high 3435973837, %v11225_v44, %v11257_v42  ;;  %v11261_v11 = vmul.u32.u64.low 3435973837, %v11228_v34  ;;  %v11262_v21 = vmul.u32.u64.high 3435973837, %v11228_v34, %v11261_v11 }
 0x158   : > { %2446 = vrot.lane.b32.xlu1 %v17935_v18, %s9643_s29  ;;  %v2988_v62 = vsel %vm17584_vm7, %v2944_v13, %v11047_v30  ;;  %v2753_v8 = vpop.permute.xlu0 %2752  ;;  %v11266_v26 = vsel %vm915_vm1, %v955_v63, %v503_v55  ;;  %vm833_vm0 = vcmp.ne.s32.totalorder %v481_v35, 0  ;;  %vm873_vm2 = vcmp.lt.s32.totalorder %v481_v35, 0 }
 0x159   : > { %17936 = vst [vmem:[#allocation16_spill] sm:$0xff] %v11266_v26  ;;  %v2942_v46 = vsel %vm17599_vm6, %v17937_v16, %v11034_v40  ;;  %v3031_v18 = vsel %vm17583_vm8, %v2988_v62, %v11089_v10  ;;  %v2814_v42 = vpop.permute.xlu1 %2813  ;;  %v953_v60 = vadd.s32 320, %v481_v35  ;;  %v11274_v43 = vadd.s32 120, %v10358_v0  ;;  %vm913_vm3 = vmand %vm873_vm2, %vm833_vm0 }
 0x15a   : > { %v2986_v30 = vsel %vm17584_vm7, %v2942_v46, %v11079_v45  ;;  %v3074_v55 = vsel %vm17582_vm9, %v3031_v18, %v11122_v39  ;;  %2444 = vrot.lane.b32.xlu0 %v11153_v12, %s9643_s29  ;;  %v513_v13 = vmul.u32 320, %v512_v17  ;;  %v491_v63 = vmul.u32 320, %v490_v7  ;;  %s8908_s29 = sshll.u32 %s9727_s13, 4 }
 0x15b   : > { %v3029_v40 = vsel %vm17583_vm8, %v2986_v30, %v11114_v36  ;;  %v3117_v10 = vsel %vm17581_vm10, %v3074_v55, %v2706_v59  ;;  %v545_v11 = vshrl.u32 %v11258_v32, 8  ;;  %v523_v45 = vshrl.u32 %v11262_v21, 8 }
 0x15c   : > { %2491 = vrot.lane.b32.xlu1 %v10815_v9, %s9641_s27  ;;  %v3072_v39 = vsel %vm17582_vm9, %v3029_v40, %v11177_v25  ;;  %v3160_v62 = vsel %vm17580_vm11, %v3117_v10, %v2755_v37  ;;  %v2812_v12 = vpop.permute.xlu0 %2811  ;;  %vm1131_vm13 = vcmp.lt.s32.totalorder %v10933_v2, 0  ;;  %v1116_v17 = vmul.u32 17, %v1115_v49  ;;  %v9478_v2 = vld [vmem:[%s17524_s3 + $0x88] sm:$0xff]  }
 0x15d   : > { %v11294_v36 = vadd.s32 4294967272, %v11266_v26  ;;  %v3203_v9 = vsel %vm17579_vm12, %v3160_v62, %v2814_v42  ;;  %v2901_v59 = vpop.permute.xlu1 %2900  ;;  %v546_v7 = vmul.u32 320, %v545_v11  ;;  %v3115_v37 = vsel %vm17581_vm10, %v3072_v39, %v2704_v24  ;;  %9104 = vmatprep.subr.bf16.mxu0 %v9478_v2  ;;  %v17970_v26 = vld [vmem:[#allocation17_spill] sm:$0xff] }
 0x15e   : > { %v11300_v32 = vmul.u32.u64.low 3435973837, %v11274_v43  ;;  %v11301_v21 = vmul.u32.u64.high 3435973837, %v11274_v43, %v11300_v32  ;;  %2489 = vrot.lane.b32.xlu0 %v10853_v29, %s9641_s27  ;;  %vm17938_vm15 = vcmask 195584   ;;  %v1140_v25 = vsub.s32 0, %v11240_v54  ;;  %9105 = vmatpush3.bf16.msra.mxu0 %v9478_v2  ;;  %s9652_s27 = smov 96  }
 0x15f   : > { %v11307_v49 = vsel %vm17938_vm15, %v3203_v9, %v2901_v59  ;;  %v514_v16 = vsub.s32 %v11103_v3, %v513_v13  ;;  %v3158_v46 = vsel %vm17580_vm11, %v3115_v37, %v2753_v8  ;;  %v11314_v18 = vsel %vm913_vm3, %v953_v60, %v481_v35  ;;  %vm17940_vm5 = vmmov %vm17938_vm15 }
 0x160   : > { %2721 = vrot.lane.b32.xlu1 %v11158_v20, %s9644_s14  ;;  %17939 = vst [vmem:[#allocation8_spill] sm:$0xff] %v11314_v18  ;;  %v492_v42 = vsub.s32 %v11106_v19, %v491_v63  ;;  %v524_v24 = vmul.u32 320, %v523_v45  ;;  %v3201_v30 = vsel %vm17579_vm12, %v3158_v46, %v2812_v12  ;;  %v17585_v29 = vrot.slane %v11307_v49, 3  ;;  %v2899_v55 = vpop.permute.xlu0 %2898 }
 0x161   : > { %v1149_v40 = vmul.u32 17, %v1148_v61  ;;  %v547_v10 = vsub.s32 %v11225_v44, %v546_v7  ;;  %v3244_v3 = vsel %vm17940_vm5, %v3201_v30, %v2899_v55  ;;  %v11321_v13 = vpop.permute.xlu1 %2257  ;;  %v11324_v8 = vsub.s32 %v11087_v52, %v1116_v17 }
 0x162   : > { %v1126_v60 = vshrl.u32 %v11250_v28, 4  ;;  %v1176_v19 = vsub.s32 0, %v11294_v36  ;;  %v3317_v20 = vrot.slane %v3244_v3, 3  ;;  %2719 = vrot.lane.b32.xlu0 %v10857_v50, %s9644_s14  ;;  %v11331_v35 = vadd.s32 4294967272, %v11314_v18  ;;  %s9650_s14 = smov 64  }
 0x163   : > { %vm836_vm1 = vcmp.ne.s32.totalorder %v514_v16, 0  ;;  %vm876_vm0 = vcmp.lt.s32.totalorder %v514_v16, 0  ;;  %v17941_v61 = vrot.slane %v10865_v14, 5  ;;  %v956_v44 = vadd.s32 320, %v514_v16 }
 0x164   : > { %vm834_vm2 = vcmp.ne.s32.totalorder %v492_v42, 0  ;;  %vm874_vm3 = vcmp.lt.s32.totalorder %v492_v42, 0  ;;  %v11337_v52 = vsub.s32 %v11228_v34, %v524_v24  ;;  %v11339_v28 = vpop.permute.xlu0 %2255  ;;  %v17942_v63 = vrot.slane %v10991_v1, 3 }
 0x165   : > { %2770 = vrot.lane.b32.xlu1 %v17941_v61, %s9645_s16  ;;  %vm17943_vm15 = vcmask 1044480   ;;  %vm1508_vm12 = vcmp.ne.s32.totalorder %v11185_v27, 0  ;;  %vm1548_vm11 = vcmp.lt.s32.totalorder %v11185_v27, 0  ;;  %vm839_vm10 = vcmp.ne.s32.totalorder %v547_v10, 0  ;;  %v11350_v14 = vpop.permute.xlu1 %2359 }
 0x166   : > { %v3318_v50 = vsel %vm17943_vm15, %v17942_v63, %v3317_v20  ;;  %vm17944_vm5 = vmmov %vm17943_vm15  ;;  %vm879_vm9 = vcmp.lt.s32.totalorder %v547_v10, 0  ;;  %vm17945_vm8 = vcmask 220160   ;;  %v4128_v34 = vshll.u32 %v11231_v51, 16  ;;  %2768 = vrot.lane.b32.xlu0 %v11164_v56, %s9645_s16  ;;  %s324_s16 = scalar_lea.vmem [#allocation4], %s323_s22 }
 0x167   : > { %v3320_v11 = vsel %vm17944_vm5, %v3317_v20, %v17585_v29  ;;  %9084 = vmatprep.mubr.msk.bf16.mxu0 %vm17945_vm8, %v3318_v50  ;;  %v11354_v1 = vmin.u32 %v11294_v36, %v1176_v19  ;;  %vm11358_vm15 = vmand %vm876_vm0, %vm836_vm1  ;;  %v954_v39 = vadd.s32 320, %v492_v42  ;;  %v556_v62 = vshrl.u32 %v11301_v21, 8 }
 0x168   : > { %9085 = vmatmul.mubr.msk.bf16.gmra.mxu0 %vm17945_vm8, %v3320_v11  ;;  %vm1506_vm5 = vcmp.ne.s32.totalorder %v11189_v23, 0  ;;  %vm1546_vm7 = vcmp.lt.s32.totalorder %v11189_v23, 0  ;;  %v17948_v12 = vcombine.low %v11203_v6, %v11205_v5  ;;  %v4126_v9 = vshrl.u32 %v11231_v51, 16  ;;  %vm11377_vm0 = vmand %vm874_vm3, %vm834_vm2  ;;  %v11394_v37 = vpop.permute.xlu0 %2357 }
 0x169   : > { %vm1109_vm1 = vcmp.lt.s32.totalorder %v11003_v4, 0  ;;  %v959_v56 = vadd.s32 320, %v547_v10  ;;  %2829 = vrot.lane.b32.xlu1 %v11167_v58, %s9646_s17  ;;  %v11386_v6 = vsel %vm1131_vm13, %v1140_v25, %v11240_v54  ;;  %v1118_v7 = vsub.s32 0, %v11324_v8  ;;  %vm919_vm2 = vmand %vm879_vm9, %vm839_vm10  ;;  %v11406_v54 = vpop.permute.xlu1 %2434 }
 0x16a   : > { %v11371_v17 = vrot.slane %v17948_v12, 5  ;;  %v11390_v32 = vsub.s32 %v11093_v33, %v1149_v40  ;;  %v1127_v21 = vmul.u32 17, %v1126_v60  ;;  %v1154_v46 = vsub.s32 0, %v11331_v35  ;;  %2827 = vrot.lane.b32.xlu0 %v11181_v31, %s9646_s17  ;;  %s8434_s17 = sshll.u32 %s324_s16, 4  ;;  %s17482_s17 = int_to_ptr.vmem [resolvable:$true] %s8434_s17 }
 0x16b   : > { %v11399_v58 = vsel %vm11358_vm15, %v956_v44, %v514_v16  ;;  %vm837_vm13 = vcmp.ne.s32.totalorder %v11337_v52, 0  ;;  %vm877_vm3 = vcmp.lt.s32.totalorder %v11337_v52, 0  ;;  %v11414_v24 = vsel %vm11377_vm0, %v954_v39, %v492_v42  ;;  %vm11474_vm0 = vmand %vm1548_vm11, %vm1508_vm12  ;;  %s9578_s13 = scalar_lea.vmem %s17482_s17, 16 }
 0x16c   : > { %17949 = vst [vmem:[#allocation22_spill] sm:$0xff] %v11371_v17  ;;  %17952 = vst [vmem:[#allocation7_spill] sm:$0xff] %v11399_v58  ;;  %v11409_v33 = vmul.u32.u64.low 4042322161, %v11354_v1  ;;  %v11410_v25 = vmul.u32.u64.high 4042322161, %v11354_v1, %v11409_v33  ;;  %v557_v16 = vmul.u32 320, %v556_v62  ;;  %v4130_v30 = vrot.slane %v4128_v34, 1  ;;  %v11436_v42 = vpop.permute.xlu0 %2432  ;;  %p9579_p11 = scmp.ne.s32.totalorder %s17482_s17, %s9578_s13 }
 0x16d   : > { %17953 = vst [vmem:[#allocation32_spill] sm:$0xff] %v11414_v24  ;;  %v11418_v55 = vsel %vm919_vm2, %v959_v56, %v547_v10  ;;  %v957_v40 = vadd.s32 320, %v11337_v52  ;;  %v11422_v3 = vadd.s32 104, %v10358_v0  ;;  %2916 = vrot.lane.b32.xlu1 %v11192_v47, %s9647_s21  ;;  %vm1511_vm9 = vcmp.ne.s32.totalorder %v11386_v6, 0  ;;  %vm917_vm8 = vmand %vm877_vm3, %vm837_vm13  ;;  %v11450_v20 = vpop.permute.xlu1 %2479 }
 0x16e   : > { %17954 = vst [vmem:[#allocation33_spill] sm:$0xff] %v11418_v55  ;;  %vm1551_vm10 = vcmp.lt.s32.totalorder %v11386_v6, 0  ;;  %vm1142_vm15 = vcmp.lt.s32.totalorder %v11016_v22, 0  ;;  %v11430_v31 = vadd.s32 4294967272, %v11399_v58  ;;  %v11441_v47 = vsel %vm1109_vm1, %v1118_v7, %v11324_v8  ;;  %2914 = vrot.lane.b32.xlu0 %v11197_v53, %s9647_s21  ;;  %vm11498_vm11 = vmand %vm1546_vm7, %vm1506_vm5  ;;  %p9580_p12 = pnand %p9579_p11, %p9744_p5  ;;  %s9655_s21 = smov [#allocation4]  }
 0x16f   : > { %v1128_v10 = vsub.s32 %v11214_v41, %v1127_v21  ;;  %v11445_v60 = vmin.u32 %v11331_v35, %v1154_v46  ;;  %v11448_v19 = vadd.s32 4294967272, %v11414_v24  ;;  %v11453_v61 = vadd.s32 17, %v11386_v6  ;;  %vm11516_vm7 = vmand %vm1551_vm10, %vm1511_vm9  ;;  %s9582_s23 = sshll.u32 %s9655_s21, 4  ;;  %s9583_s23 = int_to_ptr.vmem [resolvable:$false] %s9582_s23 }
 0x170   : > { %v1151_v44 = vsub.s32 0, %v11390_v32  ;;  %v11457_v63 = vadd.s32 4294967272, %v11418_v55  ;;  %v558_v4 = vsub.s32 %v11274_v43, %v557_v16  ;;  %vm1120_vm1 = vcmp.lt.s32.totalorder %v11096_v57, 0  ;;  %v9479_v43 = vld [vmem:[%s17524_s3 + $0x80] sm:$0xff]   ;;  %v11487_v34 = vpop.permute.xlu0 %2477  ;;  %p9581_p13 = pneg %p9580_p12  ;;  %s9584_s26 = scalar_lea.vmem %s9583_s23, 32 }
 0x171   : > { %v11464_v41 = vsel %vm917_vm8, %v957_v40, %v11337_v52  ;;  %v11467_v8 = vmul.u32.u64.low 3435973837, %v11422_v3  ;;  %v11468_v50 = vmul.u32.u64.high 3435973837, %v11422_v3, %v11467_v8  ;;  %vm1509_vm2 = vcmp.ne.s32.totalorder %v11441_v47, 0  ;;  %v2710_v59 = vpop.permute.xlu1 %2709  ;;  %9106 = vmatprep.subr.bf16.mxu0 %v9479_v43  ;;  %p9585_p0 = scmp.lt.s32.totalorder %s17482_s17, %s9583_s23  ;;  %p9586_p1 = scmp.lt.s32.totalorder %s9584_s26, %s9578_s13 }
 0x172   : > { %17955 = vst [vmem:[#allocation34_spill] sm:$0xff] %v11464_v41  ;;  %vm1549_vm13 = vcmp.lt.s32.totalorder %v11441_v47, 0  ;;  %v1187_v53 = vsub.s32 0, %v11430_v31  ;;  %v11485_v52 = vadd.s32 144, %v10358_v0  ;;  %v1129_v45 = vsub.s32 0, %v1128_v10  ;;  %4393 = vrot.lane.b32.xlu0 %v11371_v17, %s9650_s14  ;;  %9107 = vmatpush3.bf16.msra.mxu0 %v9479_v43 }
 0x173   : > { %v11490_v39 = vmul.u32.u64.low 4042322161, %v11445_v60  ;;  %v11491_v62 = vmul.u32.u64.high 4042322161, %v11445_v60, %v11490_v39  ;;  %v1165_v12 = vsub.s32 0, %v11448_v19  ;;  %v1220_v7 = vsub.s32 0, %v11457_v63  ;;  %vm11533_vm5 = vmand %vm1549_vm13, %vm1509_vm2  ;;  %p9587_p2 = por %p9586_p1, %p9585_p0 }
 0x174   : > { %v11504_v21 = vadd.s32 4294967272, %v11464_v41  ;;  %vm840_vm12 = vcmp.ne.s32.totalorder %v558_v4, 0  ;;  %vm880_vm3 = vcmp.lt.s32.totalorder %v558_v4, 0  ;;  %v11521_v33 = vadd.s32 17, %v11441_v47 }
 0x175   : > { %v11526_v16 = vsel %vm1142_vm15, %v1151_v44, %v11390_v32  ;;  %v1181_v40 = vshrl.u32 %v11410_v25, 4  ;;  %v11538_v39 = vmin.u32 %v11430_v31, %v1187_v53  ;;  %v960_v46 = vadd.s32 320, %v558_v4  ;;  %v2708_v25 = vpop.permute.xlu0 %2707  ;;  %vm920_vm9 = vmand %vm880_vm3, %vm840_vm12  ;;  %v2759_v24 = vpop.permute.xlu1 %2758  ;;  %p9588_p3 = pnand %p9587_p2, %p9581_p13 }
 0x176   : > { %v11541_v29 = vmul.u32.u64.low 3435973837, %v11485_v52  ;;  %v11542_v22 = vmul.u32.u64.high 3435973837, %v11485_v52, %v11541_v29  ;;  %v17964_v32 = vmov 0   ;;  %v11551_v43 = vor.u32 %v4130_v30, %v4126_v9 }
 0x177   : > { %7766 = vmatprep.subr.bf16.mxu0 %v17964_v32  ;;  %v11555_v53 = vsel %vm1120_vm1, %v1129_v45, %v1128_v10  ;;  %v11558_v41 = vmin.u32 %v11448_v19, %v1165_v12  ;;  %v17966_v29 = vld [vmem:[#allocation10_spill] sm:$0xff]  ;;  %v11570_v57 = vmin.u32 %v11457_v63, %v1220_v7  ;;  %v1198_v30 = vsub.s32 0, %v11504_v21 }
 0x178   : > { %17965 = vst [vmem:[#allocation35_spill] sm:$0xff] %v11555_v53  ;;  %v2948_v55 = vsel %vm17599_vm6, %v17966_v29, %v11321_v13  ;;  %vm1512_vm10 = vcmp.ne.s32.totalorder %v11526_v16, 0  ;;  %vm1552_vm15 = vcmp.lt.s32.totalorder %v11526_v16, 0  ;;  %v11580_v13 = vadd.s32 17, %v11526_v16 }
 0x179   : > { %v534_v45 = vshrl.u32 %v11468_v50, 8  ;;  %vm1510_vm8 = vcmp.ne.s32.totalorder %v11555_v53, 0  ;;  %v1182_v12 = vmul.u32 17, %v1181_v40  ;;  %v11588_v9 = vsel %vm920_vm9, %v960_v46, %v558_v4  ;;  %v2757_v44 = vpop.permute.xlu0 %2756  ;;  %v2818_v40 = vpop.permute.xlu1 %2817 }
 0x17a   : > { %v11585_v7 = vmul.u32.u64.low 4042322161, %v11538_v39  ;;  %v11586_v29 = vmul.u32.u64.high 4042322161, %v11538_v39, %v11585_v7  ;;  %17967 = vst [vmem:[#allocation10_spill] sm:$0xff] %v11588_v9  ;;  %vm17968_vm1 = vcmask 48128   ;;  %v1159_v51 = vshrl.u32 %v11491_v62, 4 }
 0x17b   : > { %v2992_v10 = vsel %vm17968_vm1, %v2948_v55, %v11350_v14  ;;  %v11594_v58 = vmul.u32.u64.low 4042322161, %v11558_v41  ;;  %v11595_v18 = vmul.u32.u64.high 4042322161, %v11558_v41, %v11594_v58  ;;  %vm17969_vm2 = vcmask 72704   ;;  %v17971_v55 = vld [vmem:[#allocation9_spill] sm:$0xff] }
 0x17c   : > { %v3035_v50 = vsel %vm17969_vm2, %v2992_v10, %v11406_v54  ;;  %v11602_v4 = vmul.u32.u64.low 4042322161, %v11570_v57  ;;  %v11603_v46 = vmul.u32.u64.high 4042322161, %v11570_v57, %v11602_v4  ;;  %v11606_v14 = vmin.u32 %v11504_v21, %v1198_v30 }
 0x17d   : > { %v2946_v62 = vsel %vm17599_vm6, %v17971_v55, %v11339_v28  ;;  %vm17972_vm3 = vcmask 97280   ;;  %v11615_v54 = vadd.s32 4294967272, %v11588_v9  ;;  %v535_v10 = vmul.u32 320, %v534_v45 }
 0x17e   : > { %v3078_v58 = vsel %vm17972_vm3, %v3035_v50, %v11450_v20  ;;  %v2990_v7 = vsel %vm17968_vm1, %v2946_v62, %v11394_v37  ;;  %vm17973_vm2 = vcmask 121856   ;;  %vm1550_vm13 = vcmp.lt.s32.totalorder %v11555_v53, 0  ;;  %v2816_v50 = vpop.permute.xlu0 %2815  ;;  %v2905_v62 = vpop.permute.xlu1 %2904 }
 0x17f   : > { %v3121_v4 = vsel %vm17973_vm2, %v3078_v58, %v2710_v59  ;;  %v589_v30 = vshrl.u32 %v11542_v22, 8  ;;  %vm17974_vm6 = vcmask 72704   ;;  %vm17975_vm12 = vcmask 146432   ;;  %v17977_v59 = vld [vmem:[#allocation29_spill] sm:$0xff]  ;;  %v17978_v58 = vld [vmem:[#allocation26_spill] sm:$0xff] }
 0x180   : > { %v3033_v28 = vsel %vm17974_vm6, %v2990_v7, %v11436_v42  ;;  %v3164_v20 = vsel %vm17975_vm12, %v3121_v4, %v2759_v24  ;;  %v1183_v55 = vsub.s32 %v11354_v1, %v1182_v12  ;;  %v1160_v9 = vmul.u32 17, %v1159_v51  ;;  %vm17982_vm6 = vmmov %vm17973_vm2 }
 0x181   : > { %v3076_v45 = vsel %vm17972_vm3, %v3033_v28, %v11487_v34  ;;  %vm17976_vm9 = vcmask 171008   ;;  %v17979_v22 = vsel %vm11136_vm14, %v17977_v59, %v17978_v58  ;;  %vm17983_vm12 = vcmask 195584   ;;  %v17985_v34 = vld [vmem:[#allocation18_spill] sm:$0xff] }
 0x182   : > { %v3207_v37 = vsel %vm17976_vm9, %v3164_v20, %v2818_v40  ;;  %vm11634_vm1 = vcmp.lt.s32.totalorder %v17979_v22, 16  ;;  %v11639_v24 = vmul.u32.u64.low 4042322161, %v11606_v14  ;;  %v11640_v42 = vmul.u32.u64.high 4042322161, %v11606_v14, %v11639_v24  ;;  %vm17987_vm3 = vmmov %vm17976_vm9 }
 0x183   : > { %v3119_v51 = vsel %vm17982_vm6, %v3076_v45, %v2708_v25  ;;  %v11644_v1 = vsel %vm17983_vm12, %v3207_v37, %v2905_v62  ;;  %v1231_v38 = vsub.s32 0, %v11615_v54  ;;  %v536_v12 = vsub.s32 %v11422_v3, %v535_v10  ;;  %v2903_v45 = vpop.permute.xlu0 %2902  ;;  %v17988_v37 = vld [vmem:[#allocation19_spill] sm:$0xff]  ;;  %vm11679_vm6 = vmand %vm1552_vm15, %vm1512_vm10 }
 0x184   : > { %17984 = vst [vmem:[#allocation17_spill] sm:$0xff] %v11644_v1  ;;  %vm17986_vm14 = vcmask 146432   ;;  %v1192_v7 = vshrl.u32 %v11586_v29, 4  ;;  %v590_v4 = vmul.u32 320, %v589_v30  ;;  %v11653_v28 = vadd.s32 128, %v10358_v0  ;;  %v11664_v29 = vpop.permute.xlu1 %2261  ;;  %v17992_v30 = vld [vmem:[#allocation30_spill] sm:$0xff] }
 0x185   : > { %v3162_v40 = vsel %vm17986_vm14, %v3119_v51, %v2757_v44  ;;  %v17605_v20 = vrot.slane %v11644_v1, 3  ;;  %v11660_v62 = vadd.s32 17, %v11555_v53  ;;  %v1170_v3 = vshrl.u32 %v11595_v18, 4  ;;  %vm17990_vm14 = vmmov %vm17983_vm12 }
 0x186   : > { %v3205_v25 = vsel %vm17987_vm3, %v3162_v40, %v2816_v50  ;;  %v17993_v50 = vld [vmem:[#allocation28_spill] sm:$0xff]  ;;  %v17997_v22 = vmov 0  ;;  %v1184_v18 = vsub.s32 0, %v1183_v55  ;;  %v1161_v24 = vsub.s32 %v11445_v60, %v1160_v9  ;;  %vm11691_vm12 = vmand %vm1550_vm13, %vm1510_vm8 }
 0x187   : > { %17989 = vst [vmem:[#allocation9_spill] sm:$0xff] %v11660_v62  ;;  %v3248_v44 = vsel %vm17990_vm14, %v3205_v25, %v2903_v45  ;;  %v17994_v59 = vsel %vm11173_vm4, %v17992_v30, %v17993_v50  ;;  %v17998_v22 = vsel %vm11679_vm6, 4294967295, %v17997_v22  ;;  %v1225_v51 = vshrl.u32 %v11603_v46, 4  ;;  %v17999_v25 = vld [vmem:[#allocation20_spill] sm:$0xff]  ;;  %v11705_v30 = vpop.permute.xlu0 %2259 }
 0x188   : > { %vm11671_vm3 = vcmp.lt.s32.totalorder %v17994_v59, 16  ;;  %v3321_v40 = vrot.slane %v3248_v44, 3  ;;  %v18000_v45 = vmov 0  ;;  %v11696_v10 = vmin.u32 %v11615_v54, %v1231_v38 }
 0x189   : > { %v18001_v45 = vsel %vm11691_vm12, 4294967295, %v18000_v45  ;;  %vm838_vm10 = vcmp.ne.s32.totalorder %v536_v12, 0  ;;  %vm878_vm15 = vcmp.lt.s32.totalorder %v536_v12, 0  ;;  %v1193_v60 = vmul.u32 17, %v1192_v7 }
 0x18a   : > { %v11699_v9 = vsub.s32 %v11485_v52, %v590_v4  ;;  %v11702_v46 = vmul.u32.u64.low 3435973837, %v11653_v28  ;;  %v11703_v44 = vmul.u32.u64.high 3435973837, %v11653_v28, %v11702_v46  ;;  %v18002_v50 = vrot.slane %v11307_v49, 3 }
 0x18b   : > { %vm18003_vm8 = vcmask 1044480   ;;  %vm18005_vm4 = vcmp.lt.s32.totalorder %v17970_v26, 296  ;;  %vm18006_vm14 = vcmp.ge.s32.totalorder %v17970_v26, 24  ;;  %v18009_v7 = vsel %vm11474_vm0, %v11219_v48, %v11185_v27 }
 0x18c   : > { %v3322_v59 = vsel %vm18003_vm8, %v18002_v50, %v3321_v40  ;;  %vm18004_vm13 = vmmov %vm18003_vm8  ;;  %vm11726_vm2 = vcmp.lt.s32.totalorder %v18009_v7, 16  ;;  %v1171_v4 = vmul.u32 17, %v1170_v3  ;;  %v958_v46 = vadd.s32 320, %v536_v12 }
 0x18d   : > { %v3324_v38 = vsel %vm18004_vm13, %v3321_v40, %v17605_v20  ;;  %vm11717_vm9 = vmand %vm18006_vm14, %vm18005_vm4  ;;  %vm18012_vm8 = vcmask 220160   ;;  %v11731_v40 = vpop.permute.xlu1 %2363  ;;  %vm18013_vm0 = vcmp.lt.s32.totalorder %v11294_v36, 0  ;;  %v1226_v11 = vmul.u32 17, %v1225_v51  ;;  %v11769_v51 = vld [vmem:[%s17523_s2] ss:$0 sm:$0xff] }
 0x18e   : > { %9088 = vmatprep.mubr.msk.bf16.mxu0 %vm18012_vm8, %v3322_v59  ;;  %v11743_v48 = vsel %vm18013_vm0, %v1184_v18, %v1183_v55  ;;  %vm11747_vm4 = vmand %vm878_vm15, %vm838_vm10  ;;  %v18017_v50 = vsel %vm11498_vm11, %v11222_v15, %v11189_v23  ;;  %v1162_v36 = vsub.s32 0, %v1161_v24  ;;  %v11772_v56 = vsub.s32 %v11538_v39, %v1193_v60  ;;  %v11777_v15 = vpop.permute.xlu0 %2361  ;;  %v9066_v60 = vpop.f32.mrf.mxu0  ;;  %v9485_v59 = vld [vmem:[%s17524_s3 + $0x30] sm:$0xff]  }
 0x18f   : > { %vm18016_vm14 = vmmov %vm18012_vm8  ;;  %vm11757_vm13 = vcmp.lt.s32.totalorder %v18017_v50, 16  ;;  %vm1153_vm8 = vcmp.lt.s32.totalorder %v11331_v35, 0  ;;  %v11763_v55 = vmul.u32.u64.low 4042322161, %v11696_v10  ;;  %v11764_v18 = vmul.u32.u64.high 4042322161, %v11696_v10, %v11763_v55 }
 0x190   : > { %9089 = vmatmul.mubr.msk.bf16.gmra.mxu0 %vm18016_vm14, %v3324_v38  ;;  %v1203_v23 = vshrl.u32 %v11640_v42, 4  ;;  %vm843_vm11 = vcmp.ne.s32.totalorder %v11699_v9, 0  ;;  %vm11783_vm15 = vmand %vm11717_vm9, %vm11634_vm1  ;;  %v18020_v38 = vmov 0  ;;  %v11790_v39 = vsub.s32 %v11558_v41, %v1171_v4 }
 0x191   : > { %v18021_v38 = vsel %vm11783_vm15, 4294967295, %v18020_v38  ;;  %v11794_v42 = vsel %vm11747_vm4, %v958_v46, %v536_v12  ;;  %v11796_v7 = vpop.permute.xlu1 %2438  ;;  %vm18024_vm10 = vcmp.lt.s32.totalorder %v17985_v34, 296  ;;  %vm18025_vm1 = vcmp.ge.s32.totalorder %v17985_v34, 24  ;;  %v3450_v34 = vpop.f32.mrf.mxu0 }
 0x192   : > { %18022 = vst [vmem:[#allocation29_spill] sm:$0xff] %v18021_v38  ;;  %18023 = vst [vmem:[#allocation26_spill] sm:$0xff] %v11794_v42  ;;  %v11807_v52 = vadd.s32 17, %v11743_v48  ;;  %v1227_v41 = vsub.s32 %v11570_v57, %v1226_v11  ;;  %v963_v4 = vadd.s32 320, %v11699_v9  ;;  %v11812_v12 = vadd.s32 152, %v10358_v0  ;;  %v11851_v20 = vpop.permute.xlu0 %2436 }
 0x193   : > { %vm11802_vm9 = vmand %vm18025_vm1, %vm18024_vm10  ;;  %v3459_v46 = vadd.f32 %v9066_v60, %v11769_v51  ;;  %v11817_v3 = vsel %vm1153_vm8, %v1162_v36, %v1161_v24  ;;  %vm1186_vm4 = vcmp.lt.s32.totalorder %v11430_v31, 0  ;;  %vm1164_vm10 = vcmp.lt.s32.totalorder %v11448_v19, 0  ;;  %v9067_v27 = vpop.f32.mrf.mxu0 }
 0x194   : > { %vm18028_vm1 = vcmp.lt.s32.totalorder %v11699_v9, 0  ;;  %vm18031_vm0 = vcmp.lt.s32.totalorder %v17988_v37, 296  ;;  %vm18032_vm12 = vcmp.ge.s32.totalorder %v17988_v37, 24  ;;  %v1195_v24 = vsub.s32 0, %v11772_v56  ;;  %vm11846_vm8 = vmand %vm11802_vm9, %vm11671_vm3 }
 0x195   : > { %vm11825_vm14 = vmand %vm18028_vm1, %vm843_vm11  ;;  %v1204_v11 = vmul.u32 17, %v1203_v23  ;;  %v11839_v50 = vadd.s32 4294967272, %v11794_v42  ;;  %v567_v36 = vshrl.u32 %v11703_v44, 8  ;;  %v3611_v55 = vmax.f32 %v3459_v46, 0.0  ;;  %v11855_v26 = vpop.permute.xlu1 %2483  ;;  %v9484_v46 = vld [vmem:[%s17524_s3 + $0x38] sm:$0xff]  }
 0x196   : > { %vm11833_vm6 = vmand %vm18032_vm12, %vm18031_vm0  ;;  %v18035_v60 = vmov 0  ;;  %v3451_v37 = vadd.f32 %v11769_v51, %v3450_v34  ;;  %v1173_v23 = vsub.s32 0, %v11790_v39  ;;  %vm1219_vm12 = vcmp.lt.s32.totalorder %v11457_v63, 0  ;;  %5537 = vmatpush1.bf16.msra.mxu1 %v9484_v46  ;;  %v11908_v62 = vpop.permute.xlu0 %2481  ;;  %v9486_v63 = vld [vmem:[%s17524_s3 + $0x28] sm:$0xff]  }
 0x197   : > { %v18036_v60 = vsel %vm11846_vm8, 4294967295, %v18035_v60  ;;  %vm18038_vm11 = vcmp.lt.s32.totalorder %v17999_v25, 296  ;;  %vm18039_vm0 = vcmp.ge.s32.totalorder %v17999_v25, 24  ;;  %v1228_v44 = vsub.s32 0, %v1227_v41  ;;  %5538 = vmatprep.subr.bf16.mxu1 %v17964_v32 }
 0x198   : > { %18037 = vst [vmem:[#allocation18_spill] sm:$0xff] %v18036_v60  ;;  %vm11861_vm1 = vmand %vm18039_vm0, %vm18038_vm11  ;;  %v11868_v17 = vsel %vm11825_vm14, %v963_v4, %v11699_v9  ;;  %v11874_v34 = vmul.u32.u64.low 3435973837, %v11812_v12  ;;  %v11875_v42 = vmul.u32.u64.high 3435973837, %v11812_v12, %v11874_v34  ;;  %v11879_v25 = vsel %vm11783_vm15, %v3611_v55, 0.0  ;;  %v18209_v9 = vld [vmem:[#allocation32_spill] sm:$0xff] }
 0x199   : > { %18042 = vst [vmem:[#allocation19_spill] sm:$0xff] %v11868_v17  ;;  %18043 = vst [vmem:[#allocation31_spill] sm:$0xff] %v11879_v25  ;;  %v3609_v1 = vmax.f32 %v3451_v37, 0.0  ;;  %v3462_v53 = vadd.f32 %v9067_v27, %v11769_v51  ;;  %vm18044_vm3 = vcmp.ne.s32.totalorder %v11743_v48, 0  ;;  %vm18045_vm14 = vcmp.lt.s32.totalorder %v11743_v48, 0  ;;  %v3453_v27 = vpop.f32.mrf.mxu0 }
 0x19a   : > { %vm11886_vm9 = vmand %vm18045_vm14, %vm18044_vm3  ;;  %v1236_v4 = vshrl.u32 %v11764_v18, 4  ;;  %v8913_v57 = vpack.c.bf16 %v11879_v25, %v11879_v25  ;;  %v18048_v55 = vmov 0  ;;  %v1205_v37 = vsub.s32 %v11606_v14, %v1204_v11  ;;  %5539 = vmatpush1.bf16.msra.mxu1 %v9485_v59 }
 0x19b   : > { %vm11897_vm11 = vmand %vm11833_vm6, %vm11726_vm2  ;;  %v1209_v34 = vsub.s32 0, %v11839_v50  ;;  %v568_v38 = vmul.u32 320, %v567_v36  ;;  %v11905_v18 = vsel %vm11846_vm8, %v3609_v1, 0.0  ;;  %v3612_v25 = vmax.f32 %v3462_v53, 0.0  ;;  %v2714_v1 = vpop.permute.xlu1 %2713  ;;  %5540 = vmatprep.subr.bf16.mxu1 %v17964_v32 }
 0x19c   : > { %v18049_v55 = vsel %vm11897_vm11, 4294967295, %v18048_v55  ;;  %18051 = vst [vmem:[#allocation28_spill] sm:$0xff] %v11905_v18  ;;  %v3454_v49 = vadd.f32 %v11769_v51, %v3453_v27  ;;  %v11911_v35 = vadd.s32 4294967272, %v11868_v17  ;;  %vm18052_vm2 = vcmask 257024   ;;  %vm11921_vm6 = vmand %vm11861_vm1, %vm11757_vm13 }
 0x19d   : > { %18050 = vst [vmem:[#allocation30_spill] sm:$0xff] %v18049_v55  ;;  %3931 = vst.msk [vmem:[#allocation2 + $0x14] sm:$0xf] %vm18052_vm2, %v8913_v57  ;;  %v8911_v14 = vpack.c.bf16 %v11905_v18, %v11905_v18  ;;  %v18053_v53 = vmov 0  ;;  %v11930_v36 = vadd.s32 17, %v11817_v3  ;;  %v11935_v46 = vsel %vm1186_vm4, %v1195_v24, %v11772_v56 }
 0x19e   : > { %v18054_v53 = vsel %vm11921_vm6, 4294967295, %v18053_v53  ;;  %v11942_v58 = vsel %vm11897_vm11, %v3612_v25, 0.0  ;;  %v3610_v57 = vmax.f32 %v3454_v49, 0.0  ;;  %v11947_v27 = vsel %vm1164_vm10, %v1173_v23, %v11790_v39  ;;  %vm18057_vm13 = vmmov %vm18052_vm2  ;;  %v2712_v39 = vpop.permute.xlu0 %2711  ;;  %5541 = vmatpush1.bf16.msra.mxu1 %v9486_v63 }
 0x19f   : > { %18055 = vst [vmem:[#allocation20_spill] sm:$0xff] %v18054_v53  ;;  %18056 = vst [vmem:[#allocation36_spill] sm:$0xff] %v11942_v58  ;;  %v1237_v11 = vmul.u32 17, %v1236_v4  ;;  %v8914_v31 = vpack.c.bf16 %v11942_v58, %v11942_v58  ;;  %v11954_v56 = vsel %vm1219_vm12, %v1228_v44, %v1227_v41  ;;  %v1206_v24 = vsub.s32 0, %v1205_v37  ;;  %v18059_v41 = vld [vmem:[#allocation12_spill] sm:$0xff]  ;;  %v2763_v49 = vpop.permute.xlu1 %2762  ;;  %5542 = vmatprep.subr.bf16.mxu1 %v17964_v32 }
 0x1a0   : > { %3929 = vst.msk [vmem:[#allocation2 + $0xc] sm:$0xf] %vm18057_vm13, %v8911_v14  ;;  %v11957_v25 = vmin.u32 %v11839_v50, %v1209_v34  ;;  %v11961_v19 = vsel %vm11921_vm6, %v3610_v57, 0.0  ;;  %vm1197_vm4 = vcmp.lt.s32.totalorder %v11504_v21, 0  ;;  %v1264_v23 = vsub.s32 0, %v11911_v35  ;;  %vm18061_vm12 = vmmov %vm18052_vm2 }
 0x1a1   : > { %18058 = vst [vmem:[#allocation37_spill] sm:$0xff] %v11961_v19  ;;  %v11966_v4 = vsub.s32 %v11653_v28, %v568_v38  ;;  %vm18060_vm10 = vcmask 23552   ;;  %3932 = vst.msk [vmem:[#allocation2 + $0x18] sm:$0xf] %vm18061_vm12, %v8914_v31  ;;  %v8912_v34 = vpack.c.bf16 %v11961_v19, %v11961_v19  ;;  %v11979_v14 = vadd.s32 17, %v11935_v46  ;;  %v18062_v31 = vld [vmem:[#allocation11_spill] sm:$0xff] }
 0x1a2   : > { %v2952_v44 = vsel %vm18060_vm10, %v18059_v41, %v11664_v29  ;;  %v11982_v28 = vadd.s32 136, %v10358_v0  ;;  %v11985_v38 = vadd.s32 17, %v11947_v27  ;;  %v11988_v59 = vadd.s32 17, %v11954_v56  ;;  %vm18063_vm0 = vmmov %vm18060_vm10 }
 0x1a3   : > { %v11991_v29 = vsub.s32 %v11696_v10, %v1237_v11  ;;  %v600_v57 = vshrl.u32 %v11875_v42, 8  ;;  %v2950_v41 = vsel %vm18063_vm0, %v18062_v31, %v11705_v30  ;;  %vm18064_vm1 = vmmov %vm18052_vm2  ;;  %v12000_v58 = vsel %vm1197_vm4, %v1206_v24, %v1205_v37  ;;  %v9487_v10 = vld [vmem:[%s17524_s3 + $0x20] sm:$0xff]   ;;  %v2761_v30 = vpop.permute.xlu0 %2760  ;;  %v4011_v11 = vld [vmem:[#allocation2 + $0x8] sm:$0x8]  ;;  %v2822_v24 = vpop.permute.xlu1 %2821 }
 0x1a4   : > { %3930 = vst.msk [vmem:[#allocation2 + $0x10] sm:$0xf] %vm18064_vm1, %v8912_v34  ;;  %v12003_v19 = vmul.u32.u64.low 4042322161, %v11957_v25  ;;  %v12004_v18 = vmul.u32.u64.high 4042322161, %v11957_v25, %v12003_v19  ;;  %vm18065_vm3 = vcmask 48128   ;;  %v12013_v34 = vmin.u32 %v11911_v35, %v1264_v23  ;;  %5543 = vmatpush1.bf16.msra.mxu1 %v9487_v10 }
 0x1a5   : > { %v2996_v42 = vsel %vm18065_vm3, %v2952_v44, %v11731_v40  ;;  %vm841_vm14 = vcmp.ne.s32.totalorder %v11966_v4, 0  ;;  %vm881_vm2 = vcmp.lt.s32.totalorder %v11966_v4, 0  ;;  %vm18066_vm13 = vmmov %vm18065_vm3  ;;  %vm18067_vm4 = vcmask 72704   ;;  %v18068_v19 = vld [vmem:[#allocation23_spill] sm:$0xff]  ;;  %5544 = vmatprep.subr.bf16.mxu1 %v17964_v32 }
 0x1a6   : > { %v2994_v21 = vsel %vm18066_vm13, %v2950_v41, %v11777_v15  ;;  %v3039_v37 = vsel %vm18067_vm4, %v2996_v42, %v11796_v7  ;;  %v12025_v40 = vmul.u32.u64.low 3435973837, %v11982_v28  ;;  %v12026_v23 = vmul.u32.u64.high 3435973837, %v11982_v28, %v12025_v40  ;;  %vm18069_vm0 = vmmov %vm18067_vm4  ;;  %v18071_v15 = vld [vmem:[#allocation24_spill] sm:$0xff] }
 0x1a7   : > { %v3037_v63 = vsel %vm18069_vm0, %v2994_v21, %v11851_v20  ;;  %vm18070_vm1 = vcmask 97280   ;;  %v3972_v31 = vld [vmem:[#allocation2 + $0xc] sm:$0xf]  ;;  %v961_v7 = vadd.s32 320, %v11966_v4  ;;  %v601_v41 = vmul.u32 320, %v600_v57  ;;  %v18075_v20 = vld [vmem:[#allocation25_spill] sm:$0xff]  ;;  %vm12049_vm3 = vmand %vm881_vm2, %vm841_vm14  ;;  %v2820_v21 = vpop.permute.xlu0 %2819  ;;  %v2909_v60 = vpop.permute.xlu1 %2908 }
 0x1a8   : > { %v3082_v44 = vsel %vm18070_vm1, %v3039_v37, %v11855_v26  ;;  %vm18072_vm4 = vmmov %vm18070_vm1  ;;  %vm18073_vm10 = vcmask 121856   ;;  %v12039_v40 = vcombine.low %v11205_v5, %v3972_v31  ;;  %v12043_v26 = vcombine.low %v4011_v11, %v3972_v31  ;;  %v9488_v5 = vld [vmem:[%s17524_s3 + $0x18] sm:$0xff]   ;;  %v3974_v11 = vld [vmem:[#allocation2 + $0x14] sm:$0xf] }
 0x1a9   : > { %v3080_v42 = vsel %vm18072_vm4, %v3037_v63, %v11908_v62  ;;  %v3125_v55 = vsel %vm18073_vm10, %v3082_v44, %v2714_v1  ;;  %vm18078_vm4 = vcmask 146432   ;;  %v12058_v37 = vld [vmem:[#allocation2 + $0x18] sm:$0xf]  ;;  %vm18080_vm2 = vcmask 171008   ;;  %5545 = vmatpush1.bf16.msra.mxu1 %v9488_v5 }
 0x1aa   : > { %18074 = vst [vmem:[#allocation12_spill] sm:$0xff] %v12039_v40  ;;  %v3123_v62 = vsel %vm18073_vm10, %v3080_v42, %v2712_v39  ;;  %v3168_v1 = vsel %vm18078_vm4, %v3125_v55, %v2763_v49  ;;  %v12061_v63 = vmul.u32.u64.low 4042322161, %v12013_v34  ;;  %v12062_v44 = vmul.u32.u64.high 4042322161, %v12013_v34, %v12061_v63  ;;  %vm18079_vm14 = vmmov %vm18078_vm4  ;;  %5546 = vmatprep.subr.bf16.mxu1 %v17964_v32 }
 0x1ab   : > { %v3166_v10 = vsel %vm18079_vm14, %v3123_v62, %v2761_v30  ;;  %v3211_v53 = vsel %vm18080_vm2, %v3168_v1, %v2822_v24  ;;  %v8711_v17 = vcombine.low %v3974_v11, %v12058_v37  ;;  %v4133_v39 = vshll.u32 %v12039_v40, 16  ;;  %vm18084_vm4 = vmmov %vm18080_vm2  ;;  %v3973_v24 = vld [vmem:[#allocation2 + $0x10] sm:$0xf] }
 0x1ac   : > { %v18081_v55 = vsel %vm11516_vm7, %v11453_v61, %v11386_v6  ;;  %v3209_v42 = vsel %vm18084_vm4, %v3166_v10, %v2820_v21  ;;  %vm18085_vm0 = vcmask 195584   ;;  %v18087_v62 = vld [vmem:[#allocation27_spill] sm:$0xff]  ;;  %v12088_v6 = vsel %vm12049_vm3, %v961_v7, %v11966_v4 }
 0x1ad   : > { %vm12074_vm10 = vcmp.lt.s32.totalorder %v18081_v55, 16  ;;  %v12080_v30 = vsel %vm18085_vm0, %v3211_v53, %v2909_v60  ;;  %18088 = vst [vmem:[#allocation23_spill] sm:$0xff] %v12088_v6  ;;  %v12091_v61 = vsub.s32 %v11812_v12, %v601_v41  ;;  %v12093_v2 = vrot.slane %v8711_v17, 5  ;;  %v9489_v12 = vld [vmem:[%s17524_s3 + $0x10] sm:$0xff]  }
 0x1ae   : > { %18086 = vst [vmem:[#allocation11_spill] sm:$0xff] %v12080_v30  ;;  %v12095_v1 = vrot.slane %v4133_v39, 1  ;;  %v12097_v60 = vcombine.low %v3972_v31, %v3973_v24  ;;  %v18089_v53 = vsel %vm11533_vm5, %v11521_v33, %v11441_v47  ;;  %v4447_v4 = vshll.u32 %v12043_v26, 16  ;;  %v2907_v31 = vpop.permute.xlu0 %2906  ;;  %5547 = vmatpush1.bf16.msra.mxu1 %v9489_v12 }
 0x1af   : > { %vm12104_vm7 = vcmp.lt.s32.totalorder %v18089_v53, 16  ;;  %v17627_v7 = vrot.slane %v12080_v30, 3  ;;  %v4525_v41 = vshrl.u32 %v8711_v17, 16  ;;  %v4528_v57 = vshll.u32 %v8711_v17, 16  ;;  %4749 = vrot.lane.b32.xlu1 %v12093_v2, %s9650_s14  ;;  %v12131_v17 = vpop.permute.xlu1 %2265  ;;  %5548 = vmatprep.subr.bf16.mxu1 %v17964_v32 }
 0x1b0   : > { %vm18092_vm3 = vnez %v17998_v22  ;;  %v12122_v8 = vcombine.low %v3973_v24, %v3974_v11  ;;  %v3252_v5 = vsel %vm18085_vm0, %v3209_v42, %v2907_v31  ;;  %vm18097_vm4 = vsmask.f32 7424  ;;  %v18101_v11 = vld [vmem:[#allocation35_spill] sm:$0xff] }
 0x1b1   : > { %v18093_v47 = vsel %vm18092_vm3, %v11580_v13, %v11526_v16  ;;  %v4136_v22 = vsel %vm18097_vm4, %v11551_v43, %v12095_v1  ;;  %v12134_v16 = vrot.slane %v12097_v60, 5  ;;  %vm18099_vm3 = vnez %v18001_v45  ;;  %v18100_v13 = vld [vmem:[#allocation9_spill] sm:$0xff]  ;;  %v18105_v45 = vld [vmem:[#allocation22_spill] sm:$0xff] }
 0x1b2   : > { %vm12118_vm5 = vcmp.lt.s32.totalorder %v18093_v47, 16  ;;  %18096 = vst [vmem:[#allocation24_spill] sm:$0xff] %v12122_v8  ;;  %v18102_v63 = vsel %vm18099_vm3, %v18100_v13, %v18101_v11  ;;  %v578_v39 = vshrl.u32 %v12026_v23, 8  ;;  %v3325_v55 = vrot.slane %v3252_v5, 3  ;;  %4292 = vrot.lane.b32.xlu0 %v4136_v22, %s9651_s24  ;;  %v9490_v23 = vld [vmem:[%s17524_s3 + $0x8] sm:$0xff]  }
 0x1b3   : > { %18098 = vst [vmem:[#allocation25_spill] sm:$0xff] %v12134_v16  ;;  %vm12141_vm1 = vcmp.lt.s32.totalorder %v18102_v63, 16  ;;  %v4527_v43 = vrot.slane %v4525_v41, 5  ;;  %v4530_v42 = vrot.slane %v4528_v57, 6  ;;  %vm18106_vm3 = vcmask 1042432   ;;  %v12160_v41 = vpop.permute.xlu0 %2263  ;;  %v18107_v57 = vld [vmem:[#allocation17_spill] sm:$0xff]  ;;  %5549 = vmatpush1.bf16.msra.mxu1 %v9490_v23 }
 0x1b4   : > { %v4356_v24 = vsel %vm18106_vm3, %v18105_v45, %v12134_v16  ;;  %v4141_v53 = vshll.u32 %v12122_v8, 16  ;;  %v4449_v31 = vrot.slane %v4447_v4, 1  ;;  %v18108_v47 = vrot.slane %v18107_v57, 3  ;;  %v9070_v45 = vpop.f32.mrf.mxu0  ;;  %5550 = vmatprep.subr.bf16.mxu1 %v17964_v32 }
 0x1b5   : > { %vm18109_vm4 = vcmask 1044480   ;;  %vm18110_vm3 = vcmp.lt.s32.totalorder %v18068_v19, 296  ;;  %vm18111_vm0 = vcmp.ge.s32.totalorder %v18068_v19, 24  ;;  %v12173_v22 = vor.u32 %v4530_v42, %v4527_v43  ;;  %4395 = vrot.lane.b32.xlu1 %v4356_v24, %s9650_s14  ;;  %v12184_v19 = vpop.permute.xlu1 %2367 }
 0x1b6   : > { %v3326_v5 = vsel %vm18109_vm4, %v18108_v47, %v3325_v55  ;;  %vm12169_vm2 = vmand %vm18111_vm0, %vm18110_vm3  ;;  %v4517_v13 = vshrl.u32 %v12097_v60, 16  ;;  %vm18115_vm0 = vcmask 220160   ;;  %vm18116_vm3 = vcmp.lt.s32.totalorder %v18071_v15, 296 }
 0x1b7   : > { %vm18114_vm13 = vmmov %vm18109_vm4  ;;  %9092 = vmatprep.mubr.msk.bf16.mxu0 %vm18115_vm0, %v3326_v5  ;;  %vm18117_vm14 = vcmp.ge.s32.totalorder %v18071_v15, 24  ;;  %v12194_v63 = vrot.slane %v4141_v53, 1  ;;  %v4520_v43 = vshll.u32 %v12097_v60, 16  ;;  %v1239_v42 = vsub.s32 0, %v11991_v29  ;;  %4774 = vrot.lane.b32.xlu0 %v12173_v22, %s9652_s27 }
 0x1b8   : > { %v3328_v12 = vsel %vm18114_vm13, %v3325_v55, %v17627_v7  ;;  %vm12190_vm11 = vmand %vm18117_vm14, %vm18116_vm3  ;;  %v4445_v55 = vshrl.u32 %v12043_v26, 16  ;;  %vm18121_vm3 = vcmp.lt.s32.totalorder %v18075_v20, 296  ;;  %vm18122_vm4 = vcmp.ge.s32.totalorder %v18075_v20, 24 }
 0x1b9   : > { %vm18120_vm14 = vmmov %vm18115_vm0  ;;  %v12215_v26 = vadd.s32 17, %v12000_v58  ;;  %v1214_v60 = vshrl.u32 %v12004_v18, 4  ;;  %v1269_v24 = vshrl.u32 %v12062_v44, 4  ;;  %v964_v53 = vadd.s32 320, %v12091_v61  ;;  %v9492_v18 = vld [vmem:[%s17524_s3] sm:$0xff]   ;;  %v12257_v30 = vpop.permute.xlu1 %2442 }
 0x1ba   : > { %9093 = vmatmul.mubr.msk.bf16.gmra.mxu0 %vm18120_vm14, %v3328_v12  ;;  %vm12208_vm12 = vmand %vm18122_vm4, %vm18121_vm3  ;;  %v3475_v57 = vadd.f32 %v9070_v45, %v11769_v51  ;;  %v4450_v20 = vor.u32 %v4449_v31, %v4445_v55  ;;  %v12222_v47 = vadd.s32 4294967272, %v12088_v6  ;;  %vm18125_vm4 = vcmp.ne.s32.totalorder %v12091_v61, 0  ;;  %v3466_v31 = vpop.f32.mrf.mxu0  ;;  %v12243_v55 = vpop.permute.xlu0 %2365  ;;  %5551 = vmatpush1.bf16.msra.mxu1 %v9492_v18 }
 0x1bb   : > { %vm18126_vm14 = vcmp.lt.s32.totalorder %v12091_v61, 0  ;;  %v579_v12 = vmul.u32 320, %v578_v39  ;;  %vm12239_vm0 = vmand %vm12169_vm2, %vm12074_vm10  ;;  %v18129_v44 = vmov 0  ;;  %v4137_v23 = vshrl.u32 %v12039_v40, 16  ;;  %5552 = vmatprep.subr.bf16.mxu1 %v17964_v32 }
 0x1bc   : > { %vm12228_vm3 = vmand %vm18126_vm14, %vm18125_vm4  ;;  %v18130_v44 = vsel %vm12239_vm0, 4294967295, %v18129_v44  ;;  %vm18132_vm4 = vcmask 1042432   ;;  %v4519_v45 = vrot.slane %v4517_v13, 5  ;;  %v4522_v7 = vrot.slane %v4520_v43, 6 }
 0x1bd   : > { %18131 = vst [vmem:[#allocation27_spill] sm:$0xff] %v18130_v44  ;;  %v12248_v39 = vsel %vm18132_vm4, %v12134_v16, %v12093_v2  ;;  %v3615_v49 = vmax.f32 %v3475_v57, 0.0  ;;  %v3467_v4 = vadd.f32 %v11769_v51, %v3466_v31  ;;  %vm18134_vm10 = vsmask.f32 7424 }
 0x1be   : > { %18133 = vst [vmem:[#allocation9_spill] sm:$0xff] %v12248_v39  ;;  %4397 = vrot.lane.b32.xlu1 %v12248_v39, %s9650_s14  ;;  %v4451_v6 = vsel %vm18134_vm10, %v4450_v20, %v12194_v63  ;;  %vm18135_vm2 = vcmp.lt.s32.totalorder %v18087_v62, 296  ;;  %vm18136_vm14 = vcmp.ge.s32.totalorder %v18087_v62, 24  ;;  %vm18139_vm13 = vcmp.lt.s32.totalorder %v11615_v54, 0  ;;  %vm12276_vm10 = vmand %vm12190_vm11, %vm12104_vm7  ;;  %v9071_v20 = vpop.f32.mrf.mxu0  ;;  %v12311_v15 = vpop.permute.xlu0 %2440 }
 0x1bf   : > { %vm12263_vm4 = vmand %vm18136_vm14, %vm18135_vm2  ;;  %v12270_v43 = vsel %vm18139_vm13, %v1239_v42, %v11991_v29  ;;  %v18141_v57 = vmov 0  ;;  %4468 = vrot.lane.b32.xlu0 %v4451_v6, %s9652_s27  ;;  %v4139_v62 = vor.u32 %v4137_v23, %v12095_v1  ;;  %v1215_v31 = vmul.u32 17, %v1214_v60  ;;  %v12325_v23 = vpop.permute.xlu1 %2487 }
 0x1c0   : > { %18140 = vst [vmem:[#allocation35_spill] sm:$0xff] %v12270_v43  ;;  %v18142_v57 = vsel %vm12276_vm10, 4294967295, %v18141_v57  ;;  %v1270_v39 = vmul.u32 17, %v1269_v24  ;;  %v12285_v54 = vsel %vm12228_vm3, %v964_v53, %v12091_v61  ;;  %v12289_v29 = vsel %vm12239_vm0, %v3615_v49, 0.0  ;;  %vm12295_vm11 = vmand %vm12208_vm12, %vm12118_vm5  ;;  %v3469_v42 = vpop.f32.mrf.mxu0 }
 0x1c1   : > { %18143 = vst [vmem:[#allocation22_spill] sm:$0xff] %v18142_v57  ;;  %18144 = vst [vmem:[#allocation17_spill] sm:$0xff] %v12285_v54  ;;  %v3613_v21 = vmax.f32 %v3467_v4, 0.0  ;;  %v18146_v6 = vmov 0  ;;  %v3478_v1 = vadd.f32 %v9071_v20, %v11769_v51  ;;  %v1242_v11 = vsub.s32 0, %v12222_v47 }
 0x1c2   : > { %18145 = vst [vmem:[#allocation38_spill] sm:$0xff] %v12289_v29  ;;  %v18147_v6 = vsel %vm12295_vm11, 4294967295, %v18146_v6  ;;  %v8917_v61 = vpack.c.bf16 %v12289_v29, %v12289_v29  ;;  %vm12307_vm7 = vmand %vm12263_vm4, %vm12141_vm1  ;;  %v18149_v33 = vmov 0  ;;  %vm18152_vm12 = vsmask.f32 7424 }
 0x1c3   : > { %18148 = vst [vmem:[#allocation39_spill] sm:$0xff] %v18147_v6  ;;  %v18150_v33 = vsel %vm12307_vm7, 4294967295, %v18149_v33  ;;  %v4144_v60 = vsel %vm18152_vm12, %v4139_v62, %v12194_v63  ;;  %v4523_v24 = vor.u32 %v4522_v7, %v4519_v45  ;;  %v12316_v53 = vsub.s32 %v11982_v28, %v579_v12  ;;  %v9494_v12 = vld [vmem:[%s17524_s3 + $0x78] sm:$0xff]   ;;  %v9499_v28 = vld [vmem:[%s17524_s3 + $0x50] sm:$0xff]  }
 0x1c4   : > { %18151 = vst [vmem:[#allocation40_spill] sm:$0xff] %v18150_v33  ;;  %v12321_v10 = vsel %vm12276_vm10, %v3613_v21, 0.0  ;;  %v3616_v5 = vmax.f32 %v3478_v1, 0.0  ;;  %v3470_v18 = vadd.f32 %v11769_v51, %v3469_v42  ;;  %4294 = vrot.lane.b32.xlu1 %v4144_v60, %s9651_s24  ;;  %vm18154_vm1 = vcmp.ne.s32.totalorder %v11817_v3, 0  ;;  %5553 = vmatpush2.bf16.msra.mxu1 %v9494_v12  ;;  %v12375_v42 = vpop.permute.xlu0 %2485  ;;  %v9495_v12 = vld [vmem:[%s17524_s3 + $0x70] sm:$0xff]  }
 0x1c5   : > { %18153 = vst [vmem:[#allocation41_spill] sm:$0xff] %v12321_v10  ;;  %vm18155_vm5 = vcmp.lt.s32.totalorder %v11817_v3, 0  ;;  %v12336_v7 = vadd.s32 4294967272, %v12285_v54  ;;  %vm18158_vm3 = vcmask 257024   ;;  %v8915_v45 = vpack.c.bf16 %v12321_v10, %v12321_v10  ;;  %4700 = vrot.lane.b32.xlu0 %v4523_v24, %s9651_s24  ;;  %5554 = vmatprep.subr.bf16.mxu1 %v17964_v32 }
 0x1c6   : > { %vm12331_vm13 = vmand %vm18155_vm5, %vm18154_vm1  ;;  %3935 = vst.msk [vmem:[#allocation2 + $0x24] sm:$0xf] %vm18158_vm3, %v8917_v61  ;;  %vm18159_vm2 = vcmp.ne.s32.totalorder %v11935_v46, 0  ;;  %vm18160_vm14 = vcmp.lt.s32.totalorder %v11935_v46, 0  ;;  %v12356_v4 = vadd.s32 176, %v10358_v0  ;;  %v12360_v13 = vsel %vm12295_vm11, %v3616_v5, 0.0 }
 0x1c7   : > { %vm12349_vm4 = vmand %vm18160_vm14, %vm18159_vm2  ;;  %18163 = vst [vmem:[#allocation42_spill] sm:$0xff] %v12360_v13  ;;  %v3614_v20 = vmax.f32 %v3470_v18, 0.0  ;;  %vm18164_vm5 = vcmp.ne.s32.totalorder %v11947_v27, 0  ;;  %vm18165_vm3 = vcmp.lt.s32.totalorder %v11947_v27, 0  ;;  %v1216_v21 = vsub.s32 %v11957_v25, %v1215_v31 }
 0x1c8   : > { %vm12366_vm2 = vmand %vm18165_vm3, %vm18164_vm5  ;;  %v1271_v1 = vsub.s32 %v12013_v34, %v1270_v39  ;;  %vm18168_vm14 = vcmask 257024   ;;  %v8918_v61 = vpack.c.bf16 %v12360_v13, %v12360_v13  ;;  %vm18169_vm1 = vsmask.f32 2304  ;;  %v12395_v34 = vpop.permute.xlu1 %2717  ;;  %5555 = vmatpush2.bf16.msra.mxu1 %v9495_v12  ;;  %v9496_v12 = vld [vmem:[%s17524_s3 + $0x68] sm:$0xff]  }
 0x1c9   : > { %3933 = vst.msk [vmem:[#allocation2 + $0x1c] sm:$0xf] %vm18168_vm14, %v8915_v45  ;;  %v4532_v60 = vsel %vm18169_vm1, %v4523_v24, %v12173_v22  ;;  %vm18170_vm5 = vcmp.ne.s32.totalorder %v11954_v56, 0  ;;  %vm18171_vm3 = vcmp.lt.s32.totalorder %v11954_v56, 0  ;;  %v12392_v25 = vsel %vm12307_vm7, %v3614_v20, 0.0  ;;  %5556 = vmatprep.subr.bf16.mxu1 %v17964_v32 }
 0x1ca   : > { %vm12383_vm12 = vmand %vm18171_vm3, %vm18170_vm5  ;;  %18174 = vst [vmem:[#allocation43_spill] sm:$0xff] %v12392_v25  ;;  %4702 = vrot.lane.b32.xlu1 %v4532_v60, %s9651_s24  ;;  %vm18175_vm1 = vcmp.ne.s32.totalorder %v12000_v58, 0  ;;  %vm18176_vm5 = vcmp.lt.s32.totalorder %v12000_v58, 0  ;;  %v12406_v31 = vadd.s32 17, %v12270_v43  ;;  %v12409_v24 = vmin.u32 %v12222_v47, %v1242_v11 }
 0x1cb   : > { %vm12401_vm3 = vmand %vm18176_vm5, %vm18175_vm1  ;;  %v1275_v18 = vsub.s32 0, %v12336_v7  ;;  %3936 = vst.msk [vmem:[#allocation2 + $0x28] sm:$0xf] %vm18168_vm14, %v8918_v61  ;;  %v8916_v45 = vpack.c.bf16 %v12392_v25, %v12392_v25  ;;  %vm18179_vm1 = vcmp.ne.s32.totalorder %v12270_v43, 0  ;;  %vm18180_vm5 = vcmp.lt.s32.totalorder %v12270_v43, 0  ;;  %v9502_v43 = vld [vmem:[%s17524_s3 + $0x40] sm:$0xff]  }
 0x1cc   : > { %vm12422_vm11 = vmand %vm18180_vm5, %vm18179_vm1  ;;  %v18181_v20 = vmov 0  ;;  %v962_v11 = vadd.s32 320, %v12316_v53  ;;  %v12428_v60 = vmul.u32.u64.low 3435973837, %v12356_v4  ;;  %v12429_v13 = vmul.u32.u64.high 3435973837, %v12356_v4, %v12428_v60  ;;  %v2767_v61 = vpop.permute.xlu1 %2766  ;;  %5557 = vmatpush2.bf16.msra.mxu1 %v9496_v12 }
 0x1cd   : > { %v18182_v20 = vsel %vm12422_vm11, 4294967295, %v18181_v20  ;;  %v1217_v25 = vsub.s32 0, %v1216_v21  ;;  %v1272_v10 = vsub.s32 0, %v1271_v1  ;;  %vm18183_vm14 = vcmp.ne.s32.totalorder %v12316_v53, 0  ;;  %v2716_v60 = vpop.permute.xlu0 %2715  ;;  %5558 = vmatprep.subr.bf16.mxu1 %v17964_v32 }
 0x1ce   : > { %vm18184_vm1 = vcmp.lt.s32.totalorder %v12316_v53, 0  ;;  %vm18187_vm0 = vcmask 257024   ;;  %vm1208_vm7 = vcmp.lt.s32.totalorder %v11839_v50, 0  ;;  %v4145_v33 = vshrl.u32 %v12122_v8, 16 }
 0x1cf   : > { %vm12443_vm5 = vmand %vm18184_vm1, %vm18183_vm14  ;;  %3934 = vst.msk [vmem:[#allocation2 + $0x20] sm:$0xf] %vm18187_vm0, %v8916_v45  ;;  %vm1263_vm14 = vcmp.lt.s32.totalorder %v11911_v35, 0  ;;  %v18188_v45 = vld [vmem:[#allocation14_spill] sm:$0xff]  ;;  %vm18189_vm0 = vcmask 23552   ;;  %v12474_v35 = vmin.u32 %v12336_v7, %v1275_v18  ;;  %v12490_v40 = vsel %vm1208_vm7, %v1217_v25, %v1216_v21 }
 0x1d0   : > { %v2956_v44 = vsel %vm18189_vm0, %v18188_v45, %v12131_v17  ;;  %v12478_v57 = vmul.u32.u64.low 4042322161, %v12409_v24  ;;  %v12479_v16 = vmul.u32.u64.high 4042322161, %v12409_v24, %v12478_v57  ;;  %v12485_v17 = vsel %vm12443_vm5, %v962_v11, %v12316_v53  ;;  %v18191_v45 = vld [vmem:[#allocation13_spill] sm:$0xff]  ;;  %vm18192_vm1 = vmmov %vm18189_vm0  ;;  %v3976_v50 = vld [vmem:[#allocation2 + $0x1c] sm:$0xf]  ;;  %v2826_v25 = vpop.permute.xlu1 %2825 }
 0x1d1   : > { %18190 = vst [vmem:[#allocation14_spill] sm:$0xff] %v12485_v17  ;;  %v2954_v29 = vsel %vm18192_vm1, %v18191_v45, %v12160_v41  ;;  %v12492_v18 = vsel %vm1263_vm14, %v1272_v10, %v1271_v1  ;;  %v12495_v8 = vadd.s32 160, %v10358_v0  ;;  %v9497_v57 = vld [vmem:[%s17524_s3 + $0x60] sm:$0xff]   ;;  %vm18193_vm5 = vcmask 48128   ;;  %v2765_v41 = vpop.permute.xlu0 %2764 }
 0x1d2   : > { %v3000_v6 = vsel %vm18193_vm5, %v2956_v44, %v12184_v19  ;;  %vm18194_vm0 = vmmov %vm18193_vm5  ;;  %v12505_v21 = vcombine.low %v12058_v37, %v3976_v50  ;;  %v4147_v10 = vor.u32 %v4145_v33, %v12194_v63  ;;  %vm18195_vm7 = vcmask 72704   ;;  %v18196_v11 = vld [vmem:[#allocation16_spill] sm:$0xff]  ;;  %v3978_v33 = vld [vmem:[#allocation2 + $0x24] sm:$0xf]  ;;  %5559 = vmatpush2.bf16.msra.mxu1 %v9497_v57 }
 0x1d3   : > { %v2998_v53 = vsel %vm18194_vm0, %v2954_v29, %v12243_v55  ;;  %v3043_v1 = vsel %vm18195_vm7, %v3000_v6, %v12257_v30  ;;  %v12514_v19 = vmul.u32.u64.low 4042322161, %v12474_v35  ;;  %v12515_v44 = vmul.u32.u64.high 4042322161, %v12474_v35, %v12514_v19  ;;  %vm18197_vm5 = vmmov %vm18195_vm7  ;;  %v12526_v12 = vld [vmem:[#allocation2 + $0x28] sm:$0xf]  ;;  %v18199_v45 = vld [vmem:[#allocation8_spill] sm:$0xff]  ;;  %5560 = vmatprep.subr.bf16.mxu1 %v17964_v32 }
 0x1d4   : > { %v12519_v55 = vadd.s32 4294967272, %v12485_v17  ;;  %v3041_v63 = vsel %vm18197_vm5, %v2998_v53, %v12311_v15  ;;  %vm18198_vm0 = vcmask 97280   ;;  %v4149_v30 = vshll.u32 %v12505_v21, 16  ;;  %v18202_v17 = vld [vmem:[#allocation7_spill] sm:$0xff] }
 0x1d5   : > { %v3086_v29 = vsel %vm18198_vm0, %v3043_v1, %v12325_v23  ;;  %v633_v6 = vshrl.u32 %v12429_v13, 8  ;;  %vm18200_vm1 = vmmov %vm18198_vm0  ;;  %vm18201_vm10 = vcmask 121856   ;;  %v9498_v13 = vld [vmem:[%s17524_s3 + $0x58] sm:$0xff]   ;;  %vm18203_vm7 = vcmask 146432  }
 0x1d6   : > { %v3084_v19 = vsel %vm18200_vm1, %v3041_v63, %v12375_v42  ;;  %v3129_v15 = vsel %vm18201_vm10, %v3086_v29, %v12395_v34  ;;  %v3977_v53 = vld [vmem:[#allocation2 + $0x20] sm:$0xf]  ;;  %v12538_v23 = vmul.u32.u64.low 3435973837, %v12495_v8  ;;  %v12539_v1 = vmul.u32.u64.high 3435973837, %v12495_v8, %v12538_v23  ;;  %v2824_v63 = vpop.permute.xlu0 %2823  ;;  %5561 = vmatpush2.bf16.msra.mxu1 %v9498_v13 }
 0x1d7   : > { %v3172_v42 = vsel %vm18203_vm7, %v3129_v15, %v2767_v61  ;;  %v4151_v54 = vrot.slane %v4149_v30, 1  ;;  %v12546_v34 = vcombine.low %v3976_v50, %v3977_v53  ;;  %v18204_v29 = vsel %vm11886_vm9, %v11807_v52, %v11743_v48  ;;  %v2913_v30 = vpop.permute.xlu1 %2912  ;;  %5562 = vmatprep.subr.bf16.mxu1 %v17964_v32 }
 0x1d8   : > { %vm12553_vm10 = vcmp.lt.s32.totalorder %v18204_v29, 16  ;;  %v12557_v57 = vcombine.low %v3977_v53, %v3978_v33  ;;  %vm18207_vm1 = vcmask 121856   ;;  %vm18208_vm7 = vcmask 171008  }
 0x1d9   : > { %v3127_v23 = vsel %vm18207_vm1, %v3084_v19, %v2716_v60  ;;  %v3215_v61 = vsel %vm18208_vm7, %v3172_v42, %v2826_v25  ;;  %v12563_v50 = vcombine.low %v3978_v33, %v12526_v12  ;;  %v1253_v48 = vsub.s32 0, %v12519_v55 }
 0x1da   : > { %vm18210_vm0 = vcmask 195584   ;;  %vm18211_vm14 = vsmask.f32 7424  ;;  %v4359_v53 = vrot.slane %v12546_v34, 5  ;;  %v18212_v60 = vsel %vm12331_vm13, %v11930_v36, %v11817_v3  ;;  %5563 = vmatpush2.bf16.msra.mxu1 %v9499_v28 }
 0x1db   : > { %v12569_v52 = vsel %vm18210_vm0, %v3215_v61, %v2913_v30  ;;  %v4152_v15 = vsel %vm18211_vm14, %v4147_v10, %v4151_v54  ;;  %vm12578_vm1 = vcmp.lt.s32.totalorder %v18212_v60, 16  ;;  %v634_v33 = vmul.u32 320, %v633_v6  ;;  %v12610_v13 = vpop.permute.xlu1 %2269  ;;  %5564 = vmatprep.subr.bf16.mxu1 %v17964_v32 }
 0x1dc   : > { %vm18215_vm7 = vcmask 146432   ;;  %4470 = vrot.lane.b32.xlu1 %v4152_v15, %s9652_s27  ;;  %v4157_v42 = vshll.u32 %v12557_v57, 16  ;;  %v4534_v10 = vshrl.u32 %v12546_v34, 16  ;;  %v4537_v29 = vshll.u32 %v12546_v34, 16 }
 0x1dd   : > { %v3170_v19 = vsel %vm18215_vm7, %v3127_v23, %v2765_v41  ;;  %v18216_v3 = vsel %vm12349_vm4, %v11979_v14, %v11935_v46  ;;  %vm18219_vm14 = vcmask 171008   ;;  %v17667_v6 = vrot.slane %v12569_v52, 3  ;;  %v2911_v23 = vpop.permute.xlu0 %2910 }
 0x1de   : > { %vm12592_vm13 = vcmp.lt.s32.totalorder %v18216_v3, 16  ;;  %v3213_v41 = vsel %vm18219_vm14, %v3170_v19, %v2824_v63  ;;  %vm18220_vm0 = vcmask 1042432   ;;  %v4153_v46 = vshrl.u32 %v12505_v21, 16 }
 0x1df   : > { %v12603_v49 = vsel %vm18220_vm0, %v12093_v2, %v4359_v53  ;;  %vm18221_vm4 = vcmask 195584   ;;  %v17668_v63 = vrot.slane %v12563_v50, 5  ;;  %v4536_v61 = vrot.slane %v4534_v10, 5 }
 0x1e0   : > { %v3256_v14 = vsel %vm18221_vm4, %v3213_v41, %v2911_v23  ;;  %4399 = vrot.lane.b32.xlu0 %v12603_v49, %s9650_s14  ;;  %v4539_v30 = vrot.slane %v4537_v29, 6  ;;  %v12614_v2 = vrot.slane %v4157_v42, 1  ;;  %v4543_v19 = vshrl.u32 %v12563_v50, 16  ;;  %4296 = vrot.lane.b32.xlu1 %v4152_v15, %s9651_s24 }
 0x1e1   : > { %v3329_v60 = vrot.slane %v3256_v14, 3  ;;  %v4546_v3 = vshll.u32 %v12563_v50, 16  ;;  %v4155_v41 = vor.u32 %v4153_v46, %v4151_v54  ;;  %v18222_v23 = vsel %vm12366_vm2, %v11985_v38, %v11947_v27  ;;  %v9500_v54 = vld [vmem:[%s17524_s3 + $0x48] sm:$0xff]   ;;  %v12638_v62 = vpop.permute.xlu0 %2267  ;;  %vm18225_vm2 = vmmov %vm18220_vm0  ;;  %v18227_v38 = vld [vmem:[#allocation11_spill] sm:$0xff] }
 0x1e2   : > { %vm12624_vm14 = vcmp.lt.s32.totalorder %v18222_v23, 16  ;;  %v1247_v29 = vshrl.u32 %v12479_v16, 4  ;;  %v12630_v42 = vsub.s32 %v12356_v4, %v634_v33  ;;  %v12633_v14 = vadd.s32 184, %v10358_v0  ;;  %5565 = vmatpush2.bf16.msra.mxu1 %v9500_v54 }
 0x1e3   : > { %v12643_v27 = vsel %vm18225_vm2, %v4359_v53, %v17668_v63  ;;  %v18228_v16 = vrot.slane %v18227_v38, 3  ;;  %vm18229_vm0 = vcmask 1044480   ;;  %vm18230_vm4 = vcmp.lt.s32.totalorder %v18196_v11, 296  ;;  %v12663_v53 = vpop.permute.xlu1 %2371  ;;  %5566 = vmatprep.subr.bf16.mxu1 %v17964_v32 }
 0x1e4   : > { %18226 = vst [vmem:[#allocation13_spill] sm:$0xff] %v12643_v27  ;;  %vm18231_vm7 = vcmp.ge.s32.totalorder %v18196_v11, 24  ;;  %vm18234_vm9 = vmmov %vm18229_vm0  ;;  %v4540_v28 = vor.u32 %v4539_v30, %v4536_v61  ;;  %4401 = vrot.lane.b32.xlu0 %v12643_v27, %s9650_s14  ;;  %vm18235_vm2 = vcmask 220160   ;;  %v12675_v46 = vadd.s32 17, %v12490_v40  ;;  %v9074_v61 = vpop.f32.mrf.mxu0 }
 0x1e5   : > { %v3330_v4 = vsel %vm18229_vm0, %v18228_v16, %v3329_v60  ;;  %vm12652_vm5 = vmand %vm18231_vm7, %vm18230_vm4  ;;  %v3332_v33 = vsel %vm18234_vm9, %v3329_v60, %v17667_v6  ;;  %vm18236_vm0 = vcmp.lt.s32.totalorder %v18199_v45, 296  ;;  %vm18237_vm7 = vcmp.ge.s32.totalorder %v18199_v45, 24 }
 0x1e6   : > { %9096 = vmatprep.mubr.msk.bf16.mxu0 %vm18235_vm2, %v3330_v4  ;;  %vm12669_vm4 = vmand %vm18237_vm7, %vm18236_vm0  ;;  %vm1558_vm9 = vcmp.lt.s32.totalorder %v12490_v40, 0  ;;  %vm1523_vm15 = vcmp.ne.s32.totalorder %v12492_v18, 0  ;;  %vm18240_vm8 = vsmask.f32 7424  ;;  %vm18241_vm0 = vcmp.lt.s32.totalorder %v18202_v17, 296  ;;  %v12714_v4 = vpop.permute.xlu0 %2369  ;;  %5567 = vmatpush2.bf16.msra.mxu1 %v9502_v43 }
 0x1e7   : > { %9097 = vmatmul.mubr.msk.bf16.gmra.mxu0 %vm18235_vm2, %v3332_v33  ;;  %v4160_v30 = vsel %vm18240_vm8, %v4155_v41, %v12614_v2  ;;  %vm18242_vm7 = vcmp.ge.s32.totalorder %v18202_v17, 24  ;;  %v4545_v60 = vrot.slane %v4543_v19, 5  ;;  %v4548_v23 = vrot.slane %v4546_v3, 6  ;;  %vm12699_vm8 = vmand %vm12652_vm5, %vm12553_vm10 }
 0x1e8   : > { %vm12686_vm11 = vmand %vm18242_vm7, %vm18241_vm0  ;;  %v12693_v38 = vmin.u32 %v12519_v55, %v1253_v48  ;;  %v18245_v41 = vmov 0  ;;  %v3491_v17 = vadd.f32 %v9074_v61, %v11769_v51  ;;  %4472 = vrot.lane.b32.xlu1 %v4160_v30, %s9652_s27  ;;  %v1280_v19 = vshrl.u32 %v12515_v44, 4  ;;  %v3482_v48 = vpop.f32.mrf.mxu0  ;;  %v4018_v61 = vld [vmem:[#allocation2 + $0x14] sm:$0xe] }
 0x1e9   : > { %v18246_v41 = vsel %vm12699_vm8, 4294967295, %v18245_v41  ;;  %v12707_v3 = vmul.u32.u64.low 3435973837, %v12633_v14  ;;  %v12708_v16 = vmul.u32.u64.high 3435973837, %v12633_v14, %v12707_v3  ;;  %vm18248_vm5 = vsmask.f32 2304 }
 0x1ea   : > { %18247 = vst [vmem:[#allocation16_spill] sm:$0xff] %v18246_v41  ;;  %v4541_v15 = vsel %vm18248_vm5, %v12173_v22, %v4540_v28  ;;  %vm18249_vm10 = vcmp.lt.s32.totalorder %v18209_v9, 296  ;;  %vm18250_vm2 = vcmp.ge.s32.totalorder %v18209_v9, 24  ;;  %v1248_v33 = vmul.u32 17, %v1247_v29  ;;  %vm12733_vm5 = vmand %vm12669_vm4, %vm12578_vm1  ;;  %v12739_v29 = vpop.permute.xlu1 %2446  ;;  %v9075_v11 = vpop.f32.mrf.mxu0 }
 0x1eb   : > { %vm12722_vm0 = vmand %vm18250_vm2, %vm18249_vm10  ;;  %vm847_vm7 = vcmp.ne.s32.totalorder %v12630_v42, 0  ;;  %vm887_vm6 = vcmp.lt.s32.totalorder %v12630_v42, 0  ;;  %v3619_v54 = vmax.f32 %v3491_v17, 0.0  ;;  %v18253_v22 = vmov 0  ;;  %4704 = vrot.lane.b32.xlu0 %v4541_v15, %s9651_s24 }
 0x1ec   : > { %v18254_v22 = vsel %vm12733_vm5, 4294967295, %v18253_v22  ;;  %v3483_v9 = vadd.f32 %v11769_v51, %v3482_v48  ;;  %v12742_v3 = vadd.s32 17, %v12492_v18  ;;  %v611_v17 = vshrl.u32 %v12539_v1, 8  ;;  %vm12749_vm1 = vmand %vm12686_vm11, %vm12592_vm13  ;;  %4298 = vrot.lane.b32.xlu1 %v4160_v30, %s9651_s24 }
 0x1ed   : > { %18255 = vst [vmem:[#allocation8_spill] sm:$0xff] %v18254_v22  ;;  %v18256_v25 = vmov 0  ;;  %v12753_v48 = vor.u32 %v4548_v23, %v4545_v60  ;;  %v8736_v6 = vcombine.low %v4018_v61, %v12058_v37  ;;  %v12762_v1 = vsel %vm12699_vm8, %v3619_v54, 0.0  ;;  %vm12770_vm11 = vmand %vm887_vm6, %vm847_vm7  ;;  %v3485_v60 = vpop.f32.mrf.mxu0  ;;  %v12776_v23 = vpop.permute.xlu0 %2444 }
 0x1ee   : > { %v18257_v25 = vsel %vm12749_vm1, 4294967295, %v18256_v25  ;;  %v12757_v63 = vmul.u32.u64.low 4042322161, %v12693_v38  ;;  %v12758_v32 = vmul.u32.u64.high 4042322161, %v12693_v38, %v12757_v63  ;;  %18259 = vst [vmem:[#allocation32_spill] sm:$0xff] %v12762_v1  ;;  %v3617_v36 = vmax.f32 %v3483_v9, 0.0  ;;  %v9569_v9 = vld [vmem:[%s17524_s3 + $0x88] sm:$0xff]   ;;  %vm12816_vm7 = vmand %vm12722_vm0, %vm12624_vm14 }
 0x1ef   : > { %18258 = vst [vmem:[#allocation7_spill] sm:$0xff] %v18257_v25  ;;  %v3494_v45 = vadd.f32 %v9075_v11, %v11769_v51  ;;  %v1281_v27 = vmul.u32 17, %v1280_v19  ;;  %v8921_v63 = vpack.c.bf16 %v12762_v1, %v12762_v1  ;;  %vm18262_vm13 = vsmask.f32 2304  ;;  %9200 = vmatprep.subr.bf16.mxu1 %v9569_v9  ;;  %v12799_v1 = vpop.permute.xlu1 %2491 }
 0x1f0   : > { %v4550_v54 = vsel %vm18262_vm13, %v4540_v28, %v12753_v48  ;;  %vm18263_vm4 = vcmp.ne.s32.totalorder %v12490_v40, 0  ;;  %v1249_v19 = vsub.s32 %v12409_v24, %v1248_v33  ;;  %v967_v43 = vadd.s32 320, %v12630_v42  ;;  %4776 = vrot.lane.b32.xlu1 %v4541_v15, %s9652_s27 }
 0x1f1   : > { %vm12784_vm10 = vmand %vm1558_vm9, %vm18263_vm4  ;;  %v12795_v28 = vsel %vm12733_vm5, %v3617_v36, 0.0  ;;  %v3620_v61 = vmax.f32 %v3494_v45, 0.0  ;;  %v3486_v11 = vadd.f32 %v11769_v51, %v3485_v60  ;;  %4778 = vrot.lane.b32.xlu0 %v4550_v54, %s9652_s27  ;;  %vm18267_vm6 = vcmp.lt.s32.totalorder %v12492_v18, 0  ;;  %v2490_v37 = vpop.permute.xlu0 %2489 }
 0x1f2   : > { %18266 = vst [vmem:[#allocation11_spill] sm:$0xff] %v12795_v28  ;;  %vm12805_vm9 = vmand %vm18267_vm6, %vm1523_vm15  ;;  %v612_v33 = vmul.u32 320, %v611_v17  ;;  %vm18270_vm2 = vcmask 257024   ;;  %v8919_v36 = vpack.c.bf16 %v12795_v28, %v12795_v28  ;;  %v18271_v51 = vmov 0 }
 0x1f3   : > { %3939 = vst.msk [vmem:[#allocation2 + $0x34] sm:$0xf] %vm18270_vm2, %v8921_v63  ;;  %v18272_v51 = vsel %vm12816_vm7, 4294967295, %v18271_v51  ;;  %v12820_v45 = vrot.slane %v8736_v6, 6  ;;  %vm1241_vm15 = vcmp.lt.s32.totalorder %v12222_v47, 0  ;;  %v12826_v17 = vsel %vm12770_vm11, %v967_v43, %v12630_v42  ;;  %vm18275_vm14 = vmmov %vm18270_vm2 }
 0x1f4   : > { %18273 = vst [vmem:[#allocation44_spill] sm:$0xff] %v18272_v51  ;;  %v9475_v63 = vld [vmem:[%s9759_s25 + $0xa0] ss:$0 sps:$4 sm:$0x77]   ;;  %v12831_v60 = vsel %vm12749_vm1, %v3620_v61, 0.0  ;;  %v3618_v10 = vmax.f32 %v3486_v11, 0.0  ;;  %v1282_v6 = vsub.s32 %v12474_v35, %v1281_v27  ;;  %v2722_v27 = vpop.permute.xlu1 %2721  ;;  %v613_v61 = vsub.s32 %v12495_v8, %v612_v33  ;;  %vm18277_vm0 = vmmov %vm18270_vm2 }
 0x1f5   : > { %18274 = vst [vmem:[#allocation45_spill] sm:$0xff] %v12831_v60  ;;  %v4820_v44 = vrot.slane %v12546_v34, 6  ;;  %3937 = vst.msk [vmem:[#allocation2 + $0x2c] sm:$0xf] %vm18275_vm14, %v8919_v36  ;;  %v8922_v9 = vpack.c.bf16 %v12831_v60, %v12831_v60  ;;  %v12848_v34 = vadd.s32 4294967272, %v12826_v17  ;;  %4706 = vrot.lane.b32.xlu0 %v4550_v54, %s9651_s24  ;;  %v1250_v43 = vsub.s32 0, %v1249_v19 }
 0x1f6   : > { %v12852_v35 = vsel %vm12816_vm7, %v3618_v10, 0.0  ;;  %v12857_v11 = vadd.s32 168, %v10358_v0  ;;  %vm1274_vm11 = vcmp.lt.s32.totalorder %v12336_v7, 0  ;;  %vm18278_vm13 = vcmask 23552   ;;  %vm18280_vm6 = vmmov %vm18277_vm0  ;;  %s8422_s25 = scalar_lea.sflag [#allocation5], %s323_s22 }
 0x1f7   : > { %18276 = vst [vmem:[#allocation46_spill] sm:$0xff] %v12852_v35  ;;  %3940 = vst.msk [vmem:[#allocation2 + $0x38] sm:$0xf] %vm18277_vm0, %v8922_v9  ;;  %v8920_v36 = vpack.c.bf16 %v12852_v35, %v12852_v35  ;;  %v2961_v54 = vsel %vm18278_vm13, %v9475_v63, %v12610_v13  ;;  %v4161_v10 = vshrl.u32 %v12557_v57, 16  ;;  %vm18279_vm4 = vcmask 1041408   ;;  %v2720_v9 = vpop.permute.xlu0 %2719 }
 0x1f8   : > { %v12870_v8 = vsel %vm18279_vm4, %v12820_v45, %v4820_v44  ;;  %v1283_v33 = vsub.s32 0, %v1282_v6  ;;  %v1308_v60 = vsub.s32 0, %v12848_v34  ;;  %vm845_vm2 = vcmp.ne.s32.totalorder %v613_v61, 0  ;;  %v2771_v42 = vpop.permute.xlu1 %2770  ;;  %vm18282_vm0 = vmmov %vm18278_vm13 }
 0x1f9   : > { %3938 = vst.msk [vmem:[#allocation2 + $0x30] sm:$0xf] %vm18280_vm6, %v8920_v36  ;;  %vm885_vm14 = vcmp.lt.s32.totalorder %v613_v61, 0  ;;  %v644_v15 = vshrl.u32 %v12708_v16, 8  ;;  %v12876_v35 = vor.u32 %v4161_v10, %v12614_v2  ;;  %v12880_v13 = vsel %vm1241_vm15, %v1250_v43, %v1249_v19  ;;  %v18281_v36 = vld [vmem:[#allocation15_spill] sm:$0xff] }
 0x1fa   : > { %v1258_v63 = vshrl.u32 %v12758_v32, 4  ;;  %v12884_v28 = vadd.s32 208, %v10358_v0  ;;  %v2958_v25 = vsel %vm18282_vm0, %v18281_v36, %v12638_v62  ;;  %vm18283_vm13 = vcmask 48128   ;;  %vm12905_vm6 = vmand %vm885_vm14, %vm845_vm2 }
 0x1fb   : > { %v3004_v16 = vsel %vm18283_vm13, %v2961_v54, %v12663_v53  ;;  %v18284_v41 = vrot.slane %v12563_v50, 6  ;;  %v965_v47 = vadd.s32 320, %v613_v61  ;;  %vm18285_vm15 = vmmov %vm18283_vm13  ;;  %v12901_v10 = vsel %vm1274_vm11, %v1283_v33, %v1282_v6 }
 0x1fc   : > { %v3002_v19 = vsel %vm18285_vm15, %v2958_v25, %v12714_v4  ;;  %v3980_v32 = vld [vmem:[#allocation2 + $0x2c] sm:$0xf]  ;;  %v645_v53 = vmul.u32 320, %v644_v15  ;;  %vm18288_vm0 = vcmask 72704   ;;  %v2769_v25 = vpop.permute.xlu0 %2768  ;;  %v12917_v7 = vmin.u32 %v12848_v34, %v1308_v60  ;;  %v2830_v33 = vpop.permute.xlu1 %2829 }
 0x1fd   : > { %v12894_v2 = vsel %vm18279_vm4, %v4820_v44, %v18284_v41  ;;  %v3047_v41 = vsel %vm18288_vm0, %v3004_v16, %v12739_v29  ;;  %vm18289_vm13 = vmmov %vm18288_vm0  ;;  %v12914_v44 = vcombine.low %v12526_v12, %v3980_v32  ;;  %vm18290_vm11 = vcmask 97280   ;;  %v18294_v16 = vld [vmem:[#allocation33_spill] sm:$0xff] }
 0x1fe   : > { %v3045_v4 = vsel %vm18289_vm13, %v3002_v19, %v12776_v23  ;;  %v3090_v6 = vsel %vm18290_vm11, %v3047_v41, %v12799_v1  ;;  %vm18291_vm2 = vmmov %vm18290_vm11  ;;  %v12923_v15 = vmul.u32.u64.low 3435973837, %v12857_v11  ;;  %v12924_v36 = vmul.u32.u64.high 3435973837, %v12857_v11, %v12923_v15  ;;  %v12930_v12 = vld [vmem:[#allocation2 + $0x38] sm:$0xf] }
 0x1ff   : > { %v3088_v54 = vsel %vm18291_vm2, %v3045_v4, %v2490_v37  ;;  %vm18292_vm14 = vcmask 121856   ;;  %v1259_v60 = vmul.u32 17, %v1258_v63  ;;  %v12934_v1 = vsel %vm12905_vm6, %v965_v47, %v613_v61  ;;  %v18296_v63 = vld [vmem:[#allocation34_spill] sm:$0xff]  ;;  %v3982_v61 = vld [vmem:[#allocation2 + $0x34] sm:$0xf] }
 0x200   : > { %v3133_v29 = vsel %vm18292_vm14, %v3090_v6, %v2722_v27  ;;  %vm18293_vm4 = vmmov %vm18292_vm14  ;;  %v3981_v37 = vld [vmem:[#allocation2 + $0x30] sm:$0xf]  ;;  %v4165_v19 = vshll.u32 %v12914_v44, 16  ;;  %v12938_v41 = vsub.s32 %v12633_v14, %v645_v53  ;;  %vm18295_vm13 = vcmask 146432   ;;  %v2828_v6 = vpop.permute.xlu0 %2827  ;;  %v2917_v15 = vpop.permute.xlu1 %2916 }
 0x201   : > { %v3131_v23 = vsel %vm18293_vm4, %v3088_v54, %v2720_v9  ;;  %v12941_v27 = vmul.u32.u64.low 3435973837, %v12884_v28  ;;  %v12942_v9 = vmul.u32.u64.high 3435973837, %v12884_v28, %v12941_v27  ;;  %v3176_v4 = vsel %vm18295_vm13, %v3133_v29, %v2771_v42  ;;  %vm18297_vm2 = vmmov %vm18295_vm13 }
 0x202   : > { %v12945_v54 = vcombine.low %v3980_v32, %v3981_v37  ;;  %v12950_v47 = vmul.u32.u64.low 4042322161, %v12917_v7  ;;  %v12951_v62 = vmul.u32.u64.high 4042322161, %v12917_v7, %v12950_v47  ;;  %v3174_v14 = vsel %vm18297_vm2, %v3131_v23, %v2769_v25 }
 0x203   : > { %vm18298_vm14 = vcmask 171008   ;;  %v18299_v42 = vsel %vm12383_vm12, %v11988_v59, %v11954_v56  ;;  %v12965_v29 = vcombine.low %v3982_v61, %v12930_v12  ;;  %v12968_v27 = vadd.s32 4294967272, %v12934_v1  ;;  %v18303_v56 = vld [vmem:[#allocation10_spill] sm:$0xff] }
 0x204   : > { %v3219_v53 = vsel %vm18298_vm14, %v3176_v4, %v2830_v33  ;;  %vm12960_vm4 = vcmp.lt.s32.totalorder %v18299_v42, 16  ;;  %vm18302_vm2 = vcmask 195584   ;;  %v17679_v33 = vrot.slane %v12945_v54, 5  ;;  %vm18304_vm11 = vmmov %vm18298_vm14  ;;  %v2915_v42 = vpop.permute.xlu0 %2914 }
 0x205   : > { %v3262_v25 = vsel %vm18302_vm2, %v3219_v53, %v2917_v15  ;;  %v4552_v5 = vshrl.u32 %v12945_v54, 16  ;;  %v4555_v23 = vshll.u32 %v12945_v54, 16  ;;  %v3217_v59 = vsel %vm18304_vm11, %v3174_v14, %v2828_v6 }
 0x206   : > { %v12977_v4 = vrot.slane %v4165_v19, 1  ;;  %v18305_v47 = vsel %vm12401_vm3, %v12215_v26, %v12000_v58  ;;  %vm848_vm13 = vcmp.ne.s32.totalorder %v12938_v41, 0  ;;  %vm888_vm6 = vcmp.lt.s32.totalorder %v12938_v41, 0  ;;  %v18310_v58 = vld [vmem:[#allocation26_spill] sm:$0xff] }
 0x207   : > { %vm12984_vm2 = vcmp.lt.s32.totalorder %v18305_v47, 16  ;;  %v3335_v15 = vrot.slane %v3262_v25, 3  ;;  %v18308_v19 = vrot.slane %v12563_v50, 5  ;;  %vm18309_vm11 = vcmask 1042432   ;;  %v18313_v25 = vld [vmem:[#allocation35_spill] sm:$0xff] }
 0x208   : > { %v4554_v39 = vrot.slane %v4552_v5, 5  ;;  %v4557_v14 = vrot.slane %v4555_v23, 6  ;;  %vm18311_vm14 = vcmask 195584   ;;  %vm18312_vm15 = vnez %v18182_v20 }
 0x209   : > { %v12995_v6 = vsel %vm18309_vm11, %v18308_v19, %v17679_v33  ;;  %v3260_v26 = vsel %vm18311_vm14, %v3217_v59, %v2915_v42  ;;  %v18314_v47 = vsel %vm18312_vm15, %v12406_v31, %v18313_v25  ;;  %v5218_v5 = vrot.slane %v12894_v2, 3  ;;  %vm13039_vm11 = vmand %vm888_vm6, %vm848_vm13 }
 0x20a   : > { %4403 = vrot.lane.b32.xlu0 %v12995_v6, %s9650_s14  ;;  %vm13007_vm0 = vcmp.lt.s32.totalorder %v18314_v47, 16  ;;  %v13013_v23 = vsub.s32 %v12693_v38, %v1259_v60  ;;  %v622_v19 = vshrl.u32 %v12924_v36, 8  ;;  %v3333_v59 = vrot.slane %v3260_v26, 3 }
 0x20b   : > { %v13016_v42 = vor.u32 %v4557_v14, %v4554_v39  ;;  %v4561_v33 = vshrl.u32 %v12965_v29, 16  ;;  %v4564_v20 = vshll.u32 %v12965_v29, 16  ;;  %vm18317_vm15 = vsmask.f32 7424 }
 0x20c   : > { %v4168_v31 = vsel %vm18317_vm15, %v12876_v35, %v12977_v4  ;;  %v18318_v25 = vsel %vm12784_vm10, %v12675_v46, %v12490_v40  ;;  %v13032_v36 = vcombine.low %v3981_v37, %v3982_v61  ;;  %v1286_v60 = vsub.s32 0, %v12968_v27 }
 0x20d   : > { %vm13028_vm14 = vcmp.lt.s32.totalorder %v18318_v25, 16  ;;  %v968_v30 = vadd.s32 320, %v12938_v41  ;;  %vm18324_vm10 = vsmask.f32 2304  ;;  %v18325_v46 = vrot.slane %v12569_v52, 3  ;;  %v9078_v25 = vpop.f32.mrf.mxu0 }
 0x20e   : > { %18321 = vst [vmem:[#allocation15_spill] sm:$0xff] %v13032_v36  ;;  %v4559_v40 = vsel %vm18324_vm10, %v12753_v48, %v13016_v42  ;;  %vm18326_vm15 = vcmask 1044480   ;;  %v4824_v61 = vrot.slane %v12945_v54, 6  ;;  %4474 = vrot.lane.b32.xlu0 %v4168_v31, %s9652_s27  ;;  %vm18328_vm6 = vcmp.lt.s32.totalorder %v18294_v16, 296 }
 0x20f   : > { %v3334_v35 = vsel %vm18326_vm15, %v18325_v46, %v3333_v59  ;;  %vm18327_vm3 = vmmov %vm18326_vm15  ;;  %4780 = vrot.lane.b32.xlu1 %v4559_v40, %s9652_s27  ;;  %vm18329_vm13 = vcmp.ge.s32.totalorder %v18294_v16, 24  ;;  %v18332_v52 = vrot.slane %v12870_v8, 3  ;;  %v18333_v48 = vrot.slane %v12820_v45, 3  ;;  %v13084_v8 = vld [vmem:[%s17523_s2] ss:$0 sm:$0xff] }
 0x210   : > { %v3336_v37 = vsel %vm18327_vm3, %v3333_v59, %v3335_v15  ;;  %vm13058_vm12 = vmand %vm18329_vm13, %vm18328_vm6  ;;  %v1261_v59 = vsub.s32 0, %v13013_v23  ;;  %v677_v16 = vshrl.u32 %v12942_v9, 8  ;;  %vm18336_vm15 = vcmask 220160  }
 0x211   : > { %vm18334_vm10 = vmmov %vm18327_vm3  ;;  %v18335_v26 = vmov %v18332_v52  ;;  %9100 = vmatprep.mubr.msk.bf16.mxu0 %vm18336_vm15, %v3334_v35  ;;  %v4563_v46 = vrot.slane %v4561_v33, 5  ;;  %v4566_v51 = vrot.slane %v4564_v20, 6  ;;  %vm1252_vm6 = vcmp.lt.s32.totalorder %v12519_v55, 0 }
 0x212   : > { %v5213_v15 = vsel %vm18334_vm10, %v18333_v48, %v18332_v52  ;;  %v5219_v47 = vsel %vm18327_vm3, %v18335_v26, %v5218_v5  ;;  %v13079_v45 = vsel %vm13039_vm11, %v968_v30, %v12938_v41  ;;  %v623_v52 = vmul.u32 320, %v622_v19  ;;  %vm18337_vm13 = vmmov %vm18336_vm15  ;;  %4300 = vrot.lane.b32.xlu0 %v4168_v31, %s9651_s24 }
 0x213   : > { %v3507_v48 = vadd.f32 %v13084_v8, %v9078_v25  ;;  %9101 = vmatmul.mubr.msk.bf16.gmra.mxu0 %vm18337_vm13, %v3336_v37  ;;  %vm18338_vm10 = vcmp.lt.s32.totalorder %v18296_v63, 296  ;;  %vm18339_vm3 = vcmp.ge.s32.totalorder %v18296_v63, 24  ;;  %v17688_v41 = vrot.slane %v12965_v29, 5  ;;  %vm13103_vm11 = vmand %vm13058_vm12, %vm12960_vm4  ;;  %v3498_v63 = vpop.f32.mrf.mxu0  ;;  %4708 = vrot.lane.b32.xlu1 %v4559_v40, %s9651_s24 }
 0x214   : > { %vm13092_vm15 = vmand %vm18339_vm3, %vm18338_vm10  ;;  %v4169_v19 = vshrl.u32 %v12914_v44, 16  ;;  %v1313_v20 = vshrl.u32 %v12951_v62, 4  ;;  %v18342_v39 = vmov 0  ;;  %vm18345_vm13 = vcmask 261120  }
 0x215   : > { %v18343_v39 = vsel %vm13103_vm11, 4294967295, %v18342_v39  ;;  %9108 = vmatprep.mubr.msk.bf16.mxu0 %vm18345_vm13, %v5213_v15  ;;  %v18346_v30 = vrot.slane %v12563_v50, 6  ;;  %vm18347_vm10 = vcmask 1041408   ;;  %v4173_v37 = vshll.u32 %v13032_v36, 16 }
 0x216   : > { %18344 = vst [vmem:[#allocation33_spill] sm:$0xff] %v18343_v39  ;;  %v13115_v26 = vmin.u32 %v12968_v27, %v1286_v60  ;;  %v13118_v32 = vadd.s32 4294967272, %v13079_v45  ;;  %v3623_v14 = vmax.f32 %v3507_v48, 0.0  ;;  %v3499_v25 = vadd.f32 %v13084_v8, %v3498_v63 }
 0x217   : > { %v13111_v35 = vsel %vm18347_vm10, %v18346_v30, %v4824_v61  ;;  %vm18348_vm4 = vcmp.lt.s32.totalorder %v18303_v56, 296  ;;  %vm18349_vm12 = vcmp.ge.s32.totalorder %v18303_v56, 24  ;;  %v18352_v60 = vrot.slane %v12945_v54, 5  ;;  %vm13143_vm10 = vmand %vm13092_vm15, %vm12984_vm2  ;;  %v9079_v56 = vpop.f32.mrf.mxu0 }
 0x218   : > { %vm13127_vm3 = vmand %vm18349_vm12, %vm18348_vm4  ;;  %vm18353_vm13 = vcmask 1042432   ;;  %v17687_v48 = vrot.slane %v12965_v29, 6  ;;  %v18354_v31 = vmov 0  ;;  %v13147_v40 = vor.u32 %v4566_v51, %v4563_v46 }
 0x219   : > { %v13136_v15 = vsel %vm18353_vm13, %v18352_v60, %v17688_v41  ;;  %v18355_v31 = vsel %vm13143_vm10, 4294967295, %v18354_v31  ;;  %v4171_v63 = vor.u32 %v4169_v19, %v12977_v4  ;;  %v1319_v54 = vsub.s32 0, %v13118_v32  ;;  %vm13173_vm13 = vmand %vm13127_vm3, %vm13007_vm0  ;;  %v18394_v41 = vld [vmem:[#allocation19_spill] sm:$0xff] }
 0x21a   : > { %18356 = vst [vmem:[#allocation34_spill] sm:$0xff] %v18355_v31  ;;  %v624_v30 = vsub.s32 %v12857_v11, %v623_v52  ;;  %v13155_v53 = vsel %vm13103_vm11, %v3623_v14, 0.0  ;;  %v3621_v33 = vmax.f32 %v3499_v25, 0.0  ;;  %v3510_v60 = vadd.f32 %v13084_v8, %v9079_v56  ;;  %v3501_v52 = vpop.f32.mrf.mxu0  ;;  %4405 = vrot.lane.b32.xlu1 %v13136_v15, %s9650_s14 }
 0x21b   : > { %18357 = vst [vmem:[#allocation10_spill] sm:$0xff] %v13155_v53  ;;  %vm18358_vm2 = vcmp.lt.s32.totalorder %v18310_v58, 296  ;;  %vm18359_vm15 = vcmp.ge.s32.totalorder %v18310_v58, 24  ;;  %v5224_v4 = vrot.slane %v13111_v35, 3  ;;  %v8925_v11 = vpack.c.bf16 %v13155_v53, %v13155_v53 }
 0x21c   : > { %vm13162_vm12 = vmand %vm18359_vm15, %vm18358_vm2  ;;  %v18362_v46 = vmov 0  ;;  %vm18365_vm2 = vsmask.f32 2304  ;;  %v13180_v19 = vrot.slane %v4173_v37, 1  ;;  %vm18366_vm15 = vcmask 1041408  }
 0x21d   : > { %v18363_v46 = vsel %vm13173_vm13, 4294967295, %v18362_v46  ;;  %v4568_v58 = vsel %vm18365_vm2, %v13016_v42, %v13147_v40  ;;  %v13185_v35 = vsel %vm18366_vm15, %v4824_v61, %v17687_v48  ;;  %v13189_v43 = vsel %vm13143_vm10, %v3621_v33, 0.0  ;;  %vm13205_vm3 = vmand %vm13162_vm12, %vm13028_vm14 }
 0x21e   : > { %18364 = vst [vmem:[#allocation26_spill] sm:$0xff] %v18363_v46  ;;  %18367 = vst [vmem:[#allocation35_spill] sm:$0xff] %v13189_v43  ;;  %v3624_v14 = vmax.f32 %v3510_v60, 0.0  ;;  %v3502_v25 = vadd.f32 %v13084_v8, %v3501_v52  ;;  %4782 = vrot.lane.b32.xlu0 %v4568_v58, %s9652_s27  ;;  %v13196_v42 = vmin.u32 %v13118_v32, %v1319_v54  ;;  %vm18368_vm0 = vcmask 257024  }
 0x21f   : > { %3943 = vst.msk [vmem:[#allocation2 + $0x44] sm:$0xf] %vm18368_vm0, %v8925_v11  ;;  %v8923_v61 = vpack.c.bf16 %v13189_v43, %v13189_v43  ;;  %v18369_v37 = vmov 0  ;;  %v13210_v50 = vmul.u32.u64.low 4042322161, %v13115_v26  ;;  %v13211_v56 = vmul.u32.u64.high 4042322161, %v13115_v26, %v13210_v50  ;;  %v18404_v43 = vld [vmem:[#allocation14_spill] sm:$0xff] }
 0x220   : > { %v18370_v37 = vsel %vm13205_vm3, 4294967295, %v18369_v37  ;;  %v13215_v54 = vsel %vm13173_vm13, %v3624_v14, 0.0  ;;  %v3622_v33 = vmax.f32 %v3502_v25, 0.0  ;;  %vm18373_vm15 = vcmask 261120  }
 0x221   : > { %18371 = vst [vmem:[#allocation47_spill] sm:$0xff] %v18370_v37  ;;  %18372 = vst [vmem:[#allocation48_spill] sm:$0xff] %v13215_v54  ;;  %9109 = vmatmul.mubr.msk.bf16.vlgmr.msra.gmra.mxu0 %vm18373_vm15, %v5219_v47  ;;  %vm18374_vm0 = vcmask 1044480   ;;  %vm886_vm14 = vcmp.lt.s32.totalorder %v624_v30, 0  ;;  %vm18375_vm12 = vcmask 257024   ;;  %v8926_v60 = vpack.c.bf16 %v13215_v54, %v13215_v54 }
 0x222   : > { %v5225_v38 = vsel %vm18374_vm0, %v5218_v5, %v5224_v4  ;;  %3941 = vst.msk [vmem:[#allocation2 + $0x3c] sm:$0xf] %vm18375_vm12, %v8923_v61  ;;  %vm18376_vm4 = vmmov %vm18373_vm15  ;;  %vm18377_vm2 = vsmask.f32 7424  ;;  %v13228_v11 = vmul.u32.u64.low 4042322161, %v13196_v42  ;;  %v13229_v52 = vmul.u32.u64.high 4042322161, %v13196_v42, %v13228_v11  ;;  %4710 = vrot.lane.b32.xlu0 %v4568_v58, %s9651_s24 }
 0x223   : > { %9112 = vmatprep.mubr.msk.bf16.mxu0 %vm18376_vm4, %v5225_v38  ;;  %v4176_v51 = vsel %vm18377_vm2, %v4171_v63, %v13180_v19  ;;  %v13233_v2 = vsel %vm13205_vm3, %v3622_v33, 0.0  ;;  %v13242_v5 = vsel %vm1252_vm6, %v1261_v59, %v13013_v23  ;;  %vm18379_vm4 = vcmp.ne.s32.totalorder %v624_v30, 0  ;;  %vm18380_vm15 = vmmov %vm18375_vm12 }
 0x224   : > { %18378 = vst [vmem:[#allocation49_spill] sm:$0xff] %v13233_v2  ;;  %4476 = vrot.lane.b32.xlu1 %v4176_v51, %s9652_s27  ;;  %vm926_vm2 = vmand %vm886_vm14, %vm18379_vm4  ;;  %v966_v47 = vadd.s32 320, %v624_v30  ;;  %v678_v63 = vmul.u32 320, %v677_v16  ;;  %v8924_v14 = vpack.c.bf16 %v13233_v2, %v13233_v2  ;;  %v17686_v58 = vrot.slane %v13185_v35, 3 }
 0x225   : > { %3944 = vst.msk [vmem:[#allocation2 + $0x48] sm:$0xf] %vm18380_vm15, %v8926_v60  ;;  %vm1561_vm0 = vcmp.lt.s32.totalorder %v12880_v13, 0  ;;  %v1641_v25 = vadd.s32 17, %v12880_v13  ;;  %vm1524_vm6 = vcmp.ne.s32.totalorder %v12901_v10, 0  ;;  %v13258_v9 = vadd.s32 192, %v10358_v0  ;;  %vm18381_vm14 = vmmov %vm18375_vm12 }
 0x226   : > { %v13255_v55 = vsel %vm926_vm2, %v966_v47, %v624_v30  ;;  %3942 = vst.msk [vmem:[#allocation2 + $0x40] sm:$0xf] %vm18381_vm14, %v8924_v14  ;;  %vm1522_vm4 = vcmp.ne.s32.totalorder %v13242_v5, 0  ;;  %v1314_v23 = vmul.u32 17, %v1313_v20  ;;  %vm18382_vm2 = vcmp.ne.s32.totalorder %v12880_v13, 0 }
 0x227   : > { %v13266_v59 = vadd.s32 4294967272, %v13255_v55  ;;  %vm13271_vm12 = vmand %vm1561_vm0, %vm18382_vm2  ;;  %v13276_v30 = vadd.s32 17, %v12901_v10  ;;  %v13279_v61 = vadd.s32 17, %v13242_v5  ;;  %v679_v62 = vsub.s32 %v12884_v28, %v678_v63 }
 0x228   : > { %4302 = vrot.lane.b32.xlu1 %v4176_v51, %s9651_s24  ;;  %v13283_v20 = vadd.s32 216, %v10358_v0  ;;  %vm18385_vm14 = vcmask 1044480   ;;  %v4177_v33 = vshrl.u32 %v13032_v36, 16  ;;  %vm18386_vm0 = vcmp.lt.s32.totalorder %v12901_v10, 0 }
 0x229   : > { %v5231_v50 = vsel %vm18385_vm14, %v5224_v4, %v17686_v58  ;;  %vm13293_vm2 = vmand %vm18386_vm0, %vm1524_vm6  ;;  %v1291_v60 = vshrl.u32 %v13211_v56, 4  ;;  %v1297_v28 = vsub.s32 0, %v13266_v59  ;;  %vm18389_vm15 = vcmask 261120   ;;  %v3984_v51 = vld [vmem:[#allocation2 + $0x3c] sm:$0xf] }
 0x22a   : > { %9113 = vmatmul.mubr.msk.bf16.gmra.mxu0 %vm18389_vm15, %v5231_v50  ;;  %vm18390_vm14 = vcmp.lt.s32.totalorder %v13242_v5, 0  ;;  %vm851_vm11 = vcmp.ne.s32.totalorder %v679_v62, 0  ;;  %vm891_vm6 = vcmp.lt.s32.totalorder %v679_v62, 0  ;;  %v13313_v56 = vcombine.low %v12930_v12, %v3984_v51  ;;  %v13319_v58 = vld [vmem:[#allocation2 + $0x44] sm:$0xf] }
 0x22b   : > { %vm13304_vm13 = vmand %vm18390_vm14, %vm1522_vm4  ;;  %v13309_v11 = vmul.u32.u64.low 3435973837, %v13258_v9  ;;  %v13310_v47 = vmul.u32.u64.high 3435973837, %v13258_v9, %v13309_v11  ;;  %v13316_v63 = vsub.s32 %v12917_v7, %v1314_v23  ;;  %v1324_v14 = vshrl.u32 %v13229_v52, 4 }
 0x22c   : > { %18393 = vst [vmem:[#allocation50_spill] sm:$0xff] %v13313_v56  ;;  %v971_v50 = vadd.s32 320, %v679_v62  ;;  %v13321_v48 = vld [vmem:[#allocation2 + $0x48] sm:$0xf]  ;;  %vm1763_vm15 = vcmp.lt.s32.totalorder %v18394_v41, 296  ;;  %v1681_v11 = vsel %vm13271_vm12, %v1641_v25, %v12880_v13  ;;  %v1684_v7 = vsel %vm13293_vm2, %v13276_v30, %v12901_v10  ;;  %vm13335_vm0 = vmand %vm891_vm6, %vm851_vm11  ;;  %v18397_v25 = vld [vmem:[#allocation23_spill] sm:$0xff] }
 0x22d   : > { %v13333_v12 = vmin.u32 %v13266_v59, %v1297_v28  ;;  %v13340_v23 = vadd.s32 200, %v10358_v0  ;;  %v4179_v54 = vor.u32 %v4177_v33, %v13180_v19  ;;  %v13345_v13 = vcombine.low %v13319_v58, %v13321_v48  ;;  %v3985_v16 = vld [vmem:[#allocation2 + $0x40] sm:$0xf] }
 0x22e   : > { %v1682_v10 = vsel %vm13304_vm13, %v13279_v61, %v13242_v5  ;;  %vm1307_vm11 = vcmp.lt.s32.totalorder %v12848_v34, 0  ;;  %v4181_v30 = vshll.u32 %v13313_v56, 16  ;;  %v1292_v38 = vmul.u32 17, %v1291_v60 }
 0x22f   : > { %v13356_v19 = vmul.u32.u64.low 3435973837, %v13283_v20  ;;  %v13357_v33 = vmul.u32.u64.high 3435973837, %v13283_v20, %v13356_v19  ;;  %v13359_v28 = vcombine.low %v3984_v51, %v3985_v16  ;;  %v18398_v53 = vsel %vm12805_vm9, %v12742_v3, %v12492_v18 }
 0x230   : > { %vm13366_vm14 = vcmp.lt.s32.totalorder %v18398_v53, 16  ;;  %v1316_v5 = vsub.s32 0, %v13316_v63  ;;  %v1325_v61 = vmul.u32 17, %v1324_v14  ;;  %v13373_v60 = vsel %vm13335_vm0, %v971_v50, %v679_v62  ;;  %v18403_v50 = vld [vmem:[#allocation17_spill] sm:$0xff] }
 0x231   : > { %vm13375_vm13 = vcmp.lt.s32.totalorder %v1681_v11, 16  ;;  %v4579_v24 = vshrl.u32 %v13345_v13, 16  ;;  %v4582_v51 = vshll.u32 %v13345_v13, 16  ;;  %v4828_v14 = vrot.slane %v13359_v28, 6 }
 0x232   : > { %v13382_v18 = vmul.u32.u64.low 4042322161, %v13333_v12  ;;  %v13383_v3 = vmul.u32.u64.high 4042322161, %v13333_v12, %v13382_v18  ;;  %v4570_v52 = vshrl.u32 %v13359_v28, 16  ;;  %v4573_v62 = vshll.u32 %v13359_v28, 16 }
 0x233   : > { %v13391_v11 = vrot.slane %v4181_v30, 1  ;;  %v13397_v18 = vsub.s32 %v13115_v26, %v1292_v38  ;;  %v655_v53 = vshrl.u32 %v13310_v47, 8  ;;  %v18405_v46 = vrot.slane %v13359_v28, 5 }
 0x234   : > { %v18406_v39 = vrot.slane %v12965_v29, 5  ;;  %vm18407_vm9 = vcmask 1042432   ;;  %v18409_v30 = vrot.slane %v12965_v29, 6  ;;  %vm18410_vm6 = vcmask 1041408  }
 0x235   : > { %v4572_v31 = vrot.slane %v4570_v52, 5  ;;  %v4575_v22 = vrot.slane %v4573_v62, 6  ;;  %v18411_v38 = vrot.slane %v13345_v13, 6  ;;  %vm18412_vm0 = vmmov %vm18410_vm6  ;;  %vm13417_vm12 = vcmp.lt.s32.totalorder %v1684_v7, 16 }
 0x236   : > { %v13405_v37 = vsel %vm18407_vm9, %v18406_v39, %v18405_v46  ;;  %v4829_v2 = vsel %vm18410_vm6, %v18409_v30, %v4828_v14  ;;  %v13422_v39 = vsub.s32 %v13196_v42, %v1325_v61  ;;  %v13425_v29 = vadd.s32 4294967272, %v13373_v60 }
 0x237   : > { %18408 = vst [vmem:[#allocation19_spill] sm:$0xff] %v13405_v37  ;;  %4407 = vrot.lane.b32.xlu0 %v13405_v37, %s9650_s14  ;;  %v5236_v26 = vrot.slane %v4829_v2, 3  ;;  %v13415_v47 = vsel %vm18412_vm0, %v4828_v14, %v18411_v38  ;;  %v4576_v46 = vor.u32 %v4575_v22, %v4572_v31  ;;  %v4581_v62 = vrot.slane %v4579_v24, 5 }
 0x238   : > { %v17714_v52 = vrot.slane %v13415_v47, 3  ;;  %v4584_v2 = vrot.slane %v4582_v51, 6  ;;  %v18415_v30 = vrot.slane %v13185_v35, 3  ;;  %vm18416_vm9 = vcmask 1044480  }
 0x239   : > { %vm13431_vm6 = vcmp.lt.s32.totalorder %v1682_v10, 16  ;;  %v13438_v42 = vsel %vm1307_vm11, %v1316_v5, %v13316_v63  ;;  %v656_v61 = vmul.u32 320, %v655_v53  ;;  %v688_v22 = vshrl.u32 %v13357_v33, 8 }
 0x23a   : > { %v5237_v14 = vsel %vm18416_vm9, %v18415_v30, %v5236_v26  ;;  %vm18419_vm0 = vcmask 261120   ;;  %vm18420_vm2 = vsmask.f32 2304  ;;  %vm18421_vm4 = vsmask.f32 7424 }
 0x23b   : > { %9116 = vmatprep.mubr.msk.bf16.mxu0 %vm18419_vm0, %v5237_v14  ;;  %v4577_v31 = vsel %vm18420_vm2, %v13147_v40, %v4576_v46  ;;  %v4184_v35 = vsel %vm18421_vm4, %v4179_v54, %v13391_v11  ;;  %v5243_v10 = vsel %vm18416_vm9, %v5236_v26, %v17714_v52  ;;  %vm18422_vm11 = vcmp.ge.s32.totalorder %v18394_v41, 24 }
 0x23c   : > { %vm13453_vm3 = vmand %vm18422_vm11, %vm1763_vm15  ;;  %v13458_v63 = vcombine.low %v3985_v16, %v13319_v58  ;;  %4784 = vrot.lane.b32.xlu1 %v4577_v31, %s9652_s27  ;;  %4478 = vrot.lane.b32.xlu0 %v4184_v35, %s9652_s27  ;;  %vm18426_vm4 = vcmp.lt.s32.totalorder %v18397_v25, 296  ;;  %vm18427_vm2 = vcmp.ge.s32.totalorder %v18397_v25, 24  ;;  %v1294_v41 = vsub.s32 0, %v13397_v18  ;;  %v9082_v16 = vpop.f32.mrf.mxu0 }
 0x23d   : > { %vm13466_vm0 = vmand %vm18427_vm2, %vm18426_vm4  ;;  %v1302_v54 = vshrl.u32 %v13383_v3, 4  ;;  %v1352_v58 = vsub.s32 0, %v13425_v29  ;;  %vm18430_vm11 = vcmask 261120   ;;  %v17715_v33 = vrot.slane %v13345_v13, 5 }
 0x23e   : > { %18425 = vst [vmem:[#allocation23_spill] sm:$0xff] %v13458_v63  ;;  %9117 = vmatmul.mubr.msk.bf16.gmra.mxu0 %vm18430_vm11, %v5243_v10  ;;  %v13477_v25 = vor.u32 %v4584_v2, %v4581_v62  ;;  %v4185_v5 = vshrl.u32 %v13313_v56, 16  ;;  %v1327_v24 = vsub.s32 0, %v13422_v39  ;;  %vm13485_vm4 = vmand %vm13453_vm3, %vm13366_vm14  ;;  %v18431_v51 = vmov 0  ;;  %v3514_v62 = vpop.f32.mrf.mxu0 }
 0x23f   : > { %v18432_v51 = vsel %vm13485_vm4, 4294967295, %v18431_v51  ;;  %v3523_v3 = vadd.f32 %v13084_v8, %v9082_v16  ;;  %v1303_v53 = vmul.u32 17, %v1302_v54  ;;  %v13491_v26 = vmin.u32 %v13425_v29, %v1352_v58  ;;  %vm13498_vm2 = vmand %vm13466_vm0, %vm13375_vm13 }
 0x240   : > { %18433 = vst [vmem:[#allocation17_spill] sm:$0xff] %v18432_v51  ;;  %v657_v38 = vsub.s32 %v13258_v9, %v656_v61  ;;  %v18434_v4 = vmov 0  ;;  %v4189_v2 = vshll.u32 %v13458_v63, 16  ;;  %v689_v30 = vmul.u32 320, %v688_v22  ;;  %4712 = vrot.lane.b32.xlu1 %v4577_v31, %s9651_s24  ;;  %4304 = vrot.lane.b32.xlu0 %v4184_v35, %s9651_s24  ;;  %v9083_v61 = vpop.f32.mrf.mxu0 }
 0x241   : > { %v18435_v4 = vsel %vm13498_vm2, 4294967295, %v18434_v4  ;;  %v13504_v14 = vmul.u32.u64.low 3435973837, %v13340_v23  ;;  %v13505_v10 = vmul.u32.u64.high 3435973837, %v13340_v23, %v13504_v14  ;;  %v3627_v34 = vmax.f32 %v3523_v3, 0.0 }
 0x242   : > { %18436 = vst [vmem:[#allocation14_spill] sm:$0xff] %v18435_v4  ;;  %v3515_v54 = vadd.f32 %v13084_v8, %v3514_v62  ;;  %vm18437_vm3 = vcmp.lt.s32.totalorder %v18403_v50, 296  ;;  %vm18438_vm14 = vcmp.ge.s32.totalorder %v18403_v50, 24  ;;  %v1304_v19 = vsub.s32 %v13333_v12, %v1303_v53  ;;  %v3517_v62 = vpop.f32.mrf.mxu0 }
 0x243   : > { %vm13514_vm13 = vmand %vm18438_vm14, %vm18437_vm3  ;;  %vm849_vm0 = vcmp.ne.s32.totalorder %v657_v38, 0  ;;  %vm18441_vm11 = vcmp.lt.s32.totalorder %v18404_v43, 296  ;;  %vm18442_vm9 = vcmp.ge.s32.totalorder %v18404_v43, 24  ;;  %vm889_vm3 = vcmp.lt.s32.totalorder %v657_v38, 0 }
 0x244   : > { %vm13523_vm15 = vmand %vm18442_vm9, %vm18441_vm11  ;;  %v13529_v50 = vmul.u32.u64.low 4042322161, %v13491_v26  ;;  %v13530_v31 = vmul.u32.u64.high 4042322161, %v13491_v26, %v13529_v50  ;;  %v969_v35 = vadd.s32 320, %v657_v38  ;;  %v13534_v12 = vsel %vm13485_vm4, %v3627_v34, 0.0 }
 0x245   : > { %18445 = vst [vmem:[#allocation51_spill] sm:$0xff] %v13534_v12  ;;  %v3625_v40 = vmax.f32 %v3515_v54, 0.0  ;;  %v3526_v58 = vadd.f32 %v13084_v8, %v9083_v61  ;;  %v18446_v43 = vrot.slane %v13359_v28, 5  ;;  %vm18447_vm9 = vcmask 1042432   ;;  %vm929_vm14 = vmand %vm889_vm3, %vm849_vm0 }
 0x246   : > { %v8929_v3 = vpack.c.bf16 %v13534_v12, %v13534_v12  ;;  %vm13550_vm11 = vmand %vm13514_vm13, %vm13417_vm12  ;;  %v18449_v53 = vmov 0  ;;  %vm18452_vm10 = vsmask.f32 2304  ;;  %v13556_v28 = vrot.slane %v4189_v2, 1  ;;  %v13579_v2 = vpop.permute.xlu0 %4393 }
 0x247   : > { %v13542_v16 = vsel %vm18447_vm9, %v18446_v43, %v17715_v33  ;;  %v18450_v53 = vsel %vm13550_vm11, 4294967295, %v18449_v53  ;;  %v4586_v14 = vsel %vm18452_vm10, %v4576_v46, %v13477_v25  ;;  %v13558_v34 = vsel %vm929_vm14, %v969_v35, %v657_v38  ;;  %vm13575_vm10 = vmand %vm13523_vm15, %vm13431_vm6 }
 0x248   : > { %18448 = vst [vmem:[#allocation52_spill] sm:$0xff] %v13542_v16  ;;  %18451 = vst [vmem:[#allocation53_spill] sm:$0xff] %v18450_v53  ;;  %v13562_v54 = vsel %vm13498_vm2, %v3625_v40, 0.0  ;;  %v3628_v61 = vmax.f32 %v3526_v58, 0.0  ;;  %v3518_v36 = vadd.f32 %v13084_v8, %v3517_v62  ;;  %4409 = vrot.lane.b32.xlu1 %v13542_v16, %s9650_s14  ;;  %4786 = vrot.lane.b32.xlu0 %v4586_v14, %s9652_s27  ;;  %v1305_v9 = vsub.s32 0, %v1304_v19 }
 0x249   : > { %18453 = vst [vmem:[#allocation54_spill] sm:$0xff] %v13562_v54  ;;  %vm18454_vm12 = vcmask 257024   ;;  %v8927_v46 = vpack.c.bf16 %v13562_v54, %v13562_v54  ;;  %v18455_v38 = vmov 0  ;;  %v4187_v50 = vor.u32 %v4185_v5, %v13391_v11 }
 0x24a   : > { %3947 = vst.msk [vmem:[#allocation2 + $0x54] sm:$0xf] %vm18454_vm12, %v8929_v3  ;;  %v18456_v38 = vsel %vm13575_vm10, 4294967295, %v18455_v38  ;;  %vm1296_vm13 = vcmp.lt.s32.totalorder %v13266_v59, 0  ;;  %v690_v35 = vsub.s32 %v13283_v20, %v689_v30  ;;  %v13586_v40 = vsel %vm13550_vm11, %v3628_v61, 0.0  ;;  %vm18459_vm6 = vmmov %vm18454_vm12  ;;  %v18480_v61 = vld [vmem:[#allocation21_spill] sm:$0xff] }
 0x24b   : > { %18457 = vst [vmem:[#allocation55_spill] sm:$0xff] %v18456_v38  ;;  %18458 = vst [vmem:[#allocation56_spill] sm:$0xff] %v13586_v40  ;;  %v3626_v58 = vmax.f32 %v3518_v36, 0.0  ;;  %v13590_v7 = vadd.s32 4294967272, %v13558_v34  ;;  %v8930_v22 = vpack.c.bf16 %v13586_v40, %v13586_v40  ;;  %vm18460_vm15 = vsmask.f32 7424 }
 0x24c   : > { %3945 = vst.msk [vmem:[#allocation2 + $0x4c] sm:$0xf] %vm18459_vm6, %v8927_v46  ;;  %v4192_v59 = vsel %vm18460_vm15, %v4187_v50, %v13556_v28  ;;  %vm18461_vm3 = vcmp.lt.s32.totalorder %v12968_v27, 0  ;;  %vm18462_vm9 = vcmp.lt.s32.totalorder %v13118_v32, 0  ;;  %4714 = vrot.lane.b32.xlu0 %v4586_v14, %s9651_s24  ;;  %v13615_v30 = vsel %vm1296_vm13, %v1305_v9, %v1304_v19  ;;  %vm18464_vm14 = vmmov %vm18459_vm6 }
 0x24d   : > { %v13602_v20 = vsel %vm18461_vm3, %v1294_v41, %v13397_v18  ;;  %v13607_v11 = vsel %vm18462_vm9, %v1327_v24, %v13422_v39  ;;  %v13611_v5 = vsel %vm13575_vm10, %v3626_v58, 0.0  ;;  %4480 = vrot.lane.b32.xlu1 %v4192_v59, %s9652_s27  ;;  %v1357_v43 = vshrl.u32 %v13530_v31, 4  ;;  %3948 = vst.msk [vmem:[#allocation2 + $0x58] sm:$0xf] %vm18464_vm14, %v8930_v22  ;;  %v13623_v39 = vpop.permute.xlu1 %4749  ;;  %vm18467_vm9 = vmmov %vm18464_vm14 }
 0x24e   : > { %18463 = vst [vmem:[#allocation57_spill] sm:$0xff] %v13611_v5  ;;  %v666_v27 = vshrl.u32 %v13505_v10, 8  ;;  %v8928_v32 = vpack.c.bf16 %v13611_v5, %v13611_v5  ;;  %v1330_v18 = vsub.s32 0, %v13590_v7  ;;  %vm852_vm12 = vcmp.ne.s32.totalorder %v690_v35, 0  ;;  %v4293_v10 = vpop.permute.xlu0 %4292 }
 0x24f   : > { %vm892_vm6 = vcmp.lt.s32.totalorder %v690_v35, 0  ;;  %v972_v24 = vadd.s32 320, %v690_v35  ;;  %v1647_v19 = vadd.s32 17, %v13438_v42  ;;  %vm1528_vm14 = vcmp.ne.s32.totalorder %v13607_v11, 0 }
 0x250   : > { %vm13627_vm3 = vmand %vm892_vm6, %vm852_vm12  ;;  %3946 = vst.msk [vmem:[#allocation2 + $0x50] sm:$0xf] %vm18467_vm9, %v8928_v32  ;;  %vm1568_vm0 = vcmp.lt.s32.totalorder %v13607_v11, 0  ;;  %v13636_v31 = vmin.u32 %v13590_v7, %v1330_v18  ;;  %vm18468_vm12 = vcmp.ne.s32.totalorder %v13438_v42, 0  ;;  %vm18469_vm6 = vcmp.lt.s32.totalorder %v13438_v42, 0 }
 0x251   : > { %4306 = vrot.lane.b32.xlu1 %v4192_v59, %s9651_s24  ;;  %vm13643_vm13 = vmand %vm18469_vm6, %vm18468_vm12  ;;  %vm1526_vm9 = vcmp.ne.s32.totalorder %v13615_v30, 0  ;;  %vm1566_vm15 = vcmp.lt.s32.totalorder %v13615_v30, 0  ;;  %v1358_v62 = vmul.u32 17, %v1357_v43  ;;  %v667_v14 = vmul.u32 320, %v666_v27  ;;  %v3990_v33 = vld [vmem:[#allocation2 + $0x54] sm:$0xf] }
 0x252   : > { %vm18472_vm11 = vcmp.ne.s32.totalorder %v13602_v20, 0  ;;  %vm18473_vm4 = vcmp.lt.s32.totalorder %v13602_v20, 0  ;;  %v1645_v36 = vadd.s32 17, %v13602_v20  ;;  %v13659_v9 = vadd.s32 17, %v13607_v11  ;;  %vm13665_vm12 = vmand %vm1568_vm0, %vm1528_vm14  ;;  %v13704_v52 = vpop.permute.xlu0 %4774 }
 0x253   : > { %vm13653_vm10 = vmand %vm18473_vm4, %vm18472_vm11  ;;  %v13663_v46 = vsel %vm13627_vm3, %v972_v24, %v690_v35  ;;  %v3988_v50 = vld [vmem:[#allocation2 + $0x4c] sm:$0xf]  ;;  %v13670_v22 = vadd.s32 17, %v13615_v30  ;;  %v13673_v59 = vmul.u32.u64.low 4042322161, %v13636_v31  ;;  %v13674_v43 = vmul.u32.u64.high 4042322161, %v13636_v31, %v13673_v59  ;;  %v13692_v24 = vpop.permute.xlu1 %4395 }
 0x254   : > { %v13677_v27 = vcombine.low %v13321_v48, %v3988_v50  ;;  %v1687_v35 = vsel %vm13643_vm13, %v1647_v19, %v13438_v42  ;;  %vm13682_vm4 = vmand %vm1566_vm15, %vm1526_vm9  ;;  %v13687_v18 = vadd.s32 240, %v10358_v0  ;;  %v13690_v41 = vadd.s32 224, %v10358_v0  ;;  %v13695_v59 = vld [vmem:[#allocation2 + $0x58] sm:$0xf] }
 0x255   : > { %vm17733_vm11 = vcmask 523264   ;;  %v4193_v48 = vshrl.u32 %v13458_v63, 16  ;;  %v1359_v3 = vsub.s32 %v13491_v26, %v1358_v62  ;;  %v13699_v42 = vadd.s32 4294967272, %v13663_v46 }
 0x256   : > { %v13702_v19 = vsub.s32 %v13340_v23, %v667_v14  ;;  %v1685_v40 = vsel %vm13653_vm10, %v1645_v36, %v13602_v20  ;;  %v1688_v26 = vsel %vm13665_vm12, %v13659_v9, %v13607_v11  ;;  %vm1351_vm13 = vcmp.lt.s32.totalorder %v13425_v29, 0  ;;  %v13762_v51 = vpop.permute.xlu0 %4468 }
 0x257   : > { %v13717_v23 = vadd.s32 248, %v10358_v0  ;;  %v3989_v62 = vld [vmem:[#allocation2 + $0x50] sm:$0xf]  ;;  %v4195_v14 = vor.u32 %v4193_v48, %v13556_v28  ;;  %v4197_v12 = vshll.u32 %v13677_v27, 16  ;;  %v13722_v5 = vcombine.low %v3990_v33, %v13695_v59  ;;  %v13751_v32 = vpop.permute.xlu1 %4397 }
 0x258   : > { %v1686_v20 = vsel %vm13682_vm4, %v13670_v22, %v13615_v30  ;;  %vm18481_vm10 = vcmask 261120   ;;  %v13730_v36 = vcombine.low %v3988_v50, %v3989_v62  ;;  %vm13738_vm6 = vcmp.lt.s32.totalorder %v1687_v35, 16 }
 0x259   : > { %v4862_v11 = vsel %vm18481_vm10, %v18480_v61, %v4293_v10  ;;  %v13735_v28 = vmul.u32.u64.low 3435973837, %v13687_v18  ;;  %v13736_v9 = vmul.u32.u64.high 3435973837, %v13687_v18, %v13735_v28  ;;  %v1360_v48 = vsub.s32 0, %v1359_v3 }
 0x25a   : > { %v1363_v30 = vsub.s32 0, %v13699_v42  ;;  %vm850_vm9 = vcmp.ne.s32.totalorder %v13702_v19, 0  ;;  %vm890_vm12 = vcmp.lt.s32.totalorder %v13702_v19, 0  ;;  %v4832_v50 = vrot.slane %v13730_v36, 6 }
 0x25b   : > { %v4588_v22 = vshrl.u32 %v13730_v36, 16  ;;  %v970_v35 = vadd.s32 320, %v13702_v19  ;;  %v4591_v61 = vshll.u32 %v13730_v36, 16  ;;  %v13754_v28 = vrot.slane %v4197_v12, 1  ;;  %v4295_v29 = vpop.permute.xlu1 %4294 }
 0x25c   : > { %vm13757_vm3 = vcmp.lt.s32.totalorder %v1685_v40, 16  ;;  %v1335_v53 = vshrl.u32 %v13674_v43, 4  ;;  %v18486_v38 = vrot.slane %v13730_v36, 5  ;;  %v18487_v4 = vrot.slane %v13345_v13, 5 }
 0x25d   : > { %vm18488_vm4 = vcmask 1042432   ;;  %v18490_v12 = vrot.slane %v13345_v13, 6  ;;  %vm18491_vm10 = vcmask 1041408   ;;  %v4590_v54 = vrot.slane %v4588_v22, 5 }
 0x25e   : > { %v13769_v63 = vsel %vm18488_vm4, %v18487_v4, %v18486_v38  ;;  %v4597_v40 = vshrl.u32 %v13722_v5, 16  ;;  %v4593_v16 = vrot.slane %v4591_v61, 6  ;;  %v18492_v37 = vrot.slane %v13722_v5, 6  ;;  %vm18493_vm4 = vmmov %vm18491_vm10 }
 0x25f   : > { %18489 = vst [vmem:[#allocation21_spill] sm:$0xff] %v13769_v63  ;;  %v4833_v56 = vsel %vm18491_vm10, %v18490_v12, %v4832_v50  ;;  %4411 = vrot.lane.b32.xlu0 %v13769_v63, %s9650_s14  ;;  %v4600_v13 = vshll.u32 %v13722_v5, 16  ;;  %vm930_vm10 = vmand %vm890_vm12, %vm850_vm9  ;;  %vm13790_vm14 = vcmp.lt.s32.totalorder %v1688_v26, 16  ;;  %v13797_v61 = vmin.u32 %v13699_v42, %v1363_v30  ;;  %v4703_v22 = vpop.permute.xlu1 %4702 }
 0x260   : > { %v5248_v43 = vrot.slane %v4833_v56, 3  ;;  %v13782_v4 = vsel %vm18493_vm4, %v4832_v50, %v18492_v37  ;;  %v13794_v56 = vcombine.low %v3989_v62, %v3990_v33  ;;  %v18496_v37 = vrot.slane %v13415_v47, 3 }
 0x261   : > { %v17736_v38 = vrot.slane %v13782_v4, 3  ;;  %vm18497_vm4 = vcmask 1044480   ;;  %v4594_v12 = vor.u32 %v4593_v16, %v4590_v54  ;;  %vm13802_vm0 = vcmp.lt.s32.totalorder %v1686_v20, 16  ;;  %v4701_v20 = vpop.permute.xlu0 %4700 }
 0x262   : > { %v5249_v50 = vsel %vm18497_vm4, %v18496_v37, %v5248_v43  ;;  %v13808_v26 = vsel %vm1351_vm13, %v1360_v48, %v1359_v3  ;;  %v13812_v33 = vsel %vm17733_vm11, %v4862_v11, %v13579_v2  ;;  %vm18500_vm9 = vcmask 261120   ;;  %v9086_v11 = vpop.f32.mrf.mxu0 }
 0x263   : > { %9120 = vmatprep.mubr.msk.bf16.mxu0 %vm18500_vm9, %v5249_v50  ;;  %vm18501_vm12 = vsmask.f32 7424  ;;  %v5255_v16 = vsel %vm18497_vm4, %v5248_v43, %v17736_v38  ;;  %vm1329_vm15 = vcmp.lt.s32.totalorder %v13590_v7, 0  ;;  %v13822_v54 = vsel %vm930_vm10, %v970_v35, %v13702_v19  ;;  %vm18503_vm11 = vmmov %vm18500_vm9  ;;  %v18560_v7 = vld [vmem:[#allocation24_spill] sm:$0xff] }
 0x264   : > { %v4200_v47 = vsel %vm18501_vm12, %v4195_v14, %v13754_v28  ;;  %vm18502_vm13 = vsmask.f32 2304  ;;  %9121 = vmatmul.mubr.msk.bf16.gmra.mxu0 %vm18503_vm11, %v5255_v16  ;;  %vm18504_vm9 = vcmp.lt.s32.totalorder %v12826_v17, 296  ;;  %vm18505_vm12 = vcmp.ge.s32.totalorder %v12826_v17, 24  ;;  %v3530_v50 = vpop.f32.mrf.mxu0 }
 0x265   : > { %v4595_v3 = vsel %vm18502_vm13, %v13477_v25, %v4594_v12  ;;  %4482 = vrot.lane.b32.xlu0 %v4200_v47, %s9652_s27  ;;  %vm13832_vm2 = vmand %vm18505_vm12, %vm18504_vm9  ;;  %v4599_v62 = vrot.slane %v4597_v40, 5  ;;  %v4602_v14 = vrot.slane %v4600_v13, 6  ;;  %v1336_v19 = vmul.u32 17, %v1335_v53  ;;  %v18512_v13 = vld [vmem:[#allocation12_spill] sm:$0xff] }
 0x266   : > { %4788 = vrot.lane.b32.xlu1 %v4595_v3, %s9652_s27  ;;  %v4205_v25 = vshll.u32 %v13794_v56, 16  ;;  %vm1531_vm10 = vcmp.ne.s32.totalorder %v13808_v26, 0  ;;  %v13841_v48 = vmul.u32.u64.low 4042322161, %v13797_v61  ;;  %v13842_v17 = vmul.u32.u64.high 4042322161, %v13797_v61, %v13841_v48 }
 0x267   : > { %v3539_v30 = vadd.f32 %v13084_v8, %v9086_v11  ;;  %vm18508_vm4 = vcmp.lt.s32.totalorder %v12934_v1, 296  ;;  %vm18509_vm13 = vcmp.ge.s32.totalorder %v12934_v1, 24  ;;  %v13854_v35 = vadd.s32 17, %v13808_v26  ;;  %v18516_v11 = vld [vmem:[#allocation25_spill] sm:$0xff] }
 0x268   : > { %vm13849_vm9 = vmand %vm18509_vm13, %vm18508_vm4  ;;  %v1337_v40 = vsub.s32 %v13636_v31, %v1336_v19  ;;  %v13858_v43 = vadd.s32 4294967272, %v13822_v54  ;;  %v13862_v37 = vsel %vm18503_vm11, %v18512_v13, %v4295_v29  ;;  %v18513_v1 = vmov 0 }
 0x269   : > { %vm13868_vm4 = vmand %vm13832_vm2, %vm13738_vm6  ;;  %v4373_v16 = vrot.slane %v13722_v5, 5  ;;  %v4201_v31 = vshrl.u32 %v13677_v27, 16  ;;  %v721_v19 = vshrl.u32 %v13736_v9, 8  ;;  %v4992_v29 = vsel %vm18503_vm11, %v18516_v11, %v4701_v20  ;;  %4308 = vrot.lane.b32.xlu0 %v4200_v47, %s9651_s24  ;;  %v9087_v47 = vpop.f32.mrf.mxu0 }
 0x26a   : > { %v18514_v1 = vsel %vm13868_vm4, 4294967295, %v18513_v1  ;;  %v3631_v48 = vmax.f32 %v3539_v30, 0.0  ;;  %v3531_v58 = vadd.f32 %v13084_v8, %v3530_v50  ;;  %vm18517_vm2 = vcmp.lt.s32.totalorder %v13079_v45, 296  ;;  %vm13894_vm11 = vmand %vm13849_vm9, %vm13757_vm3  ;;  %4716 = vrot.lane.b32.xlu1 %v4595_v3, %s9651_s24 }
 0x26b   : > { %18515 = vst [vmem:[#allocation12_spill] sm:$0xff] %v18514_v1  ;;  %vm18518_vm6 = vcmp.ge.s32.totalorder %v13079_v45, 24  ;;  %v13888_v13 = vor.u32 %v4602_v14, %v4599_v62  ;;  %v18521_v9 = vmov 0  ;;  %v13899_v20 = vrot.slane %v4205_v25, 1 }
 0x26c   : > { %vm13884_vm12 = vmand %vm18518_vm6, %vm18517_vm2  ;;  %v18522_v9 = vsel %vm13894_vm11, 4294967295, %v18521_v9  ;;  %v1368_v45 = vshrl.u32 %v13842_v17, 4  ;;  %v1341_v30 = vsub.s32 0, %v13858_v43  ;;  %v722_v50 = vmul.u32 320, %v721_v19  ;;  %v3533_v19 = vpop.f32.mrf.mxu0 }
 0x26d   : > { %18523 = vst [vmem:[#allocation25_spill] sm:$0xff] %v18522_v9  ;;  %v13905_v62 = vsel %vm13868_vm4, %v3631_v48, 0.0  ;;  %v3629_v10 = vmax.f32 %v3531_v58, 0.0  ;;  %v3542_v14 = vadd.f32 %v13084_v8, %v9087_v47  ;;  %vm18525_vm3 = vcmp.lt.s32.totalorder %v13255_v55, 296  ;;  %vm13922_vm6 = vmand %vm13884_vm12, %vm13790_vm14 }
 0x26e   : > { %18524 = vst [vmem:[#allocation58_spill] sm:$0xff] %v13905_v62  ;;  %vm18526_vm9 = vcmp.ge.s32.totalorder %v13255_v55, 24  ;;  %v1338_v25 = vsub.s32 0, %v1337_v40  ;;  %v8933_v17 = vpack.c.bf16 %v13905_v62, %v13905_v62  ;;  %v18529_v53 = vmov 0 }
 0x26f   : > { %vm13912_vm2 = vmand %vm18526_vm9, %vm18525_vm3  ;;  %v18530_v53 = vsel %vm13922_vm6, 4294967295, %v18529_v53  ;;  %v18532_v55 = vrot.slane %v13730_v36, 5  ;;  %vm18533_vm3 = vcmask 1042432   ;;  %vm18534_vm9 = vsmask.f32 2304 }
 0x270   : > { %18531 = vst [vmem:[#allocation59_spill] sm:$0xff] %v18530_v53  ;;  %v4604_v48 = vsel %vm18534_vm9, %v4594_v12, %v13888_v13  ;;  %v4203_v58 = vor.u32 %v4201_v31, %v13754_v28  ;;  %v13938_v2 = vsel %vm13894_vm11, %v3629_v10, 0.0  ;;  %v3632_v47 = vmax.f32 %v3542_v14, 0.0  ;;  %vm13949_vm12 = vmand %vm13912_vm2, %vm13802_vm0 }
 0x271   : > { %v13931_v11 = vsel %vm18533_vm3, %v18532_v55, %v4373_v16  ;;  %18535 = vst [vmem:[#allocation60_spill] sm:$0xff] %v13938_v2  ;;  %v3534_v38 = vadd.f32 %v13084_v8, %v3533_v19  ;;  %4790 = vrot.lane.b32.xlu0 %v4604_v48, %s9652_s27  ;;  %v1369_v62 = vmul.u32 17, %v1368_v45  ;;  %vm18536_vm14 = vcmask 257024  }
 0x272   : > { %3951 = vst.msk [vmem:[#allocation2 + $0x64] sm:$0xf] %vm18536_vm14, %v8933_v17  ;;  %v8931_v36 = vpack.c.bf16 %v13938_v2, %v13938_v2  ;;  %v18537_v28 = vmov 0  ;;  %4413 = vrot.lane.b32.xlu1 %v13931_v11, %s9650_s14  ;;  %vm18539_vm3 = vsmask.f32 7424  ;;  %v8559_v12 = vmin.u32 %v13858_v43, %v1341_v30  ;;  %vm18541_vm0 = vmmov %vm18536_vm14 }
 0x273   : > { %v18538_v28 = vsel %vm13949_vm12, 4294967295, %v18537_v28  ;;  %v4208_v8 = vsel %vm18539_vm3, %v4203_v58, %v13899_v20  ;;  %v723_v31 = vsub.s32 %v13687_v18, %v722_v50  ;;  %v13961_v45 = vsel %vm13922_vm6, %v3632_v47, 0.0  ;;  %vm18546_vm3 = vmmov %vm18541_vm0 }
 0x274   : > { %18540 = vst [vmem:[#allocation61_spill] sm:$0xff] %v13961_v45  ;;  %v3630_v63 = vmax.f32 %v3534_v38, 0.0  ;;  %v13965_v10 = vsel %vm1329_vm15, %v1338_v25, %v1337_v40  ;;  %v1370_v14 = vsub.s32 %v13797_v61, %v1369_v62  ;;  %3949 = vst.msk [vmem:[#allocation2 + $0x5c] sm:$0xf] %vm18541_vm0, %v8931_v36  ;;  %v8934_v3 = vpack.c.bf16 %v13961_v45, %v13961_v45  ;;  %v4471_v38 = vpop.permute.xlu1 %4470 }
 0x275   : > { %v13971_v17 = vmul.u32.u64.low 4042322161, %v8559_v12  ;;  %v13972_v30 = vmul.u32.u64.high 4042322161, %v8559_v12, %v13971_v17  ;;  %vm855_vm2 = vcmp.ne.s32.totalorder %v723_v31, 0  ;;  %4718 = vrot.lane.b32.xlu0 %v4604_v48, %s9651_s24  ;;  %vm18543_vm15 = vcmp.lt.s32.totalorder %v13808_v26, 0 }
 0x276   : > { %v13976_v18 = vsel %vm13949_vm12, %v3630_v63, 0.0  ;;  %vm13983_vm9 = vmand %vm18543_vm15, %vm1531_vm10  ;;  %v1371_v61 = vsub.s32 0, %v1370_v14  ;;  %vm895_vm14 = vcmp.lt.s32.totalorder %v723_v31, 0  ;;  %v975_v40 = vadd.s32 320, %v723_v31  ;;  %3952 = vst.msk [vmem:[#allocation2 + $0x68] sm:$0xf] %vm18546_vm3, %v8934_v3  ;;  %4484 = vrot.lane.b32.xlu1 %v4208_v8, %s9652_s27 }
 0x277   : > { %18542 = vst [vmem:[#allocation62_spill] sm:$0xff] %v13976_v18  ;;  %v8932_v50 = vpack.c.bf16 %v13976_v18, %v13976_v18  ;;  %vm18547_vm0 = vcmask 523264   ;;  %vm13994_vm13 = vmand %vm895_vm14, %vm855_vm2  ;;  %v13999_v19 = vmul.u32.u64.low 3435973837, %v13690_v41  ;;  %v14000_v55 = vmul.u32.u64.high 3435973837, %v13690_v41, %v13999_v19 }
 0x278   : > { %v4908_v62 = vsel %vm18547_vm0, %v13862_v37, %v13692_v24  ;;  %vm18550_vm10 = vcmask 785408   ;;  %vm18551_vm15 = vmmov %vm18547_vm0  ;;  %v14010_v24 = vpop.permute.xlu0 %4399  ;;  %vm18553_vm2 = vcmp.lt.s32.totalorder %v13699_v42, 0  ;;  %vm18554_vm14 = vcmask 257024  }
 0x279   : > { %v4949_v48 = vsel %vm18550_vm10, %v13812_v33, %v13762_v51  ;;  %v5054_v58 = vsel %vm18551_vm15, %v4992_v29, %v13623_v39  ;;  %vm18552_vm3 = vmmov %vm18550_vm10  ;;  %v14014_v37 = vsel %vm18553_vm2, %v1371_v61, %v1370_v14  ;;  %3950 = vst.msk [vmem:[#allocation2 + $0x60] sm:$0xf] %vm18554_vm14, %v8932_v50  ;;  %v1691_v36 = vsel %vm13983_vm9, %v13854_v35, %v13808_v26  ;;  %v4297_v39 = vpop.permute.xlu1 %4296  ;;  %v18556_v14 = vld [vmem:[#allocation9_spill] sm:$0xff] }
 0x27a   : > { %v14008_v47 = vsel %vm18552_vm3, %v4908_v62, %v4471_v38  ;;  %vm1529_vm0 = vcmp.ne.s32.totalorder %v13965_v10, 0  ;;  %vm1569_vm10 = vcmp.lt.s32.totalorder %v13965_v10, 0  ;;  %v14024_v51 = vadd.s32 232, %v10358_v0  ;;  %4310 = vrot.lane.b32.xlu1 %v4208_v8, %s9651_s24 }
 0x27b   : > { %vm1532_vm15 = vcmp.ne.s32.totalorder %v14014_v37, 0  ;;  %vm1572_vm3 = vcmp.lt.s32.totalorder %v14014_v37, 0  ;;  %v1346_v42 = vshrl.u32 %v13972_v30, 4  ;;  %v14031_v33 = vsel %vm13994_vm13, %v975_v40, %v723_v31  ;;  %v3992_v30 = vld [vmem:[#allocation2 + $0x5c] sm:$0xf]  ;;  %vm14049_vm13 = vmand %vm1569_vm10, %vm1529_vm0 }
 0x27c   : > { %v5205_v29 = vrot.slane %v4949_v48, 3  ;;  %v17738_v26 = vrot.slane %v14008_v47, 3  ;;  %vm18555_vm9 = vcmask 785408   ;;  %v1649_v63 = vadd.s32 17, %v13965_v10  ;;  %v14042_v17 = vpop.permute.xlu0 %4401 }
 0x27d   : > { %v14037_v35 = vsel %vm18555_vm9, %v5054_v58, %v13704_v52  ;;  %vm18557_vm2 = vcmask 261120   ;;  %v4209_v31 = vshrl.u32 %v13794_v56, 16  ;;  %v1652_v52 = vadd.s32 17, %v14014_v37  ;;  %vm14063_vm9 = vmand %vm1572_vm3, %vm1532_vm15  ;;  %v4473_v25 = vpop.permute.xlu1 %4472  ;;  %v14074_v48 = vld [vmem:[#allocation2 + $0x68] sm:$0xf] }
 0x27e   : > { %v4995_v3 = vsel %vm18557_vm2, %v18556_v14, %v4703_v22  ;;  %v1347_v38 = vmul.u32 17, %v1346_v42  ;;  %vm18561_vm14 = vmmov %vm18557_vm2  ;;  %v14057_v22 = vcombine.low %v13695_v59, %v3992_v30  ;;  %v14068_v50 = vadd.s32 4294967272, %v14031_v33  ;;  %v14081_v14 = vld [vmem:[#allocation2 + $0x64] sm:$0xf] }
 0x27f   : > { %v4866_v61 = vsel %vm18561_vm14, %v18560_v7, %v4297_v39  ;;  %v699_v62 = vshrl.u32 %v14000_v55, 8  ;;  %v14072_v19 = vor.u32 %v4209_v31, %v13899_v20  ;;  %vm1340_vm0 = vcmp.lt.s32.totalorder %v13858_v43, 0 }
 0x280   : > { %v1348_v58 = vsub.s32 %v8559_v12, %v1347_v38  ;;  %vm18564_vm10 = vcmask 523264   ;;  %v4213_v42 = vshll.u32 %v14057_v22, 16  ;;  %vm18565_vm2 = vcmask 1044480   ;;  %v14095_v31 = vld [vmem:[#allocation2 + $0x60] sm:$0xf] }
 0x281   : > { %v5055_v39 = vsel %vm18564_vm10, %v4995_v3, %v14010_v24  ;;  %v14088_v20 = vsel %vm18565_vm2, %v5205_v29, %v17738_v26  ;;  %v1689_v12 = vsel %vm14049_vm13, %v1649_v63, %v13965_v10  ;;  %vm18566_vm14 = vmmov %vm18564_vm10  ;;  %v4705_v3 = vpop.permute.xlu0 %4704  ;;  %v14099_v38 = vcombine.low %v14081_v14, %v14074_v48  ;;  %v14117_v26 = vpop.permute.xlu1 %4298 }
 0x282   : > { %v4910_v55 = vsel %vm18566_vm14, %v4866_v61, %v13751_v32  ;;  %v1692_v29 = vsel %vm14063_vm9, %v1652_v52, %v14014_v37  ;;  %v1349_v8 = vsub.s32 0, %v1348_v58  ;;  %vm18567_vm13 = vcmask 261120  }
 0x283   : > { %v4998_v10 = vsel %vm18567_vm13, %v12603_v49, %v4705_v3  ;;  %v14109_v32 = vcombine.low %v3992_v30, %v14095_v31  ;;  %v1396_v63 = vsub.s32 0, %v14068_v50  ;;  %v700_v7 = vmul.u32 320, %v699_v62  ;;  %vm18573_vm13 = vmmov %vm18566_vm14 }
 0x284   : > { %vm18568_vm10 = vcmask 785408   ;;  %vm14119_vm9 = vcmp.lt.s32.totalorder %v1691_v36, 16  ;;  %v14125_v49 = vsel %vm1340_vm0, %v1349_v8, %v1348_v58  ;;  %v5056_v43 = vsel %vm18573_vm13, %v4998_v10, %v14042_v17 }
 0x285   : > { %v14115_v61 = vsel %vm18568_vm10, %v4910_v55, %v4473_v25  ;;  %v14128_v30 = vmul.u32.u64.low 3435973837, %v13717_v23  ;;  %v14129_v52 = vmul.u32.u64.high 3435973837, %v13717_v23, %v14128_v30  ;;  %v17740_v40 = vrot.slane %v14109_v32, 5  ;;  %v4779_v58 = vpop.permute.xlu0 %4778  ;;  %v4777_v10 = vpop.permute.xlu1 %4776 }
 0x286   : > { %v4836_v62 = vrot.slane %v14109_v32, 6  ;;  %v4606_v25 = vshrl.u32 %v14109_v32, 16  ;;  %v14134_v55 = vrot.slane %v4213_v42, 1  ;;  %vm14136_vm10 = vcmp.lt.s32.totalorder %v1689_v12, 16 }
 0x287   : > { %v4609_v3 = vshll.u32 %v14109_v32, 16  ;;  %vm18574_vm2 = vcmask 1042432   ;;  %v18575_v12 = vrot.slane %v13722_v5, 6  ;;  %vm18576_vm14 = vcmask 1041408  }
 0x288   : > { %v14150_v42 = vsel %vm18574_vm2, %v4373_v16, %v17740_v40  ;;  %v4608_v59 = vrot.slane %v4606_v25, 5  ;;  %vm1570_vm13 = vcmp.lt.s32.totalorder %v14125_v49, 0  ;;  %v18577_v16 = vrot.slane %v14099_v38, 6  ;;  %vm18578_vm2 = vmmov %vm18576_vm14 }
 0x289   : > { %v4837_v30 = vsel %vm18576_vm14, %v18575_v12, %v4836_v62  ;;  %4415 = vrot.lane.b32.xlu0 %v14150_v42, %s9650_s14  ;;  %v4611_v45 = vrot.slane %v4609_v3, 6  ;;  %vm14165_vm0 = vcmp.lt.s32.totalorder %v1692_v29, 16  ;;  %v4615_v25 = vshrl.u32 %v14099_v38, 16 }
 0x28a   : > { %v5260_v8 = vrot.slane %v4837_v30, 3  ;;  %v14163_v40 = vsel %vm18578_vm2, %v4836_v62, %v18577_v16  ;;  %vm18581_vm14 = vcmask 785408   ;;  %v1650_v3 = vadd.s32 17, %v14125_v49 }
 0x28b   : > { %v14171_v12 = vsel %vm18581_vm14, %v5056_v43, %v4779_v58  ;;  %vm18582_vm15 = vmmov %vm18581_vm14  ;;  %v17753_v2 = vrot.slane %v14163_v40, 3  ;;  %v18583_v53 = vrot.slane %v13782_v4, 3  ;;  %vm18584_vm2 = vcmask 1044480  }
 0x28c   : > { %v5081_v18 = vsel %vm18582_vm15, %v5055_v39, %v4777_v10  ;;  %v14179_v29 = vor.u32 %v4611_v45, %v4608_v59  ;;  %vm18585_vm3 = vcmp.ne.s32.totalorder %v14125_v49, 0  ;;  %v14190_v39 = vmin.u32 %v14068_v50, %v1396_v63 }
 0x28d   : > { %v5209_v30 = vrot.slane %v5081_v18, 3  ;;  %v5261_v62 = vsel %vm18584_vm2, %v18583_v53, %v5260_v8  ;;  %vm14185_vm6 = vmand %vm1570_vm13, %vm18585_vm3  ;;  %vm18588_vm15 = vcmask 261120   ;;  %vm18589_vm14 = vsmask.f32 7424 }
 0x28e   : > { %9124 = vmatprep.mubr.msk.bf16.mxu0 %vm18588_vm15, %v5261_v62  ;;  %v4216_v4 = vsel %vm18589_vm14, %v14072_v19, %v14134_v55  ;;  %v5267_v53 = vsel %vm18584_vm2, %v5260_v8, %v17753_v2  ;;  %v4618_v45 = vshll.u32 %v14099_v38, 16  ;;  %v701_v18 = vsub.s32 %v13690_v41, %v700_v7  ;;  %vm18591_vm13 = vmmov %vm18588_vm15  ;;  %v14238_v62 = vld [vmem:[%s17523_s2] ss:$0 sm:$0xff] }
 0x28f   : > { %v5216_v59 = vrot.slane %v14171_v12, 3  ;;  %vm18590_vm3 = vsmask.f32 2304  ;;  %4486 = vrot.lane.b32.xlu0 %v4216_v4, %s9652_s27  ;;  %9125 = vmatmul.mubr.msk.bf16.gmra.mxu0 %vm18591_vm13, %v5267_v53  ;;  %vm18592_vm15 = vcmp.lt.s32.totalorder %v13373_v60, 296  ;;  %vm18593_vm14 = vcmp.ge.s32.totalorder %v13373_v60, 24  ;;  %v9572_v53 = vld [vmem:[%s17524_s3 + $0x88] sm:$0xff]  }
 0x290   : > { %v4613_v63 = vsel %vm18590_vm3, %v13888_v13, %v14179_v29  ;;  %vm14211_vm4 = vmand %vm18593_vm14, %vm18592_vm15  ;;  %v18596_v41 = vrot.slane %v14037_v35, 3  ;;  %v4217_v58 = vshrl.u32 %v14057_v22, 16  ;;  %v9090_v13 = vpop.f32.mrf.mxu0  ;;  %vm18597_vm3 = vcmp.lt.s32.totalorder %v13558_v34, 296 }
 0x291   : > { %4792 = vrot.lane.b32.xlu1 %v4613_v63, %s9652_s27  ;;  %vm18598_vm13 = vcmp.ge.s32.totalorder %v13558_v34, 24  ;;  %v1690_v35 = vsel %vm14185_vm6, %v1650_v3, %v14125_v49  ;;  %v4617_v8 = vrot.slane %v4615_v25, 5  ;;  %v4620_v10 = vrot.slane %v4618_v45, 6  ;;  %vm18601_vm15 = vmmov %vm18584_vm2 }
 0x292   : > { %v5210_v7 = vsel %vm18584_vm2, %v18596_v41, %v5209_v30  ;;  %vm14224_vm12 = vmand %vm18598_vm13, %vm18597_vm3  ;;  %v14233_v16 = vcombine.low %v14095_v31, %v14081_v14  ;;  %v3555_v34 = vadd.f32 %v14238_v62, %v9090_v13  ;;  %v5217_v43 = vsel %vm18601_vm15, %v5209_v30, %v5216_v59  ;;  %v3546_v3 = vpop.f32.mrf.mxu0  ;;  %v4707_v13 = vpop.permute.xlu0 %4706 }
 0x293   : > { %5568 = vmatprep.mubr.bf16.mxu1 %v5210_v7  ;;  %vm18602_vm6 = vcmp.lt.s32.totalorder %v13663_v46, 296  ;;  %vm18603_vm14 = vcmp.ge.s32.totalorder %v13663_v46, 24  ;;  %v14254_v31 = vmul.u32.u64.low 4042322161, %v14190_v39  ;;  %v14255_v49 = vmul.u32.u64.high 4042322161, %v14190_v39, %v14254_v31  ;;  %vm14262_vm3 = vmand %vm14211_vm4, %vm14119_vm9  ;;  %4312 = vrot.lane.b32.xlu0 %v4216_v4, %s9651_s24  ;;  %v9573_v7 = vld [vmem:[%s17524_s3 + $0x80] sm:$0xff]  }
 0x294   : > { %5569 = vmatmul.mubr.bf16.vlgmr.msra.gmra.mxu1 %v14088_v20  ;;  %vm14249_vm2 = vmand %vm18603_vm14, %vm18602_vm6  ;;  %v5214_v25 = vrot.slane %v14115_v61, 3  ;;  %v18606_v20 = vmov 0  ;;  %v4377_v46 = vrot.slane %v14099_v38, 5  ;;  %v4221_v30 = vshll.u32 %v14233_v16, 16  ;;  %v9091_v36 = vpop.f32.mrf.mxu0 }
 0x295   : > { %v18607_v20 = vsel %vm14262_vm3, 4294967295, %v18606_v20  ;;  %5576 = vmatprep.mubr.bf16.mxu1 %v5217_v43  ;;  %vm853_vm13 = vcmp.ne.s32.totalorder %v701_v18, 0  ;;  %9202 = vmatpush3.bf16.msra.mxu1 %v9572_v53  ;;  %v3635_v45 = vmax.f32 %v3555_v34, 0.0  ;;  %vm14275_vm4 = vmand %vm14224_vm12, %vm14136_vm10  ;;  %v18609_v37 = vmov 0 }
 0x296   : > { %18608 = vst [vmem:[#allocation9_spill] sm:$0xff] %v18607_v20  ;;  %v18610_v37 = vsel %vm14275_vm4, 4294967295, %v18609_v37  ;;  %v3547_v19 = vadd.f32 %v14238_v62, %v3546_v3  ;;  %vm893_vm9 = vcmp.lt.s32.totalorder %v701_v18, 0  ;;  %v973_v41 = vadd.s32 320, %v701_v18  ;;  %9201 = vmatprep.subr.bf16.mxu1 %v9573_v7  ;;  %4720 = vrot.lane.b32.xlu1 %v4613_v63, %s9651_s24  ;;  %v3549_v3 = vpop.f32.mrf.mxu0 }
 0x297   : > { %18611 = vst [vmem:[#allocation24_spill] sm:$0xff] %v18610_v37  ;;  %vm14285_vm15 = vcmp.lt.s32.totalorder %v1690_v35, 16  ;;  %v18614_v60 = vrot.slane %v14109_v32, 5  ;;  %vm18615_vm12 = vcmask 1042432   ;;  %v14296_v34 = vor.u32 %v4620_v10, %v4617_v8  ;;  %vm933_vm10 = vmand %vm893_vm9, %vm853_vm13 }
 0x298   : > { %v732_v43 = vshrl.u32 %v14129_v52, 8  ;;  %v14302_v63 = vsel %vm14262_vm3, %v3635_v45, 0.0  ;;  %v3633_v35 = vmax.f32 %v3547_v19, 0.0  ;;  %v3558_v31 = vadd.f32 %v14238_v62, %v9091_v36  ;;  %vm14320_vm13 = vmand %vm14249_vm2, %vm14165_vm0 }
 0x299   : > { %v14294_v4 = vsel %vm18615_vm12, %v18614_v60, %v4377_v46  ;;  %18616 = vst [vmem:[#allocation63_spill] sm:$0xff] %v14302_v63  ;;  %vm18617_vm6 = vcmp.lt.s32.totalorder %v13822_v54, 296  ;;  %vm18618_vm14 = vcmp.ge.s32.totalorder %v13822_v54, 24  ;;  %v1401_v8 = vshrl.u32 %v14255_v49, 4  ;;  %9203 = vmatpush3.bf16.msra.mxu1 %v9573_v7 }
 0x29a   : > { %vm14309_vm11 = vmand %vm18618_vm14, %vm18617_vm6  ;;  %v8937_v52 = vpack.c.bf16 %v14302_v63, %v14302_v63  ;;  %v18621_v10 = vmov 0  ;;  %vm18624_vm9 = vsmask.f32 2304  ;;  %v14327_v53 = vrot.slane %v4221_v30, 1  ;;  %4417 = vrot.lane.b32.xlu1 %v14294_v4, %s9650_s14 }
 0x29b   : > { %v18622_v10 = vsel %vm14320_vm13, 4294967295, %v18621_v10  ;;  %v4622_v54 = vsel %vm18624_vm9, %v14179_v29, %v14296_v34  ;;  %v14329_v45 = vsel %vm933_vm10, %v973_v41, %v701_v18  ;;  %v14333_v49 = vsel %vm14275_vm4, %v3633_v35, 0.0  ;;  %vm14344_vm2 = vmand %vm14309_vm11, %vm14285_vm15 }
 0x29c   : > { %18623 = vst [vmem:[#allocation64_spill] sm:$0xff] %v18622_v10  ;;  %18625 = vst [vmem:[#allocation65_spill] sm:$0xff] %v14333_v49  ;;  %v3636_v5 = vmax.f32 %v3558_v31, 0.0  ;;  %v3550_v14 = vadd.f32 %v14238_v62, %v3549_v3  ;;  %4794 = vrot.lane.b32.xlu0 %v4622_v54, %s9652_s27  ;;  %v1402_v19 = vmul.u32 17, %v1401_v8  ;;  %vm18626_vm0 = vcmask 257024  }
 0x29d   : > { %3955 = vst.msk [vmem:[#allocation2 + $0x74] sm:$0xf] %vm18626_vm0, %v8937_v52  ;;  %v8935_v29 = vpack.c.bf16 %v14333_v49, %v14333_v49  ;;  %v18627_v18 = vmov 0  ;;  %v18630_v30 = vrot.slane %v14008_v47, 3  ;;  %vm18631_vm12 = vcmask 1044480   ;;  %vm18633_vm11 = vmmov %vm18626_vm0 }
 0x29e   : > { %v18628_v18 = vsel %vm14344_vm2, 4294967295, %v18627_v18  ;;  %v4219_v7 = vor.u32 %v4217_v58, %v14134_v55  ;;  %v14359_v36 = vadd.s32 4294967272, %v14329_v45  ;;  %v14363_v60 = vsel %vm14320_vm13, %v3636_v5, 0.0  ;;  %vm18636_vm6 = vmmov %vm18626_vm0 }
 0x29f   : > { %18629 = vst [vmem:[#allocation66_spill] sm:$0xff] %v18628_v18  ;;  %v5215_v41 = vsel %vm18631_vm12, %v18630_v30, %v5214_v25  ;;  %18632 = vst [vmem:[#allocation67_spill] sm:$0xff] %v14363_v60  ;;  %v3634_v35 = vmax.f32 %v3550_v14, 0.0  ;;  %v1403_v31 = vsub.s32 %v14190_v39, %v1402_v19  ;;  %v733_v32 = vmul.u32 320, %v732_v43  ;;  %v14390_v14 = vpop.permute.xlu0 %4403 }
 0x2a0   : > { %5577 = vmatmul.mubr.bf16.gmra.mxu1 %v5215_v41  ;;  %3953 = vst.msk [vmem:[#allocation2 + $0x6c] sm:$0xf] %vm18633_vm11, %v8935_v29  ;;  %v8938_v47 = vpack.c.bf16 %v14363_v60, %v14363_v60  ;;  %vm1395_vm15 = vcmp.lt.s32.totalorder %v14068_v50, 0  ;;  %v1374_v55 = vsub.s32 0, %v14359_v36  ;;  %vm18635_vm10 = vsmask.f32 7424  ;;  %4722 = vrot.lane.b32.xlu0 %v4622_v54, %s9651_s24  ;;  %vm18638_vm12 = vmmov %vm18636_vm6 }
 0x2a1   : > { %v14373_v58 = vsel %vm14344_vm2, %v3634_v35, 0.0  ;;  %v4224_v8 = vsel %vm18635_vm10, %v4219_v7, %v14327_v53  ;;  %v1404_v39 = vsub.s32 0, %v1403_v31  ;;  %v734_v43 = vsub.s32 %v13717_v23, %v733_v32  ;;  %v18639_v7 = vld [vmem:[#allocation13_spill] sm:$0xff] }
 0x2a2   : > { %18634 = vst [vmem:[#allocation68_spill] sm:$0xff] %v14373_v58  ;;  %3956 = vst.msk [vmem:[#allocation2 + $0x78] sm:$0xf] %vm18636_vm6, %v8938_v47  ;;  %v8936_v52 = vpack.c.bf16 %v14373_v58, %v14373_v58  ;;  %4488 = vrot.lane.b32.xlu1 %v4224_v8, %s9652_s27  ;;  %v14384_v50 = vmin.u32 %v14359_v36, %v1374_v55  ;;  %v14387_v3 = vmul.u32.u64.low 3435973837, %v14024_v51  ;;  %v14388_v5 = vmul.u32.u64.high 3435973837, %v14024_v51, %v14387_v3  ;;  %v4781_v47 = vpop.permute.xlu1 %4780 }
 0x2a3   : > { %v1405_v54 = vsel %vm1395_vm15, %v1404_v39, %v1403_v31  ;;  %vm856_vm14 = vcmp.ne.s32.totalorder %v734_v43, 0  ;;  %vm896_vm9 = vcmp.lt.s32.totalorder %v734_v43, 0  ;;  %v976_v23 = vadd.s32 320, %v734_v43  ;;  %v4475_v39 = vpop.permute.xlu0 %4474 }
 0x2a4   : > { %vm18637_vm0 = vcmask 261120   ;;  %3954 = vst.msk [vmem:[#allocation2 + $0x70] sm:$0xf] %vm18638_vm12, %v8936_v52  ;;  %vm1535_vm11 = vcmp.ne.s32.totalorder %v1405_v54, 0  ;;  %vm1575_vm10 = vcmp.lt.s32.totalorder %v1405_v54, 0  ;;  %vm936_vm6 = vmand %vm896_vm9, %vm856_vm14  ;;  %v4225_v31 = vshrl.u32 %v14233_v16, 16 }
 0x2a5   : > { %v4868_v19 = vsel %vm18637_vm0, %v12505_v21, %v14117_v26  ;;  %v14397_v29 = vmul.u32.u64.low 4042322161, %v14384_v50  ;;  %v14398_v30 = vmul.u32.u64.high 4042322161, %v14384_v50, %v14397_v29  ;;  %v14400_v41 = vsel %vm936_vm6, %v976_v23, %v734_v43  ;;  %vm18640_vm15 = vmmov %vm18637_vm0 }
 0x2a6   : > { %v5001_v35 = vsel %vm18640_vm15, %v18639_v7, %v4707_v13  ;;  %4314 = vrot.lane.b32.xlu1 %v4224_v8, %s9651_s24  ;;  %v1655_v32 = vadd.s32 17, %v1405_v54  ;;  %v14407_v21 = vadd.s32 4294967272, %v14400_v41  ;;  %vm18641_vm0 = vcmask 523264   ;;  %vm14415_vm9 = vmand %vm1575_vm10, %vm1535_vm11  ;;  %v14433_v29 = vld [vmem:[#allocation2 + $0x74] sm:$0xf] }
 0x2a7   : > { %v5057_v26 = vsel %vm18641_vm0, %v5001_v35, %v14390_v14  ;;  %vm18642_vm14 = vmmov %vm18641_vm0  ;;  %v3996_v43 = vld [vmem:[#allocation2 + $0x6c] sm:$0xf]  ;;  %v710_v8 = vshrl.u32 %v14388_v5, 8  ;;  %v14421_v52 = vadd.s32 272, %v10358_v0  ;;  %vm18645_vm12 = vcmask 785408  }
 0x2a8   : > { %v4912_v55 = vsel %vm18642_vm14, %v4868_v19, %v14010_v24  ;;  %v14424_v3 = vsel %vm18645_vm12, %v5057_v26, %v4781_v47  ;;  %vm18646_vm6 = vmmov %vm18645_vm12  ;;  %v14430_v24 = vcombine.low %v14074_v48, %v3996_v43  ;;  %v4227_v19 = vor.u32 %v4225_v31, %v14327_v53 }
 0x2a9   : > { %v14427_v23 = vsel %vm18646_vm6, %v4912_v55, %v4475_v39  ;;  %v17755_v7 = vrot.slane %v14424_v3, 3  ;;  %v14437_v35 = vld [vmem:[#allocation2 + $0x78] sm:$0xf]  ;;  %v1379_v2 = vshrl.u32 %v14398_v30, 4  ;;  %v1407_v26 = vsub.s32 0, %v14407_v21  ;;  %v4709_v55 = vpop.permute.xlu1 %4708  ;;  %v4301_v39 = vpop.permute.xlu0 %4300 }
 0x2aa   : > { %v17754_v5 = vrot.slane %v14427_v23, 3  ;;  %v4229_v47 = vshll.u32 %v14430_v24, 16  ;;  %v14444_v48 = vcombine.low %v14433_v29, %v14437_v35  ;;  %v1695_v53 = vsel %vm14415_vm9, %v1655_v32, %v1405_v54 }
 0x2ab   : > { %v711_v31 = vmul.u32 320, %v710_v8  ;;  %vm18647_vm15 = vcmask 1044480   ;;  %v14460_v54 = vld [vmem:[#allocation2 + $0x70] sm:$0xf]  ;;  %v1380_v32 = vmul.u32 17, %v1379_v2  ;;  %v14465_v8 = vmin.u32 %v14407_v21, %v1407_v26 }
 0x2ac   : > { %v5223_v30 = vsel %vm18647_vm15, %v5216_v59, %v17755_v7  ;;  %vm18648_vm0 = vmmov %vm18647_vm15  ;;  %vm18649_vm12 = vcmask 261120   ;;  %v14472_v61 = vcombine.low %v3996_v43, %v14460_v54  ;;  %vm1373_vm15 = vcmp.lt.s32.totalorder %v14359_v36, 0 }
 0x2ad   : > { %v5221_v13 = vsel %vm18648_vm0, %v5214_v25, %v17754_v5  ;;  %v5004_v12 = vsel %vm18649_vm12, %v12995_v6, %v4709_v55  ;;  %vm18650_vm6 = vmmov %vm18649_vm12  ;;  %5584 = vmatprep.mubr.bf16.mxu1 %v5223_v30  ;;  %v14477_v25 = vrot.slane %v4229_v47, 1  ;;  %v14489_v30 = vpop.permute.xlu1 %4405  ;;  %v18656_v7 = vrot.slane %v14099_v38, 6 }
 0x2ae   : > { %v4870_v59 = vsel %vm18650_vm6, %v12557_v57, %v4301_v39  ;;  %5585 = vmatmul.mubr.bf16.gmra.mxu1 %v5221_v13  ;;  %vm18651_vm0 = vmmov %vm18642_vm14  ;;  %vm14480_vm14 = vcmp.lt.s32.totalorder %v1695_v53, 16  ;;  %v1381_v57 = vsub.s32 %v14384_v50, %v1380_v32  ;;  %v4379_v6 = vrot.slane %v14472_v61, 5 }
 0x2af   : > { %v4914_v2 = vsel %vm18651_vm0, %v4870_v59, %v14042_v17  ;;  %v4840_v43 = vrot.slane %v14472_v61, 6  ;;  %v4624_v55 = vshrl.u32 %v14472_v61, 16  ;;  %v4627_v39 = vshll.u32 %v14472_v61, 16  ;;  %v4783_v17 = vpop.permute.xlu0 %4782  ;;  %vm18654_vm12 = vmmov %vm18651_vm0 }
 0x2b0   : > { %v1382_v47 = vsub.s32 0, %v1381_v57  ;;  %v14492_v13 = vmul.u32.u64.low 4042322161, %v14465_v8  ;;  %v14493_v53 = vmul.u32.u64.high 4042322161, %v14465_v8, %v14492_v13  ;;  %v712_v59 = vsub.s32 %v14024_v51, %v711_v31 }
 0x2b1   : > { %v5058_v50 = vsel %vm18654_vm12, %v5004_v12, %v14489_v30  ;;  %vm18655_vm6 = vcmask 1042432   ;;  %vm18657_vm0 = vcmask 1041408   ;;  %v4626_v60 = vrot.slane %v4624_v55, 5 }
 0x2b2   : > { %v14503_v32 = vsel %vm18655_vm6, %v4377_v46, %v4379_v6  ;;  %v4841_v26 = vsel %vm18657_vm0, %v18656_v7, %v4840_v43  ;;  %vm18658_vm9 = vcmask 785408   ;;  %v4629_v31 = vrot.slane %v4627_v39, 6  ;;  %vm18660_vm12 = vmmov %vm18657_vm0 }
 0x2b3   : > { %v14509_v63 = vsel %vm18658_vm9, %v5058_v50, %v4783_v17  ;;  %4419 = vrot.lane.b32.xlu0 %v14503_v32, %s9650_s14  ;;  %v5272_v51 = vrot.slane %v4841_v26, 3  ;;  %v18659_v12 = vrot.slane %v14444_v48, 6  ;;  %vm18661_vm6 = vsmask.f32 7424  ;;  %v4477_v17 = vpop.permute.xlu1 %4476 }
 0x2b4   : > { %v5228_v46 = vrot.slane %v14509_v63, 3  ;;  %v4232_v38 = vsel %vm18661_vm6, %v4227_v19, %v14477_v25  ;;  %v1383_v55 = vsel %vm1373_vm15, %v1382_v47, %v1381_v57  ;;  %v18662_v50 = vrot.slane %v14163_v40, 3 }
 0x2b5   : > { %v14516_v13 = vsel %vm18660_vm12, %v4840_v43, %v18659_v12  ;;  %vm18663_vm9 = vcmask 1044480   ;;  %v14527_v39 = vor.u32 %v4629_v31, %v4626_v60  ;;  %vm1533_vm0 = vcmp.ne.s32.totalorder %v1383_v55, 0  ;;  %v9094_v31 = vpop.f32.mrf.mxu0 }
 0x2b6   : > { %v17762_v7 = vrot.slane %v14516_v13, 3  ;;  %v5273_v26 = vsel %vm18663_vm9, %v18662_v50, %v5272_v51  ;;  %vm1573_vm12 = vcmp.lt.s32.totalorder %v1383_v55, 0  ;;  %vm18664_vm10 = vcmask 785408   ;;  %vm18667_vm15 = vmmov %vm18663_vm9 }
 0x2b7   : > { %v14531_v43 = vsel %vm18664_vm10, %v4914_v2, %v4477_v17  ;;  %vm18665_vm6 = vcmask 261120   ;;  %v18666_v36 = vrot.slane %v14424_v3, 3  ;;  %vm14542_vm13 = vmand %vm1573_vm12, %vm1533_vm0  ;;  %vm854_vm11 = vcmp.ne.s32.totalorder %v712_v59, 0  ;;  %4490 = vrot.lane.b32.xlu0 %v4232_v38, %s9652_s27 }
 0x2b8   : > { %9128 = vmatprep.mubr.msk.bf16.mxu0 %vm18665_vm6, %v5273_v26  ;;  %v5279_v40 = vsel %vm18663_vm9, %v5272_v51, %v17762_v7  ;;  %v5226_v2 = vrot.slane %v14531_v43, 3  ;;  %vm18670_vm10 = vsmask.f32 2304  ;;  %vm18671_vm6 = vcmp.lt.s32.totalorder %v14031_v33, 296 }
 0x2b9   : > { %v5229_v19 = vsel %vm18667_vm15, %v18666_v36, %v5228_v46  ;;  %v4631_v57 = vsel %vm18670_vm10, %v14296_v34, %v14527_v39  ;;  %vm18672_vm15 = vcmp.ge.s32.totalorder %v14031_v33, 24  ;;  %v1653_v47 = vadd.s32 17, %v1383_v55 }
 0x2ba   : > { %5592 = vmatprep.mubr.bf16.mxu1 %v5229_v19  ;;  %vm14555_vm3 = vmand %vm18672_vm15, %vm18671_vm6  ;;  %v1412_v51 = vshrl.u32 %v14493_v53, 4  ;;  %4796 = vrot.lane.b32.xlu1 %v4631_v57, %s9652_s27  ;;  %vm18675_vm0 = vcmask 261120   ;;  %vm18676_vm12 = vcmp.lt.s32.totalorder %v14329_v45, 296  ;;  %vm18677_vm9 = vcmp.ge.s32.totalorder %v14329_v45, 24  ;;  %v3562_v19 = vpop.f32.mrf.mxu0 }
 0x2bb   : > { %9129 = vmatmul.mubr.msk.bf16.gmra.mxu0 %vm18675_vm0, %v5279_v40  ;;  %vm14566_vm10 = vmand %vm18677_vm9, %vm18676_vm12  ;;  %vm894_vm15 = vcmp.lt.s32.totalorder %v712_v59, 0  ;;  %v974_v33 = vadd.s32 320, %v712_v59  ;;  %v4633_v12 = vshrl.u32 %v14444_v48, 16  ;;  %v3571_v53 = vadd.f32 %v14238_v62, %v9094_v31  ;;  %4316 = vrot.lane.b32.xlu0 %v4232_v38, %s9651_s24 }
 0x2bc   : > { %v1693_v17 = vsel %vm14542_vm13, %v1653_v47, %v1383_v55  ;;  %v18680_v50 = vrot.slane %v14427_v23, 3  ;;  %vm18681_vm0 = vcmask 1044480   ;;  %v1413_v26 = vmul.u32 17, %v1412_v51  ;;  %vm934_vm12 = vmand %vm894_vm15, %vm854_vm11 }
 0x2bd   : > { %vm14585_vm9 = vmand %vm14555_vm3, %vm14480_vm14  ;;  %v18682_v36 = vmov 0  ;;  %vm1853_vm6 = vcmp.lt.s32.totalorder %v1693_v17, 16  ;;  %v14589_v55 = vsel %vm934_vm12, %v974_v33, %v712_v59  ;;  %v3639_v60 = vmax.f32 %v3571_v53, 0.0  ;;  %v9095_v59 = vpop.f32.mrf.mxu0 }
 0x2be   : > { %v5227_v45 = vsel %vm18681_vm0, %v18680_v50, %v5226_v2  ;;  %v18683_v36 = vsel %vm14585_vm9, 4294967295, %v18682_v36  ;;  %v14592_v23 = vmul.u32.u64.low 3435973837, %v14421_v52  ;;  %v14593_v40 = vmul.u32.u64.high 3435973837, %v14421_v52, %v14592_v23  ;;  %vm14603_vm3 = vmand %vm14566_vm10, %vm1853_vm6  ;;  %4724 = vrot.lane.b32.xlu1 %v4631_v57, %s9651_s24 }
 0x2bf   : > { %18684 = vst [vmem:[#allocation13_spill] sm:$0xff] %v18683_v36  ;;  %5593 = vmatmul.mubr.bf16.gmra.mxu1 %v5227_v45  ;;  %v3563_v47 = vadd.f32 %v14238_v62, %v3562_v19  ;;  %v1414_v5 = vsub.s32 %v14465_v8, %v1413_v26  ;;  %v14599_v3 = vadd.s32 4294967272, %v14589_v55  ;;  %v18685_v51 = vmov 0 }
 0x2c0   : > { %v18686_v51 = vsel %vm14603_vm3, 4294967295, %v18685_v51  ;;  %vm1406_vm13 = vcmp.lt.s32.totalorder %v14407_v21, 0  ;;  %v17763_v31 = vrot.slane %v14444_v48, 5  ;;  %v4635_v33 = vrot.slane %v4633_v12, 5 }
 0x2c1   : > { %18687 = vst [vmem:[#allocation69_spill] sm:$0xff] %v18686_v51  ;;  %v4636_v38 = vshll.u32 %v14444_v48, 16  ;;  %v14613_v8 = vsel %vm14585_vm9, %v3639_v60, 0.0  ;;  %v3637_v53 = vmax.f32 %v3563_v47, 0.0  ;;  %v1415_v34 = vsub.s32 0, %v1414_v5 }
 0x2c2   : > { %18688 = vst [vmem:[#allocation70_spill] sm:$0xff] %v14613_v8  ;;  %v3574_v17 = vadd.f32 %v14238_v62, %v9095_v59  ;;  %v8941_v50 = vpack.c.bf16 %v14613_v8, %v14613_v8  ;;  %v1385_v57 = vsub.s32 0, %v14599_v3  ;;  %vm18690_vm11 = vcmask 1042432  }
 0x2c3   : > { %v4638_v21 = vrot.slane %v4636_v38, 6  ;;  %v14621_v45 = vsel %vm14603_vm3, %v3637_v53, 0.0  ;;  %v1416_v12 = vsel %vm1406_vm13, %v1415_v34, %v1414_v5  ;;  %v14628_v26 = vsel %vm18690_vm11, %v4379_v6, %v17763_v31  ;;  %v4711_v6 = vpop.permute.xlu0 %4710  ;;  %v4303_v53 = vpop.permute.xlu1 %4302 }
 0x2c4   : > { %18689 = vst [vmem:[#allocation71_spill] sm:$0xff] %v14621_v45  ;;  %v14631_v19 = vadd.s32 256, %v10358_v0  ;;  %vm18691_vm14 = vcmask 257024   ;;  %v8939_v23 = vpack.c.bf16 %v14621_v45, %v14621_v45  ;;  %vm1536_vm10 = vcmp.ne.s32.totalorder %v1416_v12, 0  ;;  %4421 = vrot.lane.b32.xlu1 %v14628_v26, %s9650_s14 }
 0x2c5   : > { %3959 = vst.msk [vmem:[#allocation2 + $0x84] sm:$0xf] %vm18691_vm14, %v8941_v50  ;;  %vm1576_vm6 = vcmp.lt.s32.totalorder %v1416_v12, 0  ;;  %v1656_v60 = vadd.s32 17, %v1416_v12  ;;  %vm18692_vm15 = vcmp.lt.s32.totalorder %v14400_v41, 296  ;;  %vm18693_vm0 = vcmp.ge.s32.totalorder %v14400_v41, 24  ;;  %vm18696_vm11 = vmmov %vm18691_vm14 }
 0x2c6   : > { %vm14640_vm12 = vmand %vm18693_vm0, %vm18692_vm15  ;;  %v3640_v47 = vmax.f32 %v3574_v17, 0.0  ;;  %v8563_v5 = vmin.u32 %v14599_v3, %v1385_v57  ;;  %v14647_v59 = vor.u32 %v4638_v21, %v4635_v33  ;;  %v14651_v38 = vcombine.low %v14460_v54, %v14433_v29  ;;  %3957 = vst.msk [vmem:[#allocation2 + $0x7c] sm:$0xf] %vm18696_vm11, %v8939_v23  ;;  %v3565_v29 = vpop.f32.mrf.mxu0 }
 0x2c7   : > { %vm1616_vm13 = vmand %vm1576_vm6, %vm1536_vm10  ;;  %v765_v34 = vshrl.u32 %v14593_v40, 8  ;;  %vm18697_vm10 = vsmask.f32 2304  ;;  %v18698_v33 = vmov 0  ;;  %v4233_v54 = vshrl.u32 %v14430_v24, 16  ;;  %v14679_v23 = vpop.permute.xlu0 %4407 }
 0x2c8   : > { %v1696_v41 = vsel %vm1616_vm13, %v1656_v60, %v1416_v12  ;;  %v14655_v50 = vmul.u32.u64.low 4042322161, %v8563_v5  ;;  %v14656_v7 = vmul.u32.u64.high 4042322161, %v8563_v5, %v14655_v50  ;;  %v4640_v17 = vsel %vm18697_vm10, %v14527_v39, %v14647_v59  ;;  %vm18704_vm13 = vmmov %vm18696_vm11 }
 0x2c9   : > { %vm1856_vm14 = vcmp.lt.s32.totalorder %v1696_v41, 16  ;;  %4798 = vrot.lane.b32.xlu0 %v4640_v17, %s9652_s27  ;;  %v4237_v40 = vshll.u32 %v14651_v38, 16  ;;  %v766_v57 = vmul.u32 320, %v765_v34  ;;  %v14671_v21 = vadd.s32 280, %v10358_v0 }
 0x2ca   : > { %vm14663_vm6 = vmand %vm14640_vm12, %vm1856_vm14  ;;  %vm18701_vm15 = vcmask 261120   ;;  %v14682_v60 = vmul.u32.u64.low 3435973837, %v14631_v19  ;;  %v14683_v61 = vmul.u32.u64.high 3435973837, %v14631_v19, %v14682_v60  ;;  %v4235_v34 = vor.u32 %v4233_v54, %v14477_v25 }
 0x2cb   : > { %v18699_v33 = vsel %vm14663_vm6, 4294967295, %v18698_v33  ;;  %v4872_v39 = vsel %vm18701_vm15, %v12914_v44, %v4303_v53  ;;  %v14677_v12 = vsel %vm14663_vm6, %v3640_v47, 0.0  ;;  %v14688_v50 = vrot.slane %v4237_v40, 1  ;;  %vm18703_vm0 = vmmov %vm18701_vm15 }
 0x2cc   : > { %18700 = vst [vmem:[#allocation72_spill] sm:$0xff] %v18699_v33  ;;  %18702 = vst [vmem:[#allocation73_spill] sm:$0xff] %v14677_v12  ;;  %v8942_v41 = vpack.c.bf16 %v14677_v12, %v14677_v12  ;;  %v767_v31 = vsub.s32 %v14421_v52, %v766_v57  ;;  %v5007_v44 = vsel %vm18703_vm0, %v13136_v15, %v4711_v6  ;;  %v1390_v47 = vshrl.u32 %v14656_v7, 4  ;;  %v4785_v7 = vpop.permute.xlu1 %4784  ;;  %v4479_v6 = vpop.permute.xlu0 %4478 }
 0x2cd   : > { %vm1734_vm12 = vcmp.ge.s32.totalorder %v14589_v55, 24  ;;  %v14696_v53 = vadd.f32 %v14238_v62, %v3565_v29  ;;  %vm18705_vm11 = vsmask.f32 7424  ;;  %4726 = vrot.lane.b32.xlu0 %v4640_v17, %s9651_s24  ;;  %vm18706_vm14 = vcmask 523264   ;;  %v14707_v29 = vld [vmem:[#allocation2 + $0x7c] sm:$0xf] }
 0x2ce   : > { %3960 = vst.msk [vmem:[#allocation2 + $0x88] sm:$0xf] %vm18704_vm13, %v8942_v41  ;;  %v4240_v60 = vsel %vm18705_vm11, %v4235_v34, %v14688_v50  ;;  %v4916_v52 = vsel %vm18706_vm14, %v4872_v39, %v14390_v14  ;;  %vm859_vm10 = vcmp.ne.s32.totalorder %v767_v31, 0  ;;  %vm899_vm15 = vcmp.lt.s32.totalorder %v767_v31, 0  ;;  %vm18707_vm0 = vmmov %vm18706_vm14 }
 0x2cf   : > { %v1391_v15 = vmul.u32 17, %v1390_v47  ;;  %4492 = vrot.lane.b32.xlu1 %v4240_v60, %s9652_s27  ;;  %v5059_v25 = vsel %vm18707_vm0, %v5007_v44, %v14679_v23  ;;  %vm939_vm13 = vmand %vm899_vm15, %vm859_vm10  ;;  %v979_v54 = vadd.s32 320, %v767_v31  ;;  %v743_v40 = vshrl.u32 %v14683_v61, 8 }
 0x2d0   : > { %vm18708_vm11 = vcmask 785408   ;;  %v14717_v57 = vmul.u32.u64.low 3435973837, %v14671_v21  ;;  %v14718_v39 = vmul.u32.u64.high 3435973837, %v14671_v21, %v14717_v57  ;;  %vm1384_vm10 = vcmp.lt.s32.totalorder %v14599_v3, 0 }
 0x2d1   : > { %v14711_v17 = vsel %vm18708_vm11, %v5059_v25, %v4785_v7  ;;  %vm18709_vm14 = vmmov %vm18708_vm11  ;;  %v1392_v41 = vsub.s32 %v8563_v5, %v1391_v15  ;;  %v14722_v47 = vsel %vm939_vm13, %v979_v54, %v767_v31  ;;  %vm1774_vm15 = vcmp.lt.s32.totalorder %v14589_v55, 296  ;;  %v4713_v5 = vpop.permute.xlu1 %4712  ;;  %v4305_v15 = vpop.permute.xlu0 %4304 }
 0x2d2   : > { %v14714_v14 = vsel %vm18709_vm14, %v4916_v52, %v4479_v6  ;;  %v5234_v34 = vrot.slane %v14711_v17, 3  ;;  %v14728_v61 = vcombine.low %v14437_v35, %v14707_v29  ;;  %v14731_v52 = vadd.s32 4294967272, %v14722_v47 }
 0x2d3   : > { %v17770_v44 = vrot.slane %v14714_v14, 3  ;;  %v1393_v25 = vsub.s32 0, %v1392_v41  ;;  %4318 = vrot.lane.b32.xlu1 %v4240_v60, %s9651_s24  ;;  %vm18710_vm0 = vcmask 1044480   ;;  %v744_v35 = vmul.u32 320, %v743_v40 }
 0x2d4   : > { %v5235_v31 = vsel %vm18710_vm0, %v5228_v46, %v5234_v34  ;;  %vm18711_vm13 = vmmov %vm18710_vm0  ;;  %v14743_v7 = vadd.s32 264, %v10358_v0  ;;  %v14746_v6 = vadd.s32 304, %v10358_v0  ;;  %v14749_v60 = vadd.s32 288, %v10358_v0 }
 0x2d5   : > { %v5233_v3 = vsel %vm18711_vm13, %v5226_v2, %v17770_v44  ;;  %5600 = vmatprep.mubr.bf16.mxu1 %v5235_v31  ;;  %v1394_v63 = vsel %vm1384_vm10, %v1393_v25, %v1392_v41  ;;  %v3638_v46 = vmax.f32 %v14696_v53, 0.0  ;;  %v1440_v54 = vsub.s32 0, %v14731_v52  ;;  %vm14758_vm0 = vmand %vm1734_vm12, %vm1774_vm15  ;;  %v18714_v53 = vld [vmem:[#allocation19_spill] sm:$0xff]  ;;  %v14765_v41 = vpop.permute.xlu1 %4409 }
 0x2d6   : > { %5601 = vmatmul.mubr.bf16.gmra.mxu1 %v5233_v3  ;;  %v745_v43 = vsub.s32 %v14631_v19, %v744_v35  ;;  %vm1534_vm11 = vcmp.ne.s32.totalorder %v1394_v63, 0  ;;  %vm1574_vm14 = vcmp.lt.s32.totalorder %v1394_v63, 0  ;;  %v1654_v2 = vadd.s32 17, %v1394_v63  ;;  %v4787_v19 = vpop.permute.xlu0 %4786  ;;  %v18716_v3 = vld [vmem:[#allocation15_spill] sm:$0xff] }
 0x2d7   : > { %v4245_v17 = vshll.u32 %v14728_v61, 16  ;;  %vm1614_vm10 = vmand %vm1574_vm14, %vm1534_vm11  ;;  %vm18715_vm13 = vcmask 261120   ;;  %v8568_v25 = vmin.u32 %v14731_v52, %v1440_v54  ;;  %vm18718_vm12 = vcmask 523264  }
 0x2d8   : > { %v5010_v57 = vsel %vm18715_vm13, %v18714_v53, %v4713_v5  ;;  %vm857_vm6 = vcmp.ne.s32.totalorder %v745_v43, 0  ;;  %vm897_vm9 = vcmp.lt.s32.totalorder %v745_v43, 0  ;;  %v1694_v31 = vsel %vm1614_vm10, %v1654_v2, %v1394_v63  ;;  %vm18717_vm3 = vmmov %vm18715_vm13  ;;  %v14776_v53 = vld [vmem:[#allocation2 + $0x88] sm:$0xf] }
 0x2d9   : > { %v4874_v55 = vsel %vm18717_vm3, %v18716_v3, %v4305_v15  ;;  %v5060_v35 = vsel %vm18718_vm12, %v5010_v57, %v14765_v41  ;;  %vm937_vm15 = vmand %vm897_vm9, %vm857_vm6  ;;  %v977_v44 = vadd.s32 320, %v745_v43  ;;  %vm1854_vm11 = vcmp.lt.s32.totalorder %v1694_v31, 16  ;;  %v4481_v3 = vpop.permute.xlu1 %4480 }
 0x2da   : > { %vm18719_vm14 = vcmask 785408   ;;  %v4241_v5 = vshrl.u32 %v14651_v38, 16  ;;  %v776_v54 = vshrl.u32 %v14718_v39, 8  ;;  %vm14781_vm10 = vmand %vm14758_vm0, %vm1854_vm11  ;;  %v18720_v63 = vmov 0 }
 0x2db   : > { %v14773_v12 = vsel %vm18719_vm14, %v5060_v35, %v4787_v19  ;;  %v18721_v63 = vsel %vm14781_vm10, 4294967295, %v18720_v63  ;;  %v14786_v2 = vmul.u32.u64.low 4042322161, %v8568_v25  ;;  %v14787_v57 = vmul.u32.u64.high 4042322161, %v8568_v25, %v14786_v2  ;;  %vm18724_vm9 = vmmov %vm18718_vm12  ;;  %v14799_v35 = vld [vmem:[#allocation2 + $0x84] sm:$0xf] }
 0x2dc   : > { %18722 = vst [vmem:[#allocation19_spill] sm:$0xff] %v18721_v63  ;;  %v17774_v15 = vrot.slane %v14773_v12, 3  ;;  %v14789_v31 = vsel %vm937_vm15, %v977_v44, %v745_v43  ;;  %v14793_v19 = vsel %vm14781_vm10, %v3638_v46, 0.0  ;;  %v4918_v39 = vsel %vm18724_vm9, %v4874_v55, %v14489_v30  ;;  %vm18725_vm3 = vmmov %vm18719_vm14 }
 0x2dd   : > { %18723 = vst [vmem:[#allocation15_spill] sm:$0xff] %v14793_v19  ;;  %v14797_v40 = vrot.slane %v4245_v17, 1  ;;  %v14802_v8 = vadd.s32 4294967272, %v14789_v31  ;;  %v8940_v2 = vpack.c.bf16 %v14793_v19, %v14793_v19  ;;  %v14807_v44 = vsel %vm18725_vm3, %v4918_v39, %v4481_v3  ;;  %v9098_v39 = vpop.f32.mrf.mxu0 }
 0x2de   : > { %vm18726_vm6 = vcmask 1044480   ;;  %v14814_v30 = vcombine.low %v14799_v35, %v14776_v53  ;;  %v4243_v17 = vor.u32 %v4241_v5, %v14688_v50  ;;  %v777_v45 = vmul.u32 320, %v776_v54 }
 0x2df   : > { %v5241_v46 = vsel %vm18726_vm6, %v5234_v34, %v17774_v15  ;;  %v1418_v55 = vsub.s32 0, %v14802_v8  ;;  %vm18727_vm0 = vcmask 257024   ;;  %v1445_v3 = vshrl.u32 %v14787_v57, 4  ;;  %vm18730_vm15 = vmmov %vm18726_vm6  ;;  %v4715_v57 = vpop.permute.xlu0 %4714 }
 0x2e0   : > { %5608 = vmatprep.mubr.bf16.mxu1 %v5241_v46  ;;  %3958 = vst.msk [vmem:[#allocation2 + $0x80] sm:$0xf] %vm18727_vm0, %v8940_v2  ;;  %v14823_v34 = vmul.u32.u64.low 3435973837, %v14743_v7  ;;  %v14824_v15 = vmul.u32.u64.high 3435973837, %v14743_v7, %v14823_v34  ;;  %v18728_v50 = vrot.slane %v14807_v44, 3  ;;  %v18729_v5 = vrot.slane %v14714_v14, 3  ;;  %v4307_v14 = vpop.permute.xlu1 %4306  ;;  %vm18733_vm6 = vmmov %vm18715_vm13 }
 0x2e1   : > { %v8566_v43 = vmin.u32 %v14802_v8, %v1418_v55  ;;  %v778_v2 = vsub.s32 %v14671_v21, %v777_v45  ;;  %vm18731_vm11 = vsmask.f32 7424  ;;  %vm1439_vm14 = vcmp.lt.s32.totalorder %v14731_v52, 0  ;;  %v3578_v21 = vpop.f32.mrf.mxu0  ;;  %v18734_v55 = vld [vmem:[#allocation50_spill] sm:$0xff] }
 0x2e2   : > { %v5239_v54 = vsel %vm18730_vm15, %v18729_v5, %v18728_v50  ;;  %v14836_v46 = vsel %vm18731_vm11, %v4243_v17, %v14797_v40  ;;  %v1446_v34 = vmul.u32 17, %v1445_v3  ;;  %v4651_v19 = vshrl.u32 %v14814_v30, 16  ;;  %v18732_v5 = vld [vmem:[#allocation52_spill] sm:$0xff]  ;;  %vm18735_vm11 = vmmov %vm18733_vm6 }
 0x2e3   : > { %5609 = vmatmul.mubr.bf16.gmra.mxu1 %v5239_v54  ;;  %v3587_v58 = vadd.f32 %v14238_v62, %v9098_v39  ;;  %v14842_v49 = vmul.u32.u64.low 4042322161, %v8566_v43  ;;  %v14843_v50 = vmul.u32.u64.high 4042322161, %v8566_v43, %v14842_v49  ;;  %vm860_vm9 = vcmp.ne.s32.totalorder %v778_v2, 0  ;;  %v9099_v18 = vpop.f32.mrf.mxu0 }
 0x2e4   : > { %v1447_v45 = vsub.s32 %v8568_v25, %v1446_v34  ;;  %vm900_vm3 = vcmp.lt.s32.totalorder %v778_v2, 0  ;;  %v980_v17 = vadd.s32 320, %v778_v2  ;;  %v14847_v33 = vsel %vm18733_vm6, %v18732_v5, %v4715_v57 }
 0x2e5   : > { %vm1417_vm0 = vcmp.lt.s32.totalorder %v14802_v8, 0  ;;  %vm940_vm15 = vmand %vm900_vm3, %vm860_vm9  ;;  %v754_v3 = vshrl.u32 %v14824_v15, 8  ;;  %v14854_v49 = vsel %vm18735_vm11, %v18734_v55, %v4307_v14  ;;  %vm1777_vm12 = vcmp.lt.s32.totalorder %v14789_v31, 296 }
 0x2e6   : > { %v1448_v54 = vsub.s32 0, %v1447_v45  ;;  %v14858_v25 = vsel %vm940_vm15, %v980_v17, %v778_v2  ;;  %v14860_v57 = vrot.slane %v4651_v19, 5  ;;  %v1423_v5 = vshrl.u32 %v14843_v50, 4 }
 0x2e7   : > { %v14862_v34 = vld [vmem:[#allocation2 + $0x80] sm:$0xf]  ;;  %v14866_v15 = vadd.f32 %v14238_v62, %v3578_v21  ;;  %v14869_v39 = vadd.s32 4294967272, %v14858_v25  ;;  %v4654_v55 = vshll.u32 %v14814_v30, 16  ;;  %v3643_v2 = vmax.f32 %v3587_v58, 0.0 }
 0x2e8   : > { %v14874_v14 = vcombine.low %v14707_v29, %v14862_v34  ;;  %v1449_v19 = vsel %vm1439_vm14, %v1448_v54, %v1447_v45  ;;  %v755_v17 = vmul.u32 320, %v754_v3  ;;  %v1424_v36 = vmul.u32 17, %v1423_v5 }
 0x2e9   : > { %vm1539_vm9 = vcmp.ne.s32.totalorder %v1449_v19, 0  ;;  %vm1579_vm3 = vcmp.lt.s32.totalorder %v1449_v19, 0  ;;  %v1659_v50 = vadd.s32 17, %v1449_v19  ;;  %vm18736_vm15 = vcmp.lt.s32.totalorder %v14722_v47, 296 }
 0x2ea   : > { %v17794_v21 = vrot.slane %v14874_v14, 5  ;;  %v4844_v63 = vrot.slane %v14874_v14, 6  ;;  %v4642_v51 = vshrl.u32 %v14874_v14, 16  ;;  %v4645_v10 = vshll.u32 %v14874_v14, 16  ;;  %vm1619_vm6 = vmand %vm1579_vm3, %vm1539_vm9 }
 0x2eb   : > { %v1699_v29 = vsel %vm1619_vm6, %v1659_v50, %v1449_v19  ;;  %vm18737_vm14 = vcmp.ge.s32.totalorder %v14722_v47, 24  ;;  %v1425_v52 = vsub.s32 %v8566_v43, %v1424_v36  ;;  %v3641_v45 = vmax.f32 %v14866_v15, 0.0 }
 0x2ec   : > { %vm14886_vm11 = vmand %vm18737_vm14, %vm18736_vm15  ;;  %v1451_v3 = vsub.s32 0, %v14869_v39  ;;  %v18740_v54 = vrot.slane %v14444_v48, 5  ;;  %vm18741_vm13 = vcmask 1042432   ;;  %v18742_v19 = vrot.slane %v14444_v48, 6 }
 0x2ed   : > { %vm18743_vm9 = vcmask 1041408   ;;  %v4644_v50 = vrot.slane %v4642_v51, 5  ;;  %v4647_v20 = vrot.slane %v4645_v10, 6  ;;  %v18744_v43 = vrot.slane %v14814_v30, 6 }
 0x2ee   : > { %v14897_v5 = vsel %vm18741_vm13, %v18740_v54, %v17794_v21  ;;  %v4845_v47 = vsel %vm18743_vm9, %v18742_v19, %v4844_v63  ;;  %vm18745_vm3 = vmmov %vm18743_vm9  ;;  %vm1859_vm6 = vcmp.lt.s32.totalorder %v1699_v29, 16  ;;  %v1426_v37 = vsub.s32 0, %v1425_v52  ;;  %v14909_v54 = vpop.permute.xlu0 %4411 }
 0x2ef   : > { %4423 = vrot.lane.b32.xlu0 %v14897_v5, %s9650_s14  ;;  %v5284_v36 = vrot.slane %v4845_v47, 3  ;;  %v14907_v15 = vsel %vm18745_vm3, %v4844_v63, %v18744_v43  ;;  %v4648_v21 = vor.u32 %v4647_v20, %v4644_v50  ;;  %vm14914_vm13 = vmand %vm14886_vm11, %vm1859_vm6  ;;  %v18746_v10 = vmov 0 }
 0x2f0   : > { %v17805_v48 = vrot.slane %v14907_v15, 3  ;;  %v18747_v10 = vsel %vm14914_vm13, 4294967295, %v18746_v10  ;;  %v8569_v51 = vmin.u32 %v14869_v39, %v1451_v3  ;;  %v756_v19 = vsub.s32 %v14743_v7, %v755_v17 }
 0x2f1   : > { %18748 = vst [vmem:[#allocation52_spill] sm:$0xff] %v18747_v10  ;;  %v18749_v63 = vrot.slane %v14516_v13, 3  ;;  %vm18750_vm15 = vcmask 1044480   ;;  %v14925_v47 = vsel %vm14914_vm13, %v3643_v2, 0.0  ;;  %v1427_v20 = vsel %vm1417_vm0, %v1426_v37, %v1425_v52  ;;  %v4789_v52 = vpop.permute.xlu1 %4788 }
 0x2f2   : > { %18751 = vst [vmem:[#allocation50_spill] sm:$0xff] %v14925_v47  ;;  %v14930_v58 = vadd.f32 %v14238_v62, %v9099_v18  ;;  %vm18752_vm14 = vcmask 261120   ;;  %vm18753_vm11 = vsmask.f32 2304  ;;  %vm18754_vm9 = vmmov %vm18750_vm15  ;;  %v8945_v7 = vpack.c.bf16 %v14925_v47, %v14925_v47 }
 0x2f3   : > { %v5285_v29 = vsel %vm18750_vm15, %v18749_v63, %v5284_v36  ;;  %v4649_v3 = vsel %vm18753_vm11, %v14647_v59, %v4648_v21  ;;  %v5291_v13 = vsel %vm18754_vm9, %v5284_v36, %v17805_v48  ;;  %vm1537_vm3 = vcmp.ne.s32.totalorder %v1427_v20, 0  ;;  %4494 = vrot.lane.b32.xlu0 %v14836_v46, %s9652_s27  ;;  %v4483_v59 = vpop.permute.xlu0 %4482 }
 0x2f4   : > { %9132 = vmatprep.mubr.msk.bf16.mxu0 %vm18752_vm14, %v5285_v29  ;;  %4800 = vrot.lane.b32.xlu1 %v4649_v3, %s9652_s27  ;;  %vm1577_vm0 = vcmp.lt.s32.totalorder %v1427_v20, 0  ;;  %v1657_v62 = vadd.s32 17, %v1427_v20  ;;  %vm18755_vm6 = vcmp.ge.s32.totalorder %v14789_v31, 24  ;;  %vm18758_vm11 = vcmask 257024  }
 0x2f5   : > { %vm14947_vm15 = vmand %vm18755_vm6, %vm1777_vm12  ;;  %v14951_v18 = vmul.u32.u64.low 4042322161, %v8569_v51  ;;  %v14952_v8 = vmul.u32.u64.high 4042322161, %v8569_v51, %v14951_v18  ;;  %9133 = vmatmul.mubr.msk.bf16.gmra.mxu0 %vm18752_vm14, %v5291_v13  ;;  %3963 = vst.msk [vmem:[#allocation2 + $0x94] sm:$0xf] %vm18758_vm11, %v8945_v7  ;;  %vm858_vm13 = vcmp.ne.s32.totalorder %v756_v19, 0  ;;  %vm898_vm10 = vcmp.lt.s32.totalorder %v756_v19, 0 }
 0x2f6   : > { %vm1617_vm9 = vmand %vm1577_vm0, %vm1537_vm3  ;;  %v978_v2 = vadd.s32 320, %v756_v19  ;;  %v4656_v17 = vrot.slane %v4654_v55, 6  ;;  %v14958_v31 = vcombine.low %v14862_v34, %v14799_v35  ;;  %v4249_v36 = vshrl.u32 %v14728_v61, 16 }
 0x2f7   : > { %v1697_v50 = vsel %vm1617_vm9, %v1657_v62, %v1427_v20  ;;  %vm938_vm2 = vmand %vm898_vm10, %vm858_vm13  ;;  %vm18759_vm12 = vcmask 523264   ;;  %vm1740_vm3 = vcmp.ge.s32.totalorder %v14858_v25, 24  ;;  %vm1780_vm0 = vcmp.lt.s32.totalorder %v14858_v25, 296  ;;  %4320 = vrot.lane.b32.xlu0 %v14836_v46, %s9651_s24  ;;  %v4309_v20 = vpop.permute.xlu0 %4308 }
 0x2f8   : > { %v4920_v43 = vsel %vm18759_vm12, %v14854_v49, %v14679_v23  ;;  %vm1857_vm6 = vcmp.lt.s32.totalorder %v1697_v50, 16  ;;  %v14966_v63 = vsel %vm938_vm2, %v978_v2, %v756_v19  ;;  %v18760_v55 = vmov 0  ;;  %4728 = vrot.lane.b32.xlu1 %v4649_v3, %s9651_s24  ;;  %vm18766_vm13 = vmmov %vm18759_vm12 }
 0x2f9   : > { %vm14970_vm10 = vmand %vm14947_vm15, %vm1857_vm6  ;;  %v1456_v23 = vshrl.u32 %v14952_v8, 4  ;;  %v14979_v35 = vadd.s32 4294967272, %v14966_v63  ;;  %v18763_v49 = vrot.slane %v14814_v30, 5  ;;  %v18764_v34 = vrot.slane %v14874_v14, 5  ;;  %v4717_v14 = vpop.permute.xlu1 %4716 }
 0x2fa   : > { %v18761_v55 = vsel %vm14970_vm10, 4294967295, %v18760_v55  ;;  %vm18765_vm2 = vcmask 1042432   ;;  %v5061_v29 = vsel %vm18766_vm13, %v14847_v33, %v14909_v54  ;;  %v14993_v46 = vsel %vm14970_vm10, %v3641_v45, 0.0 }
 0x2fb   : > { %18762 = vst [vmem:[#allocation74_spill] sm:$0xff] %v18761_v55  ;;  %v14986_v19 = vsel %vm18765_vm2, %v18764_v34, %v18763_v49  ;;  %18767 = vst [vmem:[#allocation75_spill] sm:$0xff] %v14993_v46  ;;  %v14996_v3 = vor.u32 %v4656_v17, %v14860_v57  ;;  %v4253_v13 = vshll.u32 %v14958_v31, 16  ;;  %vm18768_vm15 = vcmask 785408   ;;  %v4791_v34 = vpop.permute.xlu0 %4790 }
 0x2fc   : > { %v5093_v7 = vsel %vm18768_vm15, %v5061_v29, %v4789_v52  ;;  %v8943_v62 = vpack.c.bf16 %v14993_v46, %v14993_v46  ;;  %v1457_v37 = vmul.u32 17, %v1456_v23  ;;  %v1429_v18 = vsub.s32 0, %v14979_v35  ;;  %vm18770_vm11 = vmmov %vm18768_vm15  ;;  %4425 = vrot.lane.b32.xlu1 %v14986_v19, %s9650_s14 }
 0x2fd   : > { %v4251_v33 = vor.u32 %v4249_v36, %v14797_v40  ;;  %vm18769_vm14 = vsmask.f32 2304  ;;  %v15006_v8 = vrot.slane %v4253_v13, 1  ;;  %v5246_v57 = vrot.slane %v5093_v7, 3  ;;  %v18772_v40 = vld [vmem:[#allocation23_spill] sm:$0xff]  ;;  %v15024_v49 = vpop.permute.xlu1 %4413 }
 0x2fe   : > { %v4658_v45 = vsel %vm18769_vm14, %v4648_v21, %v14996_v3  ;;  %v4963_v2 = vsel %vm18770_vm11, %v4920_v43, %v4483_v59  ;;  %vm18771_vm9 = vcmask 257024   ;;  %v1458_v17 = vsub.s32 %v8569_v51, %v1457_v37  ;;  %v18775_v59 = vld [vmem:[#allocation21_spill] sm:$0xff] }
 0x2ff   : > { %3961 = vst.msk [vmem:[#allocation2 + $0x8c] sm:$0xf] %vm18771_vm9, %v8943_v62  ;;  %v8567_v52 = vmin.u32 %v14979_v35, %v1429_v18  ;;  %4802 = vrot.lane.b32.xlu0 %v4658_v45, %s9652_s27  ;;  %v5244_v50 = vrot.slane %v4963_v2, 3  ;;  %vm18773_vm12 = vcmask 261120   ;;  %vm1450_vm6 = vcmp.lt.s32.totalorder %v14869_v39, 0 }
 0x300   : > { %v4878_v36 = vsel %vm18773_vm12, %v18772_v40, %v4309_v20  ;;  %vm18774_vm2 = vsmask.f32 7424  ;;  %vm18776_vm13 = vmmov %vm18773_vm12  ;;  %v18777_v51 = vrot.slane %v14773_v12, 3  ;;  %vm18778_vm15 = vcmask 1044480  }
 0x301   : > { %v4256_v21 = vsel %vm18774_vm2, %v4251_v33, %v15006_v8  ;;  %v5016_v43 = vsel %vm18776_vm13, %v18775_v59, %v4717_v14  ;;  %v1459_v29 = vsub.s32 0, %v1458_v17  ;;  %v18779_v39 = vrot.slane %v14807_v44, 3  ;;  %vm18780_vm14 = vmmov %vm18778_vm15 }
 0x302   : > { %v5247_v23 = vsel %vm18778_vm15, %v18777_v51, %v5246_v57  ;;  %v15026_v13 = vmul.u32.u64.low 4042322161, %v8567_v52  ;;  %v15027_v7 = vmul.u32.u64.high 4042322161, %v8567_v52, %v15026_v13  ;;  %vm18781_vm11 = vcmask 523264   ;;  %4496 = vrot.lane.b32.xlu1 %v4256_v21, %s9652_s27  ;;  %vm15053_vm15 = vmand %vm1740_vm3, %vm1780_vm0 }
 0x303   : > { %5616 = vmatprep.mubr.bf16.mxu1 %v5247_v23  ;;  %v5245_v20 = vsel %vm18780_vm14, %v18779_v39, %v5244_v50  ;;  %v5062_v14 = vsel %vm18781_vm11, %v5016_v43, %v15024_v49  ;;  %vm18782_vm9 = vmmov %vm18781_vm11  ;;  %v15037_v62 = vmul.u32.u64.low 3435973837, %v14746_v6  ;;  %v15038_v37 = vmul.u32.u64.high 3435973837, %v14746_v6, %v15037_v62  ;;  %4730 = vrot.lane.b32.xlu0 %v4658_v45, %s9651_s24  ;;  %v3581_v23 = vpop.f32.mrf.mxu0 }
 0x304   : > { %5617 = vmatmul.mubr.bf16.gmra.mxu1 %v5245_v20  ;;  %v4922_v12 = vsel %vm18782_vm9, %v4878_v36, %v14765_v41  ;;  %v1460_v18 = vsel %vm1450_vm6, %v1459_v29, %v1458_v17  ;;  %vm18783_vm12 = vcmask 785408   ;;  %v4485_v17 = vpop.permute.xlu1 %4484  ;;  %v3644_v36 = vmax.f32 %v14930_v58, 0.0 }
 0x305   : > { %v15043_v44 = vsel %vm18783_vm12, %v5062_v14, %v4791_v34  ;;  %v15046_v33 = vmul.u32.u64.low 3435973837, %v14749_v60  ;;  %v15047_v2 = vmul.u32.u64.high 3435973837, %v14749_v60, %v15046_v33  ;;  %vm1540_vm2 = vcmp.ne.s32.totalorder %v1460_v18, 0  ;;  %vm18786_vm14 = vmmov %vm18783_vm12 }
 0x306   : > { %vm1580_vm13 = vcmp.lt.s32.totalorder %v1460_v18, 0  ;;  %v1660_v40 = vadd.s32 17, %v1460_v18  ;;  %v17804_v45 = vrot.slane %v15043_v44, 3  ;;  %v1434_v59 = vshrl.u32 %v15027_v7, 4  ;;  %4322 = vrot.lane.b32.xlu1 %v4256_v21, %s9651_s24  ;;  %v15076_v39 = vld [vmem:[#allocation2 + $0x8c] sm:$0xf] }
 0x307   : > { %vm1620_vm6 = vmand %vm1580_vm13, %vm1540_vm2  ;;  %v15061_v43 = vsel %vm18786_vm14, %v4922_v12, %v4485_v17  ;;  %vm18787_vm3 = vcmask 1044480   ;;  %v809_v29 = vshrl.u32 %v15038_v37, 8  ;;  %v787_v58 = vshrl.u32 %v15047_v2, 8  ;;  %v15088_v12 = vld [vmem:[%s17523_s2] ss:$0 sm:$0xff] }
 0x308   : > { %v1700_v51 = vsel %vm1620_vm6, %v1660_v40, %v1460_v18  ;;  %v17803_v34 = vrot.slane %v15061_v43, 3  ;;  %v5253_v25 = vsel %vm18787_vm3, %v5246_v57, %v17804_v45  ;;  %v1435_v13 = vmul.u32 17, %v1434_v59  ;;  %vm18791_vm9 = vmmov %vm18787_vm3 }
 0x309   : > { %vm1860_vm0 = vcmp.lt.s32.totalorder %v1700_v51, 16  ;;  %5624 = vmatprep.mubr.bf16.mxu1 %v5253_v25  ;;  %v18788_v7 = vmov 0  ;;  %v810_v20 = vmul.u32 320, %v809_v29  ;;  %v3582_v62 = vadd.f32 %v15088_v12, %v3581_v23 }
 0x30a   : > { %vm15072_vm11 = vmand %vm15053_vm15, %vm1860_vm0  ;;  %v5251_v57 = vsel %vm18791_vm9, %v5244_v50, %v17803_v34  ;;  %v1436_v21 = vsub.s32 %v8567_v52, %v1435_v13  ;;  %vm1428_vm12 = vcmp.lt.s32.totalorder %v14979_v35, 0  ;;  %v788_v50 = vmul.u32 320, %v787_v58 }
 0x30b   : > { %v18789_v7 = vsel %vm15072_vm11, 4294967295, %v18788_v7  ;;  %v15083_v14 = vsel %vm15072_vm11, %v3644_v36, 0.0  ;;  %v811_v18 = vsub.s32 %v14746_v6, %v810_v20  ;;  %vm1738_vm2 = vcmp.ge.s32.totalorder %v14966_v63, 24  ;;  %v9102_v6 = vpop.f32.mrf.mxu0  ;;  %v4719_v20 = vpop.permute.xlu0 %4718 }
 0x30c   : > { %18790 = vst [vmem:[#allocation23_spill] sm:$0xff] %v18789_v7  ;;  %18792 = vst [vmem:[#allocation21_spill] sm:$0xff] %v15083_v14  ;;  %v8946_v37 = vpack.c.bf16 %v15083_v14, %v15083_v14  ;;  %5625 = vmatmul.mubr.bf16.gmra.mxu1 %v5251_v57  ;;  %v1437_v33 = vsub.s32 0, %v1436_v21  ;;  %vm1778_vm13 = vcmp.lt.s32.totalorder %v14966_v63, 296  ;;  %v15099_v52 = vcombine.low %v14776_v53, %v15076_v39  ;;  %v15150_v53 = vld [vmem:[#allocation2 + $0x94] sm:$0xf] }
 0x30d   : > { %vm18793_vm15 = vcmask 257024   ;;  %vm863_vm6 = vcmp.ne.s32.totalorder %v811_v18, 0  ;;  %vm903_vm14 = vcmp.lt.s32.totalorder %v811_v18, 0  ;;  %v983_v2 = vadd.s32 320, %v811_v18  ;;  %vm15106_vm11 = vmand %vm1738_vm2, %vm1778_vm13  ;;  %v3594_v29 = vpop.f32.mrf.mxu0 }
 0x30e   : > { %3964 = vst.msk [vmem:[#allocation2 + $0x98] sm:$0xf] %vm18793_vm15, %v8946_v37  ;;  %v789_v35 = vsub.s32 %v14749_v60, %v788_v50  ;;  %v1438_v40 = vsel %vm1428_vm12, %v1437_v33, %v1436_v21  ;;  %vm943_vm3 = vmand %vm903_vm14, %vm863_vm6  ;;  %v384_v41 = vadd.s32 312, %v10358_v0  ;;  %v3642_v59 = vmax.f32 %v3582_v62, 0.0 }
 0x30f   : > { %vm1538_vm0 = vcmp.ne.s32.totalorder %v1438_v40, 0  ;;  %vm1578_vm9 = vcmp.lt.s32.totalorder %v1438_v40, 0  ;;  %v1658_v17 = vadd.s32 17, %v1438_v40  ;;  %v15110_v36 = vsel %vm943_vm3, %v983_v2, %v811_v18  ;;  %v15171_v34 = vpop.permute.xlu0 %4415 }
 0x310   : > { %vm1618_vm15 = vmand %vm1578_vm9, %vm1538_vm0  ;;  %v15113_v60 = vadd.s32 4294967272, %v15110_v36  ;;  %vm861_vm12 = vcmp.ne.s32.totalorder %v789_v35, 0  ;;  %v4261_v23 = vshll.u32 %v15099_v52, 16  ;;  %vm901_vm6 = vcmp.lt.s32.totalorder %v789_v35, 0 }
 0x311   : > { %v1698_v51 = vsel %vm1618_vm15, %v1658_v17, %v1438_v40  ;;  %v981_v25 = vadd.s32 320, %v789_v35  ;;  %vm941_vm2 = vmand %vm901_vm6, %vm861_vm12  ;;  %v15118_v13 = vadd.s32 296, %v10358_v0  ;;  %v18796_v58 = vmov 0 }
 0x312   : > { %vm1858_vm14 = vcmp.lt.s32.totalorder %v1698_v51, 16  ;;  %v1484_v63 = vsub.s32 0, %v15113_v60  ;;  %v4257_v57 = vshrl.u32 %v14958_v31, 16  ;;  %v15140_v33 = vadd.f32 %v15088_v12, %v9102_v6 }
 0x313   : > { %vm15122_vm13 = vmand %vm15106_vm11, %vm1858_vm14  ;;  %v15127_v21 = vsel %vm941_vm2, %v981_v25, %v789_v35  ;;  %v15129_v62 = vmul.u32.u64.low 3435973837, %v384_v41  ;;  %v15130_v37 = vmul.u32.u64.high 3435973837, %v384_v41, %v15129_v62  ;;  %v15148_v17 = vrot.slane %v4261_v23, 1 }
 0x314   : > { %v18797_v58 = vsel %vm15122_vm13, 4294967295, %v18796_v58  ;;  %v15134_v18 = vsel %vm15122_vm13, %v3642_v59, 0.0  ;;  %v8572_v50 = vmin.u32 %v15113_v60, %v1484_v63  ;;  %v15143_v2 = vadd.s32 4294967272, %v15127_v21  ;;  %v4311_v59 = vpop.permute.xlu1 %4310 }
 0x315   : > { %18798 = vst [vmem:[#allocation76_spill] sm:$0xff] %v18797_v58  ;;  %18799 = vst [vmem:[#allocation77_spill] sm:$0xff] %v15134_v18  ;;  %v15136_v0 = vld [vmem:[#allocation2 + $0x98] sm:$0xf]  ;;  %v8944_v35 = vpack.c.bf16 %v15134_v18, %v15134_v18  ;;  %v4259_v40 = vor.u32 %v4257_v57, %v15006_v8  ;;  %v15153_v51 = vadd.f32 %v15088_v12, %v3594_v29  ;;  %vm18800_vm11 = vcmask 257024  }
 0x316   : > { %v15157_v6 = vcombine.low %v15150_v53, %v15136_v0  ;;  %v15159_v25 = vmul.u32.u64.low 4042322161, %v8572_v50  ;;  %v15160_v63 = vmul.u32.u64.high 4042322161, %v8572_v50, %v15159_v25  ;;  %v1462_v62 = vsub.s32 0, %v15143_v2 }
 0x317   : > { %3962 = vst.msk [vmem:[#allocation2 + $0x90] sm:$0xf] %vm18800_vm11, %v8944_v35  ;;  %vm18801_vm3 = vcmask 261120   ;;  %v820_v23 = vshrl.u32 %v15130_v37, 8  ;;  %v15168_v57 = vmul.u32.u64.low 3435973837, %v15118_v13  ;;  %v15169_v29 = vmul.u32.u64.high 3435973837, %v15118_v13, %v15168_v57 }
 0x318   : > { %v5019_v8 = vsel %vm18801_vm3, %v13931_v11, %v4719_v20  ;;  %vm18802_vm0 = vmmov %vm18801_vm3  ;;  %v8570_v48 = vmin.u32 %v15143_v2, %v1462_v62  ;;  %vm18803_vm9 = vsmask.f32 7424  ;;  %vm1483_vm15 = vcmp.lt.s32.totalorder %v15113_v60, 0  ;;  %v4793_v57 = vpop.permute.xlu1 %4792 }
 0x319   : > { %v4880_v25 = vsel %vm18802_vm0, %v13677_v27, %v4311_v59  ;;  %v15180_v11 = vsel %vm18803_vm9, %v4259_v40, %v15148_v17  ;;  %v821_v37 = vmul.u32 320, %v820_v23  ;;  %v1489_v14 = vshrl.u32 %v15160_v63, 4 }
 0x31a   : > { %v15185_v45 = vmul.u32.u64.low 4042322161, %v8570_v48  ;;  %v15186_v47 = vmul.u32.u64.high 4042322161, %v8570_v48, %v15185_v45  ;;  %v4669_v27 = vshrl.u32 %v15157_v6, 16  ;;  %v798_v40 = vshrl.u32 %v15169_v29, 8 }
 0x31b   : > { %v822_v59 = vsub.s32 %v384_v41, %v821_v37  ;;  %v4672_v62 = vshll.u32 %v15157_v6, 16  ;;  %vm18804_vm14 = vcmask 523264   ;;  %v1490_v63 = vmul.u32 17, %v1489_v14  ;;  %v4487_v37 = vpop.permute.xlu0 %4486 }
 0x31c   : > { %v5063_v23 = vsel %vm18804_vm14, %v5019_v8, %v15171_v34  ;;  %vm1461_vm2 = vcmp.lt.s32.totalorder %v15143_v2, 0  ;;  %vm18805_vm11 = vcmask 785408   ;;  %vm1781_vm0 = vcmp.lt.s32.totalorder %v15127_v21, 296  ;;  %vm18806_vm6 = vmmov %vm18804_vm14 }
 0x31d   : > { %v15198_v45 = vsel %vm18805_vm11, %v5063_v23, %v4793_v57  ;;  %vm864_vm9 = vcmp.ne.s32.totalorder %v822_v59, 0  ;;  %vm904_vm12 = vcmp.lt.s32.totalorder %v822_v59, 0  ;;  %v984_v41 = vadd.s32 320, %v822_v59 }
 0x31e   : > { %v4924_v29 = vsel %vm18806_vm6, %v4880_v25, %v14909_v54  ;;  %v4005_v8 = vld [vmem:[#allocation2 + $0x90] sm:$0xf]  ;;  %v1491_v20 = vsub.s32 %v8572_v50, %v1490_v63  ;;  %v1467_v14 = vshrl.u32 %v15186_v47, 4  ;;  %vm944_vm14 = vmand %vm904_vm12, %vm864_vm9  ;;  %v799_v35 = vmul.u32 320, %v798_v40  ;;  %v15221_v50 = vpop.permute.xlu1 %4720 }
 0x31f   : > { %v15205_v18 = vrot.slane %v4669_v27, 5  ;;  %v15208_v57 = vcombine.low %v15076_v39, %v4005_v8  ;;  %v15210_v23 = vsel %vm944_vm14, %v984_v41, %v822_v59  ;;  %v15212_v46 = vrot.slane %v4672_v62, 6  ;;  %vm18807_vm6 = vmmov %vm18805_vm11 }
 0x320   : > { %v1492_v10 = vsub.s32 0, %v1491_v20  ;;  %v1468_v54 = vmul.u32 17, %v1467_v14  ;;  %v15216_v25 = vadd.s32 4294967272, %v15210_v23  ;;  %v15219_v47 = vsel %vm18807_vm6, %v4924_v29, %v4487_v37 }
 0x321   : > { %v4387_v27 = vrot.slane %v15208_v57, 5  ;;  %v4848_v39 = vrot.slane %v15208_v57, 6  ;;  %v4660_v59 = vshrl.u32 %v15208_v57, 16  ;;  %v4663_v40 = vshll.u32 %v15208_v57, 16 }
 0x322   : > { %v1493_v62 = vsel %vm1483_vm15, %v1492_v10, %v1491_v20  ;;  %v1469_v63 = vsub.s32 %v8570_v48, %v1468_v54  ;;  %v1495_v41 = vsub.s32 0, %v15216_v25  ;;  %v800_v14 = vsub.s32 %v15118_v13, %v799_v35  ;;  %v4313_v13 = vpop.permute.xlu0 %4312 }
 0x323   : > { %v18808_v29 = vrot.slane %v14814_v30, 5  ;;  %vm18809_vm12 = vcmask 1042432   ;;  %v18810_v7 = vrot.slane %v14814_v30, 6  ;;  %vm18811_vm11 = vcmask 1041408  }
 0x324   : > { %v4662_v55 = vrot.slane %v4660_v59, 5  ;;  %v4665_v1 = vrot.slane %v4663_v40, 6  ;;  %v18812_v10 = vrot.slane %v15157_v6, 6  ;;  %vm18813_vm15 = vmmov %vm18811_vm11  ;;  %vm1543_vm9 = vcmp.ne.s32.totalorder %v1493_v62, 0  ;;  %v15272_v40 = vpop.permute.xlu1 %4417 }
 0x325   : > { %v15236_v37 = vsel %vm18809_vm12, %v18808_v29, %v4387_v27  ;;  %v4849_v58 = vsel %vm18811_vm11, %v18810_v7, %v4848_v39  ;;  %vm1583_vm14 = vcmp.lt.s32.totalorder %v1493_v62, 0  ;;  %v1663_v20 = vadd.s32 17, %v1493_v62 }
 0x326   : > { %4427 = vrot.lane.b32.xlu0 %v15236_v37, %s9650_s14  ;;  %v5296_v48 = vrot.slane %v4849_v58, 3  ;;  %v15246_v60 = vsel %vm18813_vm15, %v4848_v39, %v18812_v10  ;;  %v15248_v35 = vor.u32 %v4665_v1, %v4662_v55  ;;  %vm15251_vm6 = vmand %vm1583_vm14, %vm1543_vm9  ;;  %v1470_v54 = vsub.s32 0, %v1469_v63 }
 0x327   : > { %v5302_v30 = vrot.slane %v15246_v60, 3  ;;  %v18816_v58 = vrot.slane %v14907_v15, 3  ;;  %vm18817_vm12 = vcmask 1044480   ;;  %vm18818_vm11 = vcmp.lt.s32.totalorder %v15110_v36, 296 }
 0x328   : > { %vm18819_vm15 = vcmp.ge.s32.totalorder %v15110_v36, 24  ;;  %v15267_v1 = vmin.u32 %v15216_v25, %v1495_v41  ;;  %v15270_v55 = vcombine.low %v4005_v8, %v15150_v53  ;;  %vm18822_vm14 = vcmask 261120   ;;  %v9103_v8 = vpop.f32.mrf.mxu0 }
 0x329   : > { %v5297_v59 = vsel %vm18817_vm12, %v18816_v58, %v5296_v48  ;;  %vm15262_vm3 = vmand %vm18819_vm15, %vm18818_vm11  ;;  %vm18823_vm12 = vsmask.f32 2304  ;;  %vm18824_vm11 = vcmask 1044480   ;;  %v1703_v41 = vsel %vm15251_vm6, %v1663_v20, %v1493_v62  ;;  %v4795_v58 = vpop.permute.xlu0 %4794 }
 0x32a   : > { %9136 = vmatprep.mubr.msk.bf16.mxu0 %vm18822_vm14, %v5297_v59  ;;  %v4667_v15 = vsel %vm18823_vm12, %v14996_v3, %v15248_v35  ;;  %v5303_v36 = vsel %vm18824_vm11, %v5296_v48, %v5302_v30  ;;  %v1471_v29 = vsel %vm1461_vm2, %v1470_v54, %v1469_v63  ;;  %4498 = vrot.lane.b32.xlu0 %v15180_v11, %s9652_s27  ;;  %vm1863_vm15 = vcmp.lt.s32.totalorder %v1703_v41, 16 }
 0x32b   : > { %4804 = vrot.lane.b32.xlu1 %v4667_v15, %s9652_s27  ;;  %vm1541_vm14 = vcmp.ne.s32.totalorder %v1471_v29, 0  ;;  %vm1581_vm9 = vcmp.lt.s32.totalorder %v1471_v29, 0  ;;  %v1661_v53 = vadd.s32 17, %v1471_v29  ;;  %vm18825_vm12 = vcmp.ge.s32.totalorder %v15127_v21, 24  ;;  %vm15299_vm2 = vmand %vm15262_vm3, %vm1863_vm15 }
 0x32c   : > { %vm15292_vm11 = vmand %vm18825_vm12, %vm1781_vm0  ;;  %vm18828_vm6 = vcmask 261120   ;;  %v18829_v2 = vmov 0  ;;  %v15304_v62 = vmul.u32.u64.low 4042322161, %v15267_v1  ;;  %v15305_v63 = vmul.u32.u64.high 4042322161, %v15267_v1, %v15304_v62 }
 0x32d   : > { %9137 = vmatmul.mubr.msk.bf16.gmra.mxu0 %vm18828_vm6, %v5303_v36  ;;  %v18830_v2 = vsel %vm15299_vm2, 4294967295, %v18829_v2  ;;  %vm902_vm13 = vcmp.lt.s32.totalorder %v800_v14, 0  ;;  %v982_v48 = vadd.s32 320, %v800_v14  ;;  %v18832_v21 = vmax.f32 %v15140_v33, 0.0  ;;  %vm1621_vm0 = vmand %vm1581_vm9, %vm1541_vm14 }
 0x32e   : > { %18831 = vst [vmem:[#allocation78_spill] sm:$0xff] %v18830_v2  ;;  %v4389_v7 = vrot.slane %v15157_v6, 5  ;;  %v4269_v20 = vshll.u32 %v15270_v55, 16  ;;  %v5256_v54 = vrot.slane %v15219_v47, 3  ;;  %v1701_v39 = vsel %vm1621_vm0, %v1661_v53, %v1471_v29  ;;  %4324 = vrot.lane.b32.xlu0 %v15180_v11, %s9651_s24  ;;  %v4489_v53 = vpop.permute.xlu1 %4488 }
 0x32f   : > { %v15311_v10 = vsel %vm15299_vm2, %v18832_v21, 0.0  ;;  %v15319_v36 = vadd.f32 %v15088_v12, %v9103_v8  ;;  %vm18834_vm3 = vcmp.ne.s32.totalorder %v800_v14, 0  ;;  %v15324_v33 = vor.u32 %v15212_v46, %v15205_v18  ;;  %4732 = vrot.lane.b32.xlu1 %v4667_v15, %s9651_s24 }
 0x330   : > { %18833 = vst [vmem:[#allocation79_spill] sm:$0xff] %v15311_v10  ;;  %v8949_v59 = vpack.c.bf16 %v15311_v10, %v15311_v10  ;;  %vm942_vm15 = vmand %vm902_vm13, %vm18834_vm3  ;;  %vm1861_vm9 = vcmp.lt.s32.totalorder %v1701_v39, 16  ;;  %vm18835_vm14 = vcmask 1042432   ;;  %v18836_v29 = vrot.slane %v15198_v45, 3 }
 0x331   : > { %v15329_v47 = vsel %vm942_vm15, %v982_v48, %v800_v14  ;;  %v15336_v41 = vsel %vm18835_vm14, %v4387_v27, %v4389_v7  ;;  %v18837_v46 = vrot.slane %v15043_v44, 3  ;;  %vm18838_vm13 = vcmask 1044480   ;;  %vm15346_vm6 = vmand %vm15292_vm11, %vm1861_vm9 }
 0x332   : > { %vm18839_vm12 = vcmask 257024   ;;  %v18840_v11 = vmov 0  ;;  %v1500_v57 = vshrl.u32 %v15305_v63, 4  ;;  %v15352_v27 = vadd.s32 4294967272, %v15329_v47  ;;  %vm18848_vm11 = vmmov %vm18838_vm13 }
 0x333   : > { %v5259_v18 = vsel %vm18838_vm13, %v18837_v46, %v18836_v29  ;;  %3967 = vst.msk [vmem:[#allocation2 + $0xa4] sm:$0xf] %vm18839_vm12, %v8949_v59  ;;  %v18841_v11 = vsel %vm15346_vm6, 4294967295, %v18840_v11  ;;  %vm18843_vm0 = vcmask 261120   ;;  %v18845_v15 = vmax.f32 %v15153_v51, 0.0  ;;  %4429 = vrot.lane.b32.xlu1 %v15336_v41, %s9650_s14  ;;  %v4723_v59 = vpop.permute.xlu0 %4722 }
 0x334   : > { %18842 = vst [vmem:[#allocation80_spill] sm:$0xff] %v18841_v11  ;;  %v5022_v44 = vsel %vm18843_vm0, %v14150_v42, %v15221_v50  ;;  %vm18844_vm3 = vmmov %vm18843_vm0  ;;  %5632 = vmatprep.mubr.bf16.mxu1 %v5259_v18  ;;  %v15365_v8 = vrot.slane %v4269_v20, 1  ;;  %v18847_v62 = vrot.slane %v15061_v43, 3  ;;  %vm18849_vm15 = vcmask 523264   ;;  %v4315_v18 = vpop.permute.xlu1 %4314 }
 0x335   : > { %v4882_v14 = vsel %vm18844_vm3, %v13794_v56, %v4313_v13  ;;  %v15363_v3 = vsel %vm15346_vm6, %v18845_v15, 0.0  ;;  %v5064_v48 = vsel %vm18849_vm15, %v5022_v44, %v15272_v40  ;;  %v1501_v56 = vmul.u32 17, %v1500_v57  ;;  %vm18853_vm12 = vmmov %vm18849_vm15 }
 0x336   : > { %18846 = vst [vmem:[#allocation81_spill] sm:$0xff] %v15363_v3  ;;  %v5257_v63 = vsel %vm18848_vm11, %v18847_v62, %v5256_v54  ;;  %v8947_v42 = vpack.c.bf16 %v15363_v3, %v15363_v3  ;;  %v1473_v50 = vsub.s32 0, %v15352_v27  ;;  %vm18850_vm9 = vsmask.f32 2304 }
 0x337   : > { %v4676_v51 = vsel %vm18850_vm9, %v15248_v35, %v15324_v33  ;;  %5633 = vmatmul.mubr.bf16.gmra.mxu1 %v5257_v63  ;;  %vm1744_vm14 = vcmp.ge.s32.totalorder %v15210_v23, 24  ;;  %v18851_v43 = vshrl.u32 %v15099_v52, 16  ;;  %vm18852_vm13 = vcmask 785408  }
 0x338   : > { %4806 = vrot.lane.b32.xlu0 %v4676_v51, %s9652_s27  ;;  %v5099_v21 = vsel %vm18852_vm13, %v5064_v48, %v4795_v58  ;;  %v4926_v20 = vsel %vm18853_vm12, %v4882_v14, %v15024_v49  ;;  %vm18854_vm0 = vcmask 257024   ;;  %v1502_v35 = vsub.s32 %v15267_v1, %v1501_v56  ;;  %vm18855_vm3 = vmmov %vm18852_vm13 }
 0x339   : > { %v4267_v13 = vor.u32 %v18851_v43, %v15148_v17  ;;  %3965 = vst.msk [vmem:[#allocation2 + $0x9c] sm:$0xf] %vm18854_vm0, %v8947_v42  ;;  %v8571_v39 = vmin.u32 %v15352_v27, %v1473_v50  ;;  %v5264_v29 = vrot.slane %v5099_v21, 3  ;;  %v4969_v46 = vsel %vm18855_vm3, %v4926_v20, %v4489_v53  ;;  %v15405_v53 = vpop.permute.xlu0 %4419 }
 0x33a   : > { %vm1494_vm11 = vcmp.lt.s32.totalorder %v15216_v25, 0  ;;  %vm1784_vm15 = vcmp.lt.s32.totalorder %v15210_v23, 296  ;;  %vm18856_vm9 = vsmask.f32 7424  ;;  %v5262_v58 = vrot.slane %v4969_v46, 3 }
 0x33b   : > { %v4272_v17 = vsel %vm18856_vm9, %v4267_v13, %v15365_v8  ;;  %v1503_v49 = vsub.s32 0, %v1502_v35  ;;  %v15396_v57 = vmul.u32.u64.low 4042322161, %v8571_v39  ;;  %v15397_v44 = vmul.u32.u64.high 4042322161, %v8571_v39, %v15396_v57 }
 0x33c   : > { %v18857_v1 = vrot.slane %v15198_v45, 3  ;;  %vm18858_vm13 = vcmask 1044480   ;;  %4500 = vrot.lane.b32.xlu1 %v4272_v17, %s9652_s27  ;;  %4734 = vrot.lane.b32.xlu0 %v4676_v51, %s9651_s24  ;;  %vm18860_vm0 = vcmask 261120   ;;  %v3597_v51 = vpop.f32.mrf.mxu0  ;;  %v18867_v21 = vmov 0 }
 0x33d   : > { %vm18859_vm12 = vmmov %vm18858_vm13  ;;  %v1504_v15 = vsel %vm1494_vm11, %v1503_v49, %v1502_v35  ;;  %v4884_v62 = vsel %vm18860_vm0, %v14057_v22, %v4315_v18  ;;  %v1478_v48 = vshrl.u32 %v15397_v44, 4  ;;  %v4491_v23 = vpop.permute.xlu0 %4490  ;;  %v3598_v46 = vadd.f32 %v15088_v12, %v3597_v51 }
 0x33e   : > { %v5265_v14 = vsel %vm18858_vm13, %v18857_v1, %v5264_v29  ;;  %v5263_v25 = vsel %vm18859_vm12, %v5256_v54, %v5262_v58  ;;  %vm1544_vm3 = vcmp.ne.s32.totalorder %v1504_v15, 0  ;;  %vm1584_vm9 = vcmp.lt.s32.totalorder %v1504_v15, 0  ;;  %vm15413_vm13 = vmand %vm1744_vm14, %vm1784_vm15  ;;  %v15447_v1 = vld [vmem:[#allocation2 + $0xac] sm:$0xff]  }
 0x33f   : > { %5640 = vmatprep.mubr.bf16.mxu1 %v5265_v14  ;;  %v1664_v63 = vadd.s32 17, %v1504_v15  ;;  %vm1624_vm6 = vmand %vm1584_vm9, %vm1544_vm3  ;;  %v3648_v54 = vmax.f32 %v15319_v36, 0.0  ;;  %vm18864_vm12 = vcmask 523264   ;;  %v1479_v50 = vmul.u32 17, %v1478_v48  ;;  %v4797_v36 = vpop.permute.xlu1 %4796  ;;  %v4012_v48 = vld [vmem:[#allocation2 + $0xa4] sm:$0xf] }
 0x340   : > { %5641 = vmatmul.mubr.bf16.gmra.mxu1 %v5263_v25  ;;  %4326 = vrot.lane.b32.xlu1 %v4272_v17, %s9651_s24  ;;  %vm18863_vm11 = vmmov %vm18860_vm0  ;;  %v4928_v56 = vsel %vm18864_vm12, %v4884_v62, %v15171_v34  ;;  %vm18866_vm0 = vcmask 785408   ;;  %vm1472_vm9 = vcmp.lt.s32.totalorder %v15352_v27, 0  ;;  %v15449_v27 = vld [vmem:[#allocation2 + $0xb4] ss:$0 sps:$4 sm:$0x11]   ;;  %v18877_v45 = vmov 0 }
 0x341   : > { %v1704_v42 = vsel %vm1624_vm6, %v1664_v63, %v1504_v15  ;;  %v5025_v22 = vsel %vm18863_vm11, %v14294_v4, %v4723_v59  ;;  %vm18865_vm15 = vmmov %vm18864_vm12  ;;  %v4971_v13 = vsel %vm18866_vm0, %v4928_v56, %v4491_v23  ;;  %v1480_v59 = vsub.s32 %v8571_v39, %v1479_v50  ;;  %v4317_v14 = vpop.permute.xlu0 %4316 }
 0x342   : > { %vm1864_vm14 = vcmp.lt.s32.totalorder %v1704_v42, 16  ;;  %v5065_v43 = vsel %vm18865_vm15, %v5025_v22, %v15405_v53  ;;  %vm18870_vm3 = vmmov %vm18866_vm0  ;;  %v5268_v20 = vrot.slane %v4971_v13, 3  ;;  %vm1782_vm11 = vcmp.lt.s32.totalorder %v15329_v47, 296 }
 0x343   : > { %vm15429_vm6 = vmand %vm15413_vm13, %vm1864_vm14  ;;  %v5101_v4 = vsel %vm18870_vm3, %v5065_v43, %v4797_v36  ;;  %v1481_v18 = vsub.s32 0, %v1480_v59  ;;  %vm1742_vm13 = vcmp.ge.s32.totalorder %v15329_v47, 24  ;;  %v4725_v49 = vpop.permute.xlu1 %4724  ;;  %vm18872_vm12 = vcmask 1044480   ;;  %v4008_v36 = vld [vmem:[#allocation2 + $0x9c] sm:$0xf] }
 0x344   : > { %v18868_v21 = vsel %vm15429_vm6, 4294967295, %v18867_v21  ;;  %v15436_v34 = vsel %vm15429_vm6, %v3648_v54, 0.0  ;;  %v5270_v17 = vrot.slane %v5101_v4, 3  ;;  %v5269_v57 = vsel %vm18872_vm12, %v5262_v58, %v5268_v20  ;;  %vm18874_vm15 = vmmov %vm18872_vm12 }
 0x345   : > { %18869 = vst [vmem:[#allocation82_spill] sm:$0xff] %v18868_v21  ;;  %18871 = vst [vmem:[#allocation83_spill] sm:$0xff] %v15436_v34  ;;  %v8950_v35 = vpack.c.bf16 %v15436_v34, %v15436_v34  ;;  %vm18873_vm14 = vcmask 257024   ;;  %v1482_v44 = vsel %vm1472_vm9, %v1481_v18, %v1480_v59  ;;  %v3646_v47 = vmax.f32 %v3598_v46, 0.0 }
 0x346   : > { %v5271_v39 = vsel %vm18874_vm15, %v5264_v29, %v5270_v17  ;;  %vm1542_vm0 = vcmp.ne.s32.totalorder %v1482_v44, 0  ;;  %vm1582_vm3 = vcmp.lt.s32.totalorder %v1482_v44, 0  ;;  %v1662_v12 = vadd.s32 17, %v1482_v44  ;;  %vm1822_vm6 = vmand %vm1742_vm13, %vm1782_vm11 }
 0x347   : > { %3968 = vst.msk [vmem:[#allocation2 + $0xa8] sm:$0xf] %vm18873_vm14, %v8950_v35  ;;  %5648 = vmatprep.mubr.bf16.mxu1 %v5271_v39  ;;  %vm1622_vm2 = vmand %vm1582_vm3, %vm1542_vm0  ;;  %v15451_v25 = vpop.permute.xlu1 %4421  ;;  %vm18875_vm12 = vcmask 261120   ;;  %vm18876_vm14 = vcmask 523264   ;;  %v4858_v62 = vrot.slane %v15449_v27, 6  ;;  %v4856_v63 = vrot.slane %v15447_v1, 6 }
 0x348   : > { %5649 = vmatmul.mubr.bf16.gmra.mxu1 %v5269_v57  ;;  %v1702_v58 = vsel %vm1622_vm2, %v1662_v12, %v1482_v44  ;;  %v5028_v29 = vsel %vm18875_vm12, %v14503_v32, %v4725_v49  ;;  %v4799_v32 = vpop.permute.xlu0 %4798  ;;  %vm18881_vm2 = vcmask 785408   ;;  %vm18883_vm13 = vcmask 1041408   ;;  %vm18886_vm3 = vmmov %vm18876_vm14 }
 0x349   : > { %vm1862_vm9 = vcmp.lt.s32.totalorder %v1702_v58, 16  ;;  %v5066_v15 = vsel %vm18876_vm14, %v5028_v29, %v15451_v25  ;;  %v4859_v43 = vsel %vm18883_vm13, %v4856_v63, %v4858_v62  ;;  %vm18884_vm11 = vcmask 257024  }
 0x34a   : > { %vm15459_vm15 = vmand %vm1822_vm6, %vm1862_vm9  ;;  %v15473_v23 = vsel %vm18881_vm2, %v5066_v15, %v4799_v32  ;;  %vm18885_vm0 = vcmask 1044480   ;;  %v5326_v46 = vrot.slane %v4859_v43, 3  ;;  %v4273_v15 = vshrl.u32 %v15270_v55, 16 }
 0x34b   : > { %v18878_v45 = vsel %vm15459_vm15, 4294967295, %v18877_v45  ;;  %v15465_v54 = vsel %vm15459_vm15, %v3646_v47, 0.0  ;;  %vm18882_vm6 = vmmov %vm18875_vm12  ;;  %v5276_v51 = vrot.slane %v15473_v23, 3  ;;  %v4493_v59 = vpop.permute.xlu1 %4492 }
 0x34c   : > { %18879 = vst [vmem:[#allocation84_spill] sm:$0xff] %v18878_v45  ;;  %18880 = vst [vmem:[#allocation85_spill] sm:$0xff] %v15465_v54  ;;  %v8948_v22 = vpack.c.bf16 %v15465_v54, %v15465_v54  ;;  %v4886_v50 = vsel %vm18882_vm6, %v14233_v16, %v4317_v14  ;;  %v15486_v16 = vcombine.low %v15136_v0, %v4008_v36  ;;  %vm18891_vm6 = vcmask 1042432  }
 0x34d   : > { %v5277_v4 = vsel %vm18885_vm0, %v5270_v17, %v5276_v51  ;;  %v4930_v35 = vsel %vm18886_vm3, %v4886_v50, %v15272_v40  ;;  %vm18887_vm12 = vmmov %vm18881_vm2 }
 0x34e   : > { %v15467_v42 = vld [vmem:[#allocation2 + $0xa8] sm:$0xf]  ;;  %3966 = vst.msk [vmem:[#allocation2 + $0xa0] sm:$0xf] %vm18884_vm11, %v8948_v22  ;;  %5656 = vmatprep.mubr.bf16.mxu1 %v5277_v4  ;;  %v15489_v18 = vsel %vm18887_vm12, %v4930_v35, %v4493_v59  ;;  %vm18888_vm9 = vmmov %vm18883_vm13  ;;  %v4277_v14 = vshll.u32 %v15486_v16, 16  ;;  %v4275_v59 = vor.u32 %v4273_v15, %v15365_v8 }
 0x34f   : > { %v8732_v56 = vcombine.low %v4012_v48, %v15467_v42  ;;  %v5274_v57 = vrot.slane %v15489_v18, 3  ;;  %vm18889_vm14 = vmmov %vm18885_vm0 }
 0x350   : > { %vm18890_vm2 = vmmov %vm18885_vm0  ;;  %v4279_v62 = vrot.slane %v4277_v14, 1 }
 0x351   : > { %v4854_v13 = vrot.slane %v8732_v56, 6  ;;  %v5275_v17 = vsel %vm18889_vm14, %v5268_v20, %v5274_v57  ;;  %vm18893_vm13 = vmmov %vm18888_vm9  ;;  %v4687_v35 = vshrl.u32 %v8732_v56, 16  ;;  %vm18898_vm14 = vsmask.f32 7424 }
 0x352   : > { %5657 = vmatmul.mubr.bf16.gmra.mxu1 %v5275_v17  ;;  %vm18894_vm11 = vmmov %vm18888_vm9  ;;  %v4280_v17 = vsel %vm18898_vm14, %v4275_v59, %v4279_v62  ;;  %v4319_v59 = vpop.permute.xlu1 %4318 }
 0x353   : > { %v4857_v49 = vsel %vm18888_vm9, %v4854_v13, %v4856_v63  ;;  %v18892_v63 = vrot.slane %v15157_v6, 6  ;;  %vm18895_vm3 = vmmov %vm18885_vm0  ;;  %vm18897_vm9 = vcmask 261120  }
 0x354   : > { %v5320_v39 = vrot.slane %v4857_v49, 3  ;;  %vm18896_vm12 = vmmov %vm18885_vm0 }
 0x355   : > { %v4010_v40 = vld [vmem:[#allocation2 + $0xa0] sm:$0xf] }
 0x356   : > { %v15497_v44 = vsel %vm18890_vm2, %v5320_v39, %v5326_v46  ;;  %v8728_v0 = vcombine.low %v4008_v36, %v4010_v40  ;;  %v4690_v46 = vshll.u32 %v8732_v56, 16  ;;  %vm18899_vm2 = vmmov %vm18897_vm9  ;;  %v8730_v60 = vcombine.low %v4010_v40, %v4012_v48 }
 0x357   : > { %v4761_v48 = vshrl.u32 %v15447_v1, 16 }
 0x358   : > { %v15500_v12 = vrot.slane %v8728_v0, 5  ;;  %v4852_v47 = vrot.slane %v8728_v0, 6  ;;  %v4678_v58 = vshrl.u32 %v8728_v0, 16  ;;  %v4681_v29 = vshll.u32 %v8728_v0, 16 }
 0x359   : > { %v4692_v14 = vrot.slane %v4690_v46, 6  ;;  %v15531_v0 = vcombine.low %v4010_v40, %v4010_v40  ;;  %v4281_v40 = vshrl.u32 %v15486_v16, 16 }
 0x35a   : > { %v15507_v20 = vsel %vm18891_vm6, %v4389_v7, %v15500_v12  ;;  %v4853_v32 = vsel %vm18893_vm13, %v18892_v63, %v4852_v47  ;;  %v4855_v22 = vsel %vm18894_vm11, %v4852_v47, %v4854_v13  ;;  %v4680_v50 = vrot.slane %v4678_v58, 5 }
 0x35b   : > { %4431 = vrot.lane.b32.xlu0 %v15507_v20, %s9650_s14  ;;  %v5308_v43 = vrot.slane %v4853_v32, 3  ;;  %v5314_v36 = vrot.slane %v4855_v22, 3  ;;  %v4683_v4 = vrot.slane %v4681_v29, 6  ;;  %vm18900_vm6 = vsmask.f32 2304  ;;  %v4727_v22 = vpop.permute.xlu0 %4726 }
 0x35c   : > { %v15536_v58 = vrot.slane %v8732_v56, 5  ;;  %vm18901_vm13 = vmmov %vm18900_vm6  ;;  %v4764_v29 = vshll.u32 %v15447_v1, 16  ;;  %vm18902_vm11 = vcmask 1042432   ;;  %v4285_v56 = vshll.u32 %v15531_v0, 16 }
 0x35d   : > { %v5309_v7 = vsel %vm18885_vm0, %v5302_v30, %v5308_v43  ;;  %v5315_v6 = vsel %vm18895_vm3, %v5308_v43, %v5314_v36  ;;  %v4684_v49 = vor.u32 %v4683_v4, %v4680_v50  ;;  %v15521_v13 = vsel %vm18896_vm12, %v5314_v36, %v5320_v39  ;;  %v15556_v50 = vpop.f32.mrf.mxu0  ;;  %v9516_v36 = vld [vmem:[#allocation2 + $0xac] ss:$0 sps:$4 sm:$0x11]   ;;  %vm18903_vm0 = vmmov %vm18898_vm14 }
 0x35e   : > { %9140 = vmatprep.mubr.msk.bf16.mxu0 %vm18897_vm9, %v5309_v7  ;;  %v4689_v30 = vrot.slane %v4687_v35, 5  ;;  %v4453_v39 = vshll.u32 %v8730_v60, 16  ;;  %v15545_v15 = vsel %vm18902_vm11, %v15500_v12, %v15536_v58  ;;  %v15554_v32 = vcombine.low %v15467_v42, %v15467_v42  ;;  %vm18904_vm3 = vmmov %vm18899_vm2 }
 0x35f   : > { %9141 = vmatmul.mubr.msk.bf16.gmra.mxu0 %vm18899_vm2, %v5315_v6  ;;  %v4685_v8 = vsel %vm18900_vm6, %v15324_v33, %v4684_v49  ;;  %4502 = vrot.lane.b32.xlu0 %v4280_v17, %s9652_s27  ;;  %v4283_v43 = vor.u32 %v4281_v40, %v4279_v62  ;;  %v4747_v4 = vrot.slane %v15447_v1, 5  ;;  %v4287_v46 = vrot.slane %v4285_v56, 1  ;;  %v15568_v62 = vld [vmem:[%s17525_s4] ss:$0 sm:$0xff]  ;;  %vm18905_vm12 = vmmov %vm18902_vm11 }
 0x360   : > { %4808 = vrot.lane.b32.xlu1 %v4685_v8, %s9652_s27  ;;  %v15534_v47 = vor.u32 %v4692_v14, %v4689_v30  ;;  %v4455_v63 = vrot.slane %v4453_v39, 1  ;;  %v4763_v7 = vrot.slane %v4761_v48, 5  ;;  %v4766_v6 = vrot.slane %v4764_v29, 6  ;;  %vm18906_vm9 = vmmov %vm18903_vm0 }
 0x361   : > { %v4461_v42 = vshll.u32 %v15554_v32, 16  ;;  %v4696_v30 = vshll.u32 %v9516_v36, 16  ;;  %v4888_v14 = vsel %vm18904_vm3, %v14430_v24, %v4319_v59  ;;  %v4748_v39 = vsel %vm18905_vm12, %v15536_v58, %v4747_v4  ;;  %vm18907_vm14 = vmmov %vm18899_vm2 }
 0x362   : > { %v4694_v33 = vsel %vm18901_vm13, %v4684_v49, %v15534_v47  ;;  %v4456_v35 = vsel %vm18903_vm0, %v4283_v43, %v4455_v63  ;;  %v4457_v49 = vshrl.u32 %v8730_v60, 16  ;;  %v4288_v48 = vsel %vm18906_vm9, %v4283_v43, %v4287_v46 }
 0x363   : > { %4328 = vrot.lane.b32.xlu0 %v4280_v17, %s9651_s24  ;;  %v15563_v17 = vpop.permute.xlu0 %4423  ;;  %v4767_v29 = vor.u32 %v4766_v6, %v4763_v7  ;;  %v5031_v40 = vsel %vm18907_vm14, %v14628_v26, %v4727_v22  ;;  %v15582_v24 = vrot.slane %v4461_v42, 1  ;;  %vm18908_vm2 = vcmask 523264  }
 0x364   : > { %4736 = vrot.lane.b32.xlu1 %v4685_v8, %s9651_s24  ;;  %v5763_v8 = vpop.f32.mrf.mxu0  ;;  %v4459_v60 = vor.u32 %v4457_v49, %v4455_v63  ;;  %v5067_v36 = vsel %vm18908_vm2, %v5031_v40, %v15563_v17  ;;  %vm18909_vm6 = vmmov %vm18908_vm2  ;;  %v4698_v7 = vrot.slane %v4696_v30, 6  ;;  %vm18910_vm13 = vcmask 785408  }
 0x365   : > { %v4932_v63 = vsel %vm18909_vm6, %v4888_v14, %v15405_v53  ;;  %vm18911_vm11 = vmmov %vm18910_vm13  ;;  %vm18912_vm3 = vsmask.f32 2304  ;;  %v4289_v14 = vshrl.u32 %v15531_v0, 16  ;;  %vm18913_vm12 = vcmask 1044480  }
 0x366   : > { %v4801_v59 = vpop.permute.xlu1 %4800  ;;  %v4464_v42 = vsel %vm18903_vm0, %v4459_v60, %v15582_v24  ;;  %v4768_v30 = vsel %vm18912_vm3, %v15534_v47, %v4767_v29  ;;  %vm18914_vm9 = vmmov %vm18913_vm12  ;;  %vm18918_vm6 = vcmask 261120   ;;  %vm18921_vm0 = vcmask 523264  }
 0x367   : > { %4810 = vrot.lane.b32.xlu0 %v4694_v33, %s9652_s27  ;;  %v4495_v43 = vpop.permute.xlu0 %4494  ;;  %v15591_v6 = vsel %vm18910_vm13, %v5067_v36, %v4801_v59  ;;  %vm18917_vm2 = vmmov %vm18912_vm3  ;;  %vm18919_vm13 = vcmask 257024   ;;  %vm18922_vm3 = vcmask 785408  }
 0x368   : > { %4751 = vrot.lane.b32.xlu1 %v15545_v15, %s9650_s14  ;;  %v15594_v26 = vsel %vm18911_vm11, %v4932_v63, %v4495_v43  ;;  %v4291_v43 = vor.u32 %v4289_v14, %v4287_v46  ;;  %v4699_v18 = vsel %vm18917_vm2, %v15534_v47, %v4698_v7  ;;  %vm18920_vm11 = vmmov %vm18918_vm6 }
 0x369   : > { %v5280_v53 = vrot.slane %v15594_v26, 3 }
 0x36a   : > { %v4729_v60 = vpop.permute.xlu1 %4728 }
 0x36b   : > { %4738 = vrot.lane.b32.xlu0 %v4694_v33, %s9651_s24  ;;  %v5570_v33 = vpop.f32.mrf.mxu1  ;;  %v5281_v59 = vsel %vm18914_vm9, %v5274_v57, %v5280_v53  ;;  %v5034_v46 = vsel %vm18918_vm6, %v14897_v5, %v4729_v60  ;;  %v18923_v5 = vld [vmem:[#allocation20_spill] sm:$0xff]  ;;  %vm18925_vm9 = vmmov %vm18917_vm2 }
 0x36c   : > { %4504 = vrot.lane.b32.xlu1 %v4456_v35, %s9652_s27  ;;  %v5571_v56 = vadd.f32 %v15568_v62, %v5570_v33  ;;  %v15588_v35 = vpop.f32.mrf.mxu0  ;;  %v5282_v33 = vrot.slane %v15591_v6, 3  ;;  %v18915_v6 = vld [vmem:[#allocation18_spill] sm:$0xff]  ;;  %vm18926_vm2 = vmmov %vm18921_vm0 }
 0x36d   : > { %v5572_v49 = vpop.f32.mrf.mxu1  ;;  %vm18916_vm14 = vnez %v18915_v6  ;;  %vm18927_vm6 = vmmov %vm18922_vm3 }
 0x36e   : > { %v5764_v22 = vadd.f32 %v5763_v8, %v5571_v56  ;;  %v6202_v8 = vld [vmem:[#allocation3] sm:$0x8]  ;;  %v15605_v56 = vld [vmem:[#allocation3 + $0x4] sm:$0xf]  ;;  %v5283_v36 = vsel %vm18913_vm12, %v5276_v51, %v5282_v33  ;;  %v5766_v63 = vpop.f32.mrf.mxu0  ;;  %v15628_v14 = vpop.permute.xlu1 %4425  ;;  %vm18924_vm12 = vnez %v18923_v5 }
 0x36f   : > { %4753 = vrot.lane.b32.xlu0 %v4748_v39, %s9650_s14  ;;  %v4770_v39 = vshll.u32 %v15449_v27, 16  ;;  %v5573_v40 = vpop.f32.mrf.mxu1  ;;  %v4321_v27 = vpop.permute.xlu0 %4320  ;;  %5664 = vmatprep.mubr.bf16.mxu1 %v5283_v36  ;;  %v15620_v51 = vcombine.low %v6202_v8, %v15605_v56  ;;  %v5068_v7 = vsel %vm18921_vm0, %v5034_v46, %v15628_v14  ;;  %v6204_v36 = vld [vmem:[#allocation3 + $0x8] sm:$0xf] }
 0x370   : > { %4330 = vrot.lane.b32.xlu1 %v4288_v48, %s9651_s24  ;;  %v5922_v48 = vmax.f32 %v5764_v22, 0.0  ;;  %v5574_v0 = vadd.f32 %v15568_v62, %v5573_v40  ;;  %5665 = vmatmul.mubr.bf16.gmra.mxu1 %v5281_v59  ;;  %v4890_v47 = vsel %vm18920_vm11, %v14651_v38, %v4321_v27  ;;  %v4465_v27 = vshrl.u32 %v15554_v32, 16 }
 0x371   : > { %v5575_v49 = vpop.f32.mrf.mxu1  ;;  %v4772_v57 = vrot.slane %v4770_v39, 6  ;;  %vm18929_vm11 = vcmask 257024  }
 0x372   : > { %v5962_v22 = vsel %vm18916_vm14, %v5922_v48, 0.0  ;;  %v5767_v23 = vadd.f32 %v5766_v63, %v5574_v0  ;;  %v6361_v63 = vshll.u32 %v15620_v51, 16 }
 0x373   : > { %4506 = vrot.lane.b32.xlu0 %v4464_v42, %s9652_s27  ;;  %v8951_v42 = vpack.c.bf16 %v5962_v22, %v5962_v22  ;;  %v4803_v48 = vpop.permute.xlu0 %4802  ;;  %v4773_v38 = vsel %vm18925_vm9, %v4767_v29, %v4772_v57  ;;  %v4467_v29 = vor.u32 %v4465_v27, %v15582_v24  ;;  %vm18933_vm9 = vmmov %vm18929_vm11 }
 0x374   : > { %4812 = vrot.lane.b32.xlu1 %v4768_v30, %s9652_s27  ;;  %v5578_v30 = vpop.f32.mrf.mxu1  ;;  %v5923_v40 = vmax.f32 %v5767_v23, 0.0  ;;  %v15637_v59 = vsel %vm18922_vm3, %v5068_v7, %v4803_v48  ;;  %v6363_v48 = vrot.slane %v6361_v63, 1  ;;  %v18934_v63 = vld [vmem:[#allocation30_spill] sm:$0xff] }
 0x375   : > { %6162 = vst.msk [vmem:[#allocation3 + $0xc] sm:$0xf] %vm18919_vm13, %v8951_v42  ;;  %v5579_v8 = vadd.f32 %v15568_v62, %v5578_v30  ;;  %v4497_v42 = vpop.permute.xlu1 %4496  ;;  %vm18928_vm13 = vcmask 1044480  }
 0x376   : > { %v5580_v39 = vpop.f32.mrf.mxu1  ;;  %v5963_v60 = vsel %vm18924_vm12, %v5923_v40, 0.0  ;;  %vm18932_vm3 = vmmov %vm18928_vm13 }
 0x377   : > { %4332 = vrot.lane.b32.xlu0 %v4291_v43, %s9651_s24  ;;  %v5772_v0 = vadd.f32 %v15556_v50, %v5579_v8  ;;  %v17829_v43 = vrot.slane %v15637_v59, 3  ;;  %v8952_v22 = vpack.c.bf16 %v5963_v60, %v5963_v60  ;;  %v4934_v50 = vsel %vm18926_vm2, %v4890_v47, %v15451_v25  ;;  %v15664_v25 = vpop.f32.mrf.mxu0  ;;  %v6244_v8 = vld [vmem:[#allocation3 + $0x8] sm:$0x8]  ;;  %v15674_v47 = vld [vmem:[%s17526_s5 + $0x88] sm:$0xff]  }
 0x378   : > { %4740 = vrot.lane.b32.xlu1 %v4699_v18, %s9651_s24  ;;  %v5581_v49 = vpop.f32.mrf.mxu1  ;;  %v15657_v32 = vsel %vm18927_vm6, %v4934_v50, %v4497_v42  ;;  %9148 = vmatprep.subr.bf16.mxu1 %v15674_v47  ;;  %vm18935_vm2 = vnez %v18934_v63  ;;  %vm18936_vm6 = vmmov %vm18933_vm9 }
 0x379   : > { %v5924_v23 = vmax.f32 %v5772_v0, 0.0  ;;  %v5582_v18 = vadd.f32 %v15568_v62, %v5581_v49  ;;  %v5289_v57 = vsel %vm18928_vm13, %v5282_v33, %v17829_v43  ;;  %6163 = vst.msk [vmem:[#allocation3 + $0x10] sm:$0xf] %vm18929_vm11, %v8952_v22  ;;  %v17828_v30 = vrot.slane %v15657_v32, 3  ;;  %v5779_v0 = vpop.f32.mrf.mxu0 }
 0x37a   : > { %v5583_v1 = vpop.f32.mrf.mxu1  ;;  %5672 = vmatprep.mubr.bf16.mxu1 %v5289_v57  ;;  %vm18937_vm13 = vsmask.f32 7424  ;;  %vm18938_vm11 = vcmask 1042432  }
 0x37b   : > { %4433 = vrot.lane.b32.xlu0 %v15500_v12, %s9650_s14  ;;  %v8838_v12 = vcombine.low %v15605_v56, %v6204_v36  ;;  %v18930_v56 = vld [vmem:[#allocation29_spill] sm:$0xff]  ;;  %v5775_v46 = vadd.f32 %v15588_v35, %v5582_v18  ;;  %v5287_v7 = vsel %vm18932_vm3, %v5280_v53, %v17828_v30  ;;  %v15692_v18 = vpop.f32.mrf.mxu0 }
 0x37c   : > { %4755 = vrot.lane.b32.xlu1 %v4747_v4, %s9650_s14  ;;  %v6359_v4 = vshrl.u32 %v15620_v51, 16  ;;  %vm18931_vm0 = vnez %v18930_v56  ;;  %v6205_v33 = vld [vmem:[#allocation3 + $0xc] sm:$0xf]  ;;  %5673 = vmatmul.mubr.bf16.gmra.mxu1 %v5287_v7  ;;  %v5586_v53 = vpop.f32.mrf.mxu1 }
 0x37d   : > { %v5964_v24 = vsel %vm18931_vm0, %v5924_v23, 0.0  ;;  %v5925_v35 = vmax.f32 %v5775_v46, 0.0  ;;  %v6587_v39 = vrot.slane %v8838_v12, 5  ;;  %v15682_v60 = vcombine.low %v6204_v36, %v6205_v33 }
 0x37e   : > { %v8953_v40 = vpack.c.bf16 %v5964_v24, %v5964_v24  ;;  %v8858_v49 = vcombine.low %v6244_v8, %v6205_v33  ;;  %v5587_v50 = vadd.f32 %v15568_v62, %v5586_v53  ;;  %v5588_v12 = vpop.f32.mrf.mxu1  ;;  %v18939_v53 = vld [vmem:[#allocation22_spill] sm:$0xff] }
 0x37f   : > { %4508 = vrot.lane.b32.xlu0 %v4467_v29, %s9652_s27  ;;  %v5965_v27 = vsel %vm18935_vm2, %v5925_v35, 0.0  ;;  %v6366_v22 = vshll.u32 %v15682_v60, 16  ;;  %vm18940_vm3 = vnez %v18939_v53  ;;  %v6370_v12 = vshrl.u32 %v15682_v60, 16 }
 0x380   : > { %4814 = vrot.lane.b32.xlu1 %v4773_v38, %s9652_s27  ;;  %6164 = vst.msk [vmem:[#allocation3 + $0x14] sm:$0xf] %vm18933_vm9, %v8953_v40  ;;  %v6364_v38 = vor.u32 %v6363_v48, %v6359_v4  ;;  %v8954_v26 = vpack.c.bf16 %v5965_v27, %v5965_v27  ;;  %v6206_v36 = vld [vmem:[#allocation3 + $0x10] sm:$0xf]  ;;  %v6680_v57 = vshll.u32 %v8858_v49, 16  ;;  %v5780_v1 = vadd.f32 %v5779_v0, %v5587_v50  ;;  %v5589_v48 = vpop.f32.mrf.mxu1  ;;  %v5782_v27 = vpop.f32.mrf.mxu0  ;;  %vm18941_vm9 = vmmov %vm18936_vm6 }
 0x381   : > { %v6368_v42 = vrot.slane %v6366_v22, 1  ;;  %v8839_v23 = vcombine.low %v6205_v33, %v6206_v36  ;;  %v5590_v7 = vadd.f32 %v15568_v62, %v5589_v48 }
 0x382   : > { %6165 = vst.msk [vmem:[#allocation3 + $0x18] sm:$0xf] %vm18936_vm6, %v8954_v26  ;;  %v5926_v8 = vmax.f32 %v5780_v1, 0.0  ;;  %v6682_v26 = vrot.slane %v6680_v57, 1 }
 0x383   : > { %v6369_v29 = vsel %vm18937_vm13, %v6364_v38, %v6368_v42  ;;  %v15695_v4 = vrot.slane %v8839_v23, 5  ;;  %v6750_v24 = vshrl.u32 %v8839_v23, 16  ;;  %v6753_v46 = vshll.u32 %v8839_v23, 16  ;;  %v5591_v38 = vpop.f32.mrf.mxu1 }
 0x384   : > { %6626 = vrot.lane.b32.xlu1 %v6587_v39, %s9650_s14  ;;  %v5966_v50 = vsel %vm18940_vm3, %v5926_v8, 0.0  ;;  %v5783_v23 = vadd.f32 %v5782_v27, %v5590_v7  ;;  %v18942_v8 = vld [vmem:[#allocation40_spill] sm:$0xff] }
 0x385   : > { %v6589_v33 = vsel %vm18938_vm11, %v6587_v39, %v15695_v4  ;;  %v6752_v35 = vrot.slane %v6750_v24, 5  ;;  %v6755_v0 = vrot.slane %v6753_v46, 6  ;;  %v6678_v39 = vshrl.u32 %v8858_v49, 16  ;;  %vm18944_vm11 = vmmov %vm18937_vm13 }
 0x386   : > { %6628 = vrot.lane.b32.xlu0 %v6589_v33, %s9650_s14  ;;  %v5927_v30 = vmax.f32 %v5783_v23, 0.0  ;;  %vm18943_vm6 = vnez %v18942_v8  ;;  %v5594_v33 = vpop.f32.mrf.mxu1 }
 0x387   : > { %v6207_v40 = vld [vmem:[#allocation3 + $0x14] sm:$0xf]  ;;  %v6756_v1 = vor.u32 %v6755_v0, %v6752_v35  ;;  %v6683_v46 = vor.u32 %v6682_v26, %v6678_v39 }
 0x388   : > { %6525 = vrot.lane.b32.xlu1 %v6369_v29, %s9651_s24  ;;  %v15702_v22 = vcombine.low %v6206_v36, %v6207_v40  ;;  %v8955_v29 = vpack.c.bf16 %v5966_v50, %v5966_v50  ;;  %v6372_v36 = vor.u32 %v6370_v12, %v6368_v42  ;;  %v5967_v7 = vsel %vm18943_vm6, %v5927_v30, 0.0  ;;  %v9530_v42 = vld [vmem:[%s17526_s5 + $0x38] sm:$0xff]   ;;  %v5596_v26 = vpop.f32.mrf.mxu1  ;;  %v9531_v12 = vld [vmem:[%s17526_s5 + $0x30] sm:$0xff]  }
 0x389   : > { %v6208_v24 = vld [vmem:[#allocation3 + $0x18] sm:$0xf]  ;;  %v8956_v38 = vpack.c.bf16 %v5967_v7, %v5967_v7  ;;  %7767 = vmatpush1.bf16.msra.mxu0 %v9530_v42 }
 0x38a   : > { %v6374_v48 = vshll.u32 %v15702_v22, 16  ;;  %v8840_v43 = vcombine.low %v6207_v40, %v6208_v24  ;;  %6166 = vst.msk [vmem:[#allocation3 + $0x1c] sm:$0xf] %vm18941_vm9, %v8955_v29  ;;  %v5595_v40 = vadd.f32 %v15568_v62, %v5594_v33 }
 0x38b   : > { %6167 = vst.msk [vmem:[#allocation3 + $0x20] sm:$0xf] %vm18941_vm9, %v8956_v38 }
 0x38c   : > { %6933 = vrot.lane.b32.xlu1 %v6756_v1, %s9651_s24  ;;  %v15710_v57 = vrot.slane %v6374_v48, 1  ;;  %v6758_v27 = vshrl.u32 %v8840_v43, 16  ;;  %v6761_v35 = vshll.u32 %v8840_v43, 16  ;;  %v5788_v23 = vadd.f32 %v15664_v25, %v5595_v40  ;;  %v5597_v48 = vpop.f32.mrf.mxu1  ;;  %v9532_v40 = vld [vmem:[%s17526_s5 + $0x28] sm:$0xff]  }
 0x38d   : > { %v6590_v29 = vrot.slane %v8840_v43, 5  ;;  %v5598_v7 = vadd.f32 %v15568_v62, %v5597_v48 }
 0x38e   : > { %v6377_v49 = vsel %vm18937_vm13, %v6372_v36, %v15710_v57  ;;  %v6684_v0 = vsel %vm18944_vm11, %v6683_v46, %v15710_v57  ;;  %v6760_v30 = vrot.slane %v6758_v27, 5  ;;  %v6763_v50 = vrot.slane %v6761_v35, 6  ;;  %v5599_v33 = vpop.f32.mrf.mxu1  ;;  %v18946_v27 = vld [vmem:[#allocation27_spill] sm:$0xff] }
 0x38f   : > { %6527 = vrot.lane.b32.xlu0 %v6377_v49, %s9651_s24  ;;  %v18945_v36 = vmov 0   ;;  %v5928_v46 = vmax.f32 %v5788_v23, 0.0  ;;  %vm18947_vm13 = vnez %v18946_v27  ;;  %v5791_v38 = vadd.f32 %v15692_v18, %v5598_v7  ;;  %v6251_v49 = vld [vmem:[#allocation3 + $0x14] sm:$0xe] }
 0x390   : > { %6701 = vrot.lane.b32.xlu1 %v6684_v0, %s9652_s27  ;;  %v15729_v39 = vor.u32 %v6763_v50, %v6760_v30  ;;  %7768 = vmatprep.subr.bf16.mxu0 %v18945_v36  ;;  %v4323_v0 = vpop.permute.xlu1 %4322  ;;  %v8865_v26 = vcombine.low %v6251_v49, %v6208_v24  ;;  %v4731_v30 = vpop.permute.xlu0 %4730  ;;  %vm18948_vm11 = vcmask 1042432  }
 0x391   : > { %v6209_v25 = vld [vmem:[#allocation3 + $0x1c] sm:$0xf]  ;;  %v5968_v35 = vsel %vm18947_vm13, %v5928_v46, 0.0  ;;  %7769 = vmatpush1.bf16.msra.mxu0 %v9531_v12  ;;  %v5929_v50 = vmax.f32 %v5791_v38, 0.0  ;;  %v15747_v18 = vsel %vm18948_vm11, %v15695_v4, %v6590_v29  ;;  %vm18949_vm13 = vcmask 261120  }
 0x392   : > { %v15739_v43 = vcombine.low %v6208_v24, %v6209_v25  ;;  %v8957_v42 = vpack.c.bf16 %v5968_v35, %v5968_v35  ;;  %7770 = vmatprep.subr.bf16.mxu0 %v18945_v36  ;;  %v6210_v12 = vld [vmem:[#allocation3 + $0x20] sm:$0xf]  ;;  %v4892_v48 = vsel %vm18949_vm13, %v14728_v61, %v4323_v0  ;;  %vm18952_vm11 = vsmask.f32 2304  ;;  %vm18953_vm13 = vmmov %vm18941_vm9 }
 0x393   : > { %6982 = vrot.lane.b32.xlu0 %v6590_v29, %s9650_s14  ;;  %v18950_v24 = vld [vmem:[#allocation39_spill] sm:$0xff]  ;;  %v15757_v7 = vcombine.low %v6209_v25, %v6210_v12  ;;  %v6765_v35 = vsel %vm18952_vm11, %v6756_v1, %v15729_v39  ;;  %v6378_v38 = vshrl.u32 %v15702_v22, 16  ;;  %v7052_v49 = vrot.slane %v8865_v26, 6 }
 0x394   : > { %7007 = vrot.lane.b32.xlu1 %v15729_v39, %s9652_s27  ;;  %v6382_v23 = vshll.u32 %v15739_v43, 16  ;;  %6168 = vst.msk [vmem:[#allocation3 + $0x24] sm:$0xf] %vm18941_vm9, %v8957_v42  ;;  %vm18951_vm6 = vnez %v18950_v24  ;;  %vm18954_vm9 = vcmask 1042432   ;;  %vm18955_vm11 = vcmask 261120  }
 0x395   : > { %v5969_v46 = vsel %vm18951_vm6, %v5929_v50, 0.0  ;;  %7771 = vmatpush1.bf16.msra.mxu0 %v9532_v40  ;;  %v17833_v34 = vrot.slane %v15757_v7, 5  ;;  %v6767_v0 = vshrl.u32 %v15757_v7, 16  ;;  %v6770_v25 = vshll.u32 %v15757_v7, 16 }
 0x396   : > { %v8958_v33 = vpack.c.bf16 %v5969_v46, %v5969_v46  ;;  %7772 = vmatprep.subr.bf16.mxu0 %v18945_v36  ;;  %v6384_v61 = vrot.slane %v6382_v23, 1  ;;  %v17832_v1 = vrot.slane %v15757_v7, 6  ;;  %v6380_v26 = vor.u32 %v6378_v38, %v15710_v57  ;;  %v15777_v23 = vpop.f32.mrf.mxu0  ;;  %v9534_v57 = vld [vmem:[%s17526_s5 + $0x20] sm:$0xff]   ;;  %v5602_v24 = vpop.f32.mrf.mxu1 }
 0x397   : > { %6630 = vrot.lane.b32.xlu0 %v15747_v18, %s9650_s14  ;;  %v15774_v40 = vsel %vm18954_vm9, %v6590_v29, %v17833_v34  ;;  %v6769_v50 = vrot.slane %v6767_v0, 5  ;;  %v6772_v46 = vrot.slane %v6770_v25, 6  ;;  %v5037_v10 = vsel %vm18955_vm11, %v14986_v19, %v4731_v30 }
 0x398   : > { %v15763_v42 = vpop.permute.xlu0 %4427  ;;  %6169 = vst.msk [vmem:[#allocation3 + $0x28] sm:$0xf] %vm18953_vm13, %v8958_v33  ;;  %vm18956_vm13 = vcmask 523264   ;;  %6632 = vrot.lane.b32.xlu1 %v15774_v40, %s9650_s14  ;;  %vm18957_vm6 = vcmask 1041408   ;;  %vm18959_vm11 = vsmask.f32 7424 }
 0x399   : > { %v4936_v33 = vsel %vm18956_vm13, %v4892_v48, %v15563_v17  ;;  %v15788_v29 = vsel %vm18957_vm6, %v7052_v49, %v17832_v1  ;;  %vm18958_vm9 = vmmov %vm18956_vm13  ;;  %v6385_v17 = vsel %vm18959_vm11, %v6380_v26, %v6384_v61  ;;  %v15796_v48 = vor.u32 %v6772_v46, %v6769_v50  ;;  %7773 = vmatpush1.bf16.msra.mxu0 %v9534_v57 }
 0x39a   : > { %v5069_v38 = vsel %vm18958_vm9, %v5037_v10, %v15763_v42  ;;  %v17834_v25 = vrot.slane %v15788_v29, 3  ;;  %vm18960_vm13 = vcmask 785408   ;;  %vm18962_vm9 = vsmask.f32 2304  ;;  %7774 = vmatprep.subr.bf16.mxu0 %v18945_v36 }
 0x39b   : > { %6935 = vrot.lane.b32.xlu0 %v6765_v35, %s9651_s24  ;;  %v7441_v35 = vrot.slane %v7052_v49, 3  ;;  %v6211_v0 = vld [vmem:[#allocation3 + $0x24] sm:$0xf]  ;;  %vm18961_vm6 = vmmov %vm18960_vm13  ;;  %v6774_v50 = vsel %vm18962_vm9, %v15729_v39, %v15796_v48  ;;  %vm18963_vm11 = vcmask 1044480   ;;  %v18964_v39 = vrot.slane %v15637_v59, 3 }
 0x39c   : > { %v4499_v30 = vpop.permute.xlu0 %4498  ;;  %v15806_v34 = vcombine.low %v6210_v12, %v6211_v0  ;;  %6937 = vrot.lane.b32.xlu1 %v6774_v50, %s9651_s24  ;;  %v9535_v12 = vld [vmem:[%s17526_s5 + $0x18] sm:$0xff]   ;;  %v6386_v54 = vshrl.u32 %v15739_v43, 16  ;;  %vm18968_vm9 = vcmask 261120   ;;  %v18971_v8 = vrot.slane %v15757_v7, 5 }
 0x39d   : > { %v4805_v19 = vpop.permute.xlu1 %4804  ;;  %v15803_v49 = vsel %vm18961_vm6, %v4936_v33, %v4499_v30  ;;  %v15816_v46 = vsel %vm18963_vm11, %v7441_v35, %v17834_v25  ;;  %v5795_v33 = vpop.f32.mrf.mxu0  ;;  %v18966_v35 = vrot.slane %v15657_v32, 3  ;;  %vm18967_vm6 = vmmov %vm18963_vm11  ;;  %7775 = vmatpush1.bf16.msra.mxu0 %v9535_v12  ;;  %v9536_v32 = vld [vmem:[%s17526_s5 + $0x10] sm:$0xff]  }
 0x39e   : > { %v15800_v1 = vsel %vm18960_vm13, %v5069_v38, %v4805_v19  ;;  %v17838_v26 = vrot.slane %v15803_v49, 3  ;;  %vm18965_vm13 = vmmov %vm18963_vm11  ;;  %v6390_v3 = vshll.u32 %v15806_v34, 16  ;;  %7776 = vmatprep.subr.bf16.mxu0 %v18945_v36 }
 0x39f   : > { %6703 = vrot.lane.b32.xlu0 %v6385_v17, %s9652_s27  ;;  %v17837_v10 = vrot.slane %v15800_v1, 3  ;;  %v15833_v25 = vld [vmem:[#allocation3 + $0x28] sm:$0xf]  ;;  %vm18969_vm11 = vmmov %vm18968_vm9 }
 0x3a0   : > { %v4325_v38 = vpop.permute.xlu0 %4324  ;;  %v5293_v30 = vsel %vm18967_vm6, %v18966_v35, %v17838_v26  ;;  %v15839_v59 = vcombine.low %v6211_v0, %v15833_v25  ;;  %v15845_v35 = vpop.f32.mrf.mxu0  ;;  %v15857_v27 = vrot.slane %v6390_v3, 1  ;;  %vm18972_vm6 = vcmask 1042432  }
 0x3a1   : > { %v4733_v57 = vpop.permute.xlu1 %4732  ;;  %v5295_v19 = vsel %vm18965_vm13, %v18964_v39, %v17837_v10  ;;  %v5603_v39 = vadd.f32 %v15568_v62, %v5602_v24  ;;  %v6388_v10 = vor.u32 %v6386_v54, %v6384_v61  ;;  %v5604_v26 = vpop.f32.mrf.mxu1  ;;  %v4894_v54 = vsel %vm18969_vm11, %v14958_v31, %v4325_v38  ;;  %7777 = vmatpush1.bf16.msra.mxu0 %v9536_v32 }
 0x3a2   : > { %5680 = vmatprep.mubr.bf16.mxu1 %v5295_v19  ;;  %v5040_v19 = vsel %vm18968_vm9, %v15236_v37, %v4733_v57  ;;  %v6776_v0 = vshrl.u32 %v15839_v59, 16  ;;  %v17840_v37 = vrot.slane %v15839_v59, 6  ;;  %vm18970_vm13 = vcmask 523264   ;;  %7778 = vmatprep.subr.bf16.mxu0 %v18945_v36 }
 0x3a3   : > { %6529 = vrot.lane.b32.xlu0 %v6385_v17, %s9651_s24  ;;  %5681 = vmatmul.mubr.bf16.gmra.mxu1 %v5293_v30  ;;  %v17839_v17 = vrot.slane %v15839_v59, 5  ;;  %v6779_v30 = vshll.u32 %v15839_v59, 16  ;;  %v5796_v12 = vadd.f32 %v5795_v33, %v5603_v39  ;;  %v5605_v57 = vpop.f32.mrf.mxu1  ;;  %vm18973_vm9 = vcmask 785408  }
 0x3a4   : > { %v6778_v38 = vrot.slane %v6776_v0, 5  ;;  %v5606_v39 = vadd.f32 %v15568_v62, %v5605_v57  ;;  %vm18975_vm11 = vcmask 1041408   ;;  %v5798_v0 = vpop.f32.mrf.mxu0 }
 0x3a5   : > { %v15855_v24 = vpop.permute.xlu1 %4429  ;;  %v15868_v31 = vsel %vm18972_vm6, %v18971_v8, %v17839_v17  ;;  %v6781_v53 = vrot.slane %v6779_v30, 6  ;;  %v5930_v33 = vmax.f32 %v5796_v12, 0.0  ;;  %v9537_v8 = vld [vmem:[%s17526_s5 + $0x8] sm:$0xff]   ;;  %vm18977_vm6 = vsmask.f32 7424 }
 0x3a6   : > { %v5070_v26 = vsel %vm18970_vm13, %v5040_v19, %v15855_v24  ;;  %6634 = vrot.lane.b32.xlu1 %v15868_v31, %s9650_s14  ;;  %v5799_v17 = vadd.f32 %v5798_v0, %v5606_v39  ;;  %v18983_v39 = vrot.slane %v15788_v29, 3  ;;  %7779 = vmatpush1.bf16.msra.mxu0 %v9537_v8 }
 0x3a7   : > { %7009 = vrot.lane.b32.xlu0 %v6774_v50, %s9652_s27  ;;  %v18974_v50 = vrot.slane %v15757_v7, 6  ;;  %v15887_v12 = vor.u32 %v6781_v53, %v6778_v38  ;;  %v4938_v7 = vsel %vm18970_vm13, %v4894_v54, %v15628_v14  ;;  %v5970_v32 = vsel %vm12733_vm5, %v5930_v33, 0.0  ;;  %7780 = vmatprep.subr.bf16.mxu0 %v18945_v36 }
 0x3a8   : > { %v18979_v38 = vrot.slane %v15800_v1, 3  ;;  %v5931_v54 = vmax.f32 %v5799_v17, 0.0  ;;  %vm18981_vm13 = vsmask.f32 2304  ;;  %v9538_v1 = vld [vmem:[%s17526_s5] sm:$0xff]  }
 0x3a9   : > { %v15881_v19 = vsel %vm18975_vm11, %v18974_v50, %v17840_v37  ;;  %v6393_v37 = vsel %vm18977_vm6, %v6388_v10, %v15857_v27  ;;  %vm18980_vm11 = vcmask 1044480   ;;  %v6783_v10 = vsel %vm18981_vm13, %v15796_v48, %v15887_v12 }
 0x3aa   : > { %v4807_v61 = vpop.permute.xlu0 %4806  ;;  %v18982_v33 = vrot.slane %v15881_v19, 3  ;;  %vm18984_vm6 = vmmov %vm18980_vm11  ;;  %7011 = vrot.lane.b32.xlu1 %v6783_v10, %s9652_s27  ;;  %v18986_v48 = vrot.slane %v15803_v49, 3  ;;  %v5971_v8 = vsel %vm12816_vm7, %v5931_v54, 0.0  ;;  %7781 = vmatpush1.bf16.msra.mxu0 %v9538_v1  ;;  %vm19056_vm7 = vcmask 785408  }
 0x3ab   : > { %v15871_v3 = vsel %vm18973_vm9, %v5070_v26, %v4807_v61  ;;  %v5607_v61 = vpop.f32.mrf.mxu1  ;;  %v8959_v26 = vpack.c.bf16 %v5970_v32, %v5970_v32  ;;  %6705 = vrot.lane.b32.xlu0 %v6393_v37, %s9652_s27  ;;  %v8960_v32 = vpack.c.bf16 %v5971_v8, %v5971_v8  ;;  %7782 = vmatprep.subr.bf16.mxu0 %v18945_v36  ;;  %v6394_v8 = vshrl.u32 %v15806_v34, 16 }
 0x3ac   : > { %v18978_v53 = vrot.slane %v15871_v3, 3  ;;  %v15915_v0 = vsel %vm18984_vm6, %v18983_v39, %v18982_v33 }
 0x3ad   : > { %v5610_v17 = vpop.f32.mrf.mxu1 }
 0x3ae   : > { %v4501_v57 = vpop.permute.xlu1 %4500  ;;  %v5301_v61 = vsel %vm18980_vm11, %v18979_v38, %v18978_v53  ;;  %vm18987_vm11 = vmmov %vm18984_vm6  ;;  %v9540_v38 = vld [vmem:[%s17526_s5 + $0x78] sm:$0xff]   ;;  %6939 = vrot.lane.b32.xlu1 %v6783_v10, %s9651_s24 }
 0x3af   : > { %v15898_v30 = vsel %vm18973_vm9, %v4938_v7, %v4501_v57  ;;  %5688 = vmatprep.mubr.bf16.mxu1 %v5301_v61  ;;  %vm18985_vm9 = vcmask 257024   ;;  %v5611_v7 = vadd.f32 %v15568_v62, %v5610_v17  ;;  %6531 = vrot.lane.b32.xlu0 %v6393_v37, %s9651_s24  ;;  %v9541_v17 = vld [vmem:[%s17526_s5 + $0x70] sm:$0xff]  }
 0x3b0   : > { %v17841_v14 = vrot.slane %v15898_v30, 3  ;;  %6170 = vst.msk [vmem:[#allocation3 + $0x2c] sm:$0xf] %vm18985_vm9, %v8959_v26  ;;  %v5612_v26 = vpop.f32.mrf.mxu1  ;;  %vm18989_vm13 = vmmov %vm18985_vm9  ;;  %7783 = vmatpush2.bf16.msra.mxu0 %v9540_v38  ;;  %v6396_v38 = vor.u32 %v6394_v8, %v15857_v27  ;;  %v9544_v27 = vld [vmem:[%s17526_s5 + $0x60] sm:$0xff]  }
 0x3b1   : > { %v5804_v53 = vadd.f32 %v15777_v23, %v5611_v7  ;;  %6171 = vst.msk [vmem:[#allocation3 + $0x30] sm:$0xf] %vm18989_vm13, %v8960_v32  ;;  %7784 = vmatprep.subr.bf16.mxu0 %v18945_v36  ;;  %vm18991_vm6 = vmmov %vm18985_vm9  ;;  %vm18996_vm13 = vcmask 1041408  }
 0x3b2   : > { %v5299_v29 = vsel %vm18987_vm11, %v18986_v48, %v17841_v14  ;;  %v5613_v49 = vpop.f32.mrf.mxu1  ;;  %vm18993_vm9 = vmmov %vm18991_vm6  ;;  %vm18994_vm11 = vsmask.f32 7424  ;;  %v4327_v56 = vpop.permute.xlu1 %4326 }
 0x3b3   : > { %5689 = vmatmul.mubr.bf16.gmra.mxu1 %v5299_v29  ;;  %v5932_v61 = vmax.f32 %v5804_v53, 0.0  ;;  %v5614_v54 = vadd.f32 %v15568_v62, %v5613_v49  ;;  %v9542_v53 = vld [vmem:[%s17526_s5 + $0x68] sm:$0xff]  }
 0x3b4   : > { %v5615_v33 = vpop.f32.mrf.mxu1  ;;  %7785 = vmatpush2.bf16.msra.mxu0 %v9541_v17 }
 0x3b5   : > { %v5972_v39 = vsel %vm12699_vm8, %v5932_v61, 0.0  ;;  %v5807_v23 = vadd.f32 %v15845_v35, %v5614_v54  ;;  %7786 = vmatprep.subr.bf16.mxu0 %v18945_v36 }
 0x3b6   : > { %v8961_v48 = vpack.c.bf16 %v5972_v39, %v5972_v39 }
 0x3b7   : > { %v6213_v1 = vld [vmem:[#allocation3 + $0x2c] sm:$0xf]  ;;  %v5933_v29 = vmax.f32 %v5807_v23, 0.0 }
 0x3b8   : > { %v15947_v10 = vcombine.low %v15833_v25, %v6213_v1  ;;  %6172 = vst.msk [vmem:[#allocation3 + $0x34] sm:$0xf] %vm18991_vm6, %v8961_v48  ;;  %v6214_v26 = vld [vmem:[#allocation3 + $0x30] sm:$0xf]  ;;  %7787 = vmatpush2.bf16.msra.mxu0 %v9542_v53  ;;  %v15978_v53 = vpop.f32.mrf.mxu0  ;;  %vm18997_vm6 = vsmask.f32 2304 }
 0x3b9   : > { %v5973_v32 = vsel %vm12749_vm1, %v5933_v29, 0.0  ;;  %v15959_v61 = vcombine.low %v6213_v1, %v6214_v26  ;;  %7788 = vmatprep.subr.bf16.mxu0 %v18945_v36  ;;  %v18995_v29 = vrot.slane %v15839_v59, 6  ;;  %vm19011_vm1 = vcmask 785408  }
 0x3ba   : > { %v6398_v7 = vshll.u32 %v15947_v10, 16  ;;  %v8962_v25 = vpack.c.bf16 %v5973_v32, %v5973_v32 }
 0x3bb   : > { %v6785_v33 = vshrl.u32 %v15959_v61, 16  ;;  %v6788_v39 = vshll.u32 %v15959_v61, 16  ;;  %v7057_v23 = vrot.slane %v15959_v61, 6  ;;  %v17842_v32 = vrot.slane %v15959_v61, 5 }
 0x3bc   : > { %v6400_v49 = vrot.slane %v6398_v7, 1  ;;  %6173 = vst.msk [vmem:[#allocation3 + $0x38] sm:$0xf] %vm18993_vm9, %v8962_v25  ;;  %7789 = vmatpush2.bf16.msra.mxu0 %v9544_v27  ;;  %vm18999_vm9 = vcmask 1044480   ;;  %v19000_v27 = vrot.slane %v15839_v59, 5 }
 0x3bd   : > { %v6787_v1 = vrot.slane %v6785_v33, 5  ;;  %v6790_v17 = vrot.slane %v6788_v39, 6  ;;  %v7058_v8 = vsel %vm18996_vm13, %v18995_v29, %v7057_v23  ;;  %v9545_v33 = vld [vmem:[%s17526_s5 + $0x58] sm:$0xff]   ;;  %7790 = vmatprep.subr.bf16.mxu0 %v18945_v36 }
 0x3be   : > { %v6401_v54 = vsel %vm18994_vm11, %v6396_v38, %v6400_v49  ;;  %v7454_v38 = vrot.slane %v7058_v8, 3  ;;  %vm19001_vm11 = vcmask 1042432   ;;  %v9546_v8 = vld [vmem:[%s17526_s5 + $0x50] sm:$0xff]  }
 0x3bf   : > { %6707 = vrot.lane.b32.xlu1 %v6401_v54, %s9652_s27  ;;  %v6215_v48 = vld [vmem:[#allocation3 + $0x34] sm:$0xf]  ;;  %v6791_v7 = vor.u32 %v6790_v17, %v6787_v1  ;;  %v18998_v1 = vrot.slane %v15881_v19, 3  ;;  %v16001_v17 = vsel %vm19001_vm11, %v19000_v27, %v17842_v32  ;;  %v5811_v19 = vpop.f32.mrf.mxu0  ;;  %v4735_v32 = vpop.permute.xlu0 %4734  ;;  %vm19004_vm11 = vcmask 1044480  }
 0x3c0   : > { %v15976_v25 = vcombine.low %v6214_v26, %v6215_v48  ;;  %7791 = vmatpush2.bf16.msra.mxu0 %v9545_v33 }
 0x3c1   : > { %v6792_v39 = vsel %vm18997_vm6, %v15887_v12, %v6791_v7  ;;  %v15990_v26 = vsel %vm18999_vm9, %v18998_v1, %v7454_v38  ;;  %v6402_v1 = vshrl.u32 %v15947_v10, 16  ;;  %7792 = vmatprep.subr.bf16.mxu0 %v18945_v36  ;;  %v16019_v50 = vpop.f32.mrf.mxu0  ;;  %vm19002_vm6 = vsmask.f32 7424 }
 0x3c2   : > { %v6406_v29 = vshll.u32 %v15976_v25, 16  ;;  %7013 = vrot.lane.b32.xlu0 %v6792_v39, %s9652_s27  ;;  %vm19003_vm9 = vsmask.f32 2304 }
 0x3c3   : > { %6533 = vrot.lane.b32.xlu1 %v6401_v54, %s9651_s24  ;;  %v15994_v54 = vld [vmem:[#allocation3 + $0x38] sm:$0xf]  ;;  %v6404_v35 = vor.u32 %v6402_v1, %v6400_v49 }
 0x3c4   : > { %v16004_v12 = vcombine.low %v6215_v48, %v15994_v54  ;;  %v16012_v14 = vrot.slane %v6406_v29, 1  ;;  %v5618_v33 = vpop.f32.mrf.mxu1  ;;  %7793 = vmatpush2.bf16.msra.mxu0 %v9546_v8 }
 0x3c5   : > { %v5619_v29 = vadd.f32 %v15568_v62, %v5618_v33  ;;  %7794 = vmatprep.subr.bf16.mxu0 %v18945_v36 }
 0x3c6   : > { %v6794_v59 = vshrl.u32 %v16004_v12, 16  ;;  %v6797_v27 = vshll.u32 %v16004_v12, 16  ;;  %6941 = vrot.lane.b32.xlu0 %v6792_v39, %s9651_s24  ;;  %v17843_v48 = vrot.slane %v16004_v12, 6  ;;  %v9547_v39 = vld [vmem:[%s17526_s5 + $0x48] sm:$0xff]   ;;  %v5620_v5 = vpop.f32.mrf.mxu1  ;;  %v6409_v49 = vsel %vm19002_vm6, %v6404_v35, %v16012_v14 }
 0x3c7   : > { %6636 = vrot.lane.b32.xlu1 %v16001_v17, %s9650_s14 }
 0x3c8   : > { %v6796_v37 = vrot.slane %v6794_v59, 5  ;;  %v6799_v57 = vrot.slane %v6797_v27, 6  ;;  %v16025_v63 = vsel %vm18996_vm13, %v7057_v23, %v17843_v48  ;;  %v5812_v27 = vadd.f32 %v5811_v19, %v5619_v29  ;;  %v5621_v8 = vpop.f32.mrf.mxu1  ;;  %7795 = vmatpush2.bf16.msra.mxu0 %v9547_v39  ;;  %v9548_v19 = vld [vmem:[%s17526_s5 + $0x40] sm:$0xff]   ;;  %v5814_v29 = vpop.f32.mrf.mxu0 }
 0x3c9   : > { %v17844_v59 = vrot.slane %v16025_v63, 3  ;;  %vm19005_vm13 = vcmask 261120   ;;  %v5622_v35 = vadd.f32 %v15568_v62, %v5621_v8  ;;  %7796 = vmatprep.subr.bf16.mxu0 %v18945_v36 }
 0x3ca   : > { %v16032_v1 = vor.u32 %v6799_v57, %v6796_v37  ;;  %6709 = vrot.lane.b32.xlu0 %v6409_v49, %s9652_s27  ;;  %v4896_v57 = vsel %vm19005_vm13, %v15099_v52, %v4327_v56  ;;  %v5934_v37 = vmax.f32 %v5812_v27, 0.0 }
 0x3cb   : > { %v16044_v5 = vsel %vm19004_vm11, %v7454_v38, %v17844_v59  ;;  %v19006_v38 = vld [vmem:[#allocation34_spill] sm:$0xff]  ;;  %v5815_v52 = vadd.f32 %v5814_v29, %v5622_v35  ;;  %vm19009_vm11 = vcmask 523264  }
 0x3cc   : > { %v6801_v33 = vsel %vm19003_vm9, %v6791_v7, %v16032_v1  ;;  %v5623_v7 = vpop.f32.mrf.mxu1  ;;  %vm19007_vm6 = vnez %v19006_v38  ;;  %vm19008_vm9 = vmmov %vm19005_vm13  ;;  %v4940_v39 = vsel %vm19009_vm11, %v4896_v57, %v15763_v42  ;;  %7797 = vmatpush2.bf16.msra.mxu0 %v9548_v19  ;;  %v19019_v19 = vrot.slane %v15898_v30, 3 }
 0x3cd   : > { %v16037_v23 = vpop.permute.xlu0 %4431  ;;  %7015 = vrot.lane.b32.xlu1 %v6801_v33, %s9652_s27  ;;  %v5974_v59 = vsel %vm19007_vm6, %v5934_v37, 0.0  ;;  %v5043_v56 = vsel %vm19008_vm9, %v15336_v41, %v4735_v32  ;;  %vm19010_vm13 = vmmov %vm19009_vm11  ;;  %v5935_v37 = vmax.f32 %v5815_v52, 0.0  ;;  %vm19013_vm11 = vcmask 257024   ;;  %v19017_v52 = vld [vmem:[#allocation47_spill] sm:$0xff] }
 0x3ce   : > { %6535 = vrot.lane.b32.xlu0 %v6409_v49, %s9651_s24  ;;  %v8963_v8 = vpack.c.bf16 %v5974_v59, %v5974_v59  ;;  %v5626_v6 = vpop.f32.mrf.mxu1  ;;  %v5071_v7 = vsel %vm19010_vm13, %v5043_v56, %v16037_v23  ;;  %vm19012_vm9 = vmmov %vm19011_vm1  ;;  %v19014_v49 = vrot.slane %v16004_v12, 5  ;;  %v19015_v59 = vrot.slane %v15959_v61, 5 }
 0x3cf   : > { %v5627_v35 = vadd.f32 %v15568_v62, %v5626_v6  ;;  %vm19016_vm13 = vcmask 1042432   ;;  %vm19028_vm6 = vcmask 523264  }
 0x3d0   : > { %6174 = vst.msk [vmem:[#allocation3 + $0x3c] sm:$0xf] %vm19013_vm11, %v8963_v8  ;;  %v5628_v32 = vpop.f32.mrf.mxu1  ;;  %v16077_v57 = vsel %vm19016_vm13, %v19015_v59, %v19014_v49  ;;  %v19021_v8 = vrot.slane %v15871_v3, 3  ;;  %vm19023_vm13 = vcmask 257024  }
 0x3d1   : > { %v4503_v27 = vpop.permute.xlu0 %4502  ;;  %6943 = vrot.lane.b32.xlu1 %v6801_v33, %s9651_s24  ;;  %v5820_v33 = vadd.f32 %v15978_v53, %v5627_v35  ;;  %v19024_v35 = vld [vmem:[#allocation33_spill] sm:$0xff] }
 0x3d2   : > { %v4809_v48 = vpop.permute.xlu1 %4808  ;;  %v16065_v36 = vsel %vm19011_vm1, %v4940_v39, %v4503_v27  ;;  %vm19018_vm1 = vnez %v19017_v52  ;;  %6638 = vrot.lane.b32.xlu0 %v16077_v57, %s9650_s14  ;;  %v5629_v27 = vpop.f32.mrf.mxu1 }
 0x3d3   : > { %v5113_v41 = vsel %vm19012_vm9, %v5071_v7, %v4809_v48  ;;  %v5304_v42 = vrot.slane %v16065_v36, 3  ;;  %v5975_v6 = vsel %vm19018_vm1, %v5935_v37, 0.0  ;;  %vm19020_vm9 = vcmask 1044480  }
 0x3d4   : > { %v5306_v29 = vrot.slane %v5113_v41, 3  ;;  %v8964_v39 = vpack.c.bf16 %v5975_v6, %v5975_v6  ;;  %vm19022_vm11 = vmmov %vm19020_vm9  ;;  %v5936_v36 = vmax.f32 %v5820_v33, 0.0  ;;  %v5630_v37 = vadd.f32 %v15568_v62, %v5629_v27  ;;  %v5631_v53 = vpop.f32.mrf.mxu1 }
 0x3d5   : > { %v4329_v48 = vpop.permute.xlu0 %4328  ;;  %v5305_v56 = vsel %vm19020_vm9, %v19019_v19, %v5304_v42  ;;  %vm19025_vm1 = vnez %v19024_v35  ;;  %vm19026_vm9 = vcmask 261120  }
 0x3d6   : > { %v4737_v61 = vpop.permute.xlu1 %4736  ;;  %v5307_v7 = vsel %vm19022_vm11, %v19021_v8, %v5306_v29  ;;  %6175 = vst.msk [vmem:[#allocation3 + $0x40] sm:$0xf] %vm19023_vm13, %v8964_v39  ;;  %v5976_v30 = vsel %vm19025_vm1, %v5936_v36, 0.0  ;;  %v5823_v41 = vadd.f32 %v16019_v50, %v5630_v37  ;;  %vm19027_vm11 = vmmov %vm19026_vm9  ;;  %vm19029_vm1 = vcmask 785408   ;;  %v19030_v39 = vld [vmem:[#allocation26_spill] sm:$0xff] }
 0x3d7   : > { %5696 = vmatprep.mubr.bf16.mxu1 %v5307_v7  ;;  %v8965_v49 = vpack.c.bf16 %v5976_v30, %v5976_v30  ;;  %v5046_v3 = vsel %vm19026_vm9, %v15507_v20, %v4737_v61  ;;  %v6217_v33 = vld [vmem:[#allocation3 + $0x3c] sm:$0xf]  ;;  %v4898_v62 = vsel %vm19027_vm11, %v15270_v55, %v4329_v48  ;;  %vm19031_vm8 = vnez %v19030_v39  ;;  %vm19032_vm9 = vmmov %vm19029_vm1 }
 0x3d8   : > { %5697 = vmatmul.mubr.bf16.gmra.mxu1 %v5305_v56  ;;  %v5937_v6 = vmax.f32 %v5823_v41, 0.0  ;;  %v16102_v56 = vcombine.low %v15994_v54, %v6217_v33  ;;  %v6410_v20 = vshrl.u32 %v15976_v25, 16  ;;  %v4942_v48 = vsel %vm19028_vm6, %v4898_v62, %v15855_v24  ;;  %vm19034_vm11 = vmmov %vm19023_vm13 }
 0x3d9   : > { %v4811_v32 = vpop.permute.xlu0 %4810  ;;  %6176 = vst.msk [vmem:[#allocation3 + $0x44] sm:$0xf] %vm19023_vm13, %v8965_v49  ;;  %vm19035_vm13 = vsmask.f32 7424 }
 0x3da   : > { %v4752_v59 = vpop.permute.xlu1 %4751  ;;  %v5977_v27 = vsel %vm19031_vm8, %v5937_v6, 0.0  ;;  %v6414_v36 = vshll.u32 %v16102_v56, 16  ;;  %v6412_v54 = vor.u32 %v6410_v20, %v16012_v14 }
 0x3db   : > { %v5073_v19 = vsel %vm19028_vm6, %v5046_v3, %v4752_v59  ;;  %v8966_v7 = vpack.c.bf16 %v5977_v27, %v5977_v27 }
 0x3dc   : > { %v5115_v50 = vsel %vm19029_vm1, %v5073_v19, %v4811_v32  ;;  %vm19033_vm1 = vcmask 1044480   ;;  %v6416_v41 = vrot.slane %v6414_v36, 1 }
 0x3dd   : > { %v5312_v61 = vrot.slane %v5115_v50, 3  ;;  %v4739_v8 = vpop.permute.xlu0 %4738  ;;  %v6218_v37 = vld [vmem:[#allocation3 + $0x40] sm:$0xf]  ;;  %6177 = vst.msk [vmem:[#allocation3 + $0x48] sm:$0xf] %vm19034_vm11, %v8966_v7  ;;  %vm19036_vm6 = vmmov %vm19033_vm1  ;;  %v19038_v50 = vrot.slane %v16004_v12, 6 }
 0x3de   : > { %v4505_v55 = vpop.permute.xlu1 %4504  ;;  %v16115_v32 = vcombine.low %v6217_v33, %v6218_v37  ;;  %v6417_v59 = vsel %vm19035_vm13, %v6412_v54, %v6416_v41  ;;  %vm19041_vm13 = vcmask 523264  }
 0x3df   : > { %v4985_v53 = vsel %vm19032_vm9, %v4942_v48, %v4505_v55  ;;  %v5313_v30 = vsel %vm19033_vm1, %v5306_v29, %v5312_v61  ;;  %6711 = vrot.lane.b32.xlu1 %v6417_v59, %s9652_s27  ;;  %vm19037_vm9 = vcmask 261120   ;;  %vm19039_vm1 = vcmask 1041408  }
 0x3e0   : > { %v5310_v49 = vrot.slane %v4985_v53, 3  ;;  %5704 = vmatprep.mubr.bf16.mxu1 %v5313_v30  ;;  %v17850_v6 = vrot.slane %v16115_v32, 6  ;;  %v6803_v24 = vshrl.u32 %v16115_v32, 16  ;;  %v6806_v14 = vshll.u32 %v16115_v32, 16  ;;  %v6219_v29 = vld [vmem:[#allocation3 + $0x44] sm:$0xf]  ;;  %vm19040_vm11 = vmmov %vm19037_vm9 }
 0x3e1   : > { %v4754_v3 = vpop.permute.xlu0 %4753  ;;  %v16133_v55 = vcombine.low %v6218_v37, %v6219_v29  ;;  %v6600_v53 = vrot.slane %v16115_v32, 5  ;;  %v19044_v37 = vrot.slane %v16025_v63, 3 }
 0x3e2   : > { %v4331_v62 = vpop.permute.xlu1 %4330  ;;  %v5311_v19 = vsel %vm19036_vm6, %v5304_v42, %v5310_v49  ;;  %v16130_v27 = vsel %vm19039_vm1, %v19038_v50, %v17850_v6  ;;  %v6805_v20 = vrot.slane %v6803_v24, 5  ;;  %v6808_v7 = vrot.slane %v6806_v14, 6  ;;  %vm19042_vm6 = vmmov %vm19041_vm13 }
 0x3e3   : > { %v4900_v33 = vsel %vm19037_vm9, %v15486_v16, %v4331_v62  ;;  %5705 = vmatmul.mubr.bf16.gmra.mxu1 %v5311_v19  ;;  %v17847_v36 = vrot.slane %v16130_v27, 3  ;;  %v5049_v42 = vsel %vm19040_vm11, %v15545_v15, %v4739_v8  ;;  %vm19043_vm9 = vcmask 785408   ;;  %6537 = vrot.lane.b32.xlu1 %v6417_v59, %s9651_s24 }
 0x3e4   : > { %v4944_v16 = vsel %vm19041_vm13, %v4900_v33, %v16037_v23  ;;  %v6809_v54 = vor.u32 %v6808_v7, %v6805_v20  ;;  %v5075_v30 = vsel %vm19042_vm6, %v5049_v42, %v4754_v3  ;;  %vm19045_vm1 = vcmask 1044480   ;;  %v16150_v8 = vld [vmem:[#allocation3 + $0x48] sm:$0xf]  ;;  %vm19046_vm11 = vmmov %vm19043_vm9 }
 0x3e5   : > { %v4507_v48 = vpop.permute.xlu0 %4506  ;;  %v16148_v15 = vsel %vm19045_vm1, %v19044_v37, %v17847_v36  ;;  %v6422_v23 = vshll.u32 %v16133_v55, 16  ;;  %vm19047_vm13 = vsmask.f32 2304  ;;  %v16157_v33 = vcombine.low %v6219_v29, %v16150_v8  ;;  %vm19048_vm6 = vmmov %vm19045_vm1 }
 0x3e6   : > { %v4813_v62 = vpop.permute.xlu1 %4812  ;;  %v4987_v24 = vsel %vm19043_vm9, %v4944_v16, %v4507_v48  ;;  %v6810_v3 = vsel %vm19047_vm13, %v16032_v1, %v6809_v54  ;;  %v19049_v20 = vrot.slane %v16004_v12, 5  ;;  %vm19050_vm9 = vcmask 1042432  }
 0x3e7   : > { %v5117_v14 = vsel %vm19046_vm11, %v5075_v30, %v4813_v62  ;;  %v5316_v19 = vrot.slane %v4987_v24, 3  ;;  %7017 = vrot.lane.b32.xlu0 %v6810_v3, %s9652_s27  ;;  %v6812_v42 = vshrl.u32 %v16157_v33, 16  ;;  %v6815_v1 = vshll.u32 %v16157_v33, 16 }
 0x3e8   : > { %v5318_v59 = vrot.slane %v5117_v14, 3  ;;  %v16166_v7 = vsel %vm19050_vm9, %v19049_v20, %v6600_v53  ;;  %v16174_v48 = vrot.slane %v6422_v23, 1  ;;  %v9524_v14 = vld [vmem:[#allocation2 + $0xa0] ss:$0 sps:$4 sm:$0x77]  }
 0x3e9   : > { %v4333_v63 = vpop.permute.xlu0 %4332  ;;  %v5317_v50 = vsel %vm19048_vm6, %v5310_v49, %v5316_v19  ;;  %6640 = vrot.lane.b32.xlu1 %v16166_v7, %s9650_s14  ;;  %v6418_v49 = vshrl.u32 %v16102_v56, 16  ;;  %v6814_v30 = vrot.slane %v6812_v42, 5  ;;  %v6817_v12 = vrot.slane %v6815_v1, 6 }
 0x3ea   : > { %v4741_v16 = vpop.permute.xlu1 %4740  ;;  %v5319_v29 = vsel %vm19045_vm1, %v5312_v61, %v5318_v59  ;;  %v9126_v61 = vpop.f32.mrf.mxu0  ;;  %vm19051_vm11 = vsmask.f32 7424  ;;  %vm19052_vm6 = vcmask 261120   ;;  %vm19054_vm1 = vcmask 523264  }
 0x3eb   : > { %5712 = vmatprep.mubr.bf16.mxu1 %v5319_v29  ;;  %6945 = vrot.lane.b32.xlu0 %v6810_v3, %s9651_s24  ;;  %v6420_v24 = vor.u32 %v6418_v49, %v6416_v41  ;;  %v16177_v37 = vor.u32 %v6817_v12, %v6814_v30  ;;  %v4903_v23 = vsel %vm19052_vm6, %v9524_v14, %v4333_v63  ;;  %vm19053_vm9 = vmmov %vm19052_vm6  ;;  %v17849_v63 = vrot.slane %v16157_v33, 5  ;;  %v16200_v14 = vld [vmem:[%s17525_s4] ss:$0 sm:$0xff] }
 0x3ec   : > { %5713 = vmatmul.mubr.bf16.gmra.mxu1 %v5317_v50  ;;  %v5052_v41 = vsel %vm19053_vm9, %v15536_v58, %v4741_v16  ;;  %vm19055_vm8 = vmmov %vm19054_vm1  ;;  %v5827_v30 = vpop.f32.mrf.mxu0 }
 0x3ed   : > { %v4434_v62 = vpop.permute.xlu0 %4433  ;;  %v6425_v36 = vsel %vm19051_vm11, %v6420_v24, %v16174_v48  ;;  %v6819_v29 = vsel %vm19047_vm13, %v6809_v54, %v16177_v37  ;;  %vm19057_vm11 = vmmov %vm19056_vm7  ;;  %vm19058_vm13 = vcmask 1044480  }
 0x3ee   : > { %v4756_v20 = vpop.permute.xlu1 %4755  ;;  %7019 = vrot.lane.b32.xlu1 %v6819_v29, %s9652_s27  ;;  %v4946_v3 = vsel %vm19054_vm1, %v4903_v23, %v4434_v62  ;;  %vm19059_vm6 = vmmov %vm19058_vm13  ;;  %vm19064_vm1 = vcmask 257024  }
 0x3ef   : > { %6713 = vrot.lane.b32.xlu0 %v6425_v36, %s9652_s27  ;;  %v5077_v42 = vsel %vm19055_vm8, %v5052_v41, %v4756_v20  ;;  %v9127_v41 = vpop.f32.mrf.mxu0  ;;  %vm19060_vm8 = vcmask 1042432  }
 0x3f1   : > { %v4509_v50 = vpop.permute.xlu0 %4508 }
 0x3f2   : > { %v4815_v1 = vpop.permute.xlu1 %4814  ;;  %v4989_v49 = vsel %vm19056_vm7, %v4946_v3, %v4509_v50  ;;  %6947 = vrot.lane.b32.xlu1 %v6819_v29, %s9651_s24  ;;  %vm19061_vm7 = vmmov %vm19053_vm9 }
 0x3f3   : > { %v5119_v54 = vsel %vm19057_vm11, %v5077_v42, %v4815_v1  ;;  %v5322_v12 = vrot.slane %v4989_v49, 3  ;;  %6539 = vrot.lane.b32.xlu0 %v6425_v36, %s9651_s24  ;;  %v16210_v36 = vsel %vm19060_vm8, %v6600_v53, %v17849_v63  ;;  %v5830_v42 = vpop.f32.mrf.mxu0  ;;  %v19062_v49 = vld [vmem:[#allocation14_spill] sm:$0xff]  ;;  %vm19065_vm11 = vmmov %vm19061_vm7 }
 0x3f4   : > { %v5324_v24 = vrot.slane %v5119_v54, 3  ;;  %vm19063_vm9 = vnez %v19062_v49  ;;  %vm19069_vm8 = vmmov %vm19064_vm1 }
 0x3f5   : > { %v5323_v58 = vsel %vm19058_vm13, %v5316_v19, %v5322_v12 }
 0x3f6   : > { %v5325_v62 = vsel %vm19059_vm6, %v5318_v59, %v5324_v24  ;;  %v16203_v23 = vpop.permute.xlu1 %6626  ;;  %vm19068_vm6 = vmmov %vm19061_vm7 }
 0x3f7   : > { %v5634_v16 = vpop.f32.mrf.mxu1  ;;  %5720 = vmatprep.mubr.bf16.mxu1 %v5325_v62  ;;  %6642 = vrot.lane.b32.xlu0 %v16210_v36, %s9650_s14 }
 0x3f8   : > { %v5635_v20 = vadd.f32 %v16200_v14, %v5634_v16  ;;  %5721 = vmatmul.mubr.bf16.gmra.mxu1 %v5323_v58  ;;  %v9528_v58 = vld [vmem:[%s17526_s5 + $0x80] sm:$0xff]  }
 0x3f9   : > { %v5636_v3 = vpop.f32.mrf.mxu1  ;;  %9144 = vmatprep.mubr.msk.bf16.mxu1 %vm19061_vm7, %v15521_v13 }
 0x3fa   : > { %v5828_v19 = vadd.f32 %v5827_v30, %v5635_v20  ;;  %v16219_v53 = vpop.permute.xlu1 %6525  ;;  %v16226_v20 = vpop.permute.xlu0 %6628  ;;  %v19066_v3 = vld [vmem:[#allocation55_spill] sm:$0xff] }
 0x3fb   : > { %v5637_v59 = vpop.f32.mrf.mxu1  ;;  %vm19067_vm13 = vnez %v19066_v3 }
 0x3fc   : > { %v5938_v29 = vmax.f32 %v5828_v19, 0.0  ;;  %v5638_v50 = vadd.f32 %v16200_v14, %v5637_v59 }
 0x3fd   : > { %v5639_v1 = vpop.f32.mrf.mxu1 }
 0x3fe   : > { %v5978_v54 = vsel %vm19063_vm9, %v5938_v29, 0.0  ;;  %v5831_v12 = vadd.f32 %v5830_v42, %v5638_v50  ;;  %v16232_v29 = vpop.f32.mrf.mxu0 }
 0x3ff   : > { %v8967_v24 = vpack.c.bf16 %v5978_v54, %v5978_v54 }
 0x400   : > { %v5642_v30 = vpop.f32.mrf.mxu1  ;;  %v5939_v16 = vmax.f32 %v5831_v12, 0.0  ;;  %9145 = vmatmul.mubr.msk.bf16.vlgmr.msra.gmra.mxu1 %vm19065_vm11, %v15497_v44  ;;  %v6934_v12 = vpop.permute.xlu1 %6933  ;;  %vm19072_vm11 = vmmov %vm19068_vm6 }
 0x401   : > { %v5643_v13 = vadd.f32 %v16200_v14, %v5642_v30  ;;  %6178 = vst.msk [vmem:[#allocation3 + $0x4c] sm:$0xf] %vm19064_vm1, %v8967_v24  ;;  %9149 = vmatpush3.bf16.msra.mxu1 %v15674_v47  ;;  %9152 = vmatprep.mubr.msk.bf16.mxu1 %vm19068_vm6, %v15816_v46  ;;  %v16239_v24 = vpop.permute.xlu0 %6527  ;;  %v5843_v47 = vpop.f32.mrf.mxu0 }
 0x402   : > { %v5644_v62 = vpop.f32.mrf.mxu1  ;;  %v5979_v19 = vsel %vm19067_vm13, %v5939_v16, 0.0  ;;  %9150 = vmatprep.subr.bf16.mxu1 %v9528_v58 }
 0x403   : > { %v5836_v59 = vadd.f32 %v9126_v61, %v5643_v13  ;;  %v8968_v50 = vpack.c.bf16 %v5979_v19, %v5979_v19  ;;  %v19070_v61 = vld [vmem:[#allocation17_spill] sm:$0xff] }
 0x404   : > { %v5645_v42 = vpop.f32.mrf.mxu1  ;;  %vm19071_vm7 = vnez %v19070_v61 }
 0x405   : > { %v5940_v1 = vmax.f32 %v5836_v59, 0.0  ;;  %v5646_v54 = vadd.f32 %v16200_v14, %v5645_v42  ;;  %6179 = vst.msk [vmem:[#allocation3 + $0x50] sm:$0xf] %vm19069_vm8, %v8968_v50  ;;  %9151 = vmatpush3.bf16.msra.mxu1 %v9528_v58  ;;  %v6983_v42 = vpop.permute.xlu0 %6982  ;;  %vm19075_vm8 = vmmov %vm19072_vm11 }
 0x406   : > { %v5647_v44 = vpop.f32.mrf.mxu1 }
 0x407   : > { %v5980_v30 = vsel %vm19071_vm7, %v5940_v1, 0.0  ;;  %v5839_v16 = vadd.f32 %v9127_v41, %v5646_v54  ;;  %v7063_v1 = vrot.slane %v16157_v33, 6  ;;  %v19073_v41 = vld [vmem:[#allocation53_spill] sm:$0xff]  ;;  %v6426_v54 = vshrl.u32 %v16133_v55, 16  ;;  %v6702_v44 = vpop.permute.xlu1 %6701 }
 0x408   : > { %v8969_v13 = vpack.c.bf16 %v5980_v30, %v5980_v30  ;;  %v6221_v62 = vld [vmem:[#allocation3 + $0x4c] sm:$0xf]  ;;  %v5650_v19 = vpop.f32.mrf.mxu1  ;;  %9153 = vmatmul.mubr.msk.bf16.vlgmr.msra.gmra.mxu1 %vm19072_vm11, %v15915_v0  ;;  %vm19074_vm6 = vnez %v19073_v41  ;;  %vm19077_vm11 = vcmask 1041408   ;;  %vm19084_vm7 = vcmask 523264  }
 0x409   : > { %v5941_v46 = vmax.f32 %v5839_v16, 0.0  ;;  %v16245_v59 = vcombine.low %v16150_v8, %v6221_v62  ;;  %v5651_v50 = vadd.f32 %v16200_v14, %v5650_v19  ;;  %v16254_v16 = vpop.f32.mrf.mxu0  ;;  %9156 = vmatprep.mubr.msk.bf16.mxu1 %vm19075_vm8, %v15990_v26  ;;  %v6428_v0 = vor.u32 %v6426_v54, %v16174_v48  ;;  %v16266_v3 = vpop.permute.xlu0 %6630 }
 0x40a   : > { %6180 = vst.msk [vmem:[#allocation3 + $0x54] sm:$0xf] %vm19064_vm1, %v8969_v13  ;;  %v5652_v30 = vpop.f32.mrf.mxu1  ;;  %v19076_v26 = vrot.slane %v16115_v32, 6  ;;  %vm19078_vm8 = vsmask.f32 7424 }
 0x40b   : > { %v5981_v58 = vsel %vm19074_vm6, %v5941_v46, 0.0  ;;  %v6430_v13 = vshll.u32 %v16245_v59, 16  ;;  %v5844_v19 = vadd.f32 %v5843_v47, %v5651_v50  ;;  %v5846_v50 = vpop.f32.mrf.mxu0  ;;  %vm19080_vm6 = vnez %v18522_v9 }
 0x40c   : > { %v8970_v8 = vpack.c.bf16 %v5981_v58, %v5981_v58  ;;  %v6222_v63 = vld [vmem:[#allocation3 + $0x50] sm:$0xf]  ;;  %v5653_v6 = vpop.f32.mrf.mxu1  ;;  %v7064_v58 = vsel %vm19077_vm11, %v19076_v26, %v7063_v1 }
 0x40d   : > { %v16261_v46 = vrot.slane %v6430_v13, 1  ;;  %v16263_v41 = vcombine.low %v6221_v62, %v6222_v63  ;;  %v5942_v30 = vmax.f32 %v5844_v19, 0.0  ;;  %v5654_v61 = vadd.f32 %v16200_v14, %v5653_v6  ;;  %v7008_v13 = vpop.permute.xlu1 %7007  ;;  %v6936_v35 = vpop.permute.xlu0 %6935 }
 0x40e   : > { %6181 = vst.msk [vmem:[#allocation3 + $0x58] sm:$0xf] %vm19064_vm1, %v8970_v8  ;;  %v5655_v47 = vpop.f32.mrf.mxu1  ;;  %vm19079_vm1 = vcmask 261120   ;;  %v7472_v52 = vrot.slane %v7064_v58, 3 }
 0x40f   : > { %v6433_v48 = vsel %vm19078_vm8, %v6428_v0, %v16261_v46  ;;  %v7065_v54 = vrot.slane %v16263_v41, 6  ;;  %v6821_v8 = vshrl.u32 %v16263_v41, 16  ;;  %v6824_v62 = vshll.u32 %v16263_v41, 16  ;;  %vm19081_vm8 = vmmov %vm19079_vm1 }
 0x410   : > { %v7094_v6 = vsel %vm19079_vm1, %v15620_v51, %v16219_v53  ;;  %6715 = vrot.lane.b32.xlu1 %v6433_v48, %s9652_s27  ;;  %v5982_v32 = vsel %vm19080_vm6, %v5942_v30, 0.0  ;;  %v5847_v19 = vadd.f32 %v5846_v50, %v5654_v61  ;;  %9157 = vmatmul.mubr.msk.bf16.gmra.mxu1 %vm19081_vm8, %v16044_v5  ;;  %v7222_v51 = vsel %vm19079_vm1, %v15695_v4, %v6934_v12  ;;  %vm19082_vm6 = vmmov %vm19079_vm1 }
 0x411   : > { %v6223_v26 = vld [vmem:[#allocation3 + $0x54] sm:$0xf]  ;;  %v16283_v0 = vsel %vm19077_vm11, %v7063_v1, %v7065_v54  ;;  %v6823_v47 = vrot.slane %v6821_v8, 5  ;;  %v6826_v49 = vrot.slane %v6824_v62, 6  ;;  %v8971_v39 = vpack.c.bf16 %v5982_v32, %v5982_v32  ;;  %9160 = vmatprep.mubr.msk.bf16.mxu1 %vm19082_vm6, %v16148_v15  ;;  %vm19085_vm8 = vmmov %vm19079_vm1 }
 0x412   : > { %v5943_v53 = vmax.f32 %v5847_v19, 0.0  ;;  %v16289_v9 = vcombine.low %v6222_v63, %v6223_v26  ;;  %vm19083_vm11 = vcmask 257024   ;;  %v6604_v1 = vrot.slane %v16263_v41, 5  ;;  %vm19086_vm1 = vmmov %vm19084_vm7  ;;  %v5658_v32 = vpop.f32.mrf.mxu1 }
 0x413   : > { %v6827_v61 = vor.u32 %v6826_v49, %v6823_v47  ;;  %6182 = vst.msk [vmem:[#allocation3 + $0x5c] sm:$0xf] %vm19083_vm11, %v8971_v39  ;;  %v7284_v30 = vsel %vm19084_vm7, %v7222_v51, %v6983_v42  ;;  %v7096_v5 = vsel %vm19085_vm8, %v15682_v60, %v16239_v24  ;;  %v7137_v4 = vsel %vm19086_vm1, %v7094_v6, %v16203_v23  ;;  %v16305_v39 = vpop.permute.xlu1 %6632  ;;  %v6704_v60 = vpop.permute.xlu0 %6703 }
 0x414   : > { %6541 = vrot.lane.b32.xlu1 %v6433_v48, %s9651_s24  ;;  %v7478_v63 = vrot.slane %v16283_v0, 3  ;;  %vm19087_vm6 = vnez %v18538_v28  ;;  %vm19088_vm11 = vsmask.f32 2304  ;;  %v6438_v58 = vshll.u32 %v16289_v9, 16 }
 0x415   : > { %v5983_v15 = vsel %vm19087_vm6, %v5943_v53, 0.0  ;;  %v6224_v49 = vld [vmem:[#allocation3 + $0x58] sm:$0xf]  ;;  %v6828_v12 = vsel %vm19088_vm11, %v16177_v37, %v6827_v61  ;;  %v19089_v24 = vrot.slane %v16130_v27, 3  ;;  %vm19090_vm7 = vcmask 1044480  }
 0x416   : > { %v8972_v42 = vpack.c.bf16 %v5983_v15, %v5983_v15  ;;  %v16310_v50 = vcombine.low %v6223_v26, %v6224_v49  ;;  %vm19091_vm8 = vcmask 785408   ;;  %7021 = vrot.lane.b32.xlu0 %v6828_v12, %s9652_s27  ;;  %v19093_v37 = vrot.slane %v16157_v33, 5 }
 0x417   : > { %v7473_v23 = vsel %vm19090_vm7, %v19089_v24, %v7472_v52  ;;  %v16316_v48 = vsel %vm19091_vm8, %v7137_v4, %v6702_v44  ;;  %vm19092_vm1 = vmmov %vm19091_vm8  ;;  %vm19094_vm11 = vcmask 1042432   ;;  %vm19095_vm6 = vcmask 257024   ;;  %v5660_v4 = vpop.f32.mrf.mxu1 }
 0x418   : > { %v16320_v8 = vsel %vm19092_vm1, %v7284_v30, %v7008_v13  ;;  %v16327_v62 = vsel %vm19094_vm11, %v19093_v37, %v6604_v1  ;;  %6183 = vst.msk [vmem:[#allocation3 + $0x60] sm:$0xf] %vm19095_vm6, %v8972_v42  ;;  %v7067_v27 = vrot.slane %v16310_v50, 6  ;;  %v6830_v6 = vshrl.u32 %v16310_v50, 16 }
 0x419   : > { %v6833_v44 = vshll.u32 %v16310_v50, 16  ;;  %v7479_v13 = vsel %vm19090_vm7, %v7472_v52, %v7478_v63  ;;  %6644 = vrot.lane.b32.xlu1 %v16327_v62, %s9650_s14  ;;  %v6434_v33 = vshrl.u32 %v16245_v59, 16  ;;  %v5659_v19 = vadd.f32 %v16200_v14, %v5658_v32  ;;  %v6530_v52 = vpop.permute.xlu0 %6529 }
 0x41a   : > { %vm19096_vm6 = vcmask 523264   ;;  %v6440_v47 = vrot.slane %v6438_v58, 1  ;;  %vm19097_vm8 = vcmask 1041408   ;;  %v6832_v53 = vrot.slane %v6830_v6, 5  ;;  %6949 = vrot.lane.b32.xlu0 %v6828_v12, %s9651_s24  ;;  %v6938_v58 = vpop.permute.xlu1 %6937 }
 0x41b   : > { %v7139_v26 = vsel %vm19096_vm6, %v7096_v5, %v16226_v20  ;;  %v16345_v51 = vsel %vm19097_vm8, %v7065_v54, %v7067_v27  ;;  %v6835_v30 = vrot.slane %v6833_v44, 6  ;;  %vm19098_vm1 = vcmask 261120   ;;  %v6225_v54 = vld [vmem:[#allocation3 + $0x5c] sm:$0xf] }
 0x41c   : > { %9161 = vmatmul.mubr.msk.bf16.gmra.mxu1 %vm19098_vm1, %v7473_v23  ;;  %v7438_v15 = vrot.slane %v16320_v8, 3  ;;  %v6436_v42 = vor.u32 %v6434_v33, %v16261_v46  ;;  %v5852_v20 = vadd.f32 %v16232_v29, %v5659_v19  ;;  %vm19099_vm11 = vcmask 785408   ;;  %vm19100_vm7 = vmmov %vm19098_vm1  ;;  %v5661_v8 = vpop.f32.mrf.mxu1  ;;  %v19105_v33 = vld [vmem:[#allocation12_spill] sm:$0xff] }
 0x41d   : > { %v16353_v5 = vsel %vm19099_vm11, %v7139_v26, %v6704_v60  ;;  %9164 = vmatprep.mubr.msk.bf16.mxu1 %vm19100_vm7, %v7479_v13  ;;  %v7484_v24 = vrot.slane %v16345_v51, 3  ;;  %vm19101_vm6 = vmmov %vm19098_vm1  ;;  %v16359_v37 = vor.u32 %v6835_v30, %v6832_v53  ;;  %v16361_v12 = vcombine.low %v6224_v49, %v6225_v54  ;;  %v7010_v13 = vpop.permute.xlu0 %7009 }
 0x41e   : > { %v7225_v23 = vsel %vm19101_vm6, %v15747_v18, %v6936_v35  ;;  %v5944_v46 = vmax.f32 %v5852_v20, 0.0  ;;  %vm19102_vm8 = vcmask 523264   ;;  %v5662_v60 = vadd.f32 %v16200_v14, %v5661_v8  ;;  %v5663_v35 = vpop.f32.mrf.mxu1  ;;  %v16380_v30 = vpop.permute.xlu1 %6634 }
 0x41f   : > { %v7285_v29 = vsel %vm19102_vm8, %v7225_v23, %v16305_v39  ;;  %v6442_v6 = vshrl.u32 %v16289_v9, 16  ;;  %vm19103_vm1 = vsmask.f32 7424  ;;  %vm19104_vm11 = vsmask.f32 2304 }
 0x420   : > { %v6441_v44 = vsel %vm19103_vm1, %v6436_v42, %v6440_v47  ;;  %v6837_v32 = vsel %vm19104_vm11, %v6827_v61, %v16359_v37  ;;  %v7436_v18 = vrot.slane %v16353_v5, 3  ;;  %v6446_v49 = vshll.u32 %v16361_v12, 16  ;;  %v6226_v4 = vld [vmem:[#allocation3 + $0x60] sm:$0xf] }
 0x421   : > { %6717 = vrot.lane.b32.xlu0 %v6441_v44, %s9652_s27  ;;  %7023 = vrot.lane.b32.xlu1 %v6837_v32, %s9652_s27  ;;  %vm19106_vm7 = vnez %v19105_v33  ;;  %v5855_v26 = vadd.f32 %v16254_v16, %v5662_v60  ;;  %v7098_v53 = vsel %vm19101_vm6, %v15702_v22, %v6530_v52  ;;  %vm19107_vm8 = vcmask 785408  }
 0x422   : > { %v5984_v19 = vsel %vm19106_vm7, %v5944_v46, 0.0  ;;  %v7311_v61 = vsel %vm19107_vm8, %v7285_v29, %v7010_v13  ;;  %vm19108_vm1 = vcmask 1044480   ;;  %v6448_v8 = vrot.slane %v6446_v49, 1  ;;  %vm19111_vm7 = vmmov %vm19101_vm6 }
 0x423   : > { %v7485_v42 = vsel %vm19108_vm1, %v7478_v63, %v7484_v24  ;;  %v8973_v20 = vpack.c.bf16 %v5984_v19, %v5984_v19  ;;  %v7439_v23 = vrot.slane %v7311_v61, 3  ;;  %v7435_v46 = vrot.slane %v16316_v48, 3  ;;  %v6706_v63 = vpop.permute.xlu0 %6705  ;;  %v19112_v48 = vld [vmem:[#allocation59_spill] sm:$0xff] }
 0x424   : > { %v6606_v16 = vrot.slane %v16310_v50, 5  ;;  %v5945_v60 = vmax.f32 %v5855_v26, 0.0  ;;  %v16389_v22 = vcombine.low %v6225_v54, %v6226_v4  ;;  %vm19109_vm11 = vcmask 257024   ;;  %9165 = vmatmul.mubr.msk.bf16.gmra.mxu1 %vm19111_vm7, %v7485_v42 }
 0x425   : > { %6184 = vst.msk [vmem:[#allocation3 + $0x64] sm:$0xf] %vm19109_vm11, %v8973_v20  ;;  %v7228_v52 = vsel %vm19101_vm6, %v15774_v40, %v6938_v58  ;;  %v6444_v29 = vor.u32 %v6442_v6, %v6440_v47  ;;  %vm19110_vm8 = vcmask 523264   ;;  %v7440_v35 = vsel %vm19108_vm1, %v7438_v15, %v7439_v23  ;;  %6543 = vrot.lane.b32.xlu0 %v6441_v44, %s9651_s24  ;;  %vm19114_vm11 = vmmov %vm19108_vm1  ;;  %v7012_v6 = vpop.permute.xlu1 %7011 }
 0x426   : > { %v7141_v0 = vsel %vm19110_vm8, %v7098_v53, %v16266_v3  ;;  %vm19113_vm13 = vnez %v19112_v48  ;;  %v7437_v13 = vsel %vm19114_vm11, %v7435_v46, %v7436_v18  ;;  %v7069_v40 = vrot.slane %v16389_v22, 6  ;;  %6951 = vrot.lane.b32.xlu1 %v6837_v32, %s9651_s24  ;;  %vm19115_vm6 = vmmov %vm19110_vm8  ;;  %7798 = vmatprep.mubr.bf16.mxu0 %v7440_v35 }
 0x427   : > { %v5985_v54 = vsel %vm19113_vm13, %v5945_v60, 0.0  ;;  %v6839_v47 = vshrl.u32 %v16389_v22, 16  ;;  %v7286_v15 = vsel %vm19115_vm6, %v7228_v52, %v16380_v30  ;;  %vm19116_vm7 = vsmask.f32 7424  ;;  %7799 = vmatmul.mubr.bf16.vlgmr.msra.gmra.mxu0 %v7437_v13  ;;  %v9134_v13 = vpop.f32.mrf.mxu0 }
 0x428   : > { %v8974_v3 = vpack.c.bf16 %v5985_v54, %v5985_v54  ;;  %v6449_v58 = vsel %vm19116_vm7, %v6444_v29, %v6448_v8  ;;  %v6842_v44 = vshll.u32 %v16389_v22, 16  ;;  %vm19117_vm8 = vcmask 785408  }
 0x429   : > { %v16412_v49 = vsel %vm19117_vm8, %v7141_v0, %v6706_v63  ;;  %vm19118_vm1 = vmmov %vm19117_vm8  ;;  %vm19119_vm11 = vcmask 1041408   ;;  %v6841_v26 = vrot.slane %v6839_v47, 5  ;;  %vm19120_vm6 = vcmask 1042432  }
 0x42a   : > { %v16415_v19 = vsel %vm19118_vm1, %v7286_v15, %v7012_v6  ;;  %v7070_v32 = vsel %vm19119_vm11, %v7067_v27, %v7069_v40  ;;  %v16423_v53 = vsel %vm19120_vm6, %v6604_v1, %v6606_v16  ;;  %vm19121_vm7 = vcmask 257024   ;;  %6719 = vrot.lane.b32.xlu1 %v6449_v58, %s9652_s27 }
 0x42b   : > { %6185 = vst.msk [vmem:[#allocation3 + $0x68] sm:$0xf] %vm19121_vm7, %v8974_v3  ;;  %v7446_v61 = vrot.slane %v16415_v19, 3  ;;  %v7490_v42 = vrot.slane %v7070_v32, 3  ;;  %v6844_v20 = vrot.slane %v6842_v44, 6  ;;  %6646 = vrot.lane.b32.xlu0 %v16423_v53, %s9650_s14  ;;  %v7444_v50 = vrot.slane %v16412_v49, 3 }
 0x42c   : > { %vm19122_vm8 = vcmask 1044480   ;;  %vm19124_vm11 = vcmask 261120   ;;  %v6227_v46 = vld [vmem:[#allocation3 + $0x64] sm:$0xf]  ;;  %vm19125_vm6 = vsmask.f32 2304 }
 0x42d   : > { %v7491_v41 = vsel %vm19122_vm8, %v7484_v24, %v7490_v42  ;;  %v6845_v27 = vor.u32 %v6844_v20, %v6841_v26  ;;  %vm19123_vm1 = vmmov %vm19122_vm8  ;;  %v16440_v52 = vcombine.low %v6226_v4, %v6227_v46  ;;  %v6608_v51 = vrot.slane %v16389_v22, 5  ;;  %v6940_v22 = vpop.permute.xlu1 %6939  ;;  %v5859_v26 = vpop.f32.mrf.mxu0 }
 0x42e   : > { %v7447_v1 = vsel %vm19123_vm1, %v7439_v23, %v7446_v61  ;;  %9168 = vmatprep.mubr.msk.bf16.mxu1 %vm19124_vm11, %v7491_v41  ;;  %6545 = vrot.lane.b32.xlu1 %v6449_v58, %s9651_s24  ;;  %vm19126_vm7 = vmmov %vm19123_vm1  ;;  %vm19127_vm8 = vcmask 1042432   ;;  %vm19128_vm1 = vsmask.f32 7424  ;;  %vm19129_vm11 = vcmask 1041408   ;;  %v6532_v58 = vpop.permute.xlu0 %6531 }
 0x42f   : > { %7806 = vmatprep.mubr.bf16.mxu0 %v7447_v1  ;;  %v6846_v60 = vsel %vm19125_vm6, %v16359_v37, %v6845_v27  ;;  %v7445_v24 = vsel %vm19126_vm7, %v7436_v18, %v7444_v50  ;;  %v6454_v23 = vshll.u32 %v16440_v52, 16  ;;  %v6450_v37 = vshrl.u32 %v16361_v12, 16  ;;  %vm19130_vm6 = vmmov %vm19126_vm7 }
 0x430   : > { %7025 = vrot.lane.b32.xlu0 %v6846_v60, %s9652_s27  ;;  %7807 = vmatmul.mubr.bf16.gmra.mxu0 %v7445_v24  ;;  %v16460_v63 = vsel %vm19127_vm8, %v6606_v16, %v6608_v51  ;;  %vm19131_vm7 = vcmask 261120   ;;  %v9135_v24 = vpop.f32.mrf.mxu0 }
 0x431   : > { %v16454_v4 = vrot.slane %v6454_v23, 1  ;;  %v6452_v5 = vor.u32 %v6450_v37, %v6448_v8  ;;  %v6708_v6 = vpop.permute.xlu1 %6707  ;;  %v7100_v20 = vsel %vm19131_vm7, %v15739_v43, %v6532_v58  ;;  %vm19132_vm8 = vmmov %vm19131_vm7  ;;  %vm19136_vm7 = vcmask 1042432  }
 0x432   : > { %v16451_v29 = vld [vmem:[#allocation3 + $0x68] sm:$0xf]  ;;  %6648 = vrot.lane.b32.xlu1 %v16460_v63, %s9650_s14  ;;  %v7231_v37 = vsel %vm19132_vm8, %v15868_v31, %v6940_v22 }
 0x433   : > { %v16457_v0 = vcombine.low %v6227_v46, %v16451_v29  ;;  %v6457_v47 = vsel %vm19128_vm1, %v6452_v5, %v16454_v4  ;;  %vm19133_vm1 = vsmask.f32 2304  ;;  %v5666_v46 = vpop.f32.mrf.mxu1 }
 0x434   : > { %6953 = vrot.lane.b32.xlu0 %v6846_v60, %s9651_s24  ;;  %v7014_v60 = vpop.permute.xlu0 %7013  ;;  %v5667_v43 = vadd.f32 %v16200_v14, %v5666_v46 }
 0x435   : > { %v7071_v18 = vrot.slane %v16457_v0, 6  ;;  %v6848_v35 = vshrl.u32 %v16457_v0, 16  ;;  %v6851_v54 = vshll.u32 %v16457_v0, 16  ;;  %v6610_v41 = vrot.slane %v16457_v0, 5  ;;  %v6534_v1 = vpop.permute.xlu1 %6533  ;;  %v5668_v5 = vpop.f32.mrf.mxu1 }
 0x436   : > { %v19144_v5 = vld [vmem:[#allocation66_spill] sm:$0xff] }
 0x437   : > { %v16473_v16 = vsel %vm19129_vm11, %v7069_v40, %v7071_v18  ;;  %v6850_v3 = vrot.slane %v6848_v35, 5  ;;  %v6853_v15 = vrot.slane %v6851_v54, 6  ;;  %vm19134_vm11 = vcmask 523264  }
 0x438   : > { %6721 = vrot.lane.b32.xlu0 %v6457_v47, %s9652_s27  ;;  %v7496_v8 = vrot.slane %v16473_v16, 3  ;;  %v5860_v35 = vadd.f32 %v5859_v26, %v5667_v43 }
 0x439   : > { %v16477_v44 = vor.u32 %v6853_v15, %v6850_v3  ;;  %v6942_v15 = vpop.permute.xlu0 %6941 }
 0x43a   : > { %v7497_v32 = vsel %vm19130_vm6, %v7490_v42, %v7496_v8  ;;  %v7143_v42 = vsel %vm19134_vm11, %v7100_v20, %v16305_v39  ;;  %vm19135_vm6 = vcmask 785408   ;;  %v16506_v39 = vpop.permute.xlu1 %6636  ;;  %v5946_v58 = vmax.f32 %v5860_v35, 0.0  ;;  %v19139_v20 = vld [vmem:[#allocation24_spill] sm:$0xff] }
 0x43b   : > { %9169 = vmatmul.mubr.msk.bf16.gmra.mxu1 %vm19132_vm8, %v7497_v32  ;;  %v6855_v40 = vsel %vm19133_vm1, %v6845_v27, %v16477_v44  ;;  %v16494_v23 = vsel %vm19135_vm6, %v7143_v42, %v6708_v6  ;;  %v16499_v27 = vsel %vm19136_vm7, %v6608_v51, %v6610_v41  ;;  %vm19137_vm1 = vmmov %vm19134_vm11  ;;  %v5862_v6 = vpop.f32.mrf.mxu0  ;;  %vm19142_vm8 = vcmask 257024  }
 0x43c   : > { %7027 = vrot.lane.b32.xlu1 %v6855_v40, %s9652_s27  ;;  %6547 = vrot.lane.b32.xlu0 %v6457_v47, %s9651_s24  ;;  %v7287_v54 = vsel %vm19137_vm1, %v7231_v37, %v16506_v39  ;;  %v5669_v47 = vpop.f32.mrf.mxu1  ;;  %v7450_v3 = vrot.slane %v16494_v23, 3  ;;  %vm19138_vm11 = vmmov %vm19135_vm6  ;;  %vm19140_vm6 = vcmask 1044480   ;;  %vm19143_vm1 = vcmask 261120  }
 0x43d   : > { %v7315_v51 = vsel %vm19138_vm11, %v7287_v54, %v7014_v60  ;;  %v5670_v31 = vadd.f32 %v16200_v14, %v5669_v47  ;;  %v6710_v43 = vpop.permute.xlu0 %6709  ;;  %vm19141_vm7 = vmmov %vm19140_vm6  ;;  %v7102_v37 = vsel %vm19143_vm1, %v15806_v34, %v6534_v1  ;;  %vm19145_vm11 = vnez %v19144_v5 }
 0x43e   : > { %v7452_v22 = vrot.slane %v7315_v51, 3  ;;  %v5671_v32 = vpop.f32.mrf.mxu1  ;;  %v7451_v60 = vsel %vm19141_vm7, %v7444_v50, %v7450_v3  ;;  %vm19147_vm7 = vmmov %vm19142_vm8 }
 0x43f   : > { %v5863_v46 = vadd.f32 %v5862_v6, %v5670_v31 }
 0x440   : > { %6955 = vrot.lane.b32.xlu1 %v6855_v40, %s9651_s24  ;;  %6650 = vrot.lane.b32.xlu0 %v16499_v27, %s9650_s14  ;;  %v5986_v40 = vsel %vm14275_vm4, %v5946_v58, 0.0  ;;  %v7453_v26 = vsel %vm19140_vm6, %v7446_v61, %v7452_v22  ;;  %v5674_v19 = vpop.f32.mrf.mxu1  ;;  %vm19146_vm6 = vcmask 523264   ;;  %vm19148_vm4 = vcmask 785408  }
 0x441   : > { %v8975_v42 = vpack.c.bf16 %v5986_v40, %v5986_v40  ;;  %7814 = vmatprep.mubr.bf16.mxu0 %v7453_v26  ;;  %v5947_v23 = vmax.f32 %v5863_v46, 0.0  ;;  %v5675_v61 = vadd.f32 %v16200_v14, %v5674_v19  ;;  %v6536_v47 = vpop.permute.xlu0 %6535  ;;  %v7145_v49 = vsel %vm19146_vm6, %v7102_v37, %v16380_v30  ;;  %v7016_v30 = vpop.permute.xlu1 %7015 }
 0x442   : > { %7815 = vmatmul.mubr.bf16.gmra.mxu0 %v7451_v60  ;;  %v5676_v51 = vpop.f32.mrf.mxu1  ;;  %v16531_v58 = vsel %vm19148_vm4, %v7145_v49, %v6710_v43 }
 0x443   : > { %6186 = vst.msk [vmem:[#allocation3 + $0x6c] sm:$0xf] %vm19142_vm8, %v8975_v42  ;;  %v5987_v35 = vsel %vm19145_vm11, %v5947_v23, 0.0  ;;  %v5868_v50 = vadd.f32 %v9134_v13, %v5675_v61  ;;  %vm19149_vm8 = vmmov %vm19143_vm1  ;;  %v7456_v26 = vrot.slane %v16531_v58, 3  ;;  %v19151_v42 = vld [vmem:[#allocation9_spill] sm:$0xff] }
 0x444   : > { %v8976_v54 = vpack.c.bf16 %v5987_v35, %v5987_v35  ;;  %v5677_v31 = vpop.f32.mrf.mxu1  ;;  %v7234_v6 = vsel %vm19149_vm8, %v16001_v17, %v6942_v15  ;;  %vm19150_vm1 = vmmov %vm19146_vm6  ;;  %vm19152_vm4 = vnez %v19151_v42  ;;  %vm19153_vm6 = vcmask 785408  }
 0x445   : > { %v5948_v34 = vmax.f32 %v5868_v50, 0.0  ;;  %v5678_v1 = vadd.f32 %v16200_v14, %v5677_v31  ;;  %v16536_v32 = vpop.permute.xlu0 %6638  ;;  %v6458_v15 = vshrl.u32 %v16440_v52, 16  ;;  %vm19154_vm8 = vcmask 1044480  }
 0x446   : > { %6187 = vst.msk [vmem:[#allocation3 + $0x70] sm:$0xf] %vm19147_vm7, %v8976_v54  ;;  %v5679_v40 = vpop.f32.mrf.mxu1  ;;  %v7288_v13 = vsel %vm19150_vm1, %v7234_v6, %v16536_v32 }
 0x447   : > { %v5988_v43 = vsel %vm19152_vm4, %v5948_v34, 0.0  ;;  %v5871_v60 = vadd.f32 %v9135_v24, %v5678_v1  ;;  %v16547_v37 = vsel %vm19153_vm6, %v7288_v13, %v7016_v30  ;;  %v6460_v51 = vor.u32 %v6458_v15, %v16454_v4  ;;  %v19155_v24 = vld [vmem:[#allocation64_spill] sm:$0xff]  ;;  %vm19157_vm6 = vmmov %vm19154_vm8  ;;  %v6944_v13 = vpop.permute.xlu1 %6943 }
 0x448   : > { %v8977_v17 = vpack.c.bf16 %v5988_v43, %v5988_v43  ;;  %v7458_v35 = vrot.slane %v16547_v37, 3  ;;  %vm19156_vm1 = vnez %v19155_v24  ;;  %v7457_v34 = vsel %vm19157_vm6, %v7450_v3, %v7456_v26 }
 0x449   : > { %v5949_v19 = vmax.f32 %v5871_v60, 0.0  ;;  %vm19168_vm4 = vsmask.f32 7424 }
 0x44a   : > { %v6229_v46 = vld [vmem:[#allocation3 + $0x6c] sm:$0xf]  ;;  %6188 = vst.msk [vmem:[#allocation3 + $0x74] sm:$0xf] %vm19147_vm7, %v8977_v17  ;;  %vm19158_vm7 = vsmask.f32 7424 }
 0x44b   : > { %v16544_v23 = vcombine.low %v16451_v29, %v6229_v46  ;;  %v7459_v29 = vsel %vm19154_vm8, %v7452_v22, %v7458_v35  ;;  %v5989_v49 = vsel %vm19156_vm1, %v5949_v19, 0.0  ;;  %vm19159_vm8 = vcmask 257024  }
 0x44c   : > { %7822 = vmatprep.mubr.bf16.mxu0 %v7459_v29  ;;  %v8978_v1 = vpack.c.bf16 %v5989_v49, %v5989_v49  ;;  %vm19160_vm1 = vcmask 1041408  }
 0x44d   : > { %v6462_v54 = vshll.u32 %v16544_v23, 16  ;;  %v6230_v61 = vld [vmem:[#allocation3 + $0x70] sm:$0xf]  ;;  %7823 = vmatmul.mubr.bf16.gmra.mxu0 %v7457_v34 }
 0x44e   : > { %v16559_v31 = vcombine.low %v6229_v46, %v6230_v61  ;;  %6189 = vst.msk [vmem:[#allocation3 + $0x78] sm:$0xf] %vm19159_vm8, %v8978_v1  ;;  %vm19163_vm8 = vcmask 1042432  }
 0x44f   : > { %v6464_v50 = vrot.slane %v6462_v54, 1 }
 0x450   : > { %v7073_v4 = vrot.slane %v16559_v31, 6  ;;  %v6857_v40 = vshrl.u32 %v16559_v31, 16  ;;  %v6860_v22 = vshll.u32 %v16559_v31, 16  ;;  %v6612_v17 = vrot.slane %v16559_v31, 5 }
 0x451   : > { %v6465_v6 = vsel %vm19158_vm7, %v6460_v51, %v6464_v50  ;;  %v6231_v15 = vld [vmem:[#allocation3 + $0x74] sm:$0xf]  ;;  %vm19161_vm7 = vcmask 261120   ;;  %v6712_v51 = vpop.permute.xlu1 %6711 }
 0x452   : > { %6723 = vrot.lane.b32.xlu1 %v6465_v6, %s9652_s27  ;;  %v7074_v46 = vsel %vm19160_vm1, %v7071_v18, %v7073_v4  ;;  %v6859_v30 = vrot.slane %v6857_v40, 5  ;;  %v6862_v3 = vrot.slane %v6860_v22, 6  ;;  %v16578_v54 = vcombine.low %v6230_v61, %v6231_v15 }
 0x453   : > { %v7502_v43 = vrot.slane %v7074_v46, 3  ;;  %vm19162_vm1 = vsmask.f32 2304  ;;  %v16588_v49 = vsel %vm19163_vm8, %v6610_v41, %v6612_v17  ;;  %v6466_v61 = vshrl.u32 %v16544_v23, 16 }
 0x454   : > { %v6863_v60 = vor.u32 %v6862_v3, %v6859_v30  ;;  %v6470_v29 = vshll.u32 %v16578_v54, 16  ;;  %vm19167_vm8 = vcmask 785408  }
 0x455   : > { %v7503_v19 = vsel %vm19157_vm6, %v7496_v8, %v7502_v43  ;;  %v16590_v16 = vld [vmem:[#allocation3 + $0x78] sm:$0xf]  ;;  %vm19164_vm6 = vmmov %vm19161_vm7  ;;  %v6538_v34 = vpop.permute.xlu1 %6537 }
 0x456   : > { %6549 = vrot.lane.b32.xlu1 %v6465_v6, %s9651_s24  ;;  %9172 = vmatprep.mubr.msk.bf16.mxu1 %vm19161_vm7, %v7503_v19  ;;  %v6864_v18 = vsel %vm19162_vm1, %v16477_v44, %v6863_v60  ;;  %v7104_v8 = vsel %vm19164_vm6, %v15947_v10, %v6536_v47  ;;  %v16597_v44 = vcombine.low %v6231_v15, %v16590_v16  ;;  %v16600_v31 = vrot.slane %v6470_v29, 1 }
 0x457   : > { %7029 = vrot.lane.b32.xlu0 %v6864_v18, %s9652_s27  ;;  %v6468_v10 = vor.u32 %v6466_v61, %v6464_v50  ;;  %vm19165_vm7 = vcmask 523264   ;;  %vm19166_vm1 = vcmask 1041408   ;;  %v7237_v3 = vsel %vm19164_vm6, %v16077_v57, %v6944_v13  ;;  %v9138_v61 = vpop.f32.mrf.mxu0 }
 0x458   : > { %v7075_v0 = vrot.slane %v16597_v44, 6  ;;  %v6866_v41 = vshrl.u32 %v16597_v44, 16  ;;  %v6869_v1 = vshll.u32 %v16597_v44, 16  ;;  %v7147_v47 = vsel %vm19165_vm7, %v7104_v8, %v16506_v39 }
 0x459   : > { %v7018_v6 = vpop.permute.xlu0 %7017  ;;  %v7189_v30 = vsel %vm19167_vm8, %v7147_v47, %v6712_v51  ;;  %v6473_v15 = vsel %vm19168_vm4, %v6468_v10, %v16600_v31  ;;  %vm19170_vm4 = vmmov %vm19164_vm6  ;;  %vm19171_vm6 = vsmask.f32 2304 }
 0x45a   : > { %6652 = vrot.lane.b32.xlu1 %v16588_v49, %s9650_s14  ;;  %v16611_v40 = vsel %vm19166_vm1, %v7073_v4, %v7075_v0  ;;  %v6868_v22 = vrot.slane %v6866_v41, 5  ;;  %v6871_v46 = vrot.slane %v6869_v1, 6  ;;  %vm19169_vm1 = vcmask 1044480  }
 0x45b   : > { %6957 = vrot.lane.b32.xlu0 %v6864_v18, %s9651_s24  ;;  %v7508_v50 = vrot.slane %v16611_v40, 3  ;;  %v16619_v19 = vpop.permute.xlu1 %6640  ;;  %v7462_v51 = vrot.slane %v7189_v30, 3  ;;  %v6614_v41 = vrot.slane %v16597_v44, 5  ;;  %v7106_v37 = vsel %vm19170_vm4, %v15976_v25, %v6538_v34 }
 0x45c   : > { %v16622_v39 = vor.u32 %v6871_v46, %v6868_v22  ;;  %v7289_v4 = vsel %vm19165_vm7, %v7237_v3, %v16619_v19  ;;  %vm19172_vm7 = vmmov %vm19169_vm1 }
 0x45d   : > { %v7509_v18 = vsel %vm19169_vm1, %v7502_v43, %v7508_v50  ;;  %v7319_v57 = vsel %vm19167_vm8, %v7289_v4, %v7018_v6  ;;  %v6946_v13 = vpop.permute.xlu0 %6945  ;;  %v7463_v10 = vsel %vm19169_vm1, %v7456_v26, %v7462_v51  ;;  %vm19173_vm8 = vcmask 1042432   ;;  %vm19176_vm1 = vmmov %vm19170_vm4 }
 0x45e   : > { %9173 = vmatmul.mubr.msk.bf16.gmra.mxu1 %vm19170_vm4, %v7509_v18  ;;  %v6873_v29 = vsel %vm19171_vm6, %v6863_v60, %v16622_v39  ;;  %v7464_v8 = vrot.slane %v7319_v57, 3  ;;  %v5875_v60 = vpop.f32.mrf.mxu0  ;;  %v16646_v47 = vsel %vm19173_vm8, %v6612_v17, %v6614_v41  ;;  %vm19174_vm6 = vcmask 523264  }
 0x45f   : > { %6725 = vrot.lane.b32.xlu0 %v6473_v15, %s9652_s27  ;;  %7031 = vrot.lane.b32.xlu1 %v6873_v29, %s9652_s27  ;;  %v7149_v46 = vsel %vm19174_vm6, %v7106_v37, %v16536_v32  ;;  %v7240_v25 = vsel %vm19176_vm1, %v16166_v7, %v6946_v13  ;;  %vm19177_vm8 = vmmov %vm19174_vm6  ;;  %vm19182_vm1 = vcmask 257024  }
 0x460   : > { %v7465_v43 = vsel %vm19172_vm7, %v7458_v35, %v7464_v8  ;;  %v9139_v26 = vpop.f32.mrf.mxu0  ;;  %vm19175_vm7 = vcmask 785408   ;;  %v7020_v18 = vpop.permute.xlu1 %7019 }
 0x461   : > { %7830 = vmatprep.mubr.bf16.mxu0 %v7465_v43  ;;  %v6714_v1 = vpop.permute.xlu0 %6713  ;;  %vm19178_vm4 = vmmov %vm19175_vm7 }
 0x462   : > { %7831 = vmatmul.mubr.bf16.gmra.mxu0 %v7463_v10  ;;  %v16658_v17 = vsel %vm19175_vm7, %v7149_v46, %v6714_v1  ;;  %v19179_v10 = vld [vmem:[#allocation69_spill] sm:$0xff]  ;;  %vm19181_vm7 = vcmask 1044480   ;;  %v19184_v46 = vld [vmem:[#allocation19_spill] sm:$0xff] }
 0x463   : > { %6551 = vrot.lane.b32.xlu0 %v6473_v15, %s9651_s24  ;;  %6959 = vrot.lane.b32.xlu1 %v6873_v29, %s9651_s24  ;;  %v5682_v35 = vpop.f32.mrf.mxu1  ;;  %v5878_v29 = vpop.f32.mrf.mxu0  ;;  %v7468_v32 = vrot.slane %v16658_v17, 3  ;;  %vm19180_vm6 = vnez %v19179_v10 }
 0x464   : > { %v5683_v58 = vadd.f32 %v16200_v14, %v5682_v35 }
 0x465   : > { %v16652_v6 = vpop.permute.xlu0 %6539  ;;  %v5684_v22 = vpop.f32.mrf.mxu1 }
 0x466   : > { %v5876_v30 = vadd.f32 %v5875_v60, %v5683_v58 }
 0x467   : > { %6654 = vrot.lane.b32.xlu0 %v16646_v47, %s9650_s14  ;;  %v5685_v3 = vpop.f32.mrf.mxu1 }
 0x468   : > { %v5950_v15 = vmax.f32 %v5876_v30, 0.0  ;;  %v5686_v4 = vadd.f32 %v16200_v14, %v5685_v3 }
 0x469   : > { %v16662_v34 = vpop.permute.xlu0 %6642  ;;  %v5687_v43 = vpop.f32.mrf.mxu1 }
 0x46a   : > { %v7290_v57 = vsel %vm19177_vm8, %v7240_v25, %v16662_v34  ;;  %v5990_v60 = vsel %vm19180_vm6, %v5950_v15, 0.0  ;;  %v5879_v7 = vadd.f32 %v5878_v29, %v5686_v4  ;;  %vm19183_vm8 = vmmov %vm19181_vm7 }
 0x46b   : > { %v16669_v1 = vsel %vm19178_vm4, %v7290_v57, %v7020_v18  ;;  %v8979_v37 = vpack.c.bf16 %v5990_v60, %v5990_v60  ;;  %v7469_v22 = vsel %vm19183_vm8, %v7462_v51, %v7468_v32  ;;  %vm19185_vm4 = vnez %v19184_v46  ;;  %vm19186_vm6 = vmmov %vm19182_vm1 }
 0x46c   : > { %v7470_v13 = vrot.slane %v16669_v1, 3  ;;  %v5951_v35 = vmax.f32 %v5879_v7, 0.0  ;;  %v19187_v7 = vld [vmem:[#allocation13_spill] sm:$0xff]  ;;  %vm19192_vm8 = vsmask.f32 7424  ;;  %v9142_v1 = vpop.f32.mrf.mxu0 }
 0x46d   : > { %6190 = vst.msk [vmem:[#allocation3 + $0x7c] sm:$0xf] %vm19182_vm1, %v8979_v37 }
 0x46e   : > { %v7471_v58 = vsel %vm19181_vm7, %v7464_v8, %v7470_v13  ;;  %v5991_v30 = vsel %vm19185_vm4, %v5951_v35, 0.0  ;;  %vm19188_vm7 = vnez %v19187_v7  ;;  %vm19198_vm4 = vcmask 1042432  }
 0x46f   : > { %7838 = vmatprep.mubr.bf16.mxu0 %v7471_v58  ;;  %v8980_v25 = vpack.c.bf16 %v5991_v30, %v5991_v30  ;;  %v6474_v30 = vshrl.u32 %v16578_v54, 16 }
 0x470   : > { %7839 = vmatmul.mubr.bf16.gmra.mxu0 %v7469_v22 }
 0x471   : > { %6191 = vst.msk [vmem:[#allocation3 + $0x80] sm:$0xf] %vm19186_vm6, %v8980_v25  ;;  %vm19189_vm6 = vmmov %vm19182_vm1  ;;  %v19190_v25 = vld [vmem:[#allocation72_spill] sm:$0xff] }
 0x472   : > { %vm19191_vm1 = vnez %v19190_v25 }
 0x473   : > { %v5690_v3 = vpop.f32.mrf.mxu1 }
 0x474   : > { %v5691_v15 = vadd.f32 %v16200_v14, %v5690_v3  ;;  %v6233_v60 = vld [vmem:[#allocation3 + $0x7c] sm:$0xf] }
 0x475   : > { %v5692_v4 = vpop.f32.mrf.mxu1  ;;  %v16689_v35 = vcombine.low %v16590_v16, %v6233_v60 }
 0x476   : > { %v5884_v18 = vadd.f32 %v9138_v61, %v5691_v15  ;;  %v6476_v15 = vor.u32 %v6474_v30, %v16600_v31 }
 0x477   : > { %v5693_v8 = vpop.f32.mrf.mxu1  ;;  %v6478_v3 = vshll.u32 %v16689_v35, 16  ;;  %v6482_v44 = vshrl.u32 %v16689_v35, 16 }
 0x478   : > { %v5952_v57 = vmax.f32 %v5884_v18, 0.0  ;;  %v5694_v29 = vadd.f32 %v16200_v14, %v5693_v8  ;;  %v6234_v61 = vld [vmem:[#allocation3 + $0x80] sm:$0xf] }
 0x479   : > { %v5695_v43 = vpop.f32.mrf.mxu1  ;;  %v6480_v4 = vrot.slane %v6478_v3, 1  ;;  %v16697_v18 = vcombine.low %v6233_v60, %v6234_v61 }
 0x47a   : > { %v5992_v51 = vsel %vm19188_vm7, %v5952_v57, 0.0  ;;  %v5887_v37 = vadd.f32 %v9139_v26, %v5694_v29  ;;  %v6948_v26 = vpop.permute.xlu1 %6947  ;;  %vm19197_vm7 = vsmask.f32 2304 }
 0x47b   : > { %v8981_v58 = vpack.c.bf16 %v5992_v51, %v5992_v51  ;;  %v6481_v8 = vsel %vm19192_vm8, %v6476_v15, %v6480_v4  ;;  %v7077_v57 = vrot.slane %v16697_v18, 6  ;;  %v6875_v29 = vshrl.u32 %v16697_v18, 16 }
 0x47c   : > { %v5953_v22 = vmax.f32 %v5887_v37, 0.0  ;;  %v6878_v43 = vshll.u32 %v16697_v18, 16  ;;  %6727 = vrot.lane.b32.xlu1 %v6481_v8, %s9652_s27  ;;  %v6616_v30 = vrot.slane %v16697_v18, 5  ;;  %vm19194_vm8 = vcmask 261120  }
 0x47d   : > { %6192 = vst.msk [vmem:[#allocation3 + $0x84] sm:$0xf] %vm19189_vm6, %v8981_v58  ;;  %v6877_v60 = vrot.slane %v6875_v29, 5 }
 0x47e   : > { %v5993_v14 = vsel %vm19191_vm1, %v5953_v22, 0.0  ;;  %vm19193_vm1 = vcmask 1041408   ;;  %v6880_v51 = vrot.slane %v6878_v43, 6 }
 0x47f   : > { %v8982_v16 = vpack.c.bf16 %v5993_v14, %v5993_v14  ;;  %v7078_v31 = vsel %vm19193_vm1, %v7075_v0, %v7077_v57  ;;  %v7108_v14 = vsel %vm19194_vm8, %v16102_v56, %v16652_v6  ;;  %vm19196_vm1 = vmmov %vm19194_vm8  ;;  %v16726_v56 = vsel %vm19198_vm4, %v6614_v41, %v6616_v30 }
 0x480   : > { %v7514_v58 = vrot.slane %v7078_v31, 3  ;;  %v6881_v22 = vor.u32 %v6880_v51, %v6877_v60  ;;  %6553 = vrot.lane.b32.xlu1 %v6481_v8, %s9651_s24  ;;  %vm19199_vm8 = vcmask 523264   ;;  %vm19201_vm4 = vmmov %vm19196_vm1  ;;  %v6484_v51 = vor.u32 %v6482_v44, %v6480_v4 }
 0x481   : > { %6193 = vst.msk [vmem:[#allocation3 + $0x88] sm:$0xf] %vm19189_vm6, %v8982_v16  ;;  %vm19195_vm6 = vcmask 1044480   ;;  %v7243_v43 = vsel %vm19201_vm4, %v16210_v36, %v6948_v26  ;;  %vm19206_vm4 = vcmask 1044480  }
 0x482   : > { %v6716_v37 = vpop.permute.xlu1 %6715  ;;  %v7515_v15 = vsel %vm19195_vm6, %v7508_v50, %v7514_v58  ;;  %v6882_v0 = vsel %vm19197_vm7, %v16622_v39, %v6881_v22  ;;  %v7151_v50 = vsel %vm19199_vm8, %v7108_v14, %v16619_v19  ;;  %vm19200_vm7 = vcmask 785408   ;;  %vm19202_vm6 = vmmov %vm19199_vm8 }
 0x483   : > { %9176 = vmatprep.mubr.msk.bf16.mxu1 %vm19196_vm1, %v7515_v15  ;;  %7033 = vrot.lane.b32.xlu0 %v6882_v0, %s9652_s27  ;;  %vm19203_vm1 = vcmask 1041408   ;;  %vm19204_vm8 = vmmov %vm19200_vm7 }
 0x484   : > { %v6235_v3 = vld [vmem:[#allocation3 + $0x84] sm:$0xf]  ;;  %6656 = vrot.lane.b32.xlu1 %v16726_v56, %s9650_s14 }
 0x485   : > { %v16716_v16 = vcombine.low %v6234_v61, %v6235_v3  ;;  %v16738_v61 = vsel %vm19200_vm7, %v7151_v50, %v6716_v37  ;;  %vm19205_vm7 = vsmask.f32 7424 }
 0x486   : > { %v6542_v29 = vpop.permute.xlu1 %6541  ;;  %v7474_v37 = vrot.slane %v16738_v61, 3 }
 0x487   : > { %v6486_v18 = vshll.u32 %v16716_v16, 16  ;;  %6961 = vrot.lane.b32.xlu0 %v6882_v0, %s9651_s24 }
 0x488   : > { %v16728_v40 = vld [vmem:[#allocation3 + $0x88] sm:$0xf]  ;;  %v7022_v6 = vpop.permute.xlu0 %7021 }
 0x489   : > { %v16735_v39 = vcombine.low %v6235_v3, %v16728_v40  ;;  %v16741_v8 = vrot.slane %v6486_v18, 1 }
 0x48b   : > { %v16743_v41 = vpop.permute.xlu1 %6644  ;;  %v7079_v19 = vrot.slane %v16735_v39, 6  ;;  %v6884_v31 = vshrl.u32 %v16735_v39, 16  ;;  %v6887_v60 = vshll.u32 %v16735_v39, 16  ;;  %v6489_v18 = vsel %vm19205_vm7, %v6484_v51, %v16741_v8  ;;  %vm19210_vm7 = vmmov %vm19206_vm4 }
 0x48c   : > { %v7291_v3 = vsel %vm19202_vm6, %v7243_v43, %v16743_v41  ;;  %v6950_v14 = vpop.permute.xlu0 %6949  ;;  %6729 = vrot.lane.b32.xlu0 %v6489_v18, %s9652_s27  ;;  %vm19207_vm6 = vmmov %vm19206_vm4 }
 0x48d   : > { %v16757_v15 = vsel %vm19203_vm1, %v7077_v57, %v7079_v19  ;;  %v6886_v36 = vrot.slane %v6884_v31, 5  ;;  %v6889_v26 = vrot.slane %v6887_v60, 6  ;;  %v7323_v0 = vsel %vm19204_vm8, %v7291_v3, %v7022_v6 }
 0x48e   : > { %v17854_v4 = vrot.slane %v16757_v15, 3  ;;  %v7476_v50 = vrot.slane %v7323_v0, 3  ;;  %vm19208_vm1 = vcmask 261120   ;;  %vm19209_vm8 = vsmask.f32 2304 }
 0x48f   : > { %v16764_v61 = vor.u32 %v6889_v26, %v6886_v36  ;;  %v7475_v60 = vsel %vm19210_vm7, %v7468_v32, %v7474_v37 }
 0x490   : > { %v7521_v44 = vsel %vm19206_vm4, %v7514_v58, %v17854_v4  ;;  %v7477_v57 = vsel %vm19207_vm6, %v7470_v13, %v7476_v50  ;;  %v17853_v58 = vrot.slane %v16735_v39, 5  ;;  %6555 = vrot.lane.b32.xlu0 %v6489_v18, %s9651_s24  ;;  %vm19211_vm4 = vmmov %vm19208_vm1  ;;  %vm19212_vm6 = vcmask 1042432  }
 0x491   : > { %9177 = vmatmul.mubr.msk.bf16.gmra.mxu1 %vm19208_vm1, %v7521_v44  ;;  %v6891_v31 = vsel %vm19209_vm8, %v6881_v22, %v16764_v61  ;;  %7846 = vmatprep.mubr.bf16.mxu0 %v7477_v57  ;;  %v7110_v13 = vsel %vm19211_vm4, %v16133_v55, %v6542_v29  ;;  %vm19213_vm1 = vcmask 523264   ;;  %v5891_v22 = vpop.f32.mrf.mxu0  ;;  %vm19214_vm8 = vcmask 785408   ;;  %vm19215_vm7 = vmmov %vm19211_vm4 }
 0x492   : > { %7035 = vrot.lane.b32.xlu1 %v6891_v31, %s9652_s27  ;;  %7847 = vmatmul.mubr.bf16.gmra.mxu0 %v7475_v60  ;;  %v16787_v17 = vsel %vm19212_vm6, %v6616_v30, %v17853_v58  ;;  %v7153_v32 = vsel %vm19213_vm1, %v7110_v13, %v16662_v34  ;;  %v7246_v55 = vsel %vm19215_vm7, %v16327_v62, %v6950_v14  ;;  %vm19216_vm4 = vmmov %vm19213_vm1  ;;  %v16801_v34 = vld [vmem:[%s17525_s4] ss:$0 sm:$0xff] }
 0x493   : > { %v6718_v43 = vpop.permute.xlu0 %6717  ;;  %v7024_v6 = vpop.permute.xlu1 %7023  ;;  %vm19217_vm6 = vmmov %vm19214_vm8 }
 0x494   : > { %6658 = vrot.lane.b32.xlu0 %v16787_v17, %s9650_s14  ;;  %v7195_v36 = vsel %vm19214_vm8, %v7153_v32, %v6718_v43  ;;  %v9143_v57 = vpop.f32.mrf.mxu0  ;;  %vm19218_vm1 = vmmov %vm19215_vm7  ;;  %vm19219_vm8 = vcmask 1044480  }
 0x495   : > { %v7480_v44 = vrot.slane %v7195_v36, 3  ;;  %vm19220_vm7 = vmmov %vm19219_vm8 }
 0x496   : > { %6963 = vrot.lane.b32.xlu1 %v6891_v31, %s9651_s24 }
 0x497   : > { %v6544_v51 = vpop.permute.xlu0 %6543 }
 0x498   : > { %v6952_v3 = vpop.permute.xlu1 %6951  ;;  %v5698_v18 = vpop.f32.mrf.mxu1  ;;  %v7112_v62 = vsel %vm19218_vm1, %v16245_v59, %v6544_v51 }
 0x499   : > { %v5699_v31 = vadd.f32 %v16801_v34, %v5698_v18  ;;  %v7155_v18 = vsel %vm19216_vm4, %v7112_v62, %v16743_v41 }
 0x49a   : > { %v5700_v60 = vpop.f32.mrf.mxu1 }
 0x49b   : > { %v5892_v13 = vadd.f32 %v5891_v22, %v5699_v31  ;;  %v7249_v60 = vsel %vm19218_vm1, %v16423_v53, %v6952_v3 }
 0x49c   : > { %v6720_v0 = vpop.permute.xlu1 %6719 }
 0x49d   : > { %v6647_v29 = vpop.permute.xlu0 %6646  ;;  %v5954_v58 = vmax.f32 %v5892_v13, 0.0  ;;  %v7197_v59 = vsel %vm19217_vm6, %v7155_v18, %v6720_v0  ;;  %v19225_v18 = vld [vmem:[#allocation76_spill] sm:$0xff] }
 0x49e   : > { %v7292_v26 = vsel %vm19216_vm4, %v7246_v55, %v6647_v29  ;;  %v5701_v55 = vpop.f32.mrf.mxu1 }
 0x49f   : > { %v7325_v30 = vsel %vm19217_vm6, %v7292_v26, %v7024_v6  ;;  %v7481_v6 = vsel %vm19220_vm7, %v7474_v37, %v7480_v44  ;;  %v5894_v26 = vpop.f32.mrf.mxu0  ;;  %v5702_v4 = vadd.f32 %v16801_v34, %v5701_v55  ;;  %vm19223_vm7 = vmmov %vm19217_vm6  ;;  %vm19226_vm6 = vnez %v19225_v18 }
 0x4a0   : > { %v7482_v43 = vrot.slane %v7325_v30, 3  ;;  %v6546_v36 = vpop.permute.xlu1 %6545  ;;  %v5703_v30 = vpop.f32.mrf.mxu1 }
 0x4a1   : > { %v5895_v31 = vadd.f32 %v5894_v26, %v5702_v4  ;;  %v7114_v3 = vsel %vm19218_vm1, %v16289_v9, %v6546_v36 }
 0x4a2   : > { %v7026_v14 = vpop.permute.xlu0 %7025  ;;  %v7483_v32 = vsel %vm19219_vm8, %v7476_v50, %v7482_v43  ;;  %v5994_v50 = vsel %vm14970_vm10, %v5954_v58, 0.0  ;;  %vm19222_vm8 = vmmov %vm19216_vm4  ;;  %vm19224_vm4 = vcmask 257024   ;;  %vm19227_vm10 = vcmask 1044480  }
 0x4a3   : > { %7854 = vmatprep.mubr.bf16.mxu0 %v7483_v32  ;;  %v8983_v13 = vpack.c.bf16 %v5994_v50, %v5994_v50  ;;  %v5955_v55 = vmax.f32 %v5895_v31, 0.0  ;;  %v5706_v58 = vpop.f32.mrf.mxu1 }
 0x4a4   : > { %7855 = vmatmul.mubr.bf16.gmra.mxu0 %v7481_v6  ;;  %v16816_v37 = vpop.permute.xlu1 %6648  ;;  %v7486_v6 = vrot.slane %v7197_v59, 3  ;;  %v5707_v53 = vadd.f32 %v16801_v34, %v5706_v58 }
 0x4a5   : > { %v7293_v32 = vsel %vm19222_vm8, %v7249_v60, %v16816_v37  ;;  %6194 = vst.msk [vmem:[#allocation3 + $0x8c] sm:$0xf] %vm19224_vm4, %v8983_v13  ;;  %v5995_v4 = vsel %vm19226_vm6, %v5955_v55, 0.0  ;;  %v5708_v50 = vpop.f32.mrf.mxu1  ;;  %vm19228_vm8 = vmmov %vm19227_vm10  ;;  %vm19231_vm6 = vcmask 785408  }
 0x4a6   : > { %v6954_v51 = vpop.permute.xlu0 %6953  ;;  %v7327_v41 = vsel %vm19223_vm7, %v7293_v32, %v7026_v14  ;;  %v8984_v26 = vpack.c.bf16 %v5995_v4, %v5995_v4  ;;  %v7487_v14 = vsel %vm19228_vm8, %v7480_v44, %v7486_v6  ;;  %vm19229_vm7 = vmmov %vm19224_vm4  ;;  %v5900_v59 = vadd.f32 %v9142_v1, %v5707_v53 }
 0x4a7   : > { %v7488_v0 = vrot.slane %v7327_v41, 3  ;;  %v5709_v60 = vpop.f32.mrf.mxu1  ;;  %vm19230_vm4 = vcmask 523264   ;;  %v19232_v41 = vld [vmem:[#allocation52_spill] sm:$0xff]  ;;  %v7252_v58 = vsel %vm19218_vm1, %v16460_v63, %v6954_v51  ;;  %vm19235_vm8 = vcmask 785408  }
 0x4a8   : > { %6195 = vst.msk [vmem:[#allocation3 + $0x90] sm:$0xf] %vm19229_vm7, %v8984_v26  ;;  %v7157_v13 = vsel %vm19230_vm4, %v7114_v3, %v6647_v29  ;;  %v5956_v32 = vmax.f32 %v5900_v59, 0.0  ;;  %v5710_v55 = vadd.f32 %v16801_v34, %v5709_v60  ;;  %v19236_v59 = vld [vmem:[#allocation23_spill] sm:$0xff]  ;;  %vm19238_vm1 = vcmask 1044480  }
 0x4a9   : > { %v7489_v30 = vsel %vm19227_vm10, %v7482_v43, %v7488_v0  ;;  %v5711_v43 = vpop.f32.mrf.mxu1  ;;  %vm19233_vm10 = vnez %v19232_v41 }
 0x4aa   : > { %v6722_v62 = vpop.permute.xlu0 %6721  ;;  %7862 = vmatprep.mubr.bf16.mxu0 %v7489_v30  ;;  %v5996_v44 = vsel %vm19233_vm10, %v5956_v32, 0.0  ;;  %v5903_v4 = vadd.f32 %v9143_v57, %v5710_v55  ;;  %v6490_v57 = vshrl.u32 %v16716_v16, 16 }
 0x4ab   : > { %v16835_v9 = vsel %vm19231_vm6, %v7157_v13, %v6722_v62  ;;  %v8985_v29 = vpack.c.bf16 %v5996_v44, %v5996_v44  ;;  %vm19234_vm6 = vmmov %vm19230_vm4  ;;  %vm19237_vm4 = vnez %v19236_v59 }
 0x4ac   : > { %7863 = vmatmul.mubr.bf16.gmra.mxu0 %v7487_v14  ;;  %v6237_v36 = vld [vmem:[#allocation3 + $0x8c] sm:$0xf]  ;;  %v17856_v53 = vrot.slane %v16835_v9, 3  ;;  %v5957_v30 = vmax.f32 %v5903_v4, 0.0  ;;  %v16849_v50 = vpop.f32.mrf.mxu1  ;;  %v6492_v32 = vor.u32 %v6490_v57, %v16741_v8 }
 0x4ad   : > { %v16840_v1 = vcombine.low %v16728_v40, %v6237_v36  ;;  %6196 = vst.msk [vmem:[#allocation3 + $0x94] sm:$0xf] %vm19229_vm7, %v8985_v29 }
 0x4ae   : > { %v16830_v31 = vpop.permute.xlu0 %6547  ;;  %v7028_v3 = vpop.permute.xlu1 %7027  ;;  %v5997_v60 = vsel %vm19237_vm4, %v5957_v30, 0.0  ;;  %vm19258_vm4 = vcmask 785408  }
 0x4af   : > { %v6494_v40 = vshll.u32 %v16840_v1, 16  ;;  %v6238_v63 = vld [vmem:[#allocation3 + $0x90] sm:$0xf]  ;;  %v5716_v13 = vpop.f32.mrf.mxu1  ;;  %v8986_v44 = vpack.c.bf16 %v5997_v60, %v5997_v60 }
 0x4b0   : > { %v16861_v43 = vcombine.low %v6237_v36, %v6238_v63 }
 0x4b1   : > { %v6496_v55 = vrot.slane %v6494_v40, 1  ;;  %v16869_v29 = vpop.f32.mrf.mxu1  ;;  %6197 = vst.msk [vmem:[#allocation3 + $0x98] sm:$0xf] %vm19229_vm7, %v8986_v44  ;;  %vm19244_vm7 = vsmask.f32 2304 }
 0x4b2   : > { %v16844_v26 = vpop.permute.xlu0 %6650  ;;  %v6893_v8 = vshrl.u32 %v16861_v43, 16  ;;  %v6896_v36 = vshll.u32 %v16861_v43, 16  ;;  %v6620_v13 = vrot.slane %v16861_v43, 5 }
 0x4b3   : > { %v7294_v62 = vsel %vm19234_vm6, %v7252_v58, %v16844_v26  ;;  %vm19239_vm6 = vmmov %vm19238_vm1 }
 0x4b4   : > { %v16854_v14 = vsel %vm19235_vm8, %v7294_v62, %v7028_v3  ;;  %v7493_v58 = vsel %vm19239_vm6, %v7486_v6, %v17856_v53  ;;  %vm19240_vm8 = vsmask.f32 7424  ;;  %v7081_v62 = vrot.slane %v16861_v43, 6 }
 0x4b5   : > { %v17857_v51 = vrot.slane %v16854_v14, 3  ;;  %v6497_v3 = vsel %vm19240_vm8, %v6492_v32, %v6496_v55  ;;  %v6895_v30 = vrot.slane %v6893_v8, 5  ;;  %v6898_v57 = vrot.slane %v6896_v36, 6  ;;  %v6239_v32 = vld [vmem:[#allocation3 + $0x94] sm:$0xf] }
 0x4b6   : > { %6731 = vrot.lane.b32.xlu1 %v6497_v3, %s9652_s27  ;;  %v16885_v53 = vcombine.low %v6238_v63, %v6239_v32  ;;  %vm19243_vm8 = vcmask 261120   ;;  %v19245_v43 = vrot.slane %v16735_v39, 5 }
 0x4b7   : > { %v7495_v4 = vsel %vm19238_vm1, %v7488_v0, %v17857_v51  ;;  %v5719_v0 = vpop.f32.mrf.mxu1  ;;  %vm19241_vm1 = vcmask 1041408   ;;  %v6899_v60 = vor.u32 %v6898_v57, %v6895_v30 }
 0x4b8   : > { %7870 = vmatprep.mubr.bf16.mxu0 %v7495_v4  ;;  %v7082_v6 = vsel %vm19241_vm1, %v7079_v19, %v7081_v62  ;;  %v19242_v4 = vrot.slane %v16757_v15, 3  ;;  %vm19246_vm1 = vcmask 1042432   ;;  %v16897_v15 = vld [vmem:[#allocation3 + $0x98] sm:$0xf] }
 0x4b9   : > { %7871 = vmatmul.mubr.bf16.gmra.mxu0 %v7493_v58  ;;  %v7526_v40 = vrot.slane %v7082_v6, 3  ;;  %v6900_v19 = vsel %vm19244_vm7, %v16764_v61, %v6899_v60  ;;  %v6502_v58 = vshll.u32 %v16885_v53, 16  ;;  %v5722_v8 = vpop.f32.mrf.mxu1  ;;  %v16902_v63 = vcombine.low %v6239_v32, %v16897_v15 }
 0x4ba   : > { %6557 = vrot.lane.b32.xlu1 %v6497_v3, %s9651_s24  ;;  %7037 = vrot.lane.b32.xlu0 %v6900_v19, %s9652_s27  ;;  %v16895_v3 = vsel %vm19246_vm1, %v19245_v43, %v6620_v13  ;;  %v6498_v61 = vshrl.u32 %v16840_v1, 16  ;;  %v5723_v59 = vadd.f32 %v16801_v34, %v5722_v8  ;;  %vm19249_vm7 = vcmask 1044480  }
 0x4bb   : > { %v7527_v44 = vsel %vm19239_vm6, %v19242_v4, %v7526_v40  ;;  %v5724_v36 = vpop.f32.mrf.mxu1  ;;  %v16905_v0 = vrot.slane %v6502_v58, 1  ;;  %v17858_v39 = vrot.slane %v16902_v63, 6  ;;  %v6902_v6 = vshrl.u32 %v16902_v63, 16 }
 0x4bc   : > { %9180 = vmatprep.mubr.msk.bf16.mxu1 %vm19243_vm8, %v7527_v44  ;;  %v6905_v30 = vshll.u32 %v16902_v63, 16  ;;  %v6500_v4 = vor.u32 %v6498_v61, %v6496_v55  ;;  %vm19247_vm6 = vcmask 1041408   ;;  %v6956_v36 = vpop.permute.xlu1 %6955  ;;  %vm19248_vm8 = vsmask.f32 7424 }
 0x4bd   : > { %v5725_v57 = vpop.f32.mrf.mxu1  ;;  %v16914_v32 = vsel %vm19247_vm6, %v7081_v62, %v17858_v39  ;;  %v6904_v44 = vrot.slane %v6902_v6, 5  ;;  %v5715_v61 = vadd.f32 %v16801_v34, %v16849_v50  ;;  %vm19250_vm1 = vcmask 261120  }
 0x4be   : > { %6660 = vrot.lane.b32.xlu1 %v16895_v3, %s9650_s14  ;;  %6965 = vrot.lane.b32.xlu0 %v6900_v19, %s9651_s24  ;;  %v6907_v43 = vrot.slane %v6905_v30, 6  ;;  %v6505_v19 = vsel %vm19248_vm8, %v6500_v4, %v16905_v0  ;;  %v17859_v51 = vrot.slane %v16914_v32, 3  ;;  %vm19251_vm6 = vsmask.f32 2304  ;;  %vm19252_vm8 = vmmov %vm19250_vm1 }
 0x4bf   : > { %v5727_v58 = vpop.f32.mrf.mxu1  ;;  %v7116_v50 = vsel %vm19252_vm8, %v16361_v12, %v16830_v31  ;;  %vm19256_vm8 = vcmask 523264  }
 0x4c0   : > { %v16921_v41 = vor.u32 %v6907_v43, %v6904_v44  ;;  %v7533_v62 = vsel %vm19249_vm7, %v7526_v40, %v17859_v51  ;;  %v17862_v44 = vrot.slane %v16902_v63, 5  ;;  %v5726_v43 = vadd.f32 %v16801_v34, %v5725_v57 }
 0x4c1   : > { %v9146_v55 = vpop.f32.mrf.mxu1  ;;  %9181 = vmatmul.mubr.msk.bf16.gmra.mxu1 %vm19250_vm1, %v7533_v62  ;;  %vm19253_vm7 = vnez %v18830_v2  ;;  %vm19254_vm1 = vcmask 1042432  }
 0x4c2   : > { %6733 = vrot.lane.b32.xlu0 %v6505_v19, %s9652_s27  ;;  %v5916_v6 = vadd.f32 %v9146_v55, %v5723_v59  ;;  %v6909_v30 = vsel %vm19251_vm6, %v6899_v60, %v16921_v41  ;;  %v5718_v59 = vadd.f32 %v16801_v34, %v16869_v29  ;;  %vm19255_vm6 = vnez %v18841_v11 }
 0x4c3   : > { %7039 = vrot.lane.b32.xlu1 %v6909_v30, %s9652_s27  ;;  %v5907_v8 = vpop.f32.mrf.mxu1  ;;  %v7159_v29 = vsel %vm19256_vm8, %v7116_v50, %v16816_v37 }
 0x4c4   : > { %v6724_v4 = vpop.permute.xlu1 %6723  ;;  %v5960_v58 = vmax.f32 %v5916_v6, 0.0  ;;  %v5908_v39 = vadd.f32 %v5907_v8, %v5715_v61 }
 0x4c5   : > { %v9147_v40 = vpop.f32.mrf.mxu1 }
 0x4c6   : > { %6559 = vrot.lane.b32.xlu0 %v6505_v19, %s9651_s24  ;;  %v6000_v60 = vsel %vm19253_vm7, %v5960_v58, 0.0  ;;  %v5958_v55 = vmax.f32 %v5908_v39, 0.0  ;;  %v5919_v62 = vadd.f32 %v9147_v40, %v5726_v43  ;;  %v16948_v19 = vsel %vm19254_vm1, %v6620_v13, %v17862_v44 }
 0x4c7   : > { %v8989_v57 = vpack.c.bf16 %v6000_v60, %v6000_v60  ;;  %6967 = vrot.lane.b32.xlu1 %v6909_v30, %s9651_s24  ;;  %v5910_v61 = vpop.f32.mrf.mxu1  ;;  %vm19257_vm7 = vcmask 257024   ;;  %v16958_v30 = vsel %vm19258_vm4, %v7159_v29, %v6724_v4  ;;  %vm19259_vm1 = vnez %v18868_v21 }
 0x4c8   : > { %v16942_v51 = vpop.permute.xlu1 %6549  ;;  %v5998_v12 = vsel %vm19255_vm6, %v5958_v55, 0.0  ;;  %v5961_v34 = vmax.f32 %v5919_v62, 0.0  ;;  %v5911_v31 = vadd.f32 %v5910_v61, %v5718_v59  ;;  %vm19260_vm6 = vcmask 261120   ;;  %vm19261_vm10 = vmmov %vm19257_vm7 }
 0x4c9   : > { %v7030_v39 = vpop.permute.xlu0 %7029  ;;  %6200 = vst.msk [vmem:[#allocation3 + $0xa4] sm:$0xf] %vm19257_vm7, %v8989_v57  ;;  %v8987_v6 = vpack.c.bf16 %v5998_v12, %v5998_v12  ;;  %v7255_v43 = vsel %vm19260_vm6, %v16499_v27, %v6956_v36  ;;  %v17860_v4 = vrot.slane %v16958_v30, 3  ;;  %v19263_v55 = vrot.slane %v16854_v14, 3  ;;  %v17036_v25 = vpop.f32.mrf.mxu1 }
 0x4ca   : > { %6662 = vrot.lane.b32.xlu0 %v16948_v19, %s9650_s14  ;;  %v6001_v13 = vsel %vm19259_vm1, %v5961_v34, 0.0  ;;  %v5959_v8 = vmax.f32 %v5911_v31, 0.0  ;;  %vm19264_vm6 = vcmask 1044480   ;;  %v19265_v57 = vrot.slane %v16835_v9, 3  ;;  %v16990_v34 = vld [vmem:[#allocation3 + $0xac] sm:$0xff]  }
 0x4cb   : > { %6198 = vst.msk [vmem:[#allocation3 + $0x9c] sm:$0xf] %vm19261_vm10, %v8987_v6  ;;  %v8990_v40 = vpack.c.bf16 %v6001_v13, %v6001_v13  ;;  %vm19262_vm10 = vmmov %vm19257_vm7  ;;  %v6506_v13 = vshrl.u32 %v16885_v53, 16 }
 0x4cc   : > { %v16964_v58 = vpop.permute.xlu1 %6652  ;;  %v5999_v50 = vsel %vm15459_vm15, %v5959_v8, 0.0 }
 0x4cd   : > { %v7295_v37 = vsel %vm19256_vm8, %v7255_v43, %v16964_v58  ;;  %v16975_v60 = vpop.permute.xlu0 %6957  ;;  %6201 = vst.msk [vmem:[#allocation3 + $0xa8] sm:$0xf] %vm19257_vm7, %v8990_v40  ;;  %v8988_v27 = vpack.c.bf16 %v5999_v50, %v5999_v50  ;;  %vm19266_vm8 = vmmov %vm19264_vm6  ;;  %v7089_v40 = vrot.slane %v16990_v34, 6  ;;  %vm19268_vm7 = vcmask 1042432  }
 0x4ce   : > { %v16973_v59 = vsel %vm19258_vm4, %v7295_v37, %v7030_v39  ;;  %v7499_v61 = vsel %vm19266_vm8, %v19265_v57, %v17860_v4  ;;  %v16995_v39 = vld [vmem:[#allocation3 + $0xb4] ss:$0 sps:$4 sm:$0x11]   ;;  %v6508_v37 = vor.u32 %v6506_v13, %v16905_v0  ;;  %vm19267_vm4 = vsmask.f32 7424 }
 0x4cf   : > { %v17861_v36 = vrot.slane %v16973_v59, 3  ;;  %6199 = vst.msk [vmem:[#allocation3 + $0xa0] sm:$0xf] %vm19262_vm10, %v8988_v27  ;;  %vm19270_vm10 = vcmask 1041408  }
 0x4d0   : > { %v6245_v14 = vld [vmem:[#allocation3 + $0xa4] sm:$0xf] }
 0x4d1   : > { %v7501_v62 = vsel %vm19264_vm6, %v19263_v55, %v17861_v36  ;;  %v6726_v31 = vpop.permute.xlu0 %6725  ;;  %vm19271_vm6 = vmmov %vm19270_vm10 }
 0x4d2   : > { %7878 = vmatprep.mubr.bf16.mxu0 %v7501_v62  ;;  %v6241_v12 = vld [vmem:[#allocation3 + $0x9c] sm:$0xf]  ;;  %v7091_v62 = vrot.slane %v16995_v39, 6  ;;  %vm19272_vm8 = vmmov %vm19271_vm6 }
 0x4d3   : > { %7879 = vmatmul.mubr.bf16.gmra.mxu0 %v7499_v61  ;;  %v16993_v29 = vcombine.low %v16897_v15, %v6241_v12 }
 0x4d4   : > { %v16997_v6 = vld [vmem:[#allocation3 + $0xa8] sm:$0xf] }
 0x4d5   : > { %v6510_v8 = vshll.u32 %v16993_v29, 16  ;;  %v17002_v9 = vcombine.low %v6245_v14, %v16997_v6  ;;  %v17010_v57 = vpop.permute.xlu0 %6551  ;;  %v6514_v0 = vshrl.u32 %v16993_v29, 16 }
 0x4d6   : > { %v6243_v43 = vld [vmem:[#allocation3 + $0xa0] sm:$0xf] }
 0x4d7   : > { %v6512_v50 = vrot.slane %v6510_v8, 1  ;;  %v8857_v15 = vcombine.low %v6241_v12, %v6243_v43  ;;  %v7087_v27 = vrot.slane %v17002_v9, 6  ;;  %v17007_v55 = vcombine.low %v6243_v43, %v6245_v14 }
 0x4d8   : > { %v17016_v36 = vrot.slane %v17002_v9, 5 }
 0x4d9   : > { %v6513_v61 = vsel %vm19267_vm4, %v6508_v37, %v6512_v50  ;;  %v17013_v4 = vrot.slane %v8857_v15, 5  ;;  %v7085_v44 = vrot.slane %v8857_v15, 6  ;;  %v6686_v12 = vshll.u32 %v17007_v55, 16  ;;  %vm19273_vm4 = vmmov %vm19271_vm6 }
 0x4da   : > { %6735 = vrot.lane.b32.xlu1 %v6513_v61, %s9652_s27  ;;  %v6911_v14 = vshrl.u32 %v8857_v15, 16  ;;  %v6914_v13 = vshll.u32 %v8857_v15, 16  ;;  %v19269_v37 = vrot.slane %v16902_v63, 6  ;;  %v7090_v45 = vsel %vm19272_vm8, %v7087_v27, %v7089_v40 }
 0x4db   : > { %v17024_v8 = vsel %vm19268_vm7, %v17013_v4, %v17016_v36  ;;  %v7088_v2 = vsel %vm19271_vm6, %v7085_v44, %v7087_v27  ;;  %v17033_v22 = vrot.slane %v6686_v12, 1  ;;  %v7092_v15 = vsel %vm19273_vm4, %v7089_v40, %v7091_v62  ;;  %v17049_v62 = vpop.permute.xlu0 %6654 }
 0x4dc   : > { %v7086_v21 = vsel %vm19270_vm10, %v19269_v37, %v7085_v44  ;;  %6984 = vrot.lane.b32.xlu0 %v17024_v8, %s9650_s14  ;;  %v7544_v18 = vrot.slane %v7088_v2, 3  ;;  %v17038_v7 = vor.u32 %v6514_v0, %v6512_v50  ;;  %v6913_v46 = vrot.slane %v6911_v14, 5  ;;  %v7993_v0 = vpop.f32.mrf.mxu1 }
 0x4dd   : > { %v7538_v11 = vrot.slane %v7086_v21, 3  ;;  %v6916_v10 = vrot.slane %v6914_v13, 6  ;;  %vm19274_vm7 = vcmask 261120   ;;  %v19275_v27 = vrot.slane %v16914_v32, 3 }
 0x4de   : > { %v7118_v44 = vsel %vm19274_vm7, %v16440_v52, %v16942_v51  ;;  %6561 = vrot.lane.b32.xlu1 %v6513_v61, %s9651_s24  ;;  %vm19276_vm10 = vcmask 1044480   ;;  %v7550_v12 = vrot.slane %v7090_v45, 3  ;;  %v6920_v40 = vshrl.u32 %v17002_v9, 16  ;;  %vm19278_vm8 = vmmov %vm19274_vm7 }
 0x4df   : > { %v7539_v2 = vsel %vm19276_vm10, %v19275_v27, %v7538_v11  ;;  %vm19277_vm6 = vmmov %vm19276_vm10  ;;  %vm19279_vm4 = vsmask.f32 7424  ;;  %v6917_v52 = vor.u32 %v6916_v10, %v6913_v46  ;;  %v6923_v51 = vshll.u32 %v17002_v9, 16 }
 0x4e0   : > { %v7545_v21 = vsel %vm19277_vm6, %v7538_v11, %v7544_v18  ;;  %9184 = vmatprep.mubr.msk.bf16.mxu1 %vm19278_vm8, %v7539_v2  ;;  %v6689_v50 = vsel %vm19279_vm4, %v17038_v7, %v17033_v22  ;;  %v8837_v61 = vcombine.low %v6243_v43, %v6243_v43  ;;  %vm19280_vm10 = vmmov %vm19277_vm6  ;;  %vm19282_vm8 = vcmask 523264   ;;  %v7032_v43 = vpop.permute.xlu1 %7031 }
 0x4e1   : > { %9185 = vmatmul.mubr.msk.bf16.gmra.mxu1 %vm19274_vm7, %v7545_v21  ;;  %6737 = vrot.lane.b32.xlu0 %v6689_v50, %s9652_s27  ;;  %v7551_v11 = vsel %vm19280_vm10, %v7544_v18, %v7550_v12  ;;  %vm19281_vm6 = vmmov %vm19274_vm7  ;;  %v7161_v32 = vsel %vm19282_vm8, %v7118_v44, %v16844_v26  ;;  %v19284_v10 = vrot.slane %v16902_v63, 5  ;;  %vm19285_vm4 = vcmask 1042432   ;;  %v9155_v50 = vpop.f32.mrf.mxu1 }
 0x4e2   : > { %v7258_v45 = vsel %vm19281_vm6, %v16588_v49, %v16975_v60  ;;  %vm19283_vm1 = vmmov %vm19281_vm6  ;;  %v17867_v9 = vrot.slane %v16990_v34, 5  ;;  %vm19286_vm7 = vcmask 785408   ;;  %v7556_v26 = vrot.slane %v7092_v15, 3 }
 0x4e3   : > { %9188 = vmatprep.mubr.msk.bf16.mxu1 %vm19283_vm1, %v7551_v11  ;;  %v17069_v46 = vsel %vm19285_vm4, %v19284_v10, %v17013_v4  ;;  %v17073_v18 = vsel %vm19286_vm7, %v7161_v32, %v6726_v31  ;;  %vm19287_vm10 = vmmov %vm19282_vm8  ;;  %v6994_v60 = vshrl.u32 %v16990_v34, 16  ;;  %v6997_v63 = vshll.u32 %v16990_v34, 16  ;;  %v17087_v31 = vld [vmem:[%s17527_s6] ss:$0 sm:$0xff] }
 0x4e4   : > { %v7296_v49 = vsel %vm19287_vm10, %v7258_v45, %v17049_v62  ;;  %6664 = vrot.lane.b32.xlu1 %v17069_v46, %s9650_s14  ;;  %vm19288_vm1 = vmmov %vm19286_vm7  ;;  %vm19289_vm6 = vsmask.f32 2304  ;;  %v6922_v37 = vrot.slane %v6920_v40, 5  ;;  %v6925_v44 = vrot.slane %v6923_v51, 6 }
 0x4e5   : > { %v17082_v14 = vsel %vm19288_vm1, %v7296_v49, %v7032_v43  ;;  %v6918_v13 = vsel %vm19289_vm6, %v16921_v41, %v6917_v52  ;;  %v6518_v27 = vshll.u32 %v8837_v61, 16  ;;  %vm19290_vm8 = vmmov %vm19285_vm4  ;;  %v6996_v41 = vrot.slane %v6994_v60, 5  ;;  %v9564_v51 = vld [vmem:[#allocation3 + $0xac] ss:$0 sps:$4 sm:$0x11]  }
 0x4e6   : > { %7041 = vrot.lane.b32.xlu0 %v6918_v13, %s9652_s27  ;;  %v7506_v21 = vrot.slane %v17082_v14, 3  ;;  %v6981_v11 = vsel %vm19290_vm8, %v17016_v36, %v17867_v9  ;;  %v6999_v40 = vrot.slane %v6997_v63, 6  ;;  %v19291_v10 = vrot.slane %v16973_v59, 3 }
 0x4e7   : > { %v7800_v2 = vpop.f32.mrf.mxu0  ;;  %vm19292_vm4 = vcmask 1044480   ;;  %v6926_v15 = vor.u32 %v6925_v44, %v6922_v37  ;;  %v6520_v24 = vrot.slane %v6518_v27, 1  ;;  %vm19294_vm10 = vcmask 261120  }
 0x4e8   : > { %v7801_v45 = vadd.f32 %v17087_v31, %v7800_v2  ;;  %6986 = vrot.lane.b32.xlu1 %v6981_v11, %s9650_s14  ;;  %v7507_v43 = vsel %vm19292_vm4, %v19291_v10, %v7506_v21  ;;  %vm19293_vm7 = vmmov %vm19292_vm4  ;;  %v19295_v60 = vrot.slane %v17073_v18, 3  ;;  %v19296_v63 = vrot.slane %v16958_v30, 3  ;;  %v7996_v11 = vpop.f32.mrf.mxu1 }
 0x4e9   : > { %v7802_v32 = vpop.f32.mrf.mxu0  ;;  %v7557_v49 = vsel %vm19293_vm7, %v7550_v12, %v7556_v26  ;;  %7886 = vmatprep.mubr.bf16.mxu0 %v7507_v43  ;;  %vm19297_vm1 = vmmov %vm19292_vm4  ;;  %v6927_v12 = vsel %vm19289_vm6, %v6917_v52, %v6926_v15  ;;  %v19298_v26 = vld [vmem:[#allocation28_spill] sm:$0xff]  ;;  %v6522_v44 = vshrl.u32 %v8837_v61, 16  ;;  %v6929_v27 = vshll.u32 %v9564_v51, 16  ;;  %v19300_v43 = vld [vmem:[#allocation37_spill] sm:$0xff]  ;;  %v6960_v61 = vpop.permute.xlu1 %6959 }
 0x4ea   : > { %v7994_v9 = vadd.f32 %v7993_v0, %v7801_v45  ;;  %9189 = vmatmul.mubr.msk.bf16.gmra.mxu1 %vm19294_vm10, %v7557_v49  ;;  %6969 = vrot.lane.b32.xlu0 %v6918_v13, %s9651_s24  ;;  %v7505_v2 = vsel %vm19297_vm1, %v19296_v63, %v19295_v60  ;;  %vm19299_vm8 = vsmask.f32 7424  ;;  %v7000_v30 = vor.u32 %v6999_v40, %v6996_v41  ;;  %vm19302_vm4 = vmmov %vm19289_vm6 }
 0x4eb   : > { %v7803_v42 = vpop.f32.mrf.mxu0  ;;  %7887 = vmatmul.mubr.bf16.gmra.mxu0 %v7505_v2  ;;  %v6521_v45 = vsel %vm19299_vm8, %v17038_v7, %v6520_v24  ;;  %v8860_v32 = vcombine.low %v16997_v6, %v16997_v6  ;;  %v6524_v52 = vor.u32 %v6522_v44, %v6520_v24  ;;  %v6931_v63 = vrot.slane %v6929_v27, 6  ;;  %vm19306_vm7 = vmmov %vm19294_vm10 }
 0x4ec   : > { %v7804_v59 = vadd.f32 %v17087_v31, %v7803_v42  ;;  %v8152_v37 = vadd.f32 %v7994_v9, %v19298_v26  ;;  %7043 = vrot.lane.b32.xlu1 %v6927_v12, %s9652_s27  ;;  %v7001_v6 = vsel %vm19302_vm4, %v6926_v15, %v7000_v30  ;;  %v6690_v2 = vshrl.u32 %v17007_v55, 16  ;;  %vm19311_vm1 = vmmov %vm19306_vm7 }
 0x4ed   : > { %v7805_v0 = vpop.f32.mrf.mxu0  ;;  %v6694_v24 = vshll.u32 %v8860_v32, 16  ;;  %vm19312_vm6 = vmmov %vm19311_vm1 }
 0x4ee   : > { %v7997_v13 = vadd.f32 %v7996_v11, %v7804_v59  ;;  %v8192_v42 = vmax.f32 %v8152_v37, 0.0  ;;  %6563 = vrot.lane.b32.xlu0 %v6521_v45, %s9651_s24  ;;  %v19304_v37 = vld [vmem:[#allocation31_spill] sm:$0xff] }
 0x4f0   : > { %v7808_v10 = vpop.f32.mrf.mxu0  ;;  %v8153_v9 = vadd.f32 %v7997_v13, %v19300_v43  ;;  %6565 = vrot.lane.b32.xlu1 %v6524_v52, %s9651_s24  ;;  %v8232_v7 = vsel %vm18916_vm14, %v8192_v42, 0.0  ;;  %v6692_v13 = vor.u32 %v6690_v2, %v17033_v22  ;;  %vm19305_vm14 = vmmov %vm19294_vm10  ;;  %v6728_v42 = vpop.permute.xlu1 %6727 }
 0x4f1   : > { %v7809_v49 = vadd.f32 %v17087_v31, %v7808_v10  ;;  %v8272_v45 = vsel %vm19305_vm14, %v8232_v7, 0.0  ;;  %vm19310_vm10 = vmmov %vm19299_vm8 }
 0x4f2   : > { %v7810_v60 = vpop.f32.mrf.mxu0  ;;  %v8193_v41 = vmax.f32 %v8153_v9, 0.0  ;;  %7045 = vrot.lane.b32.xlu0 %v7001_v6, %s9652_s27  ;;  %vm19316_vm8 = vmmov %vm19302_vm4 }
 0x4f3   : > { %v8002_v40 = vadd.f32 %v17036_v25, %v7809_v49  ;;  %v7003_v25 = vshll.u32 %v16995_v39, 16  ;;  %v6696_v49 = vrot.slane %v6694_v24, 1  ;;  %v19309_v39 = vld [vmem:[#allocation36_spill] sm:$0xff]  ;;  %vm19318_vm14 = vmmov %vm19311_vm1 }
 0x4f4   : > { %v7811_v59 = vpop.f32.mrf.mxu0  ;;  %v8233_v26 = vsel %vm18924_vm12, %v8193_v41, 0.0  ;;  %6971 = vrot.lane.b32.xlu1 %v6927_v12, %s9651_s24  ;;  %vm19307_vm12 = vmmov %vm19302_vm4  ;;  %v7120_v12 = vsel %vm19311_vm1, %v16544_v23, %v17010_v57  ;;  %vm19317_vm4 = vcmask 785408  }
 0x4f5   : > { %v8154_v0 = vadd.f32 %v8002_v40, %v19304_v37  ;;  %v7812_v44 = vadd.f32 %v17087_v31, %v7811_v59  ;;  %v8273_v27 = vsel %vm19306_vm7, %v8233_v26, 0.0  ;;  %v6932_v9 = vsel %vm19307_vm12, %v6926_v15, %v6931_v63  ;;  %v6554_v15 = vpop.permute.xlu1 %6553  ;;  %v7034_v24 = vpop.permute.xlu0 %7033  ;;  %vm19319_vm7 = vmmov %vm19311_vm1  ;;  %v19330_v59 = vld [vmem:[#allocation43_spill] sm:$0xff] }
 0x4f6   : > { %v7813_v55 = vpop.f32.mrf.mxu0  ;;  %v8274_v10 = vadd.f32 %v8273_v27, %v8272_v45  ;;  %6973 = vrot.lane.b32.xlu0 %v6932_v9, %s9651_s24  ;;  %v6697_v7 = vsel %vm19310_vm10, %v6692_v13, %v6696_v49  ;;  %v7005_v41 = vrot.slane %v7003_v25, 6  ;;  %v19313_v63 = vrot.slane %v16990_v34, 5  ;;  %v9158_v37 = vpop.f32.mrf.mxu1 }
 0x4f7   : > { %v8194_v52 = vmax.f32 %v8154_v0, 0.0  ;;  %v8005_v43 = vadd.f32 %v9155_v50, %v7812_v44  ;;  %v7261_v0 = vsel %vm19319_vm7, %v16646_v47, %v6960_v61  ;;  %v6698_v34 = vshrl.u32 %v8860_v32, 16 }
 0x4f8   : > { %6739 = vrot.lane.b32.xlu1 %v6697_v7, %s9652_s27  ;;  %v7006_v23 = vsel %vm19316_vm8, %v7000_v30, %v7005_v41  ;;  %vm19322_vm10 = vcmask 1044480   ;;  %v19323_v32 = vrot.slane %v17073_v18, 3 }
 0x4f9   : > { %v8234_v22 = vsel %vm18931_vm0, %v8194_v52, 0.0  ;;  %v8155_v51 = vadd.f32 %v8005_v43, %v19309_v39  ;;  %vm19314_vm0 = vcmask 523264   ;;  %v17165_v44 = vpop.permute.xlu1 %6656  ;;  %v6700_v30 = vor.u32 %v6698_v34, %v6696_v49  ;;  %v6962_v27 = vpop.permute.xlu0 %6961  ;;  %vm19324_vm1 = vmmov %vm19322_vm10  ;;  %v19325_v39 = vld [vmem:[#allocation41_spill] sm:$0xff] }
 0x4fa   : > { %v8275_v40 = vsel %vm19312_vm6, %v8234_v22, 0.0  ;;  %6988 = vrot.lane.b32.xlu0 %v19313_v63, %s9650_s14  ;;  %v7163_v2 = vsel %vm19314_vm0, %v7120_v12, %v16964_v58  ;;  %vm19320_vm12 = vmmov %vm19314_vm0  ;;  %v7122_v49 = vsel %vm19312_vm6, %v16578_v54, %v6554_v15 }
 0x4fb   : > { %v8276_v50 = vadd.f32 %v8275_v40, %v8274_v10  ;;  %v8195_v6 = vmax.f32 %v8155_v51, 0.0  ;;  %v7205_v57 = vsel %vm19317_vm4, %v7163_v2, %v6728_v42  ;;  %v7297_v13 = vsel %vm19320_vm12, %v7261_v0, %v17165_v44  ;;  %v8009_v42 = vpop.f32.mrf.mxu1 }
 0x4fc   : > { %6666 = vrot.lane.b32.xlu1 %v17013_v4, %s9650_s14  ;;  %v7510_v25 = vrot.slane %v7205_v57, 3  ;;  %v7165_v18 = vsel %vm19314_vm0, %v7122_v49, %v17049_v62 }
 0x4fd   : > { %v8235_v11 = vsel %vm18935_vm2, %v8195_v6, 0.0  ;;  %vm19321_vm2 = vmmov %vm19317_vm4  ;;  %v9159_v43 = vpop.f32.mrf.mxu1 }
 0x4fe   : > { %v8277_v26 = vsel %vm19318_vm14, %v8235_v11, 0.0  ;;  %7047 = vrot.lane.b32.xlu0 %v7006_v23, %s9652_s27  ;;  %v7335_v45 = vsel %vm19321_vm2, %v7297_v13, %v7034_v24  ;;  %v6730_v4 = vpop.permute.xlu0 %6729  ;;  %v7511_v61 = vsel %vm19324_vm1, %v19323_v32, %v7510_v25  ;;  %vm19326_vm8 = vmmov %vm19321_vm2  ;;  %v19334_v13 = vld [vmem:[#allocation40_spill] sm:$0xff] }
 0x4ff   : > { %v8278_v58 = vadd.f32 %v8277_v26, %v8276_v50  ;;  %v7512_v55 = vrot.slane %v7335_v45, 3  ;;  %v8012_v7 = vpop.f32.mrf.mxu1  ;;  %v17186_v41 = vsel %vm19326_vm8, %v7165_v18, %v6730_v4  ;;  %vm19327_vm4 = vmmov %vm19312_vm6 }
 0x500   : > { %6741 = vrot.lane.b32.xlu1 %v6700_v30, %s9652_s27  ;;  %v7264_v54 = vsel %vm19327_vm4, %v16726_v56, %v6962_v27  ;;  %vm19328_vm14 = vmmov %vm19314_vm0  ;;  %v7516_v11 = vrot.slane %v17186_v41, 3  ;;  %v19362_v41 = vld [vmem:[#allocation32_spill] sm:$0xff]  ;;  %s17480_s27 = scalar_lea.hbm %s17530_s9, %s8908_s29 }
 0x501   : > { %v7513_v47 = vsel %vm19322_vm10, %v7506_v21, %v7512_v55  ;;  %vm19331_vm7 = vmmov %vm19321_vm2  ;;  %vm19335_vm10 = vnez %v19334_v13 }
 0x502   : > { %7894 = vmatprep.mubr.bf16.mxu0 %v7513_v47  ;;  %v7816_v10 = vpop.f32.mrf.mxu0  ;;  %v6556_v22 = vpop.permute.xlu0 %6555  ;;  %vm19332_vm12 = vmmov %vm19327_vm4 }
 0x503   : > { %7895 = vmatmul.mubr.bf16.gmra.mxu0 %v7511_v61  ;;  %v7817_v52 = vadd.f32 %v17087_v31, %v7816_v10  ;;  %vm19333_vm2 = vmmov %vm19324_vm1  ;;  %v19338_v10 = vld [vmem:[#allocation38_spill] sm:$0xff] }
 0x504   : > { %v7818_v9 = vpop.f32.mrf.mxu0  ;;  %v7036_v6 = vpop.permute.xlu1 %7035 }
 0x505   : > { %v8010_v60 = vadd.f32 %v8009_v42, %v7817_v52 }
 0x506   : > { %v7819_v14 = vpop.f32.mrf.mxu0  ;;  %v17190_v15 = vpop.permute.xlu0 %6658 }
 0x507   : > { %v8156_v21 = vadd.f32 %v8010_v60, %v19325_v39  ;;  %v7820_v51 = vadd.f32 %v17087_v31, %v7819_v14  ;;  %v7298_v63 = vsel %vm19328_vm14, %v7264_v54, %v17190_v15  ;;  %v19339_v14 = vld [vmem:[#allocation27_spill] sm:$0xff]  ;;  %v19341_v39 = vld [vmem:[#allocation42_spill] sm:$0xff]  ;;  %v9162_v54 = vpop.f32.mrf.mxu1 }
 0x508   : > { %v7821_v12 = vpop.f32.mrf.mxu0  ;;  %v17199_v23 = vsel %vm19331_vm7, %v7298_v63, %v7036_v6  ;;  %vm19340_vm6 = vnez %v19339_v14  ;;  %v6964_v6 = vpop.permute.xlu1 %6963  ;;  %vm19347_vm7 = vcmask 523264  }
 0x509   : > { %v8196_v40 = vmax.f32 %v8156_v21, 0.0  ;;  %v8013_v50 = vadd.f32 %v8012_v7, %v7820_v51  ;;  %v7518_v56 = vrot.slane %v17199_v23, 3  ;;  %v19343_v12 = vld [vmem:[#allocation39_spill] sm:$0xff]  ;;  %v8025_v63 = vpop.f32.mrf.mxu1 }
 0x50a   : > { %vm19344_vm8 = vnez %v19343_v12 }
 0x50b   : > { %v8236_v24 = vsel %vm18940_vm3, %v8196_v40, 0.0  ;;  %v8157_v62 = vadd.f32 %v8013_v50, %v19330_v59  ;;  %v7519_v34 = vsel %vm19333_vm2, %v7512_v55, %v7518_v56  ;;  %vm19336_vm3 = vmmov %vm19324_vm1  ;;  %v9163_v59 = vpop.f32.mrf.mxu1 }
 0x50c   : > { %v8279_v57 = vsel %vm19332_vm12, %v8236_v24, 0.0  ;;  %7902 = vmatprep.mubr.bf16.mxu0 %v7519_v34  ;;  %v7517_v45 = vsel %vm19336_vm3, %v7510_v25, %v7516_v11  ;;  %vm19337_vm1 = vmmov %vm19327_vm4  ;;  %vm19349_vm12 = vcmask 785408  }
 0x50d   : > { %v8280_v26 = vadd.f32 %v8279_v57, %v8278_v58  ;;  %v8197_v0 = vmax.f32 %v8157_v62, 0.0  ;;  %v7824_v42 = vpop.f32.mrf.mxu0  ;;  %7903 = vmatmul.mubr.bf16.gmra.mxu0 %v7517_v45  ;;  %vm19342_vm0 = vmmov %vm19337_vm1 }
 0x50e   : > { %v7825_v4 = vadd.f32 %v17087_v31, %v7824_v42  ;;  %vm19345_vm4 = vmmov %vm19342_vm0  ;;  %v8028_v42 = vpop.f32.mrf.mxu1 }
 0x50f   : > { %v8237_v30 = vsel %vm19335_vm10, %v8197_v0, 0.0  ;;  %v7826_v32 = vpop.f32.mrf.mxu0  ;;  %vm19346_vm14 = vmmov %vm19342_vm0 }
 0x510   : > { %v8281_v27 = vsel %vm19337_vm1, %v8237_v30, 0.0  ;;  %v8018_v58 = vadd.f32 %v9158_v37, %v7825_v4  ;;  %v7124_v62 = vsel %vm19346_vm14, %v16689_v35, %v6556_v22  ;;  %v19348_v30 = vld [vmem:[#allocation11_spill] sm:$0xff]  ;;  %vm19350_vm2 = vmmov %vm19342_vm0 }
 0x511   : > { %v8282_v47 = vadd.f32 %v8281_v27, %v8280_v26  ;;  %v7827_v61 = vpop.f32.mrf.mxu0  ;;  %v7167_v34 = vsel %vm19347_vm7, %v7124_v62, %v17165_v44  ;;  %v7267_v32 = vsel %vm19350_vm2, %v16787_v17, %v6964_v6  ;;  %vm19351_vm10 = vmmov %vm19347_vm7 }
 0x512   : > { %v8158_v55 = vadd.f32 %v8018_v58, %v19338_v10  ;;  %v7828_v52 = vadd.f32 %v17087_v31, %v7827_v61  ;;  %vm19352_vm3 = vmmov %vm19349_vm12 }
 0x513   : > { %v7829_v9 = vpop.f32.mrf.mxu0  ;;  %vm19355_vm1 = vmmov %vm19342_vm0 }
 0x514   : > { %v8198_v49 = vmax.f32 %v8158_v55, 0.0  ;;  %v8021_v60 = vadd.f32 %v9159_v43, %v7828_v52  ;;  %vm19363_vm14 = vmmov %vm19347_vm7 }
 0x515   : > { %vm19364_vm7 = vmmov %vm19352_vm3 }
 0x516   : > { %v8238_v25 = vsel %vm19340_vm6, %v8198_v49, 0.0  ;;  %v8159_v21 = vadd.f32 %v8021_v60, %v19341_v39  ;;  %v19354_v49 = vld [vmem:[#allocation46_spill] sm:$0xff]  ;;  %vm19356_vm6 = vcmask 1044480   ;;  %vm19366_vm2 = vmmov %vm19351_vm10 }
 0x517   : > { %v8283_v51 = vsel %vm19342_vm0, %v8238_v25, 0.0  ;;  %vm19357_vm0 = vmmov %vm19356_vm6 }
 0x518   : > { %v8284_v7 = vadd.f32 %v8283_v51, %v8282_v47  ;;  %v8199_v18 = vmax.f32 %v8159_v21, 0.0 }
 0x51a   : > { %v8239_v37 = vsel %vm19344_vm8, %v8199_v18, 0.0  ;;  %v19358_v18 = vld [vmem:[#allocation44_spill] sm:$0xff] }
 0x51b   : > { %v8285_v40 = vsel %vm19345_vm4, %v8239_v37, 0.0  ;;  %vm19359_vm8 = vnez %v19358_v18  ;;  %vm19361_vm4 = vmmov %vm19355_vm1 }
 0x51c   : > { %v8286_v50 = vadd.f32 %v8285_v40, %v8284_v7 }
 0x522   : > { %v7832_v43 = vpop.f32.mrf.mxu0 }
 0x523   : > { %v7833_v24 = vadd.f32 %v17087_v31, %v7832_v43 }
 0x524   : > { %v7834_v23 = vpop.f32.mrf.mxu0 }
 0x525   : > { %v8026_v26 = vadd.f32 %v8025_v63, %v7833_v24 }
 0x526   : > { %v7835_v0 = vpop.f32.mrf.mxu0 }
 0x527   : > { %v8160_v45 = vadd.f32 %v8026_v26, %v19348_v30  ;;  %v7836_v27 = vadd.f32 %v17087_v31, %v7835_v0 }
 0x528   : > { %v6732_v2 = vpop.permute.xlu1 %6731  ;;  %v7837_v4 = vpop.f32.mrf.mxu0 }
 0x529   : > { %v7209_v47 = vsel %vm19349_vm12, %v7167_v34, %v6732_v2  ;;  %v8200_v22 = vmax.f32 %v8160_v45, 0.0  ;;  %v8029_v58 = vadd.f32 %v8028_v42, %v7836_v27  ;;  %vm19365_vm12 = vmmov %vm19355_vm1  ;;  %v19369_v42 = vld [vmem:[#allocation45_spill] sm:$0xff] }
 0x52a   : > { %v7522_v44 = vrot.slane %v7209_v47, 3 }
 0x52b   : > { %v8240_v9 = vsel %vm12733_vm5, %v8200_v22, 0.0  ;;  %v8161_v60 = vadd.f32 %v8029_v58, %v19354_v49  ;;  %vm19360_vm5 = vmmov %vm19355_vm1 }
 0x52c   : > { %v6558_v57 = vpop.permute.xlu1 %6557  ;;  %v7038_v13 = vpop.permute.xlu0 %7037  ;;  %v8287_v25 = vsel %vm19355_vm1, %v8240_v9, 0.0  ;;  %v7523_v7 = vsel %vm19357_vm0, %v7516_v11, %v7522_v44 }
 0x52d   : > { %v8288_v17 = vadd.f32 %v8287_v25, %v8286_v50  ;;  %v8201_v39 = vmax.f32 %v8161_v60, 0.0  ;;  %v9166_v60 = vpop.f32.mrf.mxu1 }
 0x52f   : > { %v8241_v12 = vsel %vm19359_vm8, %v8201_v39, 0.0  ;;  %v8041_v39 = vpop.f32.mrf.mxu1 }
 0x530   : > { %v17230_v35 = vpop.permute.xlu1 %6660  ;;  %v6966_v55 = vpop.permute.xlu0 %6965  ;;  %v8289_v40 = vsel %vm19360_vm5, %v8241_v12, 0.0  ;;  %vm19374_vm5 = vmmov %vm19355_vm1 }
 0x531   : > { %v7299_v61 = vsel %vm19351_vm10, %v7267_v32, %v17230_v35  ;;  %v7840_v37 = vpop.f32.mrf.mxu0  ;;  %v8290_v63 = vadd.f32 %v8289_v40, %v8288_v17  ;;  %v7270_v30 = vsel %vm19365_vm12, %v16895_v3, %v6966_v55  ;;  %v19371_v3 = vld [vmem:[#allocation7_spill] sm:$0xff]  ;;  %v17270_v12 = vpop.f32.mrf.mxu1  ;;  %vm19378_vm12 = vmmov %vm19352_vm3 }
 0x532   : > { %v7339_v10 = vsel %vm19352_vm3, %v7299_v61, %v7038_v13  ;;  %v7841_v6 = vadd.f32 %v17087_v31, %v7840_v37 }
 0x533   : > { %v7524_v14 = vrot.slane %v7339_v10, 3  ;;  %v7842_v50 = vpop.f32.mrf.mxu0 }
 0x534   : > { %v6734_v51 = vpop.permute.xlu0 %6733  ;;  %v8034_v2 = vadd.f32 %v9162_v54, %v7841_v6 }
 0x535   : > { %v7525_v21 = vsel %vm19356_vm6, %v7518_v56, %v7524_v14  ;;  %v7126_v56 = vsel %vm19361_vm4, %v16716_v16, %v6558_v57  ;;  %v7843_v24 = vpop.f32.mrf.mxu0  ;;  %v7040_v16 = vpop.permute.xlu1 %7039  ;;  %v19367_v57 = vld [vmem:[#allocation16_spill] sm:$0xff]  ;;  %vm19370_vm6 = vmmov %vm19357_vm0  ;;  %vm19372_vm0 = vnez %v19371_v3 }
 0x536   : > { %7910 = vmatprep.mubr.bf16.mxu0 %v7525_v21  ;;  %v8162_v62 = vadd.f32 %v8034_v2, %v19362_v41  ;;  %v7844_v11 = vadd.f32 %v17087_v31, %v7843_v24  ;;  %v7169_v23 = vsel %vm19363_vm14, %v7126_v56, %v17190_v15  ;;  %vm19368_vm10 = vnez %v19367_v57  ;;  %vm19373_vm8 = vmmov %vm19370_vm6  ;;  %v19380_v24 = vld [vmem:[#allocation35_spill] sm:$0xff]  ;;  %v19383_v57 = vld [vmem:[#allocation49_spill] sm:$0xff] }
 0x537   : > { %7911 = vmatmul.mubr.bf16.gmra.mxu0 %v7523_v7  ;;  %v7845_v26 = vpop.f32.mrf.mxu0  ;;  %v7211_v0 = vsel %vm19364_vm7, %v7169_v23, %v6734_v51  ;;  %vm19375_vm4 = vmmov %vm19355_vm1 }
 0x538   : > { %v6560_v43 = vpop.permute.xlu0 %6559  ;;  %v8202_v34 = vmax.f32 %v8162_v62, 0.0  ;;  %v8037_v13 = vadd.f32 %v9163_v59, %v7844_v11  ;;  %v7528_v4 = vrot.slane %v7211_v0, 3  ;;  %vm19376_vm14 = vmmov %vm19366_vm2  ;;  %v8044_v62 = vpop.f32.mrf.mxu1 }
 0x539   : > { %v6968_v49 = vpop.permute.xlu1 %6967  ;;  %v7128_v21 = vsel %vm19375_vm4, %v16840_v1, %v6560_v43  ;;  %vm19377_vm7 = vmmov %vm19355_vm1 }
 0x53a   : > { %v8242_v27 = vsel %vm19368_vm10, %v8202_v34, 0.0  ;;  %v8163_v47 = vadd.f32 %v8037_v13, %v19369_v42  ;;  %v7529_v55 = vsel %vm19373_vm8, %v7522_v44, %v7528_v4  ;;  %v7171_v44 = vsel %vm19376_vm14, %v7128_v21, %v17230_v35  ;;  %vm19379_vm10 = vmmov %vm19355_vm1 }
 0x53b   : > { %v8291_v32 = vsel %vm19355_vm1, %v8242_v27, 0.0  ;;  %v7273_v40 = vsel %vm19377_vm7, %v16948_v19, %v6968_v49  ;;  %vm19381_vm1 = vmmov %vm19366_vm2 }
 0x53c   : > { %v6663_v45 = vpop.permute.xlu0 %6662  ;;  %v8292_v58 = vadd.f32 %v8291_v32, %v8290_v63  ;;  %v8203_v59 = vmax.f32 %v8163_v47, 0.0  ;;  %vm19384_vm8 = vmmov %vm19375_vm4 }
 0x53d   : > { %v7300_v54 = vsel %vm19366_vm2, %v7270_v30, %v6663_v45  ;;  %vm19386_vm14 = vmmov %vm19352_vm3 }
 0x53e   : > { %v7341_v15 = vsel %vm19352_vm3, %v7300_v54, %v7040_v16  ;;  %v8243_v10 = vsel %vm19372_vm0, %v8203_v59, 0.0  ;;  %vm19382_vm0 = vnez %v19006_v38  ;;  %vm19387_vm7 = vmmov %vm19381_vm1 }
 0x53f   : > { %v7530_v22 = vrot.slane %v7341_v15, 3  ;;  %v8293_v52 = vsel %vm19374_vm5, %v8243_v10, 0.0  ;;  %vm19385_vm5 = vmmov %vm19370_vm6  ;;  %v19389_v10 = vld [vmem:[#allocation47_spill] sm:$0xff] }
 0x540   : > { %v8294_v9 = vadd.f32 %v8293_v52, %v8292_v58 }
 0x541   : > { %v7531_v61 = vsel %vm19370_vm6, %v7524_v14, %v7530_v22 }
 0x542   : > { %7918 = vmatprep.mubr.bf16.mxu0 %v7531_v61 }
 0x543   : > { %7919 = vmatmul.mubr.bf16.gmra.mxu0 %v7529_v55 }
 0x54c   : > { %v6736_v25 = vpop.permute.xlu1 %6735 }
 0x54d   : > { %v7213_v6 = vsel %vm19378_vm12, %v7171_v44, %v6736_v25  ;;  %vm19388_vm12 = vmmov %vm19352_vm3  ;;  %v19394_v44 = vld [vmem:[#allocation10_spill] sm:$0xff] }
 0x54e   : > { %v6985_v17 = vpop.permute.xlu0 %6984  ;;  %v7534_v11 = vrot.slane %v7213_v6, 3 }
 0x550   : > { %v6562_v51 = vpop.permute.xlu1 %6561  ;;  %v7535_v47 = vsel %vm19385_vm5, %v7528_v4, %v7534_v11 }
 0x551   : > { %v7130_v2 = vsel %vm19379_vm10, %v16885_v53, %v6562_v51  ;;  %vm19391_vm10 = vmmov %vm19375_vm4 }
 0x552   : > { %v7848_v14 = vpop.f32.mrf.mxu0  ;;  %v7173_v30 = vsel %vm19381_vm1, %v7130_v2, %v6663_v45 }
 0x553   : > { %v6738_v7 = vpop.permute.xlu0 %6737  ;;  %v7849_v18 = vadd.f32 %v17087_v31, %v7848_v14 }
 0x554   : > { %v7850_v37 = vpop.f32.mrf.mxu0  ;;  %v7215_v32 = vsel %vm19386_vm14, %v7173_v30, %v6738_v7  ;;  %vm19402_vm14 = vmmov %vm19387_vm7 }
 0x555   : > { %v8042_v50 = vadd.f32 %v8041_v39, %v7849_v18  ;;  %v7540_v52 = vrot.slane %v7215_v32, 3 }
 0x556   : > { %v17277_v63 = vpop.permute.xlu1 %6664  ;;  %v7851_v56 = vpop.f32.mrf.mxu0 }
 0x557   : > { %v7301_v1 = vsel %vm19366_vm2, %v7273_v40, %v17277_v63  ;;  %v8164_v41 = vadd.f32 %v8042_v50, %v19380_v24  ;;  %v7852_v35 = vadd.f32 %v17087_v31, %v7851_v56  ;;  %vm19390_vm2 = vnez %v19389_v10 }
 0x558   : > { %v7042_v43 = vpop.permute.xlu0 %7041  ;;  %v7853_v23 = vpop.f32.mrf.mxu0 }
 0x559   : > { %v7343_v19 = vsel %vm19352_vm3, %v7301_v1, %v7042_v43  ;;  %v8204_v34 = vmax.f32 %v8164_v41, 0.0  ;;  %v8045_v13 = vadd.f32 %v8044_v62, %v7852_v35  ;;  %vm19392_vm3 = vmmov %vm19385_vm5  ;;  %v19399_v62 = vld [vmem:[#allocation33_spill] sm:$0xff] }
 0x55a   : > { %v7536_v26 = vrot.slane %v7343_v19, 3  ;;  %v6987_v0 = vpop.permute.xlu1 %6986  ;;  %vm19393_vm1 = vmmov %vm19392_vm3  ;;  %v19401_v19 = vld [vmem:[#allocation48_spill] sm:$0xff] }
 0x55b   : > { %v8244_v53 = vsel %vm19382_vm0, %v8204_v34, 0.0  ;;  %v8165_v27 = vadd.f32 %v8045_v13, %v19383_v57  ;;  %v7541_v18 = vsel %vm19393_vm1, %v7534_v11, %v7540_v52  ;;  %vm19396_vm0 = vmmov %vm19375_vm4 }
 0x55c   : > { %v6970_v16 = vpop.permute.xlu0 %6969  ;;  %v7537_v54 = vsel %vm19370_vm6, %v7530_v22, %v7536_v26  ;;  %v8295_v15 = vsel %vm19375_vm4, %v8244_v53, 0.0  ;;  %vm19395_vm6 = vmmov %vm19375_vm4  ;;  %vm19400_vm4 = vnez %v19399_v62 }
 0x55d   : > { %v7276_v42 = vsel %vm19384_vm8, %v17069_v46, %v6970_v16  ;;  %7926 = vmatprep.mubr.bf16.mxu0 %v7537_v54  ;;  %v8296_v22 = vadd.f32 %v8295_v15, %v8294_v9  ;;  %v8205_v59 = vmax.f32 %v8165_v27, 0.0  ;;  %v17303_v9 = vpop.f32.mrf.mxu1  ;;  %vm19397_vm8 = vmmov %vm19387_vm7  ;;  %v19406_v15 = vld [vmem:[#allocation26_spill] sm:$0xff] }
 0x55e   : > { %v7044_v58 = vpop.permute.xlu1 %7043  ;;  %v7303_v45 = vsel %vm19387_vm7, %v7276_v42, %v6985_v17  ;;  %7927 = vmatmul.mubr.bf16.gmra.mxu0 %v7535_v47  ;;  %vm19398_vm5 = vmmov %vm19388_vm12 }
 0x55f   : > { %v7345_v38 = vsel %vm19388_vm12, %v7303_v45, %v7044_v58  ;;  %v8245_v46 = vsel %vm19390_vm2, %v8205_v59, 0.0  ;;  %v8057_v1 = vpop.f32.mrf.mxu1  ;;  %vm19403_vm7 = vmmov %vm19396_vm0  ;;  %v19410_v59 = vld [vmem:[#allocation54_spill] sm:$0xff] }
 0x560   : > { %v7542_v61 = vrot.slane %v7345_v38, 3  ;;  %v6564_v3 = vpop.permute.xlu0 %6563  ;;  %v8297_v4 = vsel %vm19391_vm10, %v8245_v46, 0.0  ;;  %vm19404_vm12 = vmmov %vm19398_vm5  ;;  %vm19407_vm10 = vnez %v19406_v15  ;;  %v9566_v46 = vld [vmem:[#allocation3 + $0xa0] ss:$0 sps:$4 sm:$0x77]   ;;  %v19427_v15 = vld [vmem:[#allocation53_spill] sm:$0xff] }
 0x561   : > { %v8298_v17 = vadd.f32 %v8297_v4, %v8296_v22  ;;  %v7132_v56 = vsel %vm19395_vm6, %v16993_v29, %v6564_v3  ;;  %v9171_v30 = vpop.f32.mrf.mxu1  ;;  %vm19405_vm2 = vmmov %vm19393_vm1 }
 0x562   : > { %v6566_v25 = vpop.permute.xlu1 %6565  ;;  %v7543_v39 = vsel %vm19392_vm3, %v7536_v26, %v7542_v61  ;;  %v7175_v29 = vsel %vm19402_vm14, %v7132_v56, %v17277_v63  ;;  %vm19408_vm3 = vmmov %vm19393_vm1 }
 0x563   : > { %7934 = vmatprep.mubr.bf16.mxu0 %v7543_v39  ;;  %vm19409_vm1 = vmmov %vm19396_vm0  ;;  %v8060_v10 = vpop.f32.mrf.mxu1 }
 0x564   : > { %v7856_v55 = vpop.f32.mrf.mxu0  ;;  %v7046_v14 = vpop.permute.xlu0 %7045  ;;  %vm19411_vm6 = vmmov %vm19396_vm0 }
 0x565   : > { %v7857_v49 = vadd.f32 %v17087_v31, %v7856_v55  ;;  %vm19417_vm14 = vmmov %vm19398_vm5 }
 0x566   : > { %v7858_v21 = vpop.f32.mrf.mxu0  ;;  %v6972_v6 = vpop.permute.xlu1 %6971  ;;  %7935 = vmatmul.mubr.bf16.gmra.mxu0 %v7541_v18 }
 0x567   : > { %v8050_v51 = vadd.f32 %v9166_v60, %v7857_v49  ;;  %v7279_v2 = vsel %vm19396_vm0, %v17024_v8, %v6972_v6  ;;  %vm19412_vm0 = vmmov %vm19397_vm8 }
 0x568   : > { %v7859_v7 = vpop.f32.mrf.mxu0  ;;  %v7305_v24 = vsel %vm19397_vm8, %v7279_v2, %v6987_v0  ;;  %v6974_v41 = vpop.permute.xlu0 %6973  ;;  %vm19413_vm8 = vmmov %vm19409_vm1 }
 0x569   : > { %v8166_v37 = vadd.f32 %v8050_v51, %v19394_v44  ;;  %v7860_v40 = vadd.f32 %v17087_v31, %v7859_v7  ;;  %v7347_v35 = vsel %vm19398_vm5, %v7305_v24, %v7046_v14 }
 0x56a   : > { %v7861_v50 = vpop.f32.mrf.mxu0  ;;  %v6740_v34 = vpop.permute.xlu1 %6739  ;;  %v7548_v13 = vrot.slane %v7347_v35, 3 }
 0x56b   : > { %v8206_v43 = vmax.f32 %v8166_v37, 0.0  ;;  %v8053_v60 = vadd.f32 %v17270_v12, %v7860_v40  ;;  %v7217_v0 = vsel %vm19404_vm12, %v7175_v29, %v6740_v34  ;;  %vm19419_vm12 = vmmov %vm19405_vm2  ;;  %v19423_v34 = vld [vmem:[#allocation51_spill] sm:$0xff] }
 0x56c   : > { %v7864_v26 = vpop.f32.mrf.mxu0  ;;  %v7546_v57 = vrot.slane %v7217_v0, 3  ;;  %v6989_v27 = vpop.permute.xlu0 %6988  ;;  %v7549_v42 = vsel %vm19405_vm2, %v7542_v61, %v7548_v13  ;;  %v7282_v61 = vsel %vm19411_vm6, %v17016_v36, %v6974_v41  ;;  %v19416_v36 = vld [vmem:[#allocation57_spill] sm:$0xff]  ;;  %v19420_v41 = vld [vmem:[#allocation55_spill] sm:$0xff]  ;;  %vm19428_vm6 = vnez %v19427_v15 }
 0x56d   : > { %v8246_v11 = vsel %vm19400_vm4, %v8206_v43, 0.0  ;;  %v8167_v23 = vadd.f32 %v8053_v60, %v19401_v19  ;;  %v7865_v12 = vadd.f32 %v17087_v31, %v7864_v26  ;;  %7942 = vmatprep.mubr.bf16.mxu0 %v7549_v42  ;;  %v7307_v49 = vsel %vm19412_vm0, %v7282_v61, %v6989_v27  ;;  %vm19414_vm4 = vmmov %vm19412_vm0  ;;  %v19442_v15 = vld [vmem:[#allocation65_spill] sm:$0xff] }
 0x56e   : > { %v8299_v8 = vsel %vm19403_vm7, %v8246_v11, 0.0  ;;  %v7866_v53 = vpop.f32.mrf.mxu0  ;;  %v6667_v58 = vpop.permute.xlu1 %6666  ;;  %v7547_v45 = vsel %vm19408_vm3, %v7540_v52, %v7546_v57  ;;  %v7135_v52 = vsel %vm19413_vm8, %v9566_v46, %v6566_v25  ;;  %vm19418_vm7 = vmmov %vm19409_vm1 }
 0x56f   : > { %v8300_v16 = vadd.f32 %v8299_v8, %v8298_v17  ;;  %v8207_v54 = vmax.f32 %v8167_v23, 0.0  ;;  %v8058_v47 = vadd.f32 %v8057_v1, %v7865_v12  ;;  %7943 = vmatmul.mubr.bf16.gmra.mxu0 %v7547_v45  ;;  %v7177_v14 = vsel %vm19414_vm4, %v7135_v52, %v6667_v58  ;;  %v19426_v53 = vld [vmem:[#allocation56_spill] sm:$0xff]  ;;  %vm19429_vm0 = vmmov %vm19409_vm1  ;;  %v9174_v58 = vpop.f32.mrf.mxu1 }
 0x570   : > { %v7867_v32 = vpop.f32.mrf.mxu0  ;;  %v7048_v39 = vpop.permute.xlu0 %7047  ;;  %vm19435_vm4 = vnez %v18538_v28 }
 0x571   : > { %v8247_v63 = vsel %vm19407_vm10, %v8207_v54, 0.0  ;;  %v8168_v38 = vadd.f32 %v8058_v47, %v19410_v59  ;;  %v7868_v3 = vadd.f32 %v17087_v31, %v7867_v32  ;;  %v7349_v51 = vsel %vm19398_vm5, %v7307_v49, %v7048_v39  ;;  %v8073_v45 = vpop.f32.mrf.mxu1  ;;  %vm19434_vm5 = vmmov %vm19429_vm0 }
 0x572   : > { %v8301_v22 = vsel %vm19409_vm1, %v8247_v63, 0.0  ;;  %v7869_v4 = vpop.f32.mrf.mxu0  ;;  %v7554_v7 = vrot.slane %v7349_v51, 3  ;;  %v6742_v18 = vpop.permute.xlu1 %6741  ;;  %vm19421_vm10 = vnez %v19420_v41  ;;  %v9653_v59 = vmov 0.0   ;;  %v19431_v51 = vld [vmem:[#allocation25_spill] sm:$0xff] }
 0x573   : > { %v8302_v55 = vadd.f32 %v8301_v22, %v8300_v16  ;;  %v8208_v17 = vmax.f32 %v8168_v38, 0.0  ;;  %v8061_v21 = vadd.f32 %v8060_v10, %v7868_v3  ;;  %v7219_v6 = vsel %vm19417_vm14, %v7177_v14, %v6742_v18  ;;  %v19424_v16 = vld [vmem:[#allocation17_spill] sm:$0xff]  ;;  %9192 = vmatprep.subr.bf16.mxu1 %v9653_v59  ;;  %v9175_v3 = vpop.f32.mrf.mxu1  ;;  %vm19436_vm14 = vmmov %vm19429_vm0 }
 0x574   : > { %v7552_v1 = vrot.slane %v7219_v6, 3  ;;  %v7555_v56 = vsel %vm19419_vm12, %v7548_v13, %v7554_v7  ;;  %vm19425_vm3 = vnez %v19424_v16  ;;  %vm19432_vm8 = vnez %v19431_v51  ;;  %v19433_v7 = vld [vmem:[#allocation62_spill] sm:$0xff]  ;;  %vm19440_vm12 = vmmov %vm19429_vm0 }
 0x575   : > { %v8248_v37 = vsel %vm19063_vm9, %v8208_v17, 0.0  ;;  %v8169_v40 = vadd.f32 %v8061_v21, %v19416_v36  ;;  %7950 = vmatprep.mubr.bf16.mxu0 %v7555_v56  ;;  %vm19422_vm9 = vmmov %vm19409_vm1  ;;  %v8076_v39 = vpop.f32.mrf.mxu1 }
 0x576   : > { %v8303_v50 = vsel %vm19418_vm7, %v8248_v37, 0.0  ;;  %v7553_v24 = vsel %vm19405_vm2, %v7546_v57, %v7552_v1  ;;  %vm19438_vm7 = vnez %v19105_v33  ;;  %vm19441_vm2 = vmmov %vm19429_vm0 }
 0x577   : > { %v8304_v2 = vadd.f32 %v8303_v50, %v8302_v55  ;;  %v8209_v25 = vmax.f32 %v8169_v40, 0.0  ;;  %7951 = vmatmul.mubr.bf16.gmra.mxu0 %v7553_v24  ;;  %v19430_v55 = vld [vmem:[#allocation60_spill] sm:$0xff]  ;;  %v9178_v16 = vpop.f32.mrf.mxu1 }
 0x579   : > { %v7872_v43 = vpop.f32.mrf.mxu0  ;;  %v8249_v35 = vsel %vm19421_vm10, %v8209_v25, 0.0  ;;  %v8089_v33 = vpop.f32.mrf.mxu1  ;;  %vm19445_vm10 = vmmov %vm19429_vm0 }
 0x57a   : > { %v7873_v60 = vadd.f32 %v17087_v31, %v7872_v43  ;;  %v8305_v11 = vsel %vm19422_vm9, %v8249_v35, 0.0  ;;  %vm19446_vm9 = vmmov %vm19429_vm0 }
 0x57b   : > { %v7874_v62 = vpop.f32.mrf.mxu0  ;;  %v8306_v23 = vadd.f32 %v8305_v11, %v8304_v2 }
 0x57c   : > { %v8066_v19 = vadd.f32 %v17303_v9, %v7873_v60  ;;  %v19437_v60 = vld [vmem:[#allocation58_spill] sm:$0xff] }
 0x57d   : > { %v7875_v26 = vpop.f32.mrf.mxu0 }
 0x57e   : > { %v8170_v29 = vadd.f32 %v8066_v19, %v19423_v34  ;;  %v7876_v13 = vadd.f32 %v17087_v31, %v7875_v26  ;;  %v19439_v19 = vld [vmem:[#allocation61_spill] sm:$0xff] }
 0x57f   : > { %v7877_v8 = vpop.f32.mrf.mxu0 }
 0x580   : > { %v8210_v12 = vmax.f32 %v8170_v29, 0.0  ;;  %v8069_v0 = vadd.f32 %v9171_v30, %v7876_v13  ;;  %v9567_v30 = vld [vmem:[%s17528_s7 + $0x8] sm:$0xff]  }
 0x581   : > { %9193 = vmatpush3.bf16.msra.mxu1 %v9567_v30 }
 0x582   : > { %v8250_v54 = vsel %vm19425_vm3, %v8210_v12, 0.0  ;;  %v8171_v57 = vadd.f32 %v8069_v0, %v19426_v53  ;;  %9194 = vmatprep.subr.bf16.mxu1 %v9653_v59  ;;  %v9568_v0 = vld [vmem:[%s17528_s7] sm:$0xff]   ;;  %vm9654_vm3 = vmmov 0  }
 0x583   : > { %v8307_v27 = vsel %vm19409_vm1, %v8250_v54, 0.0  ;;  %9196 = vmatprep.mubr.msk.bf16.mxu1 %vm9654_vm3, %v9653_v59  ;;  %vm19451_vm1 = vmmov %vm19429_vm0 }
 0x584   : > { %v8308_v42 = vadd.f32 %v8307_v27, %v8306_v23  ;;  %v8211_v47 = vmax.f32 %v8171_v57, 0.0  ;;  %v9179_v57 = vpop.f32.mrf.mxu1  ;;  %vm19479_vm3 = vmmov %vm19429_vm0 }
 0x585   : > { %9195 = vmatpush3.bf16.msra.mxu1 %v9568_v0 }
 0x586   : > { %v8251_v9 = vsel %vm19428_vm6, %v8211_v47, 0.0 }
 0x587   : > { %v8309_v63 = vsel %vm19429_vm0, %v8251_v9, 0.0 }
 0x588   : > { %v8310_v32 = vadd.f32 %v8309_v63, %v8308_v42  ;;  %v8092_v63 = vpop.f32.mrf.mxu1 }
 0x593   : > { %v7880_v22 = vpop.f32.mrf.mxu0 }
 0x594   : > { %v7881_v38 = vadd.f32 %v17087_v31, %v7880_v22  ;;  %v19444_v22 = vld [vmem:[#allocation68_spill] sm:$0xff] }
 0x595   : > { %v7882_v10 = vpop.f32.mrf.mxu0 }
 0x596   : > { %v8074_v46 = vadd.f32 %v8073_v45, %v7881_v38 }
 0x597   : > { %v7883_v61 = vpop.f32.mrf.mxu0 }
 0x598   : > { %v8172_v4 = vadd.f32 %v8074_v46, %v19430_v55  ;;  %v7884_v49 = vadd.f32 %v17087_v31, %v7883_v61 }
 0x599   : > { %v7885_v17 = vpop.f32.mrf.mxu0 }
 0x59a   : > { %v8212_v21 = vmax.f32 %v8172_v4, 0.0  ;;  %v8077_v52 = vadd.f32 %v8076_v39, %v7884_v49 }
 0x59c   : > { %v8252_v14 = vsel %vm19432_vm8, %v8212_v21, 0.0  ;;  %v8173_v18 = vadd.f32 %v8077_v52, %v19433_v7 }
 0x59d   : > { %v8311_v44 = vsel %vm19434_vm5, %v8252_v14, 0.0 }
 0x59e   : > { %v8312_v37 = vadd.f32 %v8311_v44, %v8310_v32  ;;  %v8213_v36 = vmax.f32 %v8173_v18, 0.0  ;;  %v19448_v44 = vld [vmem:[#allocation9_spill] sm:$0xff] }
 0x5a0   : > { %v8253_v40 = vsel %vm19435_vm4, %v8213_v36, 0.0  ;;  %v19450_v36 = vld [vmem:[#allocation67_spill] sm:$0xff]  ;;  %vm19463_vm4 = vmmov %vm19429_vm0 }
 0x5a1   : > { %v8313_v6 = vsel %vm19436_vm14, %v8253_v40, 0.0 }
 0x5a2   : > { %v8314_v50 = vadd.f32 %v8313_v6, %v8312_v37 }
 0x5ab   : > { %v7888_v1 = vpop.f32.mrf.mxu0 }
 0x5ac   : > { %v7889_v56 = vadd.f32 %v17087_v31, %v7888_v1 }
 0x5ad   : > { %v7890_v2 = vpop.f32.mrf.mxu0 }
 0x5ae   : > { %v8082_v25 = vadd.f32 %v9174_v58, %v7889_v56  ;;  %v19452_v56 = vld [vmem:[#allocation64_spill] sm:$0xff] }
 0x5af   : > { %v7891_v43 = vpop.f32.mrf.mxu0  ;;  %vm19453_vm6 = vnez %v19452_v56 }
 0x5b0   : > { %v8174_v24 = vadd.f32 %v8082_v25, %v19437_v60  ;;  %v7892_v41 = vadd.f32 %v17087_v31, %v7891_v43 }
 0x5b1   : > { %v7893_v35 = vpop.f32.mrf.mxu0 }
 0x5b2   : > { %v8214_v62 = vmax.f32 %v8174_v24, 0.0  ;;  %v8085_v11 = vadd.f32 %v9175_v3, %v7892_v41 }
 0x5b4   : > { %v8254_v28 = vsel %vm19438_vm7, %v8214_v62, 0.0  ;;  %v8175_v23 = vadd.f32 %v8085_v11, %v19439_v19  ;;  %v9182_v19 = vpop.f32.mrf.mxu1  ;;  %vm19467_vm7 = vmmov %vm19429_vm0 }
 0x5b5   : > { %v8315_v26 = vsel %vm19440_vm12, %v8254_v28, 0.0  ;;  %vm19469_vm12 = vmmov %vm19429_vm0 }
 0x5b6   : > { %v8316_v34 = vadd.f32 %v8315_v26, %v8314_v50  ;;  %v8215_v29 = vmax.f32 %v8175_v23, 0.0  ;;  %v8105_v23 = vpop.f32.mrf.mxu1 }
 0x5b8   : > { %v8255_v13 = vsel %vm19113_vm13, %v8215_v29, 0.0  ;;  %vm19443_vm13 = vnez %v19139_v20  ;;  %v19447_v20 = vld [vmem:[#allocation63_spill] sm:$0xff]  ;;  %v9183_v26 = vpop.f32.mrf.mxu1 }
 0x5b9   : > { %v8317_v8 = vsel %vm19441_vm2, %v8255_v13, 0.0 }
 0x5ba   : > { %v8318_v12 = vadd.f32 %v8317_v8, %v8316_v34  ;;  %v8108_v34 = vpop.f32.mrf.mxu1 }
 0x5bc   : > { %v9186_v29 = vpop.f32.mrf.mxu1 }
 0x5be   : > { %v8121_v0 = vpop.f32.mrf.mxu1 }
 0x5c3   : > { %v7896_v54 = vpop.f32.mrf.mxu0 }
 0x5c4   : > { %v7897_v53 = vadd.f32 %v17087_v31, %v7896_v54 }
 0x5c5   : > { %v7898_v27 = vpop.f32.mrf.mxu0 }
 0x5c6   : > { %v8090_v42 = vadd.f32 %v8089_v33, %v7897_v53 }
 0x5c7   : > { %v7899_v47 = vpop.f32.mrf.mxu0 }
 0x5c8   : > { %v8176_v48 = vadd.f32 %v8090_v42, %v19442_v15  ;;  %v7900_v9 = vadd.f32 %v17087_v31, %v7899_v47  ;;  %v9187_v42 = vpop.f32.mrf.mxu1  ;;  %v19454_v47 = vld [vmem:[#allocation71_spill] sm:$0xff] }
 0x5c9   : > { %v7901_v32 = vpop.f32.mrf.mxu0 }
 0x5ca   : > { %v8216_v58 = vmax.f32 %v8176_v48, 0.0  ;;  %v8093_v45 = vadd.f32 %v8092_v63, %v7900_v9  ;;  %v19455_v63 = vld [vmem:[#allocation15_spill] sm:$0xff] }
 0x5cc   : > { %v8256_v30 = vsel %vm19443_vm13, %v8216_v58, 0.0  ;;  %v8177_v38 = vadd.f32 %v8093_v45, %v19444_v22  ;;  %v19456_v58 = vld [vmem:[#allocation70_spill] sm:$0xff] }
 0x5cd   : > { %v8319_v3 = vsel %vm19445_vm10, %v8256_v30, 0.0  ;;  %v7904_v4 = vpop.f32.mrf.mxu0  ;;  %vm19475_vm10 = vmmov %vm19429_vm0 }
 0x5ce   : > { %v8320_v10 = vadd.f32 %v8319_v3, %v8318_v12  ;;  %v8217_v46 = vmax.f32 %v8177_v38, 0.0  ;;  %v7905_v39 = vadd.f32 %v17087_v31, %v7904_v4  ;;  %v8124_v3 = vpop.f32.mrf.mxu1  ;;  %v17418_v4 = vld [vmem:[%s17527_s6] ss:$0 sm:$0xff] }
 0x5cf   : > { %v7906_v17 = vpop.f32.mrf.mxu0 }
 0x5d0   : > { %v8257_v61 = vsel %vm19145_vm11, %v8217_v46, 0.0  ;;  %v8098_v21 = vadd.f32 %v9178_v16, %v7905_v39  ;;  %vm19449_vm11 = vnez %v19448_v44  ;;  %v19457_v17 = vld [vmem:[#allocation73_spill] sm:$0xff] }
 0x5d1   : > { %v8321_v55 = vsel %vm19446_vm9, %v8257_v61, 0.0  ;;  %v7907_v52 = vpop.f32.mrf.mxu0 }
 0x5d2   : > { %v8322_v49 = vadd.f32 %v8321_v55, %v8320_v10  ;;  %v8178_v51 = vadd.f32 %v8098_v21, %v19447_v20  ;;  %v7908_v14 = vadd.f32 %v17087_v31, %v7907_v52 }
 0x5d3   : > { %v7909_v7 = vpop.f32.mrf.mxu0 }
 0x5d4   : > { %v8218_v18 = vmax.f32 %v8178_v51, 0.0  ;;  %v8101_v5 = vadd.f32 %v9179_v57, %v7908_v14  ;;  %v9190_v51 = vpop.f32.mrf.mxu1  ;;  %v19460_v7 = vld [vmem:[#allocation75_spill] sm:$0xff] }
 0x5d6   : > { %v8258_v37 = vsel %vm19449_vm11, %v8218_v18, 0.0  ;;  %v8179_v40 = vadd.f32 %v8101_v5, %v19450_v36 }
 0x5d7   : > { %v8323_v6 = vsel %vm19451_vm1, %v8258_v37, 0.0  ;;  %v19461_v37 = vld [vmem:[#allocation19_spill] sm:$0xff]  ;;  %vm19482_vm1 = vmmov %vm19429_vm0 }
 0x5d8   : > { %v8324_v50 = vadd.f32 %v8323_v6, %v8322_v49  ;;  %v8219_v1 = vmax.f32 %v8179_v40, 0.0  ;;  %vm19462_vm5 = vnez %v19461_v37 }
 0x5da   : > { %v8259_v2 = vsel %vm19453_vm6, %v8219_v1, 0.0 }
 0x5db   : > { %v8325_v25 = vsel %vm19429_vm0, %v8259_v2, 0.0  ;;  %v19466_v2 = vld [vmem:[#allocation77_spill] sm:$0xff] }
 0x5dc   : > { %v8326_v43 = vadd.f32 %v8325_v25, %v8324_v50  ;;  %v19464_v50 = vld [vmem:[#allocation13_spill] sm:$0xff] }
 0x5dd   : > { %vm19465_vm14 = vnez %v19464_v50 }
 0x5f7   : > { %v7912_v60 = vpop.f32.mrf.mxu0 }
 0x5f8   : > { %v7913_v13 = vadd.f32 %v17087_v31, %v7912_v60 }
 0x5f9   : > { %v7914_v24 = vpop.f32.mrf.mxu0 }
 0x5fa   : > { %v8106_v16 = vadd.f32 %v8105_v23, %v7913_v13  ;;  %v8137_v24 = vpop.f32.mrf.mxu1  ;;  %v19472_v13 = vld [vmem:[#allocation21_spill] sm:$0xff] }
 0x5fb   : > { %v7915_v59 = vpop.f32.mrf.mxu0 }
 0x5fc   : > { %v7916_v8 = vadd.f32 %v17087_v31, %v7915_v59  ;;  %v8180_v15 = vadd.f32 %v8106_v16, %v19454_v47 }
 0x5fd   : > { %v7917_v41 = vpop.f32.mrf.mxu0 }
 0x5fe   : > { %v8109_v54 = vadd.f32 %v8108_v34, %v7916_v8  ;;  %v8220_v10 = vmax.f32 %v8180_v15, 0.0  ;;  %v19476_v15 = vld [vmem:[#allocation76_spill] sm:$0xff] }
 0x5ff   : > { %vm19477_vm9 = vnez %v19476_v15  ;;  %v8363_v15 = vld [vmem:[%s17529_s8] sm:$0x1] }
 0x600   : > { %v8181_v32 = vadd.f32 %v8109_v54, %v19455_v63  ;;  %v19473_v54 = vld [vmem:[#allocation74_spill] sm:$0xff]  ;;  %v19478_v63 = vld [vmem:[#allocation81_spill] sm:$0xff] }
 0x601   : > { %vm19474_vm13 = vnez %v19473_v54 }
 0x602   : > { %v8221_v55 = vmax.f32 %v8181_v32, 0.0 }
 0x603   : > { %v7920_v35 = vpop.f32.mrf.mxu0 }
 0x604   : > { %v7921_v12 = vadd.f32 %v17087_v31, %v7920_v35  ;;  %v8261_v36 = vsel %vm19462_vm5, %v8221_v55, 0.0  ;;  %vm19488_vm5 = vmmov %vm19429_vm0 }
 0x605   : > { %v7922_v62 = vpop.f32.mrf.mxu0  ;;  %v8329_v41 = vsel %vm19467_vm7, %v8261_v36, 0.0 }
 0x606   : > { %v8114_v53 = vadd.f32 %v9182_v19, %v7921_v12  ;;  %v19468_v62 = vld [vmem:[#allocation50_spill] sm:$0xff] }
 0x607   : > { %v7923_v11 = vpop.f32.mrf.mxu0 }
 0x608   : > { %v7924_v57 = vadd.f32 %v17087_v31, %v7923_v11  ;;  %v8182_v45 = vadd.f32 %v8114_v53, %v19456_v58 }
 0x609   : > { %v7925_v28 = vpop.f32.mrf.mxu0 }
 0x60a   : > { %v8117_v30 = vadd.f32 %v9183_v26, %v7924_v57  ;;  %v8222_v39 = vmax.f32 %v8182_v45, 0.0  ;;  %v19470_v26 = vld [vmem:[#allocation72_spill] sm:$0xff] }
 0x60b   : > { %vm19471_vm2 = vnez %v19470_v26 }
 0x60c   : > { %v8183_v21 = vadd.f32 %v8117_v30, %v19457_v17  ;;  %v8262_v1 = vsel %vm19465_vm14, %v8222_v39, 0.0  ;;  %v19483_v17 = vld [vmem:[#allocation23_spill] sm:$0xff]  ;;  %vm19492_vm14 = vmmov %vm19429_vm0 }
 0x60d   : > { %v8331_v19 = vsel %vm19469_vm12, %v8262_v1, 0.0  ;;  %vm19484_vm6 = vnez %v19483_v17  ;;  %vm19496_vm12 = vmmov %vm19429_vm0 }
 0x60e   : > { %v8223_v56 = vmax.f32 %v8183_v21, 0.0 }
 0x610   : > { %v8263_v34 = vsel %vm19471_vm2, %v8223_v56, 0.0  ;;  %vm19499_vm2 = vmmov %vm19429_vm0 }
 0x61e   : > { %v7928_v33 = vpop.f32.mrf.mxu0 }
 0x61f   : > { %v7929_v48 = vadd.f32 %v17087_v31, %v7928_v33 }
 0x620   : > { %v7930_v27 = vpop.f32.mrf.mxu0 }
 0x621   : > { %v8122_v46 = vadd.f32 %v8121_v0, %v7929_v48  ;;  %v9191_v0 = vpop.f32.mrf.mxu1 }
 0x622   : > { %v7931_v9 = vpop.f32.mrf.mxu0 }
 0x623   : > { %v7932_v22 = vadd.f32 %v17087_v31, %v7931_v9  ;;  %v19458_v31 = vld [vmem:[#allocation69_spill] sm:$0xff]  ;;  %v8184_v18 = vadd.f32 %v8122_v46, %v19460_v7  ;;  %v8140_v45 = vpop.f32.mrf.mxu1 }
 0x624   : > { %v7933_v38 = vpop.f32.mrf.mxu0  ;;  %vm19459_vm8 = vnez %v19458_v31 }
 0x625   : > { %v8125_v52 = vadd.f32 %v8124_v3, %v7932_v22  ;;  %v8260_v14 = vsel %vm19459_vm8, %v8220_v10, 0.0  ;;  %v8224_v35 = vmax.f32 %v8184_v18, 0.0  ;;  %v19480_v3 = vld [vmem:[#allocation52_spill] sm:$0xff] }
 0x626   : > { %v7936_v61 = vpop.f32.mrf.mxu0  ;;  %v8327_v6 = vsel %vm19463_vm4, %v8260_v14, 0.0  ;;  %vm19481_vm11 = vnez %v19480_v3  ;;  %vm19491_vm4 = vmmov %vm19429_vm0 }
 0x627   : > { %v7937_v49 = vadd.f32 %v17418_v4, %v7936_v61  ;;  %v8185_v25 = vadd.f32 %v8125_v52, %v19466_v2  ;;  %v8328_v28 = vadd.f32 %v8327_v6, %v8326_v43  ;;  %v8264_v53 = vsel %vm19474_vm13, %v8224_v35, 0.0  ;;  %v19485_v52 = vld [vmem:[#allocation85_spill] sm:$0xff]  ;;  %v19490_v2 = vld [vmem:[#allocation79_spill] sm:$0xff]  ;;  %vm19500_vm13 = vmmov %vm19429_vm0 }
 0x628   : > { %v7938_v20 = vpop.f32.mrf.mxu0  ;;  %v8335_v30 = vsel %vm19479_vm3, %v8264_v53, 0.0 }
 0x629   : > { %v8130_v5 = vadd.f32 %v9186_v29, %v7937_v49  ;;  %v8225_v29 = vmax.f32 %v8185_v25, 0.0  ;;  %v8330_v16 = vadd.f32 %v8329_v41, %v8328_v28  ;;  %v19493_v28 = vld [vmem:[#allocation78_spill] sm:$0xff] }
 0x62a   : > { %v7939_v44 = vpop.f32.mrf.mxu0  ;;  %vm19494_vm7 = vnez %v19493_v28 }
 0x62b   : > { %v7940_v40 = vadd.f32 %v17418_v4, %v7939_v44  ;;  %v8186_v11 = vadd.f32 %v8130_v5, %v19468_v62  ;;  %v8332_v43 = vadd.f32 %v8331_v19, %v8330_v16  ;;  %v8265_v48 = vsel %vm19477_vm9, %v8225_v29, 0.0  ;;  %v19486_v5 = vld [vmem:[#allocation80_spill] sm:$0xff] }
 0x62c   : > { %v7941_v60 = vpop.f32.mrf.mxu0  ;;  %v8337_v55 = vsel %vm19482_vm1, %v8265_v48, 0.0  ;;  %vm19487_vm8 = vnez %v19486_v5 }
 0x62d   : > { %v8133_v59 = vadd.f32 %v9187_v42, %v7940_v40  ;;  %v8226_v57 = vmax.f32 %v8186_v11, 0.0  ;;  %v8333_v42 = vsel %vm19475_vm10, %v8263_v34, 0.0  ;;  %vm8419_vm10 = vcmask 8192  }
 0x62e   : > { %v8334_v38 = vadd.f32 %v8333_v42, %v8332_v43 }
 0x62f   : > { %v7944_v23 = vpop.f32.mrf.mxu0  ;;  %v8187_v8 = vadd.f32 %v8133_v59, %v19472_v13  ;;  %v8266_v10 = vsel %vm19481_vm11, %v8226_v57, 0.0 }
 0x630   : > { %v7945_v12 = vadd.f32 %v17418_v4, %v7944_v23  ;;  %v8336_v39 = vadd.f32 %v8335_v30, %v8334_v38  ;;  %v8339_v14 = vsel %vm19429_vm0, %v8266_v10, 0.0  ;;  %v19495_v23 = vld [vmem:[#allocation83_spill] sm:$0xff] }
 0x631   : > { %v7946_v33 = vpop.f32.mrf.mxu0  ;;  %v8227_v9 = vmax.f32 %v8187_v8, 0.0  ;;  %v19497_v8 = vld [vmem:[#allocation82_spill] sm:$0xff] }
 0x632   : > { %v8138_v27 = vadd.f32 %v8137_v24, %v7945_v12  ;;  %v8338_v18 = vadd.f32 %v8337_v55, %v8336_v39 }
 0x633   : > { %v7947_v47 = vpop.f32.mrf.mxu0  ;;  %v8267_v21 = vsel %vm19484_vm6, %v8227_v9, 0.0 }
 0x634   : > { %v8188_v32 = vadd.f32 %v8138_v27, %v19478_v63  ;;  %v7948_v58 = vadd.f32 %v17418_v4, %v7947_v47  ;;  %v8341_v40 = vsel %vm19488_vm5, %v8267_v21, 0.0  ;;  %v8340_v50 = vadd.f32 %v8339_v14, %v8338_v18 }
 0x635   : > { %v7949_v22 = vpop.f32.mrf.mxu0 }
 0x636   : > { %v8228_v46 = vmax.f32 %v8188_v32, 0.0  ;;  %v8141_v61 = vadd.f32 %v8140_v45, %v7948_v58  ;;  %v8342_v41 = vadd.f32 %v8341_v40, %v8340_v50 }
 0x637   : > { %v7952_v49 = vpop.f32.mrf.mxu0 }
 0x638   : > { %v8189_v20 = vadd.f32 %v8141_v61, %v19485_v52  ;;  %v7953_v31 = vadd.f32 %v17418_v4, %v7952_v49  ;;  %v8268_v44 = vsel %vm19487_vm8, %v8228_v46, 0.0 }
 0x639   : > { %v7954_v7 = vpop.f32.mrf.mxu0  ;;  %v8343_v24 = vsel %vm19491_vm4, %v8268_v44, 0.0 }
 0x63a   : > { %v8229_v37 = vmax.f32 %v8189_v20, 0.0  ;;  %v8146_v36 = vadd.f32 %v9190_v51, %v7953_v31  ;;  %v8344_v51 = vadd.f32 %v8343_v24, %v8342_v41 }
 0x63b   : > { %v7955_v6 = vpop.f32.mrf.mxu0 }
 0x63c   : > { %v8269_v56 = vsel %vm15459_vm15, %v8229_v37, 0.0  ;;  %v8190_v25 = vadd.f32 %v8146_v36, %v19490_v2  ;;  %v7956_v60 = vadd.f32 %v17418_v4, %v7955_v6  ;;  %vm19498_vm15 = vnez %v19497_v8 }
 0x63d   : > { %v7957_v59 = vpop.f32.mrf.mxu0  ;;  %v8345_v11 = vsel %vm19492_vm14, %v8269_v56, 0.0 }
 0x63e   : > { %v8230_v35 = vmax.f32 %v8190_v25, 0.0  ;;  %v8149_v62 = vadd.f32 %v9191_v0, %v7956_v60  ;;  %v8346_v29 = vadd.f32 %v8345_v11, %v8344_v51 }
 0x640   : > { %v8270_v19 = vsel %vm19494_vm7, %v8230_v35, 0.0  ;;  %v8191_v26 = vadd.f32 %v8149_v62, %v19495_v23 }
 0x641   : > { %v8347_v34 = vsel %vm19496_vm12, %v8270_v19, 0.0 }
 0x642   : > { %v8231_v13 = vmax.f32 %v8191_v26, 0.0  ;;  %v8348_v4 = vadd.f32 %v8347_v34, %v8346_v29 }
 0x644   : > { %v8271_v12 = vsel %vm19498_vm15, %v8231_v13, 0.0 }
 0x645   : > { %v8349_v0 = vsel %vm19499_vm2, %v8271_v12, 0.0 }
 0x646   : > { %v8350_v16 = vadd.f32 %v8349_v0, %v8348_v4 }
 0x648   : > { %v8351_v33 = vrot.slane %v8350_v16, 4 }
 0x64a   : > { %v8352_v54 = vadd.f32 %v8351_v33, %v8350_v16 }
 0x64c   : > { %v8353_v53 = vrot.slane %v8352_v54, 2 }
 0x64e   : > { %v8354_v57 = vadd.f32 %v8353_v53, %v8352_v54 }
 0x650   : > { %v8355_v27 = vrot.slane %v8354_v57, 1 }
 0x652   : > { %v8356_v43 = vadd.f32 %v8355_v27, %v8354_v57 }
 0x654   : > { %v8357_v42 = vmul.f32 0.00390625, %v8356_v43 }
 0x656   : > { %v8358_v47 = vpack.c.bf16 %v8357_v42, %v8357_v42 }
 0x658   : > { %9197 = vmatmul.mubr.msk.bf16.vlgmr.msra.gmra.mxu1 %vm19500_vm13, %v8358_v47 }
 0x718   : > { %v8413_v48 = vpop.f32.mrf.mxu1 }
 0x719   : > { %v8414_v9 = vadd.f32 %v8413_v48, %v8363_v15 }
 0x71a   : > { %v9198_v63 = vpop.f32.mrf.mxu1 }
 0x71b   : > { %8420 = vst.msk [vmem:[%s324_s16] sm:$0x1] %vm8419_vm10, %v8414_v9 }
 0x71c   : > { %v8416_v32 = vpop.f32.mrf.mxu1 }
 0x71d   : > { %9591 = shalt.err (!%p9588_p3)
}
 0x71e   : > { %s9592_s28 = scalar_lea.hbm %s17480_s27, 16  ;;  %s9596_s16 = scalar_lea.hbm %s17530_s9, 32 }
 0x71f   : > { %p9593_p4 = scmp.ne.s32.totalorder %s17480_s27, %s9592_s28  ;;  %p9597_p9 = scmp.lt.s32.totalorder %s17480_s27, %s17530_s9 }
 0x720   : > { %p9598_p10 = scmp.lt.s32.totalorder %s9596_s16, %s9592_s28 }
 0x721   : > { %p9594_p7 = pnand %p9593_p4, %p9744_p5 }
 0x722   : > { %p9599_p11 = por %p9598_p10, %p9597_p9 }
 0x723   : > { %p9595_p8 = pneg %p9594_p7 }
 0x725   : > { %p9600_p12 = pnand %p9599_p11, %p9595_p8 }
 0x727   : > { %9603 = shalt.err (!%p9600_p12)
}
 0x728   : > { %9365 = dma.vmem_to_hbm [thread:$0]  (%p9744_p5), %s17482_s17, 16, %s17480_s27, %s8422_s25   ;;  %v9199_v58 = vpop.f32.mrf.mxu1 }
 0x729 PF: > { %p9371_p13 = scmp.ge.s32.totalorder %s9638_s12, 2  ;;  %s8446_s13 = sand.u32 1, %s9626_s30  }
 0x72a   : > { %s8447_s21 = scalar_lea.sflag [#allocation5], %s8446_s13 }
 0x72b   : > { %p9368_p0 = pnand %p9371_p13, %p9748_p6 }
 0x72d   : > { %p9369_p1 = pneg %p9368_p0 }
 0x72f   : > { %9621 = dma.done.wait (%p9369_p1), %s8447_s21, 16  }
 0x730   : > { %9623 = vsyncadd (%p9369_p1), %s8447_s21, 4294967280  ;;  %p19_p2 = scmp.ge.s32.totalorder %s9731_s15, 4   ;;  %s19501_s30 = smov %s9630_s10 }
 0x731   : > { %s19502_s10 = smov %s9634_s11  ;;  %s19503_s11 = smov %s9742_s18 }
 0x732   : > { %s19504_s12 = smov %s9731_s15  ;;  %21 = sbr.rel (!%p19_p2) target bundleno = 3 (0x3), region = 91 }
 0x737   :  { %8451 = vsyncpa [#allocation5], 1 }
 0x738   :  { %8453 = vsyncpa [#allocation5 + $0x1], 1 }

</bundles_post_ra>
